<compile_context>
chip_gen: v7x
topology: tpu7x:2x2x1
jax: 0.10.0
libtpu: 0.0.40
codegen_flags: <defaults>
</compile_context>

<pallas_src>
import math
from functools import partial

import jax
import jax.numpy as jnp
from jax.experimental import pallas as pl
from jax.experimental.pallas import tpu as pltpu


def _layernorm(x, gamma, beta, eps=1e-5):
    m = jnp.mean(x, axis=-1, keepdims=True)
    c = x - m
    var = jnp.mean(c * c, axis=-1, keepdims=True)
    return c * jax.lax.rsqrt(var + eps) * gamma + beta


def _gelu_exact(x):
    # torch nn.GELU() default (approximate='none') -> erf-based GELU
    return 0.5 * x * (1.0 + jax.lax.erf(x * (1.0 / math.sqrt(2.0))))


def block_kernel(x_ref,
                 g1_ref, be1_ref,              # LayerNorm1 gamma/beta   (1, D)  f32
                 wqkv_ref, bqkv_ref,           # QKV linear              (D, 3D) bf16, (1, 3D) f32
                 wpr_ref, bpr_ref,             # attn out proj           (D, D)  bf16, (1, D)  f32
                 g2_ref, be2_ref,              # LayerNorm2 gamma/beta   (1, D)  f32
                 wf1_ref, bf1_ref,             # MLP fc1                 (D, Hd) bf16, (1, Hd) f32
                 wf2_ref, bf2_ref,             # MLP fc2                 (Hd, D) bf16, (1, D)  f32
                 o_ref,
                 qkv_vmem,                     # scratch (S_pad, 3D) bf16
                 heads_vmem,                   # scratch (S_pad, D)  bf16
                 *, num_heads: int, head_dim: int, kv_len: int, act_dtype):
    f32 = jnp.float32
    bf16 = jnp.bfloat16

    x = x_ref[...]                             # (S_pad, D) f32 (leading batch dim squeezed)
    S, D = x.shape

    # ---- attention branch ----
    h = _layernorm(x, g1_ref[...], be1_ref[...])                       # f32
    qkv = jnp.dot(h.astype(bf16), wqkv_ref[...],
                  preferred_element_type=f32) + bqkv_ref[...]          # (S, 3D) f32
    qkv_vmem[...] = qkv.astype(bf16)                                   # stage once in VMEM

    # Per-head attention; head outputs are written into a lane-dense (S, D)
    # scratch so the output projection can be a single K=D matmul.
    # TODO(synk): lax.fori_loop with pl.ds head slices once num_heads >= ~8.
    for hh in range(num_heads):
        lo = hh * head_dim
        qh = qkv_vmem[:, lo:lo + head_dim]                  # (S, hd) bf16 (1/sqrt(hd) pre-folded)
        kh = qkv_vmem[:, D + lo:D + lo + head_dim]          # (S, hd) bf16
        vh = qkv_vmem[:, 2 * D + lo:2 * D + lo + head_dim]  # (S, hd) bf16

        # scores: contract head_dim of q with head_dim of k (transpose-B form, no XLU .T)
        s = jax.lax.dot_general(qh, kh, (((1,), (1,)), ((), ())),
                                preferred_element_type=f32)             # (S, S) f32
        if S > kv_len:  # static: only emitted when the wrapper padded the sequence
            key_idx = jax.lax.broadcasted_iota(jnp.int32, (S, S), 1)
            s = jnp.where(key_idx < kv_len, s, jnp.float32(-1e30))
        s = s - jnp.max(s, axis=-1, keepdims=True)
        p = jnp.exp(s)
        p = p * pl.reciprocal(jnp.sum(p, axis=-1, keepdims=True), approx=True)

        ho = jnp.dot(p.astype(bf16), vh, preferred_element_type=f32)    # (S, hd) f32
        heads_vmem[:, lo:lo + head_dim] = ho.astype(bf16)

    # single full-contraction output projection (K = D, full MXU utilization)
    attn = jnp.dot(heads_vmem[...], wpr_ref[...], preferred_element_type=f32)
    x1 = x + attn + bpr_ref[...]

    # ---- MLP branch ----
    h2 = _layernorm(x1, g2_ref[...], be2_ref[...])
    z = jnp.dot(h2.astype(bf16), wf1_ref[...],
                preferred_element_type=f32) + bf1_ref[...]
    z = _gelu_exact(z.astype(act_dtype))   # act_dtype=bf16 is profitable on v6e/v7x only
    y = jnp.dot(z.astype(bf16), wf2_ref[...],
                preferred_element_type=f32) + bf2_ref[...]

    o_ref[...] = (x1 + y).astype(o_ref.dtype)


def prepare_params(params, *, num_heads, mxu_dtype=jnp.bfloat16):
    """One-time weight preprocessing (call once per layer, reuse every step):
    folds the 1/sqrt(head_dim) attention scale into the Q projection (exact,
    done in f32 before the bf16 cast) and casts matmul weights to bf16."""
    f32 = jnp.float32
    D = params["wqkv"].shape[0]
    head_dim = D // num_heads
    scale = 1.0 / math.sqrt(head_dim)

    wqkv = params["wqkv"].astype(f32)
    bqkv = params["bqkv"].astype(f32)
    wqkv = wqkv.at[:, :D].multiply(scale)
    bqkv = bqkv.at[:, :D].multiply(scale)

    return (
        params["g1"].astype(f32), params["be1"].astype(f32),
        wqkv.astype(mxu_dtype), bqkv,
        params["wpr"].astype(mxu_dtype), params["bpr"].astype(f32),
        params["g2"].astype(f32), params["be2"].astype(f32),
        params["wf1"].astype(mxu_dtype), params["bf1"].astype(f32),
        params["wf2"].astype(mxu_dtype), params["bf2"].astype(f32),
    )


def _pick_vmem_limit():
    """Generation-aware scoped-VMEM limit: ~100 MiB on 128-MiB parts (v5e/v6e),
    ~52 MiB on 64-MiB parts (v7x); conservative 48 MiB if the query fails."""
    mib = 1024 * 1024
    try:
        cap = int(pltpu.get_tpu_info().vmem_capacity_bytes)
    except Exception:
        return 48 * mib
    return max(32 * mib, min(100 * mib, cap - 12 * mib))


def vit_block(x, prepared, *, num_heads, seq_align=8,
              weight_buffer_count=1, vmem_limit_bytes=None,
              act_dtype=jnp.float32):
    B, S, D = x.shape
    head_dim = D // num_heads
    bf16 = jnp.bfloat16

    # Pad S to a sublane multiple (production S like 577 -> clean (8,128) tiling);
    # padded key positions are masked inside the kernel, padded rows sliced off here.
    S_pad = ((S + seq_align - 1) // seq_align) * seq_align
    x_in = x if S_pad == S else jnp.pad(x, ((0, 0), (0, S_pad - S), (0, 0)))

    if vmem_limit_bytes is None:
        vmem_limit_bytes = _pick_vmem_limit()

    def weight_spec(shape):
        kwargs = {}
        if weight_buffer_count is not None:
            # weights are grid-invariant -> no need to double-buffer them
            kwargs["pipeline_mode"] = pl.Buffered(weight_buffer_count)
        return pl.BlockSpec(shape, lambda b: (0, 0), **kwargs)

    in_specs = [pl.BlockSpec((pl.Squeezed(), S_pad, D), lambda b: (b, 0, 0))] + [
        weight_spec(w.shape) for w in prepared
    ]
    out_spec = pl.BlockSpec((pl.Squeezed(), S_pad, D), lambda b: (b, 0, 0))

    kernel = partial(block_kernel, num_heads=num_heads, head_dim=head_dim,
                     kv_len=S, act_dtype=act_dtype)

    out = pl.pallas_call(
        kernel,
        out_shape=jax.ShapeDtypeStruct((B, S_pad, D), x.dtype),
        grid_spec=pltpu.PrefetchScalarGridSpec(
            num_scalar_prefetch=0,
            grid=(B,),
            in_specs=in_specs,
            out_specs=out_spec,
            scratch_shapes=[
                pltpu.VMEM((S_pad, 3 * D), bf16),   # staged qkv
                pltpu.VMEM((S_pad, D), bf16),       # concatenated head outputs
            ],
        ),
        compiler_params=pltpu.CompilerParams(
            dimension_semantics=("parallel",),
            vmem_limit_bytes=vmem_limit_bytes,
        ),
    )(x_in, *prepared)

    return out if S_pad == S else out[:, :S, :]


def reference_block(x, params, *, num_heads):
    # Plain-JAX f32 reference mirroring the PyTorch Block semantics.
    B, S, D = x.shape
    hd = D // num_heads
    h = _layernorm(x, params["g1"], params["be1"])
    qkv = h @ params["wqkv"] + params["bqkv"]
    q, k, v = qkv[..., :D], qkv[..., D:2 * D], qkv[..., 2 * D:]
    q = q.reshape(B, S, num_heads, hd).transpose(0, 2, 1, 3)
    k = k.reshape(B, S, num_heads, hd).transpose(0, 2, 1, 3)
    v = v.reshape(B, S, num_heads, hd).transpose(0, 2, 1, 3)
    s = jnp.einsum("bhqd,bhkd->bhqk", q, k) / math.sqrt(hd)
    p = jax.nn.softmax(s, axis=-1)
    o = jnp.einsum("bhqk,bhkd->bhqd", p, v).transpose(0, 2, 1, 3).reshape(B, S, D)
    x = x + (o @ params["wpr"] + params["bpr"])
    h2 = _layernorm(x, params["g2"], params["be2"])
    z = _gelu_exact(h2 @ params["wf1"] + params["bf1"])
    return x + (z @ params["wf2"] + params["bf2"])


def make_params(key, dim, hidden):
    ks = jax.random.split(key, 8)
    std = 0.02
    return {
        "g1":   jnp.ones((1, dim), jnp.float32),
        "be1":  jnp.zeros((1, dim), jnp.float32),
        "wqkv": std * jax.random.normal(ks[0], (dim, 3 * dim), jnp.float32),
        "bqkv": std * jax.random.normal(ks[1], (1, 3 * dim), jnp.float32),
        "wpr":  std * jax.random.normal(ks[2], (dim, dim), jnp.float32),
        "bpr":  std * jax.random.normal(ks[3], (1, dim), jnp.float32),
        "g2":   jnp.ones((1, dim), jnp.float32),
        "be2":  jnp.zeros((1, dim), jnp.float32),
        "wf1":  std * jax.random.normal(ks[4], (dim, hidden), jnp.float32),
        "bf1":  std * jax.random.normal(ks[5], (1, hidden), jnp.float32),
        "wf2":  std * jax.random.normal(ks[6], (hidden, dim), jnp.float32),
        "bf2":  std * jax.random.normal(ks[7], (1, dim), jnp.float32),
    }


if __name__ == "__main__":
    # Small but lane/sublane-friendly shapes: D=128 keeps outputs lane-dense,
    # S=64 keeps matmul M-dims sublane-aligned.
    B, S, D = 2, 64, 128
    num_heads = 4
    mlp_ratio = 4.0
    hidden = int(D * mlp_ratio)

    key = jax.random.PRNGKey(0)
    kx, kp = jax.random.split(key)
    x = jax.random.normal(kx, (B, S, D), jnp.float32)
    params = make_params(kp, D, hidden)

    # One-time weight preparation (scale fold + bf16 casts), reused across calls.
    prepared = jax.block_until_ready(prepare_params(params, num_heads=num_heads))

    def run(inp, weight_buffer_count):
        return vit_block(inp, prepared, num_heads=num_heads,
                         weight_buffer_count=weight_buffer_count)

    # Prefer single-buffered (grid-invariant) weight blocks; fall back to the
    # default-buffered, fixed-vmem-limit config if this jax build does not
    # support pipeline_mode on top-level pallas_call BlockSpecs.
    try:
        out = jax.block_until_ready(run(x, 1))
    except Exception:
        out = jax.block_until_ready(
            vit_block(x, prepared, num_heads=num_heads, weight_buffer_count=None,
                      vmem_limit_bytes=48 * 1024 * 1024))

    ref = reference_block(x, params, num_heads=num_heads)
    assert out.shape == (B, S, D) and out.dtype == jnp.float32
    # bf16 matmul inputs (f32 accumulation) + approx reciprocal -> loosened tolerance
    assert jnp.allclose(out, ref, rtol=1e-2, atol=1e-2), (
        f"max abs err {jnp.max(jnp.abs(out - ref))}")

    # Also exercise the sequence-padding + key-masking path (S=60 -> padded to 64).
    S2 = 60
    x2 = x[:, :S2, :]
    try:
        out2 = jax.block_until_ready(run(x2, 1))
    except Exception:
        out2 = jax.block_until_ready(
            vit_block(x2, prepared, num_heads=num_heads, weight_buffer_count=None,
                      vmem_limit_bytes=48 * 1024 * 1024))
    ref2 = reference_block(x2, params, num_heads=num_heads)
    assert out2.shape == (B, S2, D)
    assert jnp.allclose(out2, ref2, rtol=1e-2, atol=1e-2), (
        f"max abs err {jnp.max(jnp.abs(out2 - ref2))}")

    print("KERNEL_OK")
</pallas_src>

<mosaic_0001>
module attributes {stable_mosaic.version = 11 : i64} {
  func.func @block_kernel(%arg0: i32, %arg1: memref<1x64x128xf32, #tpu.memory_space<vmem>>, %arg2: memref<1x128xf32, #tpu.memory_space<vmem>>, %arg3: memref<1x128xf32, #tpu.memory_space<vmem>>, %arg4: memref<128x384xbf16, #tpu.memory_space<vmem>>, %arg5: memref<1x384xf32, #tpu.memory_space<vmem>>, %arg6: memref<128x128xbf16, #tpu.memory_space<vmem>>, %arg7: memref<1x128xf32, #tpu.memory_space<vmem>>, %arg8: memref<1x128xf32, #tpu.memory_space<vmem>>, %arg9: memref<1x128xf32, #tpu.memory_space<vmem>>, %arg10: memref<128x512xbf16, #tpu.memory_space<vmem>>, %arg11: memref<1x512xf32, #tpu.memory_space<vmem>>, %arg12: memref<512x128xbf16, #tpu.memory_space<vmem>>, %arg13: memref<1x128xf32, #tpu.memory_space<vmem>>, %arg14: memref<1x64x128xf32, #tpu.memory_space<vmem>>, %arg15: memref<64x384xbf16, #tpu.memory_space<vmem>>, %arg16: memref<64x128xbf16, #tpu.memory_space<vmem>>) attributes {dimension_semantics = [#tpu.dimension_semantics<parallel>], iteration_bounds = array<i64: 2>, scalar_prefetch = 0 : i64, scratch_operands = 2 : i64, tpu.core_type = #tpu.core_type<tc>, window_params = [{transform_indices = @transform_0, window_bounds = array<i64: 1, 64, 128>}, {pipeline_mode = #tpu.pipeline_mode<synchronous>, transform_indices = @transform_1, window_bounds = array<i64: 1, 128>}, {pipeline_mode = #tpu.pipeline_mode<synchronous>, transform_indices = @transform_2, window_bounds = array<i64: 1, 128>}, {pipeline_mode = #tpu.pipeline_mode<synchronous>, transform_indices = @transform_3, window_bounds = array<i64: 128, 384>}, {pipeline_mode = #tpu.pipeline_mode<synchronous>, transform_indices = @transform_4, window_bounds = array<i64: 1, 384>}, {pipeline_mode = #tpu.pipeline_mode<synchronous>, transform_indices = @transform_5, window_bounds = array<i64: 128, 128>}, {pipeline_mode = #tpu.pipeline_mode<synchronous>, transform_indices = @transform_6, window_bounds = array<i64: 1, 128>}, {pipeline_mode = #tpu.pipeline_mode<synchronous>, transform_indices = @transform_7, window_bounds = array<i64: 1, 128>}, {pipeline_mode = #tpu.pipeline_mode<synchronous>, transform_indices = @transform_8, window_bounds = array<i64: 1, 128>}, {pipeline_mode = #tpu.pipeline_mode<synchronous>, transform_indices = @transform_9, window_bounds = array<i64: 128, 512>}, {pipeline_mode = #tpu.pipeline_mode<synchronous>, transform_indices = @transform_10, window_bounds = array<i64: 1, 512>}, {pipeline_mode = #tpu.pipeline_mode<synchronous>, transform_indices = @transform_11, window_bounds = array<i64: 512, 128>}, {pipeline_mode = #tpu.pipeline_mode<synchronous>, transform_indices = @transform_12, window_bounds = array<i64: 1, 128>}, {transform_indices = @transform_13, window_bounds = array<i64: 1, 64, 128>}]} {
    %c0 = arith.constant 0 : index
    %c0_0 = arith.constant 0 : index
    %c0_1 = arith.constant 0 : index
    %0 = vector.load %arg1[%c0, %c0_0, %c0_1] : memref<1x64x128xf32, #tpu.memory_space<vmem>>, vector<1x64x128xf32>
    %1 = vector.shape_cast %0 : vector<1x64x128xf32> to vector<64x128xf32>
    %c0_2 = arith.constant 0 : index
    %c0_3 = arith.constant 0 : index
    %2 = vector.load %arg2[%c0_2, %c0_3] : memref<1x128xf32, #tpu.memory_space<vmem>>, vector<1x128xf32>
    %c0_4 = arith.constant 0 : index
    %c0_5 = arith.constant 0 : index
    %3 = vector.load %arg3[%c0_4, %c0_5] : memref<1x128xf32, #tpu.memory_space<vmem>>, vector<1x128xf32>
    %cst = arith.constant dense<0.000000e+00> : vector<64xf32>
    %4 = vector.multi_reduction <add>, %1, %cst [1] : vector<64x128xf32> to vector<64xf32>
    %5 = vector.shape_cast %4 : vector<64xf32> to vector<64x1xf32>
    %cst_6 = arith.constant 1.280000e+02 : f32
    %6 = vector.broadcast %cst_6 : f32 to vector<64x1xf32>
    %7 = arith.divf %5, %6 : vector<64x1xf32>
    %8 = vector.broadcast %7 : vector<64x1xf32> to vector<64x128xf32>
    %9 = arith.subf %1, %8 : vector<64x128xf32>
    %10 = arith.mulf %9, %9 : vector<64x128xf32>
    %cst_7 = arith.constant dense<0.000000e+00> : vector<64xf32>
    %11 = vector.multi_reduction <add>, %10, %cst_7 [1] : vector<64x128xf32> to vector<64xf32>
    %12 = vector.shape_cast %11 : vector<64xf32> to vector<64x1xf32>
    %cst_8 = arith.constant 1.280000e+02 : f32
    %13 = vector.broadcast %cst_8 : f32 to vector<64x1xf32>
    %14 = arith.divf %12, %13 : vector<64x1xf32>
    %cst_9 = arith.constant 9.99999974E-6 : f32
    %15 = vector.broadcast %cst_9 : f32 to vector<64x1xf32>
    %16 = arith.addf %14, %15 : vector<64x1xf32>
    %17 = math.rsqrt %16 : vector<64x1xf32>
    %18 = vector.broadcast %17 : vector<64x1xf32> to vector<64x128xf32>
    %19 = arith.mulf %9, %18 : vector<64x128xf32>
    %20 = vector.broadcast %2 : vector<1x128xf32> to vector<64x128xf32>
    %21 = arith.mulf %19, %20 : vector<64x128xf32>
    %22 = vector.broadcast %3 : vector<1x128xf32> to vector<64x128xf32>
    %23 = arith.addf %21, %22 : vector<64x128xf32>
    %24 = arith.truncf %23 : vector<64x128xf32> to vector<64x128xbf16>
    %c0_10 = arith.constant 0 : index
    %c0_11 = arith.constant 0 : index
    %25 = vector.load %arg4[%c0_10, %c0_11] : memref<128x384xbf16, #tpu.memory_space<vmem>>, vector<128x384xbf16>
    %cst_12 = arith.constant dense<0.000000e+00> : vector<64x384xf32>
    %26 = tpu.matmul %24, %25, %cst_12 {dimension_numbers = #tpu.dot_dimension_numbers<[1], [0], [0], [1], [0, 0, 1, 1], [], []>} : vector<64x128xbf16>, vector<128x384xbf16>, vector<64x384xf32> -> vector<64x384xf32>
    %c0_13 = arith.constant 0 : index
    %c0_14 = arith.constant 0 : index
    %27 = vector.load %arg5[%c0_13, %c0_14] : memref<1x384xf32, #tpu.memory_space<vmem>>, vector<1x384xf32>
    %28 = vector.broadcast %27 : vector<1x384xf32> to vector<64x384xf32>
    %29 = arith.addf %26, %28 : vector<64x384xf32>
    %30 = arith.truncf %29 : vector<64x384xf32> to vector<64x384xbf16>
    %c0_15 = arith.constant 0 : index
    %c0_16 = arith.constant 0 : index
    %31 = vector.load %arg15[%c0_15, %c0_16] : memref<64x384xbf16, #tpu.memory_space<vmem>>, vector<64x384xbf16>
    tpu.vector_store %arg15[%c0_15, %c0_16], %30 {strides = array<i32>} : memref<64x384xbf16, #tpu.memory_space<vmem>>, vector<64x384xbf16>,
    %c0_17 = arith.constant 0 : index
    %c0_18 = arith.constant 0 : index
    %32 = vector.load %arg15[%c0_17, %c0_18] : memref<64x384xbf16, #tpu.memory_space<vmem>>, vector<64x32xbf16>
    %c0_19 = arith.constant 0 : index
    %c128 = arith.constant 128 : index
    %33 = vector.load %arg15[%c0_19, %c128] : memref<64x384xbf16, #tpu.memory_space<vmem>>, vector<64x32xbf16>
    %c0_20 = arith.constant 0 : index
    %c256 = arith.constant 256 : index
    %34 = vector.load %arg15[%c0_20, %c256] : memref<64x384xbf16, #tpu.memory_space<vmem>>, vector<64x32xbf16>
    %cst_21 = arith.constant dense<0.000000e+00> : vector<64x64xf32>
    %35 = tpu.matmul %32, %33, %cst_21 {dimension_numbers = #tpu.dot_dimension_numbers<[1], [1], [0], [0], [0, 0, 1, 0], [], []>} : vector<64x32xbf16>, vector<64x32xbf16>, vector<64x64xf32> -> vector<64x64xf32>
    %cst_22 = arith.constant dense<0xFF800000> : vector<64xf32>
    %36 = vector.multi_reduction <maximumf>, %35, %cst_22 [1] : vector<64x64xf32> to vector<64xf32>
    %37 = vector.shape_cast %36 : vector<64xf32> to vector<64x1xf32>
    %38 = vector.broadcast %37 : vector<64x1xf32> to vector<64x64xf32>
    %39 = arith.subf %35, %38 : vector<64x64xf32>
    %40 = math.exp %39 : vector<64x64xf32>
    %cst_23 = arith.constant dense<0.000000e+00> : vector<64xf32>
    %41 = vector.multi_reduction <add>, %40, %cst_23 [1] : vector<64x64xf32> to vector<64xf32>
    %42 = vector.shape_cast %41 : vector<64xf32> to vector<64x1xf32>
    %43 = tpu.reciprocal %42 {approx = true} : vector<64x1xf32> -> vector<64x1xf32>
    %44 = vector.broadcast %43 : vector<64x1xf32> to vector<64x64xf32>
    %45 = arith.mulf %40, %44 : vector<64x64xf32>
    %46 = arith.truncf %45 : vector<64x64xf32> to vector<64x64xbf16>
    %cst_24 = arith.constant dense<0.000000e+00> : vector<64x32xf32>
    %47 = tpu.matmul %46, %34, %cst_24 {dimension_numbers = #tpu.dot_dimension_numbers<[1], [0], [0], [1], [0, 0, 1, 1], [], []>} : vector<64x64xbf16>, vector<64x32xbf16>, vector<64x32xf32> -> vector<64x32xf32>
    %48 = arith.truncf %47 : vector<64x32xf32> to vector<64x32xbf16>
    %c0_25 = arith.constant 0 : index
    %c0_26 = arith.constant 0 : index
    %49 = vector.load %arg16[%c0_25, %c0_26] : memref<64x128xbf16, #tpu.memory_space<vmem>>, vector<64x32xbf16>
    tpu.vector_store %arg16[%c0_25, %c0_26], %48 {strides = array<i32>} : memref<64x128xbf16, #tpu.memory_space<vmem>>, vector<64x32xbf16>,
    %c0_27 = arith.constant 0 : index
    %c32 = arith.constant 32 : index
    %50 = vector.load %arg15[%c0_27, %c32] : memref<64x384xbf16, #tpu.memory_space<vmem>>, vector<64x32xbf16>
    %c0_28 = arith.constant 0 : index
    %c160 = arith.constant 160 : index
    %51 = vector.load %arg15[%c0_28, %c160] : memref<64x384xbf16, #tpu.memory_space<vmem>>, vector<64x32xbf16>
    %c0_29 = arith.constant 0 : index
    %c288 = arith.constant 288 : index
    %52 = vector.load %arg15[%c0_29, %c288] : memref<64x384xbf16, #tpu.memory_space<vmem>>, vector<64x32xbf16>
    %cst_30 = arith.constant dense<0.000000e+00> : vector<64x64xf32>
    %53 = tpu.matmul %50, %51, %cst_30 {dimension_numbers = #tpu.dot_dimension_numbers<[1], [1], [0], [0], [0, 0, 1, 0], [], []>} : vector<64x32xbf16>, vector<64x32xbf16>, vector<64x64xf32> -> vector<64x64xf32>
    %cst_31 = arith.constant dense<0xFF800000> : vector<64xf32>
    %54 = vector.multi_reduction <maximumf>, %53, %cst_31 [1] : vector<64x64xf32> to vector<64xf32>
    %55 = vector.shape_cast %54 : vector<64xf32> to vector<64x1xf32>
    %56 = vector.broadcast %55 : vector<64x1xf32> to vector<64x64xf32>
    %57 = arith.subf %53, %56 : vector<64x64xf32>
    %58 = math.exp %57 : vector<64x64xf32>
    %cst_32 = arith.constant dense<0.000000e+00> : vector<64xf32>
    %59 = vector.multi_reduction <add>, %58, %cst_32 [1] : vector<64x64xf32> to vector<64xf32>
    %60 = vector.shape_cast %59 : vector<64xf32> to vector<64x1xf32>
    %61 = tpu.reciprocal %60 {approx = true} : vector<64x1xf32> -> vector<64x1xf32>
    %62 = vector.broadcast %61 : vector<64x1xf32> to vector<64x64xf32>
    %63 = arith.mulf %58, %62 : vector<64x64xf32>
    %64 = arith.truncf %63 : vector<64x64xf32> to vector<64x64xbf16>
    %cst_33 = arith.constant dense<0.000000e+00> : vector<64x32xf32>
    %65 = tpu.matmul %64, %52, %cst_33 {dimension_numbers = #tpu.dot_dimension_numbers<[1], [0], [0], [1], [0, 0, 1, 1], [], []>} : vector<64x64xbf16>, vector<64x32xbf16>, vector<64x32xf32> -> vector<64x32xf32>
    %66 = arith.truncf %65 : vector<64x32xf32> to vector<64x32xbf16>
    %c0_34 = arith.constant 0 : index
    %c32_35 = arith.constant 32 : index
    %67 = vector.load %arg16[%c0_34, %c32_35] : memref<64x128xbf16, #tpu.memory_space<vmem>>, vector<64x32xbf16>
    tpu.vector_store %arg16[%c0_34, %c32_35], %66 {strides = array<i32>} : memref<64x128xbf16, #tpu.memory_space<vmem>>, vector<64x32xbf16>,
    %c0_36 = arith.constant 0 : index
    %c64 = arith.constant 64 : index
    %68 = vector.load %arg15[%c0_36, %c64] : memref<64x384xbf16, #tpu.memory_space<vmem>>, vector<64x32xbf16>
    %c0_37 = arith.constant 0 : index
    %c192 = arith.constant 192 : index
    %69 = vector.load %arg15[%c0_37, %c192] : memref<64x384xbf16, #tpu.memory_space<vmem>>, vector<64x32xbf16>
    %c0_38 = arith.constant 0 : index
    %c320 = arith.constant 320 : index
    %70 = vector.load %arg15[%c0_38, %c320] : memref<64x384xbf16, #tpu.memory_space<vmem>>, vector<64x32xbf16>
    %cst_39 = arith.constant dense<0.000000e+00> : vector<64x64xf32>
    %71 = tpu.matmul %68, %69, %cst_39 {dimension_numbers = #tpu.dot_dimension_numbers<[1], [1], [0], [0], [0, 0, 1, 0], [], []>} : vector<64x32xbf16>, vector<64x32xbf16>, vector<64x64xf32> -> vector<64x64xf32>
    %cst_40 = arith.constant dense<0xFF800000> : vector<64xf32>
    %72 = vector.multi_reduction <maximumf>, %71, %cst_40 [1] : vector<64x64xf32> to vector<64xf32>
    %73 = vector.shape_cast %72 : vector<64xf32> to vector<64x1xf32>
    %74 = vector.broadcast %73 : vector<64x1xf32> to vector<64x64xf32>
    %75 = arith.subf %71, %74 : vector<64x64xf32>
    %76 = math.exp %75 : vector<64x64xf32>
    %cst_41 = arith.constant dense<0.000000e+00> : vector<64xf32>
    %77 = vector.multi_reduction <add>, %76, %cst_41 [1] : vector<64x64xf32> to vector<64xf32>
    %78 = vector.shape_cast %77 : vector<64xf32> to vector<64x1xf32>
    %79 = tpu.reciprocal %78 {approx = true} : vector<64x1xf32> -> vector<64x1xf32>
    %80 = vector.broadcast %79 : vector<64x1xf32> to vector<64x64xf32>
    %81 = arith.mulf %76, %80 : vector<64x64xf32>
    %82 = arith.truncf %81 : vector<64x64xf32> to vector<64x64xbf16>
    %cst_42 = arith.constant dense<0.000000e+00> : vector<64x32xf32>
    %83 = tpu.matmul %82, %70, %cst_42 {dimension_numbers = #tpu.dot_dimension_numbers<[1], [0], [0], [1], [0, 0, 1, 1], [], []>} : vector<64x64xbf16>, vector<64x32xbf16>, vector<64x32xf32> -> vector<64x32xf32>
    %84 = arith.truncf %83 : vector<64x32xf32> to vector<64x32xbf16>
    %c0_43 = arith.constant 0 : index
    %c64_44 = arith.constant 64 : index
    %85 = vector.load %arg16[%c0_43, %c64_44] : memref<64x128xbf16, #tpu.memory_space<vmem>>, vector<64x32xbf16>
    tpu.vector_store %arg16[%c0_43, %c64_44], %84 {strides = array<i32>} : memref<64x128xbf16, #tpu.memory_space<vmem>>, vector<64x32xbf16>,
    %c0_45 = arith.constant 0 : index
    %c96 = arith.constant 96 : index
    %86 = vector.load %arg15[%c0_45, %c96] : memref<64x384xbf16, #tpu.memory_space<vmem>>, vector<64x32xbf16>
    %c0_46 = arith.constant 0 : index
    %c224 = arith.constant 224 : index
    %87 = vector.load %arg15[%c0_46, %c224] : memref<64x384xbf16, #tpu.memory_space<vmem>>, vector<64x32xbf16>
    %c0_47 = arith.constant 0 : index
    %c352 = arith.constant 352 : index
    %88 = vector.load %arg15[%c0_47, %c352] : memref<64x384xbf16, #tpu.memory_space<vmem>>, vector<64x32xbf16>
    %cst_48 = arith.constant dense<0.000000e+00> : vector<64x64xf32>
    %89 = tpu.matmul %86, %87, %cst_48 {dimension_numbers = #tpu.dot_dimension_numbers<[1], [1], [0], [0], [0, 0, 1, 0], [], []>} : vector<64x32xbf16>, vector<64x32xbf16>, vector<64x64xf32> -> vector<64x64xf32>
    %cst_49 = arith.constant dense<0xFF800000> : vector<64xf32>
    %90 = vector.multi_reduction <maximumf>, %89, %cst_49 [1] : vector<64x64xf32> to vector<64xf32>
    %91 = vector.shape_cast %90 : vector<64xf32> to vector<64x1xf32>
    %92 = vector.broadcast %91 : vector<64x1xf32> to vector<64x64xf32>
    %93 = arith.subf %89, %92 : vector<64x64xf32>
    %94 = math.exp %93 : vector<64x64xf32>
    %cst_50 = arith.constant dense<0.000000e+00> : vector<64xf32>
    %95 = vector.multi_reduction <add>, %94, %cst_50 [1] : vector<64x64xf32> to vector<64xf32>
    %96 = vector.shape_cast %95 : vector<64xf32> to vector<64x1xf32>
    %97 = tpu.reciprocal %96 {approx = true} : vector<64x1xf32> -> vector<64x1xf32>
    %98 = vector.broadcast %97 : vector<64x1xf32> to vector<64x64xf32>
    %99 = arith.mulf %94, %98 : vector<64x64xf32>
    %100 = arith.truncf %99 : vector<64x64xf32> to vector<64x64xbf16>
    %cst_51 = arith.constant dense<0.000000e+00> : vector<64x32xf32>
    %101 = tpu.matmul %100, %88, %cst_51 {dimension_numbers = #tpu.dot_dimension_numbers<[1], [0], [0], [1], [0, 0, 1, 1], [], []>} : vector<64x64xbf16>, vector<64x32xbf16>, vector<64x32xf32> -> vector<64x32xf32>
    %102 = arith.truncf %101 : vector<64x32xf32> to vector<64x32xbf16>
    %c0_52 = arith.constant 0 : index
    %c96_53 = arith.constant 96 : index
    %103 = vector.load %arg16[%c0_52, %c96_53] : memref<64x128xbf16, #tpu.memory_space<vmem>>, vector<64x32xbf16>
    tpu.vector_store %arg16[%c0_52, %c96_53], %102 {strides = array<i32>} : memref<64x128xbf16, #tpu.memory_space<vmem>>, vector<64x32xbf16>,
    %c0_54 = arith.constant 0 : index
    %c0_55 = arith.constant 0 : index
    %104 = vector.load %arg16[%c0_54, %c0_55] : memref<64x128xbf16, #tpu.memory_space<vmem>>, vector<64x128xbf16>
    %c0_56 = arith.constant 0 : index
    %c0_57 = arith.constant 0 : index
    %105 = vector.load %arg6[%c0_56, %c0_57] : memref<128x128xbf16, #tpu.memory_space<vmem>>, vector<128x128xbf16>
    %cst_58 = arith.constant dense<0.000000e+00> : vector<64x128xf32>
    %106 = tpu.matmul %104, %105, %cst_58 {dimension_numbers = #tpu.dot_dimension_numbers<[1], [0], [0], [1], [0, 0, 1, 1], [], []>} : vector<64x128xbf16>, vector<128x128xbf16>, vector<64x128xf32> -> vector<64x128xf32>
    %107 = arith.addf %1, %106 : vector<64x128xf32>
    %c0_59 = arith.constant 0 : index
    %c0_60 = arith.constant 0 : index
    %108 = vector.load %arg7[%c0_59, %c0_60] : memref<1x128xf32, #tpu.memory_space<vmem>>, vector<1x128xf32>
    %109 = vector.broadcast %108 : vector<1x128xf32> to vector<64x128xf32>
    %110 = arith.addf %107, %109 : vector<64x128xf32>
    %c0_61 = arith.constant 0 : index
    %c0_62 = arith.constant 0 : index
    %111 = vector.load %arg8[%c0_61, %c0_62] : memref<1x128xf32, #tpu.memory_space<vmem>>, vector<1x128xf32>
    %c0_63 = arith.constant 0 : index
    %c0_64 = arith.constant 0 : index
    %112 = vector.load %arg9[%c0_63, %c0_64] : memref<1x128xf32, #tpu.memory_space<vmem>>, vector<1x128xf32>
    %cst_65 = arith.constant dense<0.000000e+00> : vector<64xf32>
    %113 = vector.multi_reduction <add>, %110, %cst_65 [1] : vector<64x128xf32> to vector<64xf32>
    %114 = vector.shape_cast %113 : vector<64xf32> to vector<64x1xf32>
    %cst_66 = arith.constant 1.280000e+02 : f32
    %115 = vector.broadcast %cst_66 : f32 to vector<64x1xf32>
    %116 = arith.divf %114, %115 : vector<64x1xf32>
    %117 = vector.broadcast %116 : vector<64x1xf32> to vector<64x128xf32>
    %118 = arith.subf %110, %117 : vector<64x128xf32>
    %119 = arith.mulf %118, %118 : vector<64x128xf32>
    %cst_67 = arith.constant dense<0.000000e+00> : vector<64xf32>
    %120 = vector.multi_reduction <add>, %119, %cst_67 [1] : vector<64x128xf32> to vector<64xf32>
    %121 = vector.shape_cast %120 : vector<64xf32> to vector<64x1xf32>
    %cst_68 = arith.constant 1.280000e+02 : f32
    %122 = vector.broadcast %cst_68 : f32 to vector<64x1xf32>
    %123 = arith.divf %121, %122 : vector<64x1xf32>
    %cst_69 = arith.constant 9.99999974E-6 : f32
    %124 = vector.broadcast %cst_69 : f32 to vector<64x1xf32>
    %125 = arith.addf %123, %124 : vector<64x1xf32>
    %126 = math.rsqrt %125 : vector<64x1xf32>
    %127 = vector.broadcast %126 : vector<64x1xf32> to vector<64x128xf32>
    %128 = arith.mulf %118, %127 : vector<64x128xf32>
    %129 = vector.broadcast %111 : vector<1x128xf32> to vector<64x128xf32>
    %130 = arith.mulf %128, %129 : vector<64x128xf32>
    %131 = vector.broadcast %112 : vector<1x128xf32> to vector<64x128xf32>
    %132 = arith.addf %130, %131 : vector<64x128xf32>
    %133 = arith.truncf %132 : vector<64x128xf32> to vector<64x128xbf16>
    %c0_70 = arith.constant 0 : index
    %c0_71 = arith.constant 0 : index
    %134 = vector.load %arg10[%c0_70, %c0_71] : memref<128x512xbf16, #tpu.memory_space<vmem>>, vector<128x512xbf16>
    %cst_72 = arith.constant dense<0.000000e+00> : vector<64x512xf32>
    %135 = tpu.matmul %133, %134, %cst_72 {dimension_numbers = #tpu.dot_dimension_numbers<[1], [0], [0], [1], [0, 0, 1, 1], [], []>} : vector<64x128xbf16>, vector<128x512xbf16>, vector<64x512xf32> -> vector<64x512xf32>
    %c0_73 = arith.constant 0 : index
    %c0_74 = arith.constant 0 : index
    %136 = vector.load %arg11[%c0_73, %c0_74] : memref<1x512xf32, #tpu.memory_space<vmem>>, vector<1x512xf32>
    %137 = vector.broadcast %136 : vector<1x512xf32> to vector<64x512xf32>
    %138 = arith.addf %135, %137 : vector<64x512xf32>
    %cst_75 = arith.constant 5.000000e-01 : f32
    %139 = vector.broadcast %cst_75 : f32 to vector<64x512xf32>
    %140 = arith.mulf %139, %138 : vector<64x512xf32>
    %cst_76 = arith.constant 0.707106769 : f32
    %141 = vector.broadcast %cst_76 : f32 to vector<64x512xf32>
    %142 = arith.mulf %138, %141 : vector<64x512xf32>
    %143 = math.erf %142 : vector<64x512xf32>
    %cst_77 = arith.constant 1.000000e+00 : f32
    %144 = vector.broadcast %cst_77 : f32 to vector<64x512xf32>
    %145 = arith.addf %144, %143 : vector<64x512xf32>
    %146 = arith.mulf %140, %145 : vector<64x512xf32>
    %147 = arith.truncf %146 : vector<64x512xf32> to vector<64x512xbf16>
    %c0_78 = arith.constant 0 : index
    %c0_79 = arith.constant 0 : index
    %148 = vector.load %arg12[%c0_78, %c0_79] : memref<512x128xbf16, #tpu.memory_space<vmem>>, vector<512x128xbf16>
    %cst_80 = arith.constant dense<0.000000e+00> : vector<64x128xf32>
    %149 = tpu.matmul %147, %148, %cst_80 {dimension_numbers = #tpu.dot_dimension_numbers<[1], [0], [0], [1], [0, 0, 1, 1], [], []>} : vector<64x512xbf16>, vector<512x128xbf16>, vector<64x128xf32> -> vector<64x128xf32>
    %c0_81 = arith.constant 0 : index
    %c0_82 = arith.constant 0 : index
    %150 = vector.load %arg13[%c0_81, %c0_82] : memref<1x128xf32, #tpu.memory_space<vmem>>, vector<1x128xf32>
    %151 = vector.broadcast %150 : vector<1x128xf32> to vector<64x128xf32>
    %152 = arith.addf %149, %151 : vector<64x128xf32>
    %153 = arith.addf %110, %152 : vector<64x128xf32>
    %c0_83 = arith.constant 0 : index
    %c0_84 = arith.constant 0 : index
    %c0_85 = arith.constant 0 : index
    %154 = vector.load %arg14[%c0_83, %c0_84, %c0_85] : memref<1x64x128xf32, #tpu.memory_space<vmem>>, vector<1x64x128xf32>
    %155 = vector.shape_cast %154 : vector<1x64x128xf32> to vector<64x128xf32>
    %156 = vector.shape_cast %153 : vector<64x128xf32> to vector<1x64x128xf32>
    tpu.vector_store %arg14[%c0_83, %c0_84, %c0_85], %156 {strides = array<i32>} : memref<1x64x128xf32, #tpu.memory_space<vmem>>, vector<1x64x128xf32>,
    return
  }
  func.func @transform_0(%arg0: i32) -> (i32, i32, i32) {
    %c0_i32 = arith.constant 0 : i32
    %c0_i32_0 = arith.constant 0 : i32
    %c0_i32_1 = arith.constant 0 : i32
    return %arg0, %c0_i32, %c0_i32_0 : i32, i32, i32
  }
  func.func @transform_1(%arg0: i32) -> (i32, i32) {
    %c0_i32 = arith.constant 0 : i32
    %c0_i32_0 = arith.constant 0 : i32
    %c0_i32_1 = arith.constant 0 : i32
    return %c0_i32, %c0_i32_0 : i32, i32
  }
  func.func @transform_2(%arg0: i32) -> (i32, i32) {
    %c0_i32 = arith.constant 0 : i32
    %c0_i32_0 = arith.constant 0 : i32
    %c0_i32_1 = arith.constant 0 : i32
    return %c0_i32, %c0_i32_0 : i32, i32
  }
  func.func @transform_3(%arg0: i32) -> (i32, i32) {
    %c0_i32 = arith.constant 0 : i32
    %c0_i32_0 = arith.constant 0 : i32
    %c0_i32_1 = arith.constant 0 : i32
    return %c0_i32, %c0_i32_0 : i32, i32
  }
  func.func @transform_4(%arg0: i32) -> (i32, i32) {
    %c0_i32 = arith.constant 0 : i32
    %c0_i32_0 = arith.constant 0 : i32
    %c0_i32_1 = arith.constant 0 : i32
    return %c0_i32, %c0_i32_0 : i32, i32
  }
  func.func @transform_5(%arg0: i32) -> (i32, i32) {
    %c0_i32 = arith.constant 0 : i32
    %c0_i32_0 = arith.constant 0 : i32
    %c0_i32_1 = arith.constant 0 : i32
    return %c0_i32, %c0_i32_0 : i32, i32
  }
  func.func @transform_6(%arg0: i32) -> (i32, i32) {
    %c0_i32 = arith.constant 0 : i32
    %c0_i32_0 = arith.constant 0 : i32
    %c0_i32_1 = arith.constant 0 : i32
    return %c0_i32, %c0_i32_0 : i32, i32
  }
  func.func @transform_7(%arg0: i32) -> (i32, i32) {
    %c0_i32 = arith.constant 0 : i32
    %c0_i32_0 = arith.constant 0 : i32
    %c0_i32_1 = arith.constant 0 : i32
    return %c0_i32, %c0_i32_0 : i32, i32
  }
  func.func @transform_8(%arg0: i32) -> (i32, i32) {
    %c0_i32 = arith.constant 0 : i32
    %c0_i32_0 = arith.constant 0 : i32
    %c0_i32_1 = arith.constant 0 : i32
    return %c0_i32, %c0_i32_0 : i32, i32
  }
  func.func @transform_9(%arg0: i32) -> (i32, i32) {
    %c0_i32 = arith.constant 0 : i32
    %c0_i32_0 = arith.constant 0 : i32
    %c0_i32_1 = arith.constant 0 : i32
    return %c0_i32, %c0_i32_0 : i32, i32
  }
  func.func @transform_10(%arg0: i32) -> (i32, i32) {
    %c0_i32 = arith.constant 0 : i32
    %c0_i32_0 = arith.constant 0 : i32
    %c0_i32_1 = arith.constant 0 : i32
    return %c0_i32, %c0_i32_0 : i32, i32
  }
  func.func @transform_11(%arg0: i32) -> (i32, i32) {
    %c0_i32 = arith.constant 0 : i32
    %c0_i32_0 = arith.constant 0 : i32
    %c0_i32_1 = arith.constant 0 : i32
    return %c0_i32, %c0_i32_0 : i32, i32
  }
  func.func @transform_12(%arg0: i32) -> (i32, i32) {
    %c0_i32 = arith.constant 0 : i32
    %c0_i32_0 = arith.constant 0 : i32
    %c0_i32_1 = arith.constant 0 : i32
    return %c0_i32, %c0_i32_0 : i32, i32
  }
  func.func @transform_13(%arg0: i32) -> (i32, i32, i32) {
    %c0_i32 = arith.constant 0 : i32
    %c0_i32_0 = arith.constant 0 : i32
    %c0_i32_1 = arith.constant 0 : i32
    return %arg0, %c0_i32, %c0_i32_0 : i32, i32, i32
  }
}

module attributes {stable_mosaic.version = 11 : i64} {
  func.func @block_kernel(%arg0: i32, %arg1: memref<1x64x128xf32, #tpu.memory_space<vmem>>, %arg2: memref<1x128xf32, #tpu.memory_space<vmem>>, %arg3: memref<1x128xf32, #tpu.memory_space<vmem>>, %arg4: memref<128x384xbf16, #tpu.memory_space<vmem>>, %arg5: memref<1x384xf32, #tpu.memory_space<vmem>>, %arg6: memref<128x128xbf16, #tpu.memory_space<vmem>>, %arg7: memref<1x128xf32, #tpu.memory_space<vmem>>, %arg8: memref<1x128xf32, #tpu.memory_space<vmem>>, %arg9: memref<1x128xf32, #tpu.memory_space<vmem>>, %arg10: memref<128x512xbf16, #tpu.memory_space<vmem>>, %arg11: memref<1x512xf32, #tpu.memory_space<vmem>>, %arg12: memref<512x128xbf16, #tpu.memory_space<vmem>>, %arg13: memref<1x128xf32, #tpu.memory_space<vmem>>, %arg14: memref<1x64x128xf32, #tpu.memory_space<vmem>>, %arg15: memref<64x384xbf16, #tpu.memory_space<vmem>>, %arg16: memref<64x128xbf16, #tpu.memory_space<vmem>>) attributes {dimension_semantics = [#tpu.dimension_semantics<parallel>], iteration_bounds = array<i64: 2>, scalar_prefetch = 0 : i64, scratch_operands = 2 : i64, tpu.core_type = #tpu.core_type<tc>, window_params = [{transform_indices = @transform_0, window_bounds = array<i64: 1, 64, 128>}, {pipeline_mode = #tpu.pipeline_mode<synchronous>, transform_indices = @transform_1, window_bounds = array<i64: 1, 128>}, {pipeline_mode = #tpu.pipeline_mode<synchronous>, transform_indices = @transform_2, window_bounds = array<i64: 1, 128>}, {pipeline_mode = #tpu.pipeline_mode<synchronous>, transform_indices = @transform_3, window_bounds = array<i64: 128, 384>}, {pipeline_mode = #tpu.pipeline_mode<synchronous>, transform_indices = @transform_4, window_bounds = array<i64: 1, 384>}, {pipeline_mode = #tpu.pipeline_mode<synchronous>, transform_indices = @transform_5, window_bounds = array<i64: 128, 128>}, {pipeline_mode = #tpu.pipeline_mode<synchronous>, transform_indices = @transform_6, window_bounds = array<i64: 1, 128>}, {pipeline_mode = #tpu.pipeline_mode<synchronous>, transform_indices = @transform_7, window_bounds = array<i64: 1, 128>}, {pipeline_mode = #tpu.pipeline_mode<synchronous>, transform_indices = @transform_8, window_bounds = array<i64: 1, 128>}, {pipeline_mode = #tpu.pipeline_mode<synchronous>, transform_indices = @transform_9, window_bounds = array<i64: 128, 512>}, {pipeline_mode = #tpu.pipeline_mode<synchronous>, transform_indices = @transform_10, window_bounds = array<i64: 1, 512>}, {pipeline_mode = #tpu.pipeline_mode<synchronous>, transform_indices = @transform_11, window_bounds = array<i64: 512, 128>}, {pipeline_mode = #tpu.pipeline_mode<synchronous>, transform_indices = @transform_12, window_bounds = array<i64: 1, 128>}, {transform_indices = @transform_13, window_bounds = array<i64: 1, 64, 128>}]} {
    %c0 = arith.constant 0 : index
    %c0_0 = arith.constant 0 : index
    %c0_1 = arith.constant 0 : index
    %0 = vector.load %arg1[%c0, %c0_0, %c0_1] : memref<1x64x128xf32, #tpu.memory_space<vmem>>, vector<1x64x128xf32>
    %1 = vector.shape_cast %0 : vector<1x64x128xf32> to vector<64x128xf32>
    %c0_2 = arith.constant 0 : index
    %c0_3 = arith.constant 0 : index
    %2 = vector.load %arg2[%c0_2, %c0_3] : memref<1x128xf32, #tpu.memory_space<vmem>>, vector<1x128xf32>
    %c0_4 = arith.constant 0 : index
    %c0_5 = arith.constant 0 : index
    %3 = vector.load %arg3[%c0_4, %c0_5] : memref<1x128xf32, #tpu.memory_space<vmem>>, vector<1x128xf32>
    %cst = arith.constant dense<0.000000e+00> : vector<64xf32>
    %4 = vector.multi_reduction <add>, %1, %cst [1] : vector<64x128xf32> to vector<64xf32>
    %5 = vector.shape_cast %4 : vector<64xf32> to vector<64x1xf32>
    %cst_6 = arith.constant 1.280000e+02 : f32
    %6 = vector.broadcast %cst_6 : f32 to vector<64x1xf32>
    %7 = arith.divf %5, %6 : vector<64x1xf32>
    %8 = vector.broadcast %7 : vector<64x1xf32> to vector<64x128xf32>
    %9 = arith.subf %1, %8 : vector<64x128xf32>
    %10 = arith.mulf %9, %9 : vector<64x128xf32>
    %cst_7 = arith.constant dense<0.000000e+00> : vector<64xf32>
    %11 = vector.multi_reduction <add>, %10, %cst_7 [1] : vector<64x128xf32> to vector<64xf32>
    %12 = vector.shape_cast %11 : vector<64xf32> to vector<64x1xf32>
    %cst_8 = arith.constant 1.280000e+02 : f32
    %13 = vector.broadcast %cst_8 : f32 to vector<64x1xf32>
    %14 = arith.divf %12, %13 : vector<64x1xf32>
    %cst_9 = arith.constant 9.99999974E-6 : f32
    %15 = vector.broadcast %cst_9 : f32 to vector<64x1xf32>
    %16 = arith.addf %14, %15 : vector<64x1xf32>
    %17 = math.rsqrt %16 : vector<64x1xf32>
    %18 = vector.broadcast %17 : vector<64x1xf32> to vector<64x128xf32>
    %19 = arith.mulf %9, %18 : vector<64x128xf32>
    %20 = vector.broadcast %2 : vector<1x128xf32> to vector<64x128xf32>
    %21 = arith.mulf %19, %20 : vector<64x128xf32>
    %22 = vector.broadcast %3 : vector<1x128xf32> to vector<64x128xf32>
    %23 = arith.addf %21, %22 : vector<64x128xf32>
    %24 = arith.truncf %23 : vector<64x128xf32> to vector<64x128xbf16>
    %c0_10 = arith.constant 0 : index
    %c0_11 = arith.constant 0 : index
    %25 = vector.load %arg4[%c0_10, %c0_11] : memref<128x384xbf16, #tpu.memory_space<vmem>>, vector<128x384xbf16>
    %cst_12 = arith.constant dense<0.000000e+00> : vector<64x384xf32>
    %26 = tpu.matmul %24, %25, %cst_12 {dimension_numbers = #tpu.dot_dimension_numbers<[1], [0], [0], [1], [0, 0, 1, 1], [], []>} : vector<64x128xbf16>, vector<128x384xbf16>, vector<64x384xf32> -> vector<64x384xf32>
    %c0_13 = arith.constant 0 : index
    %c0_14 = arith.constant 0 : index
    %27 = vector.load %arg5[%c0_13, %c0_14] : memref<1x384xf32, #tpu.memory_space<vmem>>, vector<1x384xf32>
    %28 = vector.broadcast %27 : vector<1x384xf32> to vector<64x384xf32>
    %29 = arith.addf %26, %28 : vector<64x384xf32>
    %30 = arith.truncf %29 : vector<64x384xf32> to vector<64x384xbf16>
    %c0_15 = arith.constant 0 : index
    %c0_16 = arith.constant 0 : index
    %31 = vector.load %arg15[%c0_15, %c0_16] : memref<64x384xbf16, #tpu.memory_space<vmem>>, vector<64x384xbf16>
    tpu.vector_store %arg15[%c0_15, %c0_16], %30 {strides = array<i32>} : memref<64x384xbf16, #tpu.memory_space<vmem>>, vector<64x384xbf16>,
    %c0_17 = arith.constant 0 : index
    %c0_18 = arith.constant 0 : index
    %32 = vector.load %arg15[%c0_17, %c0_18] : memref<64x384xbf16, #tpu.memory_space<vmem>>, vector<64x32xbf16>
    %c0_19 = arith.constant 0 : index
    %c128 = arith.constant 128 : index
    %33 = vector.load %arg15[%c0_19, %c128] : memref<64x384xbf16, #tpu.memory_space<vmem>>, vector<64x32xbf16>
    %c0_20 = arith.constant 0 : index
    %c256 = arith.constant 256 : index
    %34 = vector.load %arg15[%c0_20, %c256] : memref<64x384xbf16, #tpu.memory_space<vmem>>, vector<64x32xbf16>
    %cst_21 = arith.constant dense<0.000000e+00> : vector<64x64xf32>
    %35 = tpu.matmul %32, %33, %cst_21 {dimension_numbers = #tpu.dot_dimension_numbers<[1], [1], [0], [0], [0, 0, 1, 0], [], []>} : vector<64x32xbf16>, vector<64x32xbf16>, vector<64x64xf32> -> vector<64x64xf32>
    %cst_22 = arith.constant dense<0xFF800000> : vector<64xf32>
    %36 = vector.multi_reduction <maximumf>, %35, %cst_22 [1] : vector<64x64xf32> to vector<64xf32>
    %37 = vector.shape_cast %36 : vector<64xf32> to vector<64x1xf32>
    %38 = vector.broadcast %37 : vector<64x1xf32> to vector<64x64xf32>
    %39 = arith.subf %35, %38 : vector<64x64xf32>
    %40 = math.exp %39 : vector<64x64xf32>
    %cst_23 = arith.constant dense<0.000000e+00> : vector<64xf32>
    %41 = vector.multi_reduction <add>, %40, %cst_23 [1] : vector<64x64xf32> to vector<64xf32>
    %42 = vector.shape_cast %41 : vector<64xf32> to vector<64x1xf32>
    %43 = tpu.reciprocal %42 {approx = true} : vector<64x1xf32> -> vector<64x1xf32>
    %44 = vector.broadcast %43 : vector<64x1xf32> to vector<64x64xf32>
    %45 = arith.mulf %40, %44 : vector<64x64xf32>
    %46 = arith.truncf %45 : vector<64x64xf32> to vector<64x64xbf16>
    %cst_24 = arith.constant dense<0.000000e+00> : vector<64x32xf32>
    %47 = tpu.matmul %46, %34, %cst_24 {dimension_numbers = #tpu.dot_dimension_numbers<[1], [0], [0], [1], [0, 0, 1, 1], [], []>} : vector<64x64xbf16>, vector<64x32xbf16>, vector<64x32xf32> -> vector<64x32xf32>
    %48 = arith.truncf %47 : vector<64x32xf32> to vector<64x32xbf16>
    %c0_25 = arith.constant 0 : index
    %c0_26 = arith.constant 0 : index
    %49 = vector.load %arg16[%c0_25, %c0_26] : memref<64x128xbf16, #tpu.memory_space<vmem>>, vector<64x32xbf16>
    tpu.vector_store %arg16[%c0_25, %c0_26], %48 {strides = array<i32>} : memref<64x128xbf16, #tpu.memory_space<vmem>>, vector<64x32xbf16>,
    %c0_27 = arith.constant 0 : index
    %c32 = arith.constant 32 : index
    %50 = vector.load %arg15[%c0_27, %c32] : memref<64x384xbf16, #tpu.memory_space<vmem>>, vector<64x32xbf16>
    %c0_28 = arith.constant 0 : index
    %c160 = arith.constant 160 : index
    %51 = vector.load %arg15[%c0_28, %c160] : memref<64x384xbf16, #tpu.memory_space<vmem>>, vector<64x32xbf16>
    %c0_29 = arith.constant 0 : index
    %c288 = arith.constant 288 : index
    %52 = vector.load %arg15[%c0_29, %c288] : memref<64x384xbf16, #tpu.memory_space<vmem>>, vector<64x32xbf16>
    %cst_30 = arith.constant dense<0.000000e+00> : vector<64x64xf32>
    %53 = tpu.matmul %50, %51, %cst_30 {dimension_numbers = #tpu.dot_dimension_numbers<[1], [1], [0], [0], [0, 0, 1, 0], [], []>} : vector<64x32xbf16>, vector<64x32xbf16>, vector<64x64xf32> -> vector<64x64xf32>
    %cst_31 = arith.constant dense<0xFF800000> : vector<64xf32>
    %54 = vector.multi_reduction <maximumf>, %53, %cst_31 [1] : vector<64x64xf32> to vector<64xf32>
    %55 = vector.shape_cast %54 : vector<64xf32> to vector<64x1xf32>
    %56 = vector.broadcast %55 : vector<64x1xf32> to vector<64x64xf32>
    %57 = arith.subf %53, %56 : vector<64x64xf32>
    %58 = math.exp %57 : vector<64x64xf32>
    %cst_32 = arith.constant dense<0.000000e+00> : vector<64xf32>
    %59 = vector.multi_reduction <add>, %58, %cst_32 [1] : vector<64x64xf32> to vector<64xf32>
    %60 = vector.shape_cast %59 : vector<64xf32> to vector<64x1xf32>
    %61 = tpu.reciprocal %60 {approx = true} : vector<64x1xf32> -> vector<64x1xf32>
    %62 = vector.broadcast %61 : vector<64x1xf32> to vector<64x64xf32>
    %63 = arith.mulf %58, %62 : vector<64x64xf32>
    %64 = arith.truncf %63 : vector<64x64xf32> to vector<64x64xbf16>
    %cst_33 = arith.constant dense<0.000000e+00> : vector<64x32xf32>
    %65 = tpu.matmul %64, %52, %cst_33 {dimension_numbers = #tpu.dot_dimension_numbers<[1], [0], [0], [1], [0, 0, 1, 1], [], []>} : vector<64x64xbf16>, vector<64x32xbf16>, vector<64x32xf32> -> vector<64x32xf32>
    %66 = arith.truncf %65 : vector<64x32xf32> to vector<64x32xbf16>
    %c0_34 = arith.constant 0 : index
    %c32_35 = arith.constant 32 : index
    %67 = vector.load %arg16[%c0_34, %c32_35] : memref<64x128xbf16, #tpu.memory_space<vmem>>, vector<64x32xbf16>
    tpu.vector_store %arg16[%c0_34, %c32_35], %66 {strides = array<i32>} : memref<64x128xbf16, #tpu.memory_space<vmem>>, vector<64x32xbf16>,
    %c0_36 = arith.constant 0 : index
    %c64 = arith.constant 64 : index
    %68 = vector.load %arg15[%c0_36, %c64] : memref<64x384xbf16, #tpu.memory_space<vmem>>, vector<64x32xbf16>
    %c0_37 = arith.constant 0 : index
    %c192 = arith.constant 192 : index
    %69 = vector.load %arg15[%c0_37, %c192] : memref<64x384xbf16, #tpu.memory_space<vmem>>, vector<64x32xbf16>
    %c0_38 = arith.constant 0 : index
    %c320 = arith.constant 320 : index
    %70 = vector.load %arg15[%c0_38, %c320] : memref<64x384xbf16, #tpu.memory_space<vmem>>, vector<64x32xbf16>
    %cst_39 = arith.constant dense<0.000000e+00> : vector<64x64xf32>
    %71 = tpu.matmul %68, %69, %cst_39 {dimension_numbers = #tpu.dot_dimension_numbers<[1], [1], [0], [0], [0, 0, 1, 0], [], []>} : vector<64x32xbf16>, vector<64x32xbf16>, vector<64x64xf32> -> vector<64x64xf32>
    %cst_40 = arith.constant dense<0xFF800000> : vector<64xf32>
    %72 = vector.multi_reduction <maximumf>, %71, %cst_40 [1] : vector<64x64xf32> to vector<64xf32>
    %73 = vector.shape_cast %72 : vector<64xf32> to vector<64x1xf32>
    %74 = vector.broadcast %73 : vector<64x1xf32> to vector<64x64xf32>
    %75 = arith.subf %71, %74 : vector<64x64xf32>
    %76 = math.exp %75 : vector<64x64xf32>
    %cst_41 = arith.constant dense<0.000000e+00> : vector<64xf32>
    %77 = vector.multi_reduction <add>, %76, %cst_41 [1] : vector<64x64xf32> to vector<64xf32>
    %78 = vector.shape_cast %77 : vector<64xf32> to vector<64x1xf32>
    %79 = tpu.reciprocal %78 {approx = true} : vector<64x1xf32> -> vector<64x1xf32>
    %80 = vector.broadcast %79 : vector<64x1xf32> to vector<64x64xf32>
    %81 = arith.mulf %76, %80 : vector<64x64xf32>
    %82 = arith.truncf %81 : vector<64x64xf32> to vector<64x64xbf16>
    %cst_42 = arith.constant dense<0.000000e+00> : vector<64x32xf32>
    %83 = tpu.matmul %82, %70, %cst_42 {dimension_numbers = #tpu.dot_dimension_numbers<[1], [0], [0], [1], [0, 0, 1, 1], [], []>} : vector<64x64xbf16>, vector<64x32xbf16>, vector<64x32xf32> -> vector<64x32xf32>
    %84 = arith.truncf %83 : vector<64x32xf32> to vector<64x32xbf16>
    %c0_43 = arith.constant 0 : index
    %c64_44 = arith.constant 64 : index
    %85 = vector.load %arg16[%c0_43, %c64_44] : memref<64x128xbf16, #tpu.memory_space<vmem>>, vector<64x32xbf16>
    tpu.vector_store %arg16[%c0_43, %c64_44], %84 {strides = array<i32>} : memref<64x128xbf16, #tpu.memory_space<vmem>>, vector<64x32xbf16>,
    %c0_45 = arith.constant 0 : index
    %c96 = arith.constant 96 : index
    %86 = vector.load %arg15[%c0_45, %c96] : memref<64x384xbf16, #tpu.memory_space<vmem>>, vector<64x32xbf16>
    %c0_46 = arith.constant 0 : index
    %c224 = arith.constant 224 : index
    %87 = vector.load %arg15[%c0_46, %c224] : memref<64x384xbf16, #tpu.memory_space<vmem>>, vector<64x32xbf16>
    %c0_47 = arith.constant 0 : index
    %c352 = arith.constant 352 : index
    %88 = vector.load %arg15[%c0_47, %c352] : memref<64x384xbf16, #tpu.memory_space<vmem>>, vector<64x32xbf16>
    %cst_48 = arith.constant dense<0.000000e+00> : vector<64x64xf32>
    %89 = tpu.matmul %86, %87, %cst_48 {dimension_numbers = #tpu.dot_dimension_numbers<[1], [1], [0], [0], [0, 0, 1, 0], [], []>} : vector<64x32xbf16>, vector<64x32xbf16>, vector<64x64xf32> -> vector<64x64xf32>
    %cst_49 = arith.constant dense<0xFF800000> : vector<64xf32>
    %90 = vector.multi_reduction <maximumf>, %89, %cst_49 [1] : vector<64x64xf32> to vector<64xf32>
    %91 = vector.shape_cast %90 : vector<64xf32> to vector<64x1xf32>
    %92 = vector.broadcast %91 : vector<64x1xf32> to vector<64x64xf32>
    %93 = arith.subf %89, %92 : vector<64x64xf32>
    %94 = math.exp %93 : vector<64x64xf32>
    %cst_50 = arith.constant dense<0.000000e+00> : vector<64xf32>
    %95 = vector.multi_reduction <add>, %94, %cst_50 [1] : vector<64x64xf32> to vector<64xf32>
    %96 = vector.shape_cast %95 : vector<64xf32> to vector<64x1xf32>
    %97 = tpu.reciprocal %96 {approx = true} : vector<64x1xf32> -> vector<64x1xf32>
    %98 = vector.broadcast %97 : vector<64x1xf32> to vector<64x64xf32>
    %99 = arith.mulf %94, %98 : vector<64x64xf32>
    %100 = arith.truncf %99 : vector<64x64xf32> to vector<64x64xbf16>
    %cst_51 = arith.constant dense<0.000000e+00> : vector<64x32xf32>
    %101 = tpu.matmul %100, %88, %cst_51 {dimension_numbers = #tpu.dot_dimension_numbers<[1], [0], [0], [1], [0, 0, 1, 1], [], []>} : vector<64x64xbf16>, vector<64x32xbf16>, vector<64x32xf32> -> vector<64x32xf32>
    %102 = arith.truncf %101 : vector<64x32xf32> to vector<64x32xbf16>
    %c0_52 = arith.constant 0 : index
    %c96_53 = arith.constant 96 : index
    %103 = vector.load %arg16[%c0_52, %c96_53] : memref<64x128xbf16, #tpu.memory_space<vmem>>, vector<64x32xbf16>
    tpu.vector_store %arg16[%c0_52, %c96_53], %102 {strides = array<i32>} : memref<64x128xbf16, #tpu.memory_space<vmem>>, vector<64x32xbf16>,
    %c0_54 = arith.constant 0 : index
    %c0_55 = arith.constant 0 : index
    %104 = vector.load %arg16[%c0_54, %c0_55] : memref<64x128xbf16, #tpu.memory_space<vmem>>, vector<64x128xbf16>
    %c0_56 = arith.constant 0 : index
    %c0_57 = arith.constant 0 : index
    %105 = vector.load %arg6[%c0_56, %c0_57] : memref<128x128xbf16, #tpu.memory_space<vmem>>, vector<128x128xbf16>
    %cst_58 = arith.constant dense<0.000000e+00> : vector<64x128xf32>
    %106 = tpu.matmul %104, %105, %cst_58 {dimension_numbers = #tpu.dot_dimension_numbers<[1], [0], [0], [1], [0, 0, 1, 1], [], []>} : vector<64x128xbf16>, vector<128x128xbf16>, vector<64x128xf32> -> vector<64x128xf32>
    %107 = arith.addf %1, %106 : vector<64x128xf32>
    %c0_59 = arith.constant 0 : index
    %c0_60 = arith.constant 0 : index
    %108 = vector.load %arg7[%c0_59, %c0_60] : memref<1x128xf32, #tpu.memory_space<vmem>>, vector<1x128xf32>
    %109 = vector.broadcast %108 : vector<1x128xf32> to vector<64x128xf32>
    %110 = arith.addf %107, %109 : vector<64x128xf32>
    %c0_61 = arith.constant 0 : index
    %c0_62 = arith.constant 0 : index
    %111 = vector.load %arg8[%c0_61, %c0_62] : memref<1x128xf32, #tpu.memory_space<vmem>>, vector<1x128xf32>
    %c0_63 = arith.constant 0 : index
    %c0_64 = arith.constant 0 : index
    %112 = vector.load %arg9[%c0_63, %c0_64] : memref<1x128xf32, #tpu.memory_space<vmem>>, vector<1x128xf32>
    %cst_65 = arith.constant dense<0.000000e+00> : vector<64xf32>
    %113 = vector.multi_reduction <add>, %110, %cst_65 [1] : vector<64x128xf32> to vector<64xf32>
    %114 = vector.shape_cast %113 : vector<64xf32> to vector<64x1xf32>
    %cst_66 = arith.constant 1.280000e+02 : f32
    %115 = vector.broadcast %cst_66 : f32 to vector<64x1xf32>
    %116 = arith.divf %114, %115 : vector<64x1xf32>
    %117 = vector.broadcast %116 : vector<64x1xf32> to vector<64x128xf32>
    %118 = arith.subf %110, %117 : vector<64x128xf32>
    %119 = arith.mulf %118, %118 : vector<64x128xf32>
    %cst_67 = arith.constant dense<0.000000e+00> : vector<64xf32>
    %120 = vector.multi_reduction <add>, %119, %cst_67 [1] : vector<64x128xf32> to vector<64xf32>
    %121 = vector.shape_cast %120 : vector<64xf32> to vector<64x1xf32>
    %cst_68 = arith.constant 1.280000e+02 : f32
    %122 = vector.broadcast %cst_68 : f32 to vector<64x1xf32>
    %123 = arith.divf %121, %122 : vector<64x1xf32>
    %cst_69 = arith.constant 9.99999974E-6 : f32
    %124 = vector.broadcast %cst_69 : f32 to vector<64x1xf32>
    %125 = arith.addf %123, %124 : vector<64x1xf32>
    %126 = math.rsqrt %125 : vector<64x1xf32>
    %127 = vector.broadcast %126 : vector<64x1xf32> to vector<64x128xf32>
    %128 = arith.mulf %118, %127 : vector<64x128xf32>
    %129 = vector.broadcast %111 : vector<1x128xf32> to vector<64x128xf32>
    %130 = arith.mulf %128, %129 : vector<64x128xf32>
    %131 = vector.broadcast %112 : vector<1x128xf32> to vector<64x128xf32>
    %132 = arith.addf %130, %131 : vector<64x128xf32>
    %133 = arith.truncf %132 : vector<64x128xf32> to vector<64x128xbf16>
    %c0_70 = arith.constant 0 : index
    %c0_71 = arith.constant 0 : index
    %134 = vector.load %arg10[%c0_70, %c0_71] : memref<128x512xbf16, #tpu.memory_space<vmem>>, vector<128x512xbf16>
    %cst_72 = arith.constant dense<0.000000e+00> : vector<64x512xf32>
    %135 = tpu.matmul %133, %134, %cst_72 {dimension_numbers = #tpu.dot_dimension_numbers<[1], [0], [0], [1], [0, 0, 1, 1], [], []>} : vector<64x128xbf16>, vector<128x512xbf16>, vector<64x512xf32> -> vector<64x512xf32>
    %c0_73 = arith.constant 0 : index
    %c0_74 = arith.constant 0 : index
    %136 = vector.load %arg11[%c0_73, %c0_74] : memref<1x512xf32, #tpu.memory_space<vmem>>, vector<1x512xf32>
    %137 = vector.broadcast %136 : vector<1x512xf32> to vector<64x512xf32>
    %138 = arith.addf %135, %137 : vector<64x512xf32>
    %cst_75 = arith.constant 5.000000e-01 : f32
    %139 = vector.broadcast %cst_75 : f32 to vector<64x512xf32>
    %140 = arith.mulf %139, %138 : vector<64x512xf32>
    %cst_76 = arith.constant 0.707106769 : f32
    %141 = vector.broadcast %cst_76 : f32 to vector<64x512xf32>
    %142 = arith.mulf %138, %141 : vector<64x512xf32>
    %143 = math.erf %142 : vector<64x512xf32>
    %cst_77 = arith.constant 1.000000e+00 : f32
    %144 = vector.broadcast %cst_77 : f32 to vector<64x512xf32>
    %145 = arith.addf %144, %143 : vector<64x512xf32>
    %146 = arith.mulf %140, %145 : vector<64x512xf32>
    %147 = arith.truncf %146 : vector<64x512xf32> to vector<64x512xbf16>
    %c0_78 = arith.constant 0 : index
    %c0_79 = arith.constant 0 : index
    %148 = vector.load %arg12[%c0_78, %c0_79] : memref<512x128xbf16, #tpu.memory_space<vmem>>, vector<512x128xbf16>
    %cst_80 = arith.constant dense<0.000000e+00> : vector<64x128xf32>
    %149 = tpu.matmul %147, %148, %cst_80 {dimension_numbers = #tpu.dot_dimension_numbers<[1], [0], [0], [1], [0, 0, 1, 1], [], []>} : vector<64x512xbf16>, vector<512x128xbf16>, vector<64x128xf32> -> vector<64x128xf32>
    %c0_81 = arith.constant 0 : index
    %c0_82 = arith.constant 0 : index
    %150 = vector.load %arg13[%c0_81, %c0_82] : memref<1x128xf32, #tpu.memory_space<vmem>>, vector<1x128xf32>
    %151 = vector.broadcast %150 : vector<1x128xf32> to vector<64x128xf32>
    %152 = arith.addf %149, %151 : vector<64x128xf32>
    %153 = arith.addf %110, %152 : vector<64x128xf32>
    %c0_83 = arith.constant 0 : index
    %c0_84 = arith.constant 0 : index
    %c0_85 = arith.constant 0 : index
    %154 = vector.load %arg14[%c0_83, %c0_84, %c0_85] : memref<1x64x128xf32, #tpu.memory_space<vmem>>, vector<1x64x128xf32>
    %155 = vector.shape_cast %154 : vector<1x64x128xf32> to vector<64x128xf32>
    %156 = vector.shape_cast %153 : vector<64x128xf32> to vector<1x64x128xf32>
    tpu.vector_store %arg14[%c0_83, %c0_84, %c0_85], %156 {strides = array<i32>} : memref<1x64x128xf32, #tpu.memory_space<vmem>>, vector<1x64x128xf32>,
    return
  }
  func.func @transform_0(%arg0: i32) -> (i32, i32, i32) {
    %c0_i32 = arith.constant 0 : i32
    %c0_i32_0 = arith.constant 0 : i32
    %c0_i32_1 = arith.constant 0 : i32
    return %arg0, %c0_i32, %c0_i32_0 : i32, i32, i32
  }
  func.func @transform_1(%arg0: i32) -> (i32, i32) {
    %c0_i32 = arith.constant 0 : i32
    %c0_i32_0 = arith.constant 0 : i32
    %c0_i32_1 = arith.constant 0 : i32
    return %c0_i32, %c0_i32_0 : i32, i32
  }
  func.func @transform_2(%arg0: i32) -> (i32, i32) {
    %c0_i32 = arith.constant 0 : i32
    %c0_i32_0 = arith.constant 0 : i32
    %c0_i32_1 = arith.constant 0 : i32
    return %c0_i32, %c0_i32_0 : i32, i32
  }
  func.func @transform_3(%arg0: i32) -> (i32, i32) {
    %c0_i32 = arith.constant 0 : i32
    %c0_i32_0 = arith.constant 0 : i32
    %c0_i32_1 = arith.constant 0 : i32
    return %c0_i32, %c0_i32_0 : i32, i32
  }
  func.func @transform_4(%arg0: i32) -> (i32, i32) {
    %c0_i32 = arith.constant 0 : i32
    %c0_i32_0 = arith.constant 0 : i32
    %c0_i32_1 = arith.constant 0 : i32
    return %c0_i32, %c0_i32_0 : i32, i32
  }
  func.func @transform_5(%arg0: i32) -> (i32, i32) {
    %c0_i32 = arith.constant 0 : i32
    %c0_i32_0 = arith.constant 0 : i32
    %c0_i32_1 = arith.constant 0 : i32
    return %c0_i32, %c0_i32_0 : i32, i32
  }
  func.func @transform_6(%arg0: i32) -> (i32, i32) {
    %c0_i32 = arith.constant 0 : i32
    %c0_i32_0 = arith.constant 0 : i32
    %c0_i32_1 = arith.constant 0 : i32
    return %c0_i32, %c0_i32_0 : i32, i32
  }
  func.func @transform_7(%arg0: i32) -> (i32, i32) {
    %c0_i32 = arith.constant 0 : i32
    %c0_i32_0 = arith.constant 0 : i32
    %c0_i32_1 = arith.constant 0 : i32
    return %c0_i32, %c0_i32_0 : i32, i32
  }
  func.func @transform_8(%arg0: i32) -> (i32, i32) {
    %c0_i32 = arith.constant 0 : i32
    %c0_i32_0 = arith.constant 0 : i32
    %c0_i32_1 = arith.constant 0 : i32
    return %c0_i32, %c0_i32_0 : i32, i32
  }
  func.func @transform_9(%arg0: i32) -> (i32, i32) {
    %c0_i32 = arith.constant 0 : i32
    %c0_i32_0 = arith.constant 0 : i32
    %c0_i32_1 = arith.constant 0 : i32
    return %c0_i32, %c0_i32_0 : i32, i32
  }
  func.func @transform_10(%arg0: i32) -> (i32, i32) {
    %c0_i32 = arith.constant 0 : i32
    %c0_i32_0 = arith.constant 0 : i32
    %c0_i32_1 = arith.constant 0 : i32
    return %c0_i32, %c0_i32_0 : i32, i32
  }
  func.func @transform_11(%arg0: i32) -> (i32, i32) {
    %c0_i32 = arith.constant 0 : i32
    %c0_i32_0 = arith.constant 0 : i32
    %c0_i32_1 = arith.constant 0 : i32
    return %c0_i32, %c0_i32_0 : i32, i32
  }
  func.func @transform_12(%arg0: i32) -> (i32, i32) {
    %c0_i32 = arith.constant 0 : i32
    %c0_i32_0 = arith.constant 0 : i32
    %c0_i32_1 = arith.constant 0 : i32
    return %c0_i32, %c0_i32_0 : i32, i32
  }
  func.func @transform_13(%arg0: i32) -> (i32, i32, i32) {
    %c0_i32 = arith.constant 0 : i32
    %c0_i32_0 = arith.constant 0 : i32
    %c0_i32_1 = arith.constant 0 : i32
    return %arg0, %c0_i32, %c0_i32_0 : i32, i32, i32
  }
}

</mosaic_0001>

<bundles_post_ra>
// kernel: tpu_custom_call.1
= control target key start
LH: loop header
LB: loop body
LE: loop exit
PB: predicated region body
PF: predicated region fallthrough
CT: control target
= control target key end

     0   :  { %s6313_s0 = inlined_call_operand.hbm [shape: f32[2,64,128], index: 0, kind: input, shape index: {}]   ;;  %s6314_s1 = inlined_call_operand.hbm [shape: f32[1,128], index: 1, kind: input, shape index: {}]   ;;  %s6315_s2 = inlined_call_operand.hbm [shape: f32[1,128], index: 2, kind: input, shape index: {}]   ;;  %s6316_s3 = inlined_call_operand.hbm [shape: bf16[128,384], index: 3, kind: input, shape index: {}]   ;;  %s6317_s4 = inlined_call_operand.vmem [shape: f32[1,384], index: 4, kind: input, shape index: {}]   ;;  %s6318_s5 = inlined_call_operand.hbm [shape: bf16[128,128], index: 5, kind: input, shape index: {}]   ;;  %s6319_s6 = inlined_call_operand.vmem [shape: f32[1,128], index: 6, kind: input, shape index: {}]   ;;  %s6320_s7 = inlined_call_operand.vmem [shape: f32[1,128], index: 7, kind: input, shape index: {}]   ;;  %s6321_s8 = inlined_call_operand.vmem [shape: f32[1,128], index: 8, kind: input, shape index: {}]   ;;  %s6322_s9 = inlined_call_operand.hbm [shape: bf16[128,512], index: 9, kind: input, shape index: {}]   ;;  %s6323_s10 = inlined_call_operand.vmem [shape: f32[1,512], index: 10, kind: input, shape index: {}]   ;;  %s6324_s11 = inlined_call_operand.hbm [shape: bf16[512,128], index: 11, kind: input, shape index: {}]   ;;  %s6325_s12 = inlined_call_operand.vmem [shape: f32[1,128], index: 12, kind: input, shape index: {}]   ;;  %s6326_s13 = inlined_call_operand.hbm [shape: f32[2,64,128], index: 13, kind: output, shape index: {}]  }
   0x1   :  { %6331 = sst [smem:[#allocation22_spill]] %s6314_s1 }
   0x2   :  { %6332 = sst [smem:[#allocation23_spill]] %s6316_s3 }
   0x3   :  { %6333 = sst [smem:[#allocation24_spill]] %s6320_s7 }
   0x4   :  { %6334 = sst [smem:[#allocation25_spill]] %s6321_s8 }
   0x5   :  { %6335 = sst [smem:[#allocation26_spill]] %s6323_s10 }
   0x6   :  { %6336 = sst [smem:[#allocation27_spill]] %s6325_s12 }
   0x7   :  { %6337 = sst [smem:[#allocation28_spill]] %s6326_s13 }
   0x8   :  { %18 = vsyncpa [#allocation5], 0 }
   0x9   :  { %20 = vsyncpa [#allocation5 + $0x1], 0 }
   0xa   :  { %21 = vsyncpa [#allocation8], 0 }
   0xb   :  { %22 = vsyncpa [#allocation11], 0 }
   0xc   :  { %23 = vsyncpa [#allocation14], 0 }
   0xd   :  { %24 = vsyncpa [#allocation6], 0 }
   0xe   :  { %26 = vsyncpa [#allocation6 + $0x1], 0  ;;  %s5030_s25 = smov 0   ;;  %s5032_s26 = smov 0  }
   0xf   :  { %s5034_s27 = smov 0   ;;  %s5036_s28 = smov 0  }
  0x10 LB: > { %s4938_s29 = smov [#allocation7]   ;;  %s5051_s14 = sadd.s32 4294967295, %s4936_s28   ;;  %s4936_s28 = sphi %s5036_s28, %s6369_s28   ;;  %s4932_s27 = sphi %s5034_s27, %s6368_s27   ;;  %s4928_s26 = sphi %s5032_s26, %s6367_s26   ;;  %s4924_s25 = sphi %s5030_s25, %s6366_s25  }
  0x11   : > { %s354_s30 = sshll.u32 %s4938_s29, 4  ;;  %p3666_p0 = scmp.ge.s32.totalorder %s4936_s28, 1  ;;  %s5056_s30 = int_to_ptr.vmem [resolvable:$true] %s354_s30 }
  0x12   : > { %p6328_p1 = scmp.eq.s32.totalorder %s5051_s14, 0  ;;  %p341_p2 = scmp.lt.s32.totalorder %s4936_s28, 3 }
  0x13   : > { %s4939_s16 = smov [#allocation10]   ;;  %s4940_s19 = smov [#allocation13]  }
  0x14   : > { %p5058_p3 = pnand %p3666_p0, %p341_p2  ;;  %s375_s17 = sshll.u32 %s4939_s16, 4  ;;  %s5065_s17 = int_to_ptr.vmem [resolvable:$true] %s375_s17 }
  0x15   : > { %s413_s20 = sshll.u32 %s4940_s19, 4  ;;  %s6340_s1 = sld [smem:[#allocation22_spill]]  ;;  %s5073_s20 = int_to_ptr.vmem [resolvable:$true] %s413_s20 }
  0x16   : > { %s6338_s15 = scalar_select %p5058_p3, 1, 0 }
  0x17   : > { %p4215_p5 = pneg %p5058_p3 }
  0x19   : > { %p5069_p6 = pnand %p4215_p5, %p6328_p1 }
  0x1b   : > { %s4660_s23 = scalar_lea.hbm %s6340_s1, 16  ;;  %p5083_p8 = pneg %p5069_p6 }
  0x1c   : > { %p4661_p7 = scmp.ne.s32.totalorder %s6340_s1, %s4660_s23  ;;  %p4667_p11 = scmp.lt.u32.totalorder %s4660_s23, %s6340_s1 }
  0x1e   : > { %p4663_p9 = pnand %p5083_p8, %p4661_p7 }
  0x20   : > { %p4664_p10 = pneg %p4663_p9 }
  0x22   : > { %p4669_p12 = pnand %p4667_p11, %p4664_p10 }
  0x24   : > { %4672 = shalt.err (!%p4669_p12)
}
  0x25   : > { %s4673_s21 = scalar_lea.vmem %s5056_s30, 16  ;;  %s4680_s22 = scalar_lea.vmem %s5056_s30, 32 }
  0x26   : > { %p4674_p13 = scmp.ne.s32.totalorder %s5056_s30, %s4673_s21  ;;  %p4681_p5 = scmp.lt.s32.totalorder %s5056_s30, %s5056_s30 }
  0x27   : > { %p4682_p7 = scmp.lt.s32.totalorder %s4680_s22, %s4673_s21 }
  0x28   : > { %p4676_p0 = pnand %p4674_p13, %p5083_p8 }
  0x29   : > { %p4683_p9 = por %p4682_p7, %p4681_p5 }
  0x2a   : > { %p4677_p2 = pneg %p4676_p0 }
  0x2c   : > { %p4684_p4 = pnand %p4683_p9, %p4677_p2 }
  0x2e   : > { %4687 = shalt.err (!%p4684_p4)
}
  0x2f   : > { %4218 = dma.hbm_to_vmem [thread:$0]  (!%p5069_p6), %s6340_s1, 16, %s5056_s30, [#allocation8]  }
  0x30   : > { %s6342_s3 = sld [smem:[#allocation23_spill]] }
  0x36   : > { %s4688_s19 = scalar_lea.hbm %s6342_s3, 3072 }
  0x37   : > { %p4689_p10 = scmp.ne.s32.totalorder %s6342_s3, %s4688_s19  ;;  %p4695_p4 = scmp.lt.u32.totalorder %s4688_s19, %s6342_s3 }
  0x39   : > { %p4691_p11 = pnand %p4689_p10, %p5083_p8 }
  0x3b   : > { %p4692_p12 = pneg %p4691_p11 }
  0x3d   : > { %p4697_p13 = pnand %p4695_p4, %p4692_p12 }
  0x3f   : > { %4700 = shalt.err (!%p4697_p13)
}
  0x40   : > { %s4701_s30 = scalar_lea.vmem %s5065_s17, 3072  ;;  %p4709_p7 = scmp.lt.s32.totalorder %s5065_s17, %s5065_s17 }
  0x41   : > { %p4702_p0 = scmp.ne.s32.totalorder %s5065_s17, %s4701_s30  ;;  %p4710_p9 = scmp.lt.s32.totalorder %s4701_s30, %s4701_s30 }
  0x43   : > { %p4704_p2 = pnand %p4702_p0, %p5083_p8  ;;  %p4711_p10 = por %p4710_p9, %p4709_p7 }
  0x45   : > { %p4705_p5 = pneg %p4704_p2 }
  0x47   : > { %p4712_p11 = pnand %p4711_p10, %p4705_p5 }
  0x49   : > { %4715 = shalt.err (!%p4712_p11)
}
  0x4a   : > { %s4941_s10 = smov 192   ;;  %s4942_s12 = smov 12  }
  0x4b   : > { %4224 = dma.hbm_to_vmem [thread:$0]  (!%p5069_p6), %s6342_s3, 3072, %s5065_s17, [#allocation11], %s4941_s10, %s4941_s10, %s4942_s12  }
  0x4c   : > { %s4716_s19 = scalar_lea.hbm %s6322_s9, 4096 }
  0x4d   : > { %p4717_p12 = scmp.ne.s32.totalorder %s6322_s9, %s4716_s19  ;;  %p4723_p0 = scmp.lt.u32.totalorder %s4716_s19, %s6322_s9 }
  0x4f   : > { %p4719_p4 = pnand %p4717_p12, %p5083_p8 }
  0x51   : > { %p4720_p13 = pneg %p4719_p4 }
  0x53   : > { %p4725_p2 = pnand %p4723_p0, %p4720_p13 }
  0x55   : > { %4728 = shalt.err (!%p4725_p2)
}
  0x56   : > { %s4729_s17 = scalar_lea.vmem %s5073_s20, 4096  ;;  %p4737_p10 = scmp.lt.s32.totalorder %s5073_s20, %s5073_s20 }
  0x57   : > { %p4730_p5 = scmp.ne.s32.totalorder %s5073_s20, %s4729_s17  ;;  %p4738_p11 = scmp.lt.s32.totalorder %s4729_s17, %s4729_s17 }
  0x59   : > { %p4732_p7 = pnand %p4730_p5, %p5083_p8  ;;  %p4739_p12 = por %p4738_p11, %p4737_p10 }
  0x5b   : > { %p4733_p9 = pneg %p4732_p7 }
  0x5d   : > { %p4740_p4 = pnand %p4739_p12, %p4733_p9 }
  0x5f   : > { %4743 = shalt.err (!%p4740_p4)
}
  0x60   : > { %s4943_s10 = smov 256   ;;  %s4944_s1 = smov 16  }
  0x61   : > { %4230 = dma.hbm_to_vmem [thread:$0]  (!%p5069_p6), %s6322_s9, 4096, %s5073_s20, [#allocation14], %s4943_s10, %s4943_s10, %s4944_s1  }
  0x62   : > { %s4945_s23 = smov [#allocation9]   ;;  %s4946_s29 = smov [#allocation12]  }
  0x63   : > { %s365_s24 = sshll.u32 %s4945_s23, 4  ;;  %s391_s19 = sshll.u32 %s4946_s29, 4  ;;  %s366_s24 = int_to_ptr.vmem [resolvable:$true] %s365_s24  ;;  %s392_s19 = int_to_ptr.vmem [resolvable:$true] %s391_s19 }
  0x64   : > { %s4744_s30 = scalar_lea.hbm %s6315_s2, 16 }
  0x65   : > { %p4745_p13 = scmp.ne.s32.totalorder %s6315_s2, %s4744_s30  ;;  %p4751_p5 = scmp.lt.u32.totalorder %s4744_s30, %s6315_s2 }
  0x67   : > { %p4747_p0 = pnand %p4745_p13, %p5083_p8 }
  0x69   : > { %p4748_p2 = pneg %p4747_p0 }
  0x6b   : > { %p4753_p7 = pnand %p4751_p5, %p4748_p2 }
  0x6d   : > { %4756 = shalt.err (!%p4753_p7)
}
  0x6e   : > { %s4757_s20 = scalar_lea.vmem %s366_s24, 16  ;;  %s4764_s10 = scalar_lea.vmem %s366_s24, 32 }
  0x6f   : > { %p4758_p9 = scmp.ne.s32.totalorder %s366_s24, %s4757_s20  ;;  %p4765_p12 = scmp.lt.s32.totalorder %s366_s24, %s366_s24 }
  0x70   : > { %p4766_p4 = scmp.lt.s32.totalorder %s4764_s10, %s4757_s20 }
  0x71   : > { %p4760_p10 = pnand %p4758_p9, %p5083_p8 }
  0x72   : > { %p4767_p1 = por %p4766_p4, %p4765_p12 }
  0x73   : > { %p4761_p11 = pneg %p4760_p10 }
  0x75   : > { %p4768_p3 = pnand %p4767_p1, %p4761_p11 }
  0x77   : > { %4771 = shalt.err (!%p4768_p3)
}
  0x78   : > { %4221 = dma.hbm_to_vmem [thread:$0]  (!%p5069_p6), %s6315_s2, 16, %s366_s24, [#allocation8]  }
  0x79   : > { %s4772_s12 = scalar_lea.hbm %s6318_s5, 1024 }
  0x7a   : > { %p4773_p13 = scmp.ne.s32.totalorder %s6318_s5, %s4772_s12  ;;  %p4779_p3 = scmp.lt.u32.totalorder %s4772_s12, %s6318_s5 }
  0x7c   : > { %p4775_p0 = pnand %p4773_p13, %p5083_p8 }
  0x7e   : > { %p4776_p1 = pneg %p4775_p0 }
  0x80   : > { %p4781_p2 = pnand %p4779_p3, %p4776_p1 }
  0x82   : > { %4784 = shalt.err (!%p4781_p2)
}
  0x83   : > { %s4785_s22 = scalar_lea.vmem %s392_s19, 1024  ;;  %p4793_p10 = scmp.lt.s32.totalorder %s392_s19, %s392_s19 }
  0x84   : > { %p4786_p5 = scmp.ne.s32.totalorder %s392_s19, %s4785_s22  ;;  %p4794_p11 = scmp.lt.s32.totalorder %s4785_s22, %s4785_s22 }
  0x86   : > { %p4788_p7 = pnand %p4786_p5, %p5083_p8  ;;  %p4795_p12 = por %p4794_p11, %p4793_p10 }
  0x88   : > { %p4789_p9 = pneg %p4788_p7 }
  0x8a   : > { %p4796_p4 = pnand %p4795_p12, %p4789_p9 }
  0x8c   : > { %4799 = shalt.err (!%p4796_p4)
}
  0x8d   : > { %s4947_s24 = smov 64   ;;  %s4948_s30 = smov 4  }
  0x8e   : > { %4227 = dma.hbm_to_vmem [thread:$0]  (!%p5069_p6), %s6318_s5, 1024, %s392_s19, [#allocation11], %s4947_s24, %s4947_s24, %s4948_s30  }
  0x8f   : > { %s4949_s10 = smov [#allocation15]   ;;  %s4800_s8 = scalar_lea.hbm %s6324_s11, 4096 }
  0x90   : > { %s429_s3 = sshll.u32 %s4949_s10, 4  ;;  %p4801_p13 = scmp.ne.s32.totalorder %s6324_s11, %s4800_s8  ;;  %s430_s3 = int_to_ptr.vmem [resolvable:$true] %s429_s3 }
  0x91   : > { %p4807_p3 = scmp.lt.u32.totalorder %s4800_s8, %s6324_s11 }
  0x92   : > { %p4803_p0 = pnand %p4801_p13, %p5083_p8 }
  0x94   : > { %p4804_p1 = pneg %p4803_p0 }
  0x96   : > { %p4809_p2 = pnand %p4807_p3, %p4804_p1 }
  0x98   : > { %4812 = shalt.err (!%p4809_p2)
}
  0x99   : > { %s4813_s19 = scalar_lea.vmem %s430_s3, 4096  ;;  %p4821_p10 = scmp.lt.s32.totalorder %s430_s3, %s430_s3 }
  0x9a   : > { %p4814_p5 = scmp.ne.s32.totalorder %s430_s3, %s4813_s19  ;;  %p4822_p11 = scmp.lt.s32.totalorder %s4813_s19, %s4813_s19 }
  0x9c   : > { %p4816_p7 = pnand %p4814_p5, %p5083_p8  ;;  %p4823_p12 = por %p4822_p11, %p4821_p10 }
  0x9e   : > { %p4817_p9 = pneg %p4816_p7 }
  0xa0   : > { %p4824_p4 = pnand %p4823_p12, %p4817_p9 }
  0xa2   : > { %4827 = shalt.err (!%p4824_p4)
}
  0xa3   : > { %4233 = dma.hbm_to_vmem [thread:$0]  (!%p5069_p6), %s6324_s11, 4096, %s430_s3, [#allocation14], %s4947_s24, %s4947_s24, %s4948_s30  }
  0xa4   : > { %s3665_s16 = sadd.s32 4294967294, %s4936_s28   ;;  %s5207_s18 = sadd.s32 1, %s4936_s28  }
  0xa5   : > { %s36_s17 = ssub.s32 %s4936_s28, %s5207_s18  ;;  %s39_s20 = sadd.s32 1, %s4932_s27 }
  0xa6   : > { %p37_p8 = scmp.eq.s32.totalorder %s36_s17, 0  ;;  %p46_p13 = scmp.ne.s32.totalorder %s4932_s27, %s4928_s26 }
  0xa7   : > { %p47_p0 = scmp.eq.s32.totalorder %s4936_s28, 0  ;;  %p52_p1 = scmp.ne.s32.totalorder %s4928_s26, %s4924_s25 }
  0xa8   : > { %s5218_s10 = scalar_select %p37_p8, %s4932_s27, %s39_s20  }
  0xa9   : > { %p5220_p3 = por %p47_p0, %p46_p13  ;;  %p6344_p2 = scmp.eq.s32.totalorder %s5051_s14, 0 }
  0xaa   : > { %p328_p5 = scmp.eq.s32.totalorder %s5051_s14, 1  ;;  %p334_p7 = scmp.eq.s32.totalorder %s3665_s16, 1 }
  0xab   : > { %p5226_p6 = por %p6344_p2, %p52_p1  ;;  %p4248_p9 = scmp.lt.s32.totalorder %s4936_s28, 2 }
  0xac   : > { %s446_s30 = sand.u32 1, %s4932_s27   ;;  %p5233_p10 = por %p328_p5, %p46_p13 }
  0xad   : > { %p5237_p11 = por %p334_p7, %p52_p1  ;;  %s3674_s8 = sshll.u32 %s446_s30, 6 }
  0xae   : > { %s6346_s3 = scalar_select %p5233_p10, 1, 0 }
  0xaf   : > { %s6347_s7 = scalar_select %p5237_p11, 1, 0 }
  0xb0   : > { %s3825_s12 = sshll.u32 %s4936_s28, 10  ;;  %s450_s19 = scalar_lea.vmem [#allocation4], %s3674_s8 }
  0xb1   : > { %s5245_s29 = scalar_lea.hbm %s6313_s0, %s3825_s12  ;;  %s457_s21 = sshll.u32 %s450_s19, 4  ;;  %s5247_s21 = int_to_ptr.vmem [resolvable:$true] %s457_s21 }
  0xb2   : > { %p5251_p12 = pnand %p4248_p9, %p5220_p3  ;;  %s5255_s16 = scalar_lea.sflag [#allocation5], %s446_s30 }
  0xb3   : > { %s4828_s17 = scalar_lea.hbm %s5245_s29, 1024  ;;  %s4833_s1 = scalar_lea.hbm %s6313_s0, 2048 }
  0xb4   : > { %p4829_p4 = scmp.ne.s32.totalorder %s5245_s29, %s4828_s17  ;;  %p4830_p8 = pneg %p5251_p12 }
  0xb5   : > { %p4834_p1 = scmp.lt.u32.totalorder %s5245_s29, %s6313_s0  ;;  %p4835_p3 = scmp.lt.u32.totalorder %s4833_s1, %s4828_s17 }
  0xb6   : > { %p4831_p13 = pnand %p4830_p8, %p4829_p4  ;;  %p4837_p5 = scmp.lt.u32.totalorder %s4828_s17, %s5245_s29 }
  0xb7   : > { %p4836_p2 = por %p4835_p3, %p4834_p1 }
  0xb8   : > { %p4832_p0 = pneg %p4831_p13 }
  0xb9   : > { %p4838_p7 = por %p4837_p5, %p4836_p2 }
  0xbb   : > { %p4839_p9 = pnand %p4838_p7, %p4832_p0 }
  0xbd   : > { %4842 = shalt.err (!%p4839_p9)
}
  0xbe   : > { %s4843_s30 = scalar_lea.vmem %s5247_s21, 1024  ;;  %s4950_s23 = smov [#allocation4]  }
  0xbf   : > { %p4844_p4 = scmp.ne.s32.totalorder %s5247_s21, %s4843_s30  ;;  %s4848_s19 = sshll.u32 %s4950_s23, 4  ;;  %s4849_s19 = int_to_ptr.vmem [resolvable:$false] %s4848_s19 }
  0xc0   : > { %s4850_s20 = scalar_lea.vmem %s4849_s19, 2048  ;;  %p4851_p10 = scmp.lt.s32.totalorder %s5247_s21, %s4849_s19 }
  0xc1   : > { %p4846_p13 = pnand %p4844_p4, %p4830_p8  ;;  %p4852_p1 = scmp.lt.s32.totalorder %s4850_s20, %s4843_s30 }
  0xc3   : > { %p4847_p11 = pneg %p4846_p13  ;;  %p4853_p3 = por %p4852_p1, %p4851_p10 }
  0xc5   : > { %p4854_p2 = pnand %p4853_p3, %p4847_p11 }
  0xc7   : > { %4857 = shalt.err (!%p4854_p2)
}
  0xc8   : > { %s4951_s17 = smov 128   ;;  %s4952_s8 = smov 8  }
  0xc9   : > { %4237 = dma.hbm_to_vmem [thread:$0]  (!%p5251_p12), %s5245_s29, 1024, %s5247_s21, %s5255_s16, %s4951_s17, %s4951_s17, %s4952_s8  }
  0xca   : > { %p6349_p8 = scmp.ne.s32.totalorder %s6338_s15, 0 }
  0xcb   : > { %s5286_s1 = sand.u32 (!%p6349_p8), 1, %s4928_s26  }
  0xcc   : > { %469 = sbr.rel (%p6349_p8) target bundleno = 4151 (0x1037), region = 72  ;;  %s3678_s12 = sshll.u32 (!%p6349_p8), %s5286_s1, 6 }
  0xcd   : > { %s472_s13 = scalar_lea.sflag (!%p6349_p8), [#allocation5], %s5286_s1  ;;  %s5292_s30 = scalar_lea.vmem (!%p6349_p8), [#allocation4], %s3678_s12 }
  0xd3   : > { %4903 = dma.done.wait (%p5226_p6), %s472_s13, 1024  }
  0xd4   : > { %4905 = vsyncadd (%p5226_p6), %s472_s13, 4294966272  ;;  %p6350_p10 = scmp.eq.s32.totalorder %s5051_s14, 0 }
  0xd6   : > { %4907 = dma.done.wait (%p6350_p10), [#allocation8], 32   ;;  %p6351_p11 = pmov %p6350_p10 }
  0xd7   : > { %p6352_p12 = pmov %p6350_p10 }
  0xd8   : > { %4909 = vsyncadd (%p6351_p11), [#allocation8], 4294967264 }
  0xd9   : > { %4911 = dma.done.wait (%p6352_p12), [#allocation11], 4096   ;;  %p6353_p0 = pmov %p6350_p10 }
  0xdb   : > { %4913 = vsyncadd (%p6353_p0), [#allocation11], 4294963200  ;;  %p6354_p5 = pmov %p6353_p0 }
  0xdc   : > { %p6355_p7 = pmov %p6353_p0 }
  0xdd   : > { %4915 = dma.done.wait (%p6354_p5), [#allocation14], 8192  }
  0xde   : > { %4917 = vsyncadd (%p6355_p7), [#allocation14], 4294959104  ;;  %v543_v0 = vld [vmem:[%s5292_s30] sm:$0xff]  ;;  %v545_v1 = vld [vmem:[%s5292_s30 + $0x10] sm:$0xff]  ;;  %v4953_v63 = vmov 0   ;;  %vm1025_vm0 = vcmask 261120  }
  0xdf   : > { %553 = vadd.xlane.f32.xlu0 %v543_v0  ;;  %557 = vadd.xlane.f32.xlu1 %v545_v1  ;;  %v544_v2 = vld [vmem:[%s5292_s30 + $0x8] sm:$0xff]  ;;  %v546_v3 = vld [vmem:[%s5292_s30 + $0x18] sm:$0xff]  ;;  %v547_v4 = vld [vmem:[%s5292_s30 + $0x20] sm:$0xff]  ;;  %vm1115_vm1 = vcmask 523264   ;;  %s4954_s29 = smov 96   ;;  %s4955_s21 = smov 64  }
  0xe0   : > { %v548_v5 = vld [vmem:[%s5292_s30 + $0x28] sm:$0xff]  ;;  %v549_v6 = vld [vmem:[%s5292_s30 + $0x30] sm:$0xff]  ;;  %v550_v7 = vld [vmem:[%s5292_s30 + $0x38] sm:$0xff]  ;;  %883 = vmatprep.mubr.bf16.mxu0 %v4953_v63  ;;  %s4956_s22 = smov 32   ;;  %vm1623_vm2 = vcmask 523520   ;;  %vm1958_vm3 = vcmask 785920  }
  0xe1   : > { %v4308_v8 = vld [vmem:[#allocation10 + $0x4] ss:$12 sps:$4 sm:$0xff]   ;;  %v4310_v9 = vld [vmem:[#allocation10] ss:$12 sps:$4 sm:$0xff]   ;;  %v4311_v10 = vld [vmem:[#allocation10 + $0x1c] ss:$12 sps:$4 sm:$0xff]  }
  0xe2   : > { %v4313_v11 = vld [vmem:[#allocation10 + $0x8] ss:$12 sps:$4 sm:$0xff]   ;;  %851 = vmatprep.subr.bf16.mxu0 %v4308_v8  ;;  %v4314_v44 = vld [vmem:[#allocation10 + $0x18] ss:$12 sps:$4 sm:$0xff]   ;;  %v4317_v46 = vld [vmem:[#allocation10 + $0x20] ss:$12 sps:$4 sm:$0xff]  }
  0xe3   : > { %555 = vadd.xlane.f32.xlu0 %v544_v2  ;;  %559 = vadd.xlane.f32.xlu1 %v546_v3  ;;  %v4315_v45 = vld [vmem:[#allocation10 + $0x34] ss:$12 sps:$4 sm:$0xff]   ;;  %v4318_v47 = vld [vmem:[#allocation10 + $0x30] ss:$12 sps:$4 sm:$0xff]   ;;  %v4319_v48 = vld [vmem:[#allocation10 + $0x4c] ss:$12 sps:$4 sm:$0xff]  }
  0xe4   : > { %852 = vmatpush1.bf16.msra.mxu0 %v4310_v9  ;;  %3995 = vmatprep.subr.bf16.mxu1 %v4313_v11  ;;  %v4321_v49 = vld [vmem:[#allocation10 + $0x38] ss:$12 sps:$4 sm:$0xff]   ;;  %v4322_v50 = vld [vmem:[#allocation10 + $0x48] ss:$12 sps:$4 sm:$0xff]   ;;  %v4325_v52 = vld [vmem:[#allocation10 + $0x50] ss:$12 sps:$4 sm:$0xff]  }
  0xe5   : > { %853 = vmatprep.subr.bf16.mxu0 %v4311_v10  ;;  %3996 = vmatpush3.bf16.msra.mxu1 %v4313_v11  ;;  %v4323_v51 = vld [vmem:[#allocation10 + $0x64] ss:$12 sps:$4 sm:$0xff]   ;;  %v4326_v53 = vld [vmem:[#allocation10 + $0x60] ss:$12 sps:$4 sm:$0xff]   ;;  %v4327_v54 = vld [vmem:[#allocation10 + $0x7c] ss:$12 sps:$4 sm:$0xff]  }
  0xe6   : > { %3997 = vmatprep.subr.bf16.mxu1 %v4317_v46  ;;  %v4329_v55 = vld [vmem:[#allocation10 + $0x68] ss:$12 sps:$4 sm:$0xff]   ;;  %v4330_v56 = vld [vmem:[#allocation10 + $0x78] ss:$12 sps:$4 sm:$0xff]   ;;  %v4333_v58 = vld [vmem:[#allocation10 + $0x80] ss:$12 sps:$4 sm:$0xff]  }
  0xe7   : > { %561 = vadd.xlane.f32.xlu0 %v547_v4  ;;  %563 = vadd.xlane.f32.xlu1 %v548_v5  ;;  %v4331_v57 = vld [vmem:[#allocation10 + $0x94] ss:$12 sps:$4 sm:$0xff]   ;;  %v4334_v59 = vld [vmem:[#allocation10 + $0x90] ss:$12 sps:$4 sm:$0xff]   ;;  %v4335_v60 = vld [vmem:[#allocation10 + $0xac] ss:$12 sps:$4 sm:$0xff]  }
  0xe8   : > { %854 = vmatpush1.bf16.msra.mxu0 %v4314_v44  ;;  %v4337_v61 = vld [vmem:[#allocation10 + $0x98] ss:$12 sps:$4 sm:$0xff]   ;;  %v4338_v62 = vld [vmem:[#allocation10 + $0xa8] ss:$12 sps:$4 sm:$0xff]   ;;  %vm2293_vm4 = vcmask 1048320   ;;  %s6356_s17 = sld [smem:[#allocation24_spill]] }
  0xe9   : > { %855 = vmatprep.subr.bf16.mxu0 %v4315_v45  ;;  %3998 = vmatpush3.bf16.msra.mxu1 %v4317_v46  ;;  %s6361_s16 = sld [smem:[#allocation27_spill]]  ;;  %s6239_s23 = scalar_lea.vmem [#allocation16], %s3678_s12 }
  0xea   : > { %3999 = vmatprep.subr.bf16.mxu1 %v4321_v49  ;;  %s3826_s12 = sshll.u32 %s5051_s14, 10  ;;  %s3535_s19 = sshll.u32 %s6239_s23, 4  ;;  %s6266_s19 = int_to_ptr.vmem [resolvable:$true] %s3535_s19 }
  0xeb   : > { %565 = vadd.xlane.f32.xlu0 %v549_v6  ;;  %567 = vadd.xlane.f32.xlu1 %v550_v7  ;;  %s6362_s8 = sld [smem:[#allocation28_spill]]  ;;  %s4858_s14 = scalar_lea.vmem %s6266_s19, 1024 }
  0xec   : > { %856 = vmatpush1.bf16.msra.mxu0 %v4318_v47  ;;  %p4859_p6 = scmp.ne.s32.totalorder %s6266_s19, %s4858_s14  ;;  %p6363_p9 = scmp.ne.s32.totalorder %s6346_s3, 0 }
  0xed   : > { %857 = vmatprep.subr.bf16.mxu0 %v4319_v48  ;;  %4000 = vmatpush3.bf16.msra.mxu1 %v4321_v49  ;;  %s4957_s15 = smov [#allocation16]  }
  0xee   : > { %4001 = vmatprep.subr.bf16.mxu1 %v4325_v52  ;;  %p4860_p4 = pnand %p4859_p6, %p6363_p9  ;;  %s4862_s24 = sshll.u32 %s4957_s15, 4  ;;  %s4863_s24 = int_to_ptr.vmem [resolvable:$false] %s4862_s24 }
  0xef   : > { %p4865_p1 = scmp.lt.s32.totalorder %s6266_s19, %s4863_s24 }
  0xf0   : > { %858 = vmatpush1.bf16.msra.mxu0 %v4322_v50  ;;  %p4861_p13 = pneg %p4860_p4 }
  0xf1   : > { %859 = vmatprep.subr.bf16.mxu0 %v4323_v51  ;;  %4002 = vmatpush3.bf16.msra.mxu1 %v4325_v52  ;;  %s6264_s13 = scalar_lea.hbm %s6362_s8, %s3826_s12 }
  0xf2   : > { %4003 = vmatprep.subr.bf16.mxu1 %v4329_v55 }
  0xf4   : > { %860 = vmatpush1.bf16.msra.mxu0 %v4326_v53 }
  0xf5   : > { %861 = vmatprep.subr.bf16.mxu0 %v4327_v54  ;;  %4004 = vmatpush3.bf16.msra.mxu1 %v4329_v55 }
  0xf6   : > { %4005 = vmatprep.subr.bf16.mxu1 %v4333_v58 }
  0xf8   : > { %862 = vmatpush1.bf16.msra.mxu0 %v4330_v56 }
  0xf9   : > { %863 = vmatprep.subr.bf16.mxu0 %v4331_v57  ;;  %4006 = vmatpush3.bf16.msra.mxu1 %v4333_v58 }
  0xfa   : > { %4007 = vmatprep.subr.bf16.mxu1 %v4337_v61 }
  0xfc   : > { %864 = vmatpush1.bf16.msra.mxu0 %v4334_v59 }
  0xfd   : > { %865 = vmatprep.subr.bf16.mxu0 %v4335_v60  ;;  %4008 = vmatpush3.bf16.msra.mxu1 %v4337_v61 }
 0x100   : > { %866 = vmatpush1.bf16.msra.mxu0 %v4338_v62 }
 0x16c   : > { %v554_v12 = vpop.xlane.xlu0 %553  ;;  %v558_v13 = vpop.xlane.xlu1 %557 }
 0x16d   : > { %v570_v14 = vmul.f32 0.0078125, %v554_v12  ;;  %v572_v15 = vmul.f32 0.0078125, %v558_v13 }
 0x16f   : > { %v5318_v16 = vsub.f32 %v543_v0, %v570_v14  ;;  %v5320_v17 = vsub.f32 %v545_v1, %v572_v15  ;;  %v4339_v0 = vld [vmem:[#allocation10 + $0xb0] ss:$12 sps:$4 sm:$0xff]  }
 0x170   : > { %v556_v18 = vpop.xlane.xlu0 %555  ;;  %v560_v19 = vpop.xlane.xlu1 %559  ;;  %4009 = vmatprep.subr.bf16.mxu1 %v4339_v0 }
 0x171   : > { %v571_v20 = vmul.f32 0.0078125, %v556_v18  ;;  %v586_v21 = vmul.f32 %v5318_v16, %v5318_v16  ;;  %v573_v22 = vmul.f32 0.0078125, %v560_v19  ;;  %v588_v23 = vmul.f32 %v5320_v17, %v5320_v17  ;;  %4010 = vmatpush3.bf16.msra.mxu1 %v4339_v0 }
 0x173   : > { %594 = vadd.xlane.f32.xlu0 %v586_v21  ;;  %v5326_v24 = vsub.f32 %v544_v2, %v571_v20  ;;  %v5328_v25 = vsub.f32 %v546_v3, %v573_v22 }
 0x174   : > { %v562_v26 = vpop.xlane.xlu0 %561  ;;  %v564_v27 = vpop.xlane.xlu1 %563 }
 0x175   : > { %v574_v28 = vmul.f32 0.0078125, %v562_v26  ;;  %v587_v29 = vmul.f32 %v5326_v24, %v5326_v24  ;;  %v575_v30 = vmul.f32 0.0078125, %v564_v27  ;;  %v589_v31 = vmul.f32 %v5328_v25, %v5328_v25 }
 0x177   : > { %598 = vadd.xlane.f32.xlu0 %v588_v23  ;;  %596 = vadd.xlane.f32.xlu1 %v587_v29  ;;  %v5334_v32 = vsub.f32 %v547_v4, %v574_v28  ;;  %v5336_v33 = vsub.f32 %v548_v5, %v575_v30  ;;  %v3686_v30 = vld [vmem:[#allocation7] ss:$0 sm:$0xff] }
 0x178   : > { %v566_v34 = vpop.xlane.xlu0 %565  ;;  %v568_v35 = vpop.xlane.xlu1 %567 }
 0x179   : > { %v576_v36 = vmul.f32 0.0078125, %v566_v34  ;;  %v590_v37 = vmul.f32 %v5334_v32, %v5334_v32  ;;  %v577_v38 = vmul.f32 0.0078125, %v568_v35  ;;  %v591_v39 = vmul.f32 %v5336_v33, %v5336_v33 }
 0x17b   : > { %600 = vadd.xlane.f32.xlu1 %v589_v31  ;;  %602 = vadd.xlane.f32.xlu0 %v590_v37  ;;  %v5342_v40 = vsub.f32 %v549_v6, %v576_v36  ;;  %v5344_v41 = vsub.f32 %v550_v7, %v577_v38  ;;  %v3687_v38 = vld [vmem:[#allocation9] ss:$0 sm:$0xff] }
 0x17d   : > { %v592_v42 = vmul.f32 %v5342_v40, %v5342_v40  ;;  %v593_v43 = vmul.f32 %v5344_v41, %v5344_v41 }
 0x17f   : > { %604 = vadd.xlane.f32.xlu1 %v591_v39  ;;  %606 = vadd.xlane.f32.xlu0 %v592_v42 }
 0x183   : > { %608 = vadd.xlane.f32.xlu1 %v593_v43 }
 0x200   : > { %v595_v1 = vpop.xlane.xlu0 %594 }
 0x201   : > { %v610_v2 = vmul.f32 0.0078125, %v595_v1 }
 0x203   : > { %v618_v3 = vadd.f32 1e-05, %v610_v2 }
 0x204   : > { %v597_v4 = vpop.xlane.xlu1 %596  ;;  %v599_v5 = vpop.xlane.xlu0 %598 }
 0x205   : > { %4428 = vrsqrt.f32 %v618_v3  ;;  %v611_v6 = vmul.f32 0.0078125, %v597_v4  ;;  %v612_v7 = vmul.f32 0.0078125, %v599_v5  ;;  %v706_v3 = vld [vmem:[%s6317_s4] sm:$0x7] }
 0x207   : > { %v619_v8 = vadd.f32 1e-05, %v611_v6  ;;  %v620_v9 = vadd.f32 1e-05, %v612_v7 }
 0x208   : > { %v601_v10 = vpop.xlane.xlu1 %600  ;;  %v603_v11 = vpop.xlane.xlu0 %602 }
 0x209   : > { %4430 = vrsqrt.f32 %v619_v8  ;;  %v613_v12 = vmul.f32 0.0078125, %v601_v10  ;;  %v614_v13 = vmul.f32 0.0078125, %v603_v11 }
 0x20a   : > { %4432 = vrsqrt.f32 %v620_v9 }
 0x20b   : > { %v621_v14 = vadd.f32 1e-05, %v613_v12  ;;  %v622_v15 = vadd.f32 1e-05, %v614_v13 }
 0x20c   : > { %v605_v18 = vpop.xlane.xlu1 %604  ;;  %v607_v19 = vpop.xlane.xlu0 %606 }
 0x20d   : > { %4434 = vrsqrt.f32 %v621_v14  ;;  %v615_v20 = vmul.f32 0.0078125, %v605_v18  ;;  %v616_v21 = vmul.f32 0.0078125, %v607_v19 }
 0x20e   : > { %4436 = vrsqrt.f32 %v622_v15 }
 0x20f   : > { %v4429_v22 = vpop.eup %4428  ;;  %v623_v23 = vadd.f32 1e-05, %v615_v20  ;;  %v624_v26 = vadd.f32 1e-05, %v616_v21 }
 0x210   : > { %v609_v27 = vpop.xlane.xlu1 %608  ;;  %v634_v28 = vmul.f32 %v4429_v22, %v5318_v16 }
 0x211   : > { %4438 = vrsqrt.f32 %v623_v23  ;;  %v617_v29 = vmul.f32 0.0078125, %v609_v27 }
 0x212   : > { %4440 = vrsqrt.f32 %v624_v26  ;;  %v648_v37 = vmul.f32 %v3686_v30, %v634_v28 }
 0x213   : > { %v4431_v31 = vpop.eup %4430  ;;  %v625_v34 = vadd.f32 1e-05, %v617_v29 }
 0x214   : > { %v4433_v35 = vpop.eup %4432  ;;  %v635_v36 = vmul.f32 %v4431_v31, %v5326_v24  ;;  %v662_v46 = vadd.f32 %v3687_v38, %v648_v37 }
 0x215   : > { %4442 = vrsqrt.f32 %v625_v34  ;;  %v636_v39 = vmul.f32 %v4433_v35, %v5320_v17 }
 0x216   : > { %v649_v42 = vmul.f32 %v3686_v30, %v635_v36 }
 0x217   : > { %v4435_v43 = vpop.eup %4434  ;;  %v650_v44 = vmul.f32 %v3686_v30, %v636_v39 }
 0x218   : > { %v4437_v45 = vpop.eup %4436  ;;  %v663_v16 = vadd.f32 %v3687_v38, %v649_v42  ;;  %v637_v47 = vmul.f32 %v4435_v43, %v5328_v25 }
 0x219   : > { %v638_v48 = vmul.f32 %v4437_v45, %v5334_v32  ;;  %v664_v52 = vadd.f32 %v3687_v38, %v650_v44 }
 0x21a   : > { %v670_v49 = vpack.c.bf16 %v663_v16, %v662_v46  ;;  %v651_v50 = vmul.f32 %v3686_v30, %v637_v47 }
 0x21b   : > { %v4439_v51 = vpop.eup %4438  ;;  %v652_v54 = vmul.f32 %v3686_v30, %v638_v48 }
 0x21c   : > { %v4441_v24 = vpop.eup %4440  ;;  %884 = vmatmul.mubr.bf16.vlgmr.msra.gmra.mrb[0].mxu0 %v670_v49  ;;  %4011 = vmatprep.mubr.bf16.mxu1 %v670_v49  ;;  %v665_v53 = vadd.f32 %v3687_v38, %v651_v50  ;;  %v639_v17 = vmul.f32 %v4439_v51, %v5336_v33 }
 0x21d   : > { %893 = vmatprep.mubr.bf16.mxu0 %v4953_v63  ;;  %v640_v55 = vmul.f32 %v4441_v24, %v5342_v40  ;;  %v666_v32 = vadd.f32 %v3687_v38, %v652_v54  ;;  %v708_v40 = vlaneseq }
 0x21e   : > { %v671_v56 = vpack.c.bf16 %v665_v53, %v664_v52  ;;  %v653_v57 = vmul.f32 %v3686_v30, %v639_v17 }
 0x21f   : > { %v4443_v25 = vpop.eup %4442  ;;  %v654_v60 = vmul.f32 %v3686_v30, %v640_v55  ;;  %v5362_v2 = vshrl.u32 %v708_v40, 7 }
 0x220   : > { %4012 = vmatmul.mubr.bf16.vlgmr.msra.gmra.mrb[0].mxu1 %v671_v56  ;;  %v667_v58 = vadd.f32 %v3687_v38, %v653_v57  ;;  %v641_v59 = vmul.f32 %v4443_v25, %v5344_v41 }
 0x221   : > { %v668_v0 = vadd.f32 %v3687_v38, %v654_v60  ;;  %v710_v41 = vsub.s32 0, %v5362_v2  ;;  %v714_v4 = vsub.s32 1, %v5362_v2  ;;  %v718_v6 = vsub.s32 2, %v5362_v2 }
 0x222   : > { %v672_v61 = vpack.c.bf16 %v667_v58, %v666_v32  ;;  %v655_v62 = vmul.f32 %v3686_v30, %v641_v59 }
 0x223   : > { %v5371_v5 = vrot.slane %v706_v3, %v710_v41  ;;  %v5376_v8 = vrot.slane %v706_v3, %v714_v4  ;;  %v719_v14 = vrot.slane %v706_v3, %v718_v6 }
 0x224   : > { %894 = vmatmul.mubr.bf16.gmra.mrb[4].mxu0 %v671_v56  ;;  %4015 = vmatprep.mubr.bf16.mxu1 %v672_v61  ;;  %v669_v33 = vadd.f32 %v3687_v38, %v655_v62 }
 0x225   : > { %903 = vmatprep.mubr.bf16.mxu0 %v4953_v63 }
 0x226   : > { %v673_v1 = vpack.c.bf16 %v669_v33, %v668_v0 }
 0x228   : > { %4016 = vmatmul.mubr.bf16.gmra.mrb[4].mxu1 %v673_v1 }
 0x22c   : > { %904 = vmatmul.mubr.bf16.gmra.mrb[8].mxu0 %v672_v61 }
 0x22d   : > { %913 = vmatprep.mubr.bf16.mxu0 %v4953_v63 }
 0x234   : > { %914 = vmatmul.mubr.bf16.gmra.mrb[12].mxu0 %v673_v1 }
 0x2ef   : > { %v885_v7 = vpop.f32.mrb[0].mxu0 }
 0x2f0   : > { %v887_v9 = vpop.f32.mrb[1].mxu0  ;;  %v886_v11 = vadd.f32 %v885_v7, %v5371_v5 }
 0x2f1   : > { %v889_v10 = vpop.f32.mrb[2].mxu0  ;;  %v888_v15 = vadd.f32 %v887_v9, %v5376_v8 }
 0x2f2   : > { %v890_v12 = vadd.f32 %v889_v10, %v5371_v5  ;;  %v891_v13 = vpop.f32.mrb[3].mxu0 }
 0x2f3   : > { %v892_v18 = vadd.f32 %v891_v13, %v5376_v8  ;;  %v4013_v19 = vpop.f32.mrb[0].mxu1 }
 0x2f4   : > { %v5384_v20 = vpack.c.bf16 %v890_v12, %v886_v11  ;;  %v958_v21 = vpop.f32.mrb[1].mxu1  ;;  %v967_v26 = vadd.f32 %v4013_v19, %v719_v14 }
 0x2f5   : > { %v5386_v22 = vpack.c.bf16 %v892_v18, %v888_v15  ;;  %v4014_v23 = vpop.f32.mrb[2].mxu1  ;;  %v959_v29 = vadd.f32 %v958_v21, %v719_v14 }
 0x2f6   : > { %v970_v27 = vadd.f32 %v4014_v23, %v719_v14  ;;  %v961_v28 = vpop.f32.mrb[3].mxu1  ;;  %4027 = vmatprep.mubr.msk.bf16.mxu0 %vm1025_vm0, %v5384_v20 }
 0x2f7   : > { %v962_v30 = vadd.f32 %v961_v28, %v719_v14  ;;  %v895_v31 = vpop.f32.mrb[4].mxu0  ;;  %4171 = vmatprep.subr.msk.bf16.mxu0 %vm1025_vm0, %v5386_v22  ;;  %v1039_v34 = vsel %vm1025_vm0, %v5386_v22, 0 }
 0x2f8   : > { %v5394_v35 = vpack.c.bf16 %v970_v27, %v967_v26  ;;  %v897_v36 = vpop.f32.mrb[5].mxu0  ;;  %4020 = vmatpush3.bf16.xpose.msra.mxu0 %v1039_v34  ;;  %v896_v39 = vadd.f32 %v895_v31, %v5371_v5 }
 0x2f9   : > { %v5396_v37 = vpack.c.bf16 %v962_v30, %v959_v29  ;;  %v899_v38 = vpop.f32.mrb[6].mxu0  ;;  %v898_v44 = vadd.f32 %v897_v36, %v5376_v8 }
 0x2fa   : > { %v900_v42 = vadd.f32 %v899_v38, %v5371_v5  ;;  %v901_v43 = vpop.f32.mrb[7].mxu0 }
 0x2fb   : > { %v902_v45 = vadd.f32 %v901_v43, %v5376_v8  ;;  %v4017_v46 = vpop.f32.mrb[4].mxu1  ;;  %4035 = vmatprep.subr.bf16.mxu1 %v5396_v37 }
 0x2fc   : > { %v5403_v16 = vpack.c.bf16 %v900_v42, %v896_v39  ;;  %v974_v47 = vpop.f32.mrb[5].mxu1  ;;  %4036 = vmatpush3.bf16.msra.mxu1 %v5396_v37  ;;  %v983_v50 = vadd.f32 %v4017_v46, %v719_v14 }
 0x2fd   : > { %v5406_v48 = vpack.c.bf16 %v902_v45, %v898_v44  ;;  %v4018_v49 = vpop.f32.mrb[6].mxu1  ;;  %4037 = vmatprep.subr.bf16.mxu1 %v5394_v35  ;;  %v975_v24 = vadd.f32 %v974_v47, %v719_v14 }
 0x2fe   : > { %v986_v51 = vadd.f32 %v4018_v49, %v719_v14  ;;  %v977_v52 = vpop.f32.mrb[7].mxu1 }
 0x2ff   : > { %v978_v53 = vadd.f32 %v977_v52, %v719_v14  ;;  %v905_v17 = vpop.f32.mrb[8].mxu0  ;;  %4172 = vmatprep.subr.msk.bf16.mxu0 %vm1025_vm0, %v5406_v48  ;;  %v1042_v54 = vsel %vm1025_vm0, %v5406_v48, 0 }
 0x300   : > { %v5413_v55 = vpack.c.bf16 %v986_v51, %v983_v50  ;;  %v907_v56 = vpop.f32.mrb[9].mxu0  ;;  %4022 = vmatpush3.bf16.xpose.msra.mxu0 %v1042_v54  ;;  %4038 = vmatpush3.bf16.msra.mxu1 %v5394_v35  ;;  %v906_v32 = vadd.f32 %v905_v17, %v5371_v5 }
 0x301   : > { %v5416_v57 = vpack.c.bf16 %v978_v53, %v975_v24  ;;  %v909_v25 = vpop.f32.mrb[10].mxu0  ;;  %v908_v60 = vadd.f32 %v907_v56, %v5376_v8 }
 0x302   : > { %v910_v58 = vadd.f32 %v909_v25, %v5371_v5  ;;  %v911_v59 = vpop.f32.mrb[11].mxu0 }
 0x303   : > { %v912_v61 = vadd.f32 %v911_v59, %v5376_v8  ;;  %4039 = vmatprep.subr.bf16.mxu1 %v5416_v57 }
 0x304   : > { %v5423_v62 = vpack.c.bf16 %v910_v58, %v906_v32  ;;  %4040 = vmatpush3.bf16.msra.mxu1 %v5416_v57 }
 0x305   : > { %v5426_v0 = vpack.c.bf16 %v912_v61, %v908_v60  ;;  %4041 = vmatprep.subr.bf16.mxu1 %v5413_v55 }
 0x307   : > { %v915_v33 = vpop.f32.mrb[12].mxu0  ;;  %4173 = vmatprep.subr.msk.bf16.mxu0 %vm1025_vm0, %v5426_v0  ;;  %v1045_v1 = vsel %vm1025_vm0, %v5426_v0, 0 }
 0x308   : > { %v917_v40 = vpop.f32.mrb[13].mxu0  ;;  %4024 = vmatpush3.bf16.xpose.msra.mxu0 %v1045_v1  ;;  %4042 = vmatpush3.bf16.msra.mxu1 %v5413_v55  ;;  %v916_v7 = vadd.f32 %v915_v33, %v5371_v5 }
 0x309   : > { %v919_v3 = vpop.f32.mrb[14].mxu0  ;;  %v918_v11 = vadd.f32 %v917_v40, %v5376_v8 }
 0x30a   : > { %v920_v9 = vadd.f32 %v919_v3, %v5371_v5  ;;  %v921_v10 = vpop.f32.mrb[15].mxu0 }
 0x30b   : > { %v922_v12 = vadd.f32 %v921_v10, %v5376_v8 }
 0x30c   : > { %v5438_v13 = vpack.c.bf16 %v920_v9, %v916_v7 }
 0x30d   : > { %v5440_v14 = vpack.c.bf16 %v922_v12, %v918_v11 }
 0x30f   : > { %4174 = vmatprep.subr.msk.bf16.mxu0 %vm1025_vm0, %v5440_v14  ;;  %v1048_v15 = vsel %vm1025_vm0, %v5440_v14, 0 }
 0x310   : > { %4026 = vmatpush3.bf16.xpose.msra.mxu0 %v1048_v15 }
 0x317   : > { %4028 = vmatmul.mubr.msk.bf16.vlgmr.msra.gmra.mrb[16].mxu0 %vm1025_vm0, %v5403_v16 }
 0x318   : > { %4031 = vmatprep.mubr.msk.bf16.mxu0 %vm1025_vm0, %v5423_v62 }
 0x31f   : > { %4032 = vmatmul.mubr.msk.bf16.gmra.mrb[20].mxu0 %vm1025_vm0, %v5438_v13 }
 0x3ea   : > { %v4029_v5 = vpop.f32.mrb[16].mxu0 }
 0x3eb   : > { %v1084_v8 = vpop.f32.mrb[17].mxu0  ;;  %v1122_v26 = vsel %vm1115_vm1, %v4029_v5, -inf }
 0x3ec   : > { %v4030_v18 = vpop.f32.mrb[18].mxu0  ;;  %v1116_v19 = vsel %vm1115_vm1, %v1084_v8, -inf }
 0x3ed   : > { %1117 = vmax.xlane.f32.xlu0 %v1116_v19  ;;  %v1087_v21 = vpop.f32.mrb[19].mxu0  ;;  %v1125_v23 = vsel %vm1115_vm1, %v4030_v18, -inf }
 0x3ee   : > { %1126 = vmax.xlane.f32.xlu1 %v1125_v23  ;;  %v1119_v27 = vsel %vm1115_vm1, %v1087_v21, -inf }
 0x3f1   : > { %1123 = vmax.xlane.f32.xlu0 %v1122_v26 }
 0x3f2   : > { %1120 = vmax.xlane.f32.xlu1 %v1119_v27  ;;  %v4033_v28 = vpop.f32.mrb[20].mxu0 }
 0x3f3   : > { %v1100_v29 = vpop.f32.mrb[21].mxu0  ;;  %v1134_v38 = vsel %vm1115_vm1, %v4033_v28, -inf }
 0x3f4   : > { %v4034_v30 = vpop.f32.mrb[22].mxu0  ;;  %v1128_v31 = vsel %vm1115_vm1, %v1100_v29, -inf }
 0x3f5   : > { %1129 = vmax.xlane.f32.xlu0 %v1128_v31  ;;  %v1103_v34 = vpop.f32.mrb[23].mxu0  ;;  %v1137_v36 = vsel %vm1115_vm1, %v4034_v30, -inf }
 0x3f6   : > { %1138 = vmax.xlane.f32.xlu1 %v1137_v36  ;;  %v1131_v39 = vsel %vm1115_vm1, %v1103_v34, -inf }
 0x3f9   : > { %1135 = vmax.xlane.f32.xlu0 %v1134_v38 }
 0x3fa   : > { %1132 = vmax.xlane.f32.xlu1 %v1131_v39 }
 0x40b   : > { %1323 = vrot.lane.b32.xlu1 %v5406_v48, %s4954_s29 }
 0x40f   : > { %1325 = vrot.lane.b32.xlu1 %v5426_v0, %s4954_s29 }
 0x47a   : > { %v1118_v42 = vpop.xlane.xlu0 %1117 }
 0x47b   : > { %v1127_v43 = vpop.xlane.xlu1 %1126  ;;  %v1140_v45 = vsub.f32 %v1084_v8, %v1118_v42 }
 0x47c   : > { %v1143_v44 = vsub.f32 %v4030_v18, %v1127_v43 }
 0x47d   : > { %v1148_v52 = vmul.f32 1.442695, %v1140_v45 }
 0x47e   : > { %v1154_v46 = vmul.f32 1.442695, %v1143_v44  ;;  %v1124_v47 = vpop.xlane.xlu0 %1123 }
 0x47f   : > { %v1142_v49 = vsub.f32 %v4029_v5, %v1124_v47  ;;  %v1121_v50 = vpop.xlane.xlu1 %1120 }
 0x480   : > { %4444 = vpow2.f32 %v1154_v46  ;;  %v1141_v51 = vsub.f32 %v1087_v21, %v1121_v50 }
 0x481   : > { %v1152_v24 = vmul.f32 1.442695, %v1142_v49 }
 0x482   : > { %v1150_v53 = vmul.f32 1.442695, %v1141_v51  ;;  %v1130_v61 = vpop.xlane.xlu0 %1129 }
 0x483   : > { %4446 = vpow2.f32 %v1152_v24  ;;  %v1139_v33 = vpop.xlane.xlu1 %1138  ;;  %v1144_v11 = vsub.f32 %v1100_v29, %v1130_v61 }
 0x484   : > { %4448 = vpow2.f32 %v1150_v53  ;;  %v1147_v1 = vsub.f32 %v4034_v30, %v1139_v33 }
 0x485   : > { %4450 = vpow2.f32 %v1148_v52  ;;  %v1156_v5 = vmul.f32 1.442695, %v1144_v11 }
 0x486   : > { %v1136_v40 = vpop.xlane.xlu0 %1135  ;;  %v1162_v9 = vmul.f32 1.442695, %v1147_v1 }
 0x487   : > { %v1133_v3 = vpop.xlane.xlu1 %1132  ;;  %v1146_v7 = vsub.f32 %v4033_v28, %v1136_v40 }
 0x488   : > { %v1145_v10 = vsub.f32 %v1103_v34, %v1133_v3  ;;  %4452 = vpow2.f32 %v1162_v9 }
 0x489   : > { %v1160_v12 = vmul.f32 1.442695, %v1146_v7 }
 0x48a   : > { %v5464_v17 = vpop.eup %4444  ;;  %v1158_v15 = vmul.f32 1.442695, %v1145_v10 }
 0x48b   : > { %v1173_v54 = vsel %vm1115_vm1, %v5464_v17, 0.0  ;;  %4454 = vpow2.f32 %v1160_v12  ;;  %v1324_v29 = vpop.permute.xlu1 %1323 }
 0x48c   : > { %1174 = vadd.xlane.f32.xlu1 %v1173_v54  ;;  %4456 = vpow2.f32 %v1158_v15 }
 0x48d   : > { %v5468_v56 = vpop.eup %4446  ;;  %4458 = vpow2.f32 %v1156_v5 }
 0x48e   : > { %v5470_v25 = vpop.eup %4448  ;;  %v1170_v32 = vsel %vm1115_vm1, %v5468_v56, 0.0 }
 0x48f   : > { %v5474_v58 = vpop.eup %4450  ;;  %1171 = vadd.xlane.f32.xlu0 %v1170_v32  ;;  %v1167_v59 = vsel %vm1115_vm1, %v5470_v25, 0.0  ;;  %v1326_v30 = vpop.permute.xlu1 %1325  ;;  %v1345_v32 = vsel %vm1025_vm0, %v1324_v29, 0 }
 0x490   : > { %1168 = vadd.xlane.f32.xlu1 %v1167_v59  ;;  %v1164_v60 = vsel %vm1115_vm1, %v5474_v58, 0.0 }
 0x492   : > { %v5484_v8 = vpop.eup %4452 }
 0x493   : > { %1165 = vadd.xlane.f32.xlu0 %v1164_v60  ;;  %v1185_v19 = vsel %vm1115_vm1, %v5484_v8, 0.0 }
 0x495   : > { %v5486_v18 = vpop.eup %4454 }
 0x496   : > { %v5490_v21 = vpop.eup %4456  ;;  %v1182_v23 = vsel %vm1115_vm1, %v5486_v18, 0.0 }
 0x497   : > { %v5494_v26 = vpop.eup %4458  ;;  %v1179_v27 = vsel %vm1115_vm1, %v5490_v21, 0.0 }
 0x498   : > { %v1176_v28 = vsel %vm1115_vm1, %v5494_v26, 0.0 }
 0x4a1   : > { %1656 = vrot.lane.b32.xlu1 %v5386_v22, %s4955_s21 }
 0x4a9   : > { %1321 = vrot.lane.b32.xlu0 %v5386_v22, %s4954_s29 }
 0x4c5   : > { %1186 = vadd.xlane.f32.xlu1 %v1185_v19 }
 0x4c8   : > { %1183 = vadd.xlane.f32.xlu0 %v1182_v23 }
 0x4c9   : > { %1180 = vadd.xlane.f32.xlu1 %v1179_v27 }
 0x4cc   : > { %1177 = vadd.xlane.f32.xlu0 %v1176_v28 }
 0x4da   : > { %1658 = vrot.lane.b32.xlu1 %v5406_v48, %s4955_s21 }
 0x4de   : > { %1311 = vrot.lane.b32.xlu1 %v5403_v16, %s4954_s29 }
 0x4e2   : > { %1327 = vrot.lane.b32.xlu0 %v5440_v14, %s4954_s29  ;;  %1313 = vrot.lane.b32.xlu1 %v5423_v62, %s4954_s29 }
 0x4e6   : > { %1309 = vrot.lane.b32.xlu0 %v5384_v20, %s4954_s29  ;;  %1662 = vrot.lane.b32.xlu1 %v5440_v14, %s4955_s21 }
 0x4ea   : > { %1660 = vrot.lane.b32.xlu0 %v5426_v0, %s4955_s21  ;;  %1646 = vrot.lane.b32.xlu1 %v5403_v16, %s4955_s21 }
 0x4ee   : > { %1315 = vrot.lane.b32.xlu0 %v5438_v13, %s4954_s29  ;;  %1650 = vrot.lane.b32.xlu1 %v5438_v13, %s4955_s21 }
 0x4f2   : > { %1644 = vrot.lane.b32.xlu0 %v5384_v20, %s4955_s21 }
 0x4f6   : > { %1648 = vrot.lane.b32.xlu0 %v5423_v62, %s4955_s21 }
 0x519   : > { %v1175_v31 = vpop.xlane.xlu1 %1174 }
 0x51c   : > { %v1172_v34 = vpop.xlane.xlu0 %1171 }
 0x51d   : > { %v1169_v36 = vpop.xlane.xlu1 %1168  ;;  %4460 = vrcp.f32 %v1172_v34 }
 0x51e   : > { %4462 = vrcp.f32 %v1169_v36 }
 0x51f   : > { %4464 = vrcp.f32 %v1175_v31 }
 0x520   : > { %v1166_v38 = vpop.xlane.xlu0 %1165 }
 0x521   : > { %4466 = vrcp.f32 %v1166_v38  ;;  %v1657_v39 = vpop.permute.xlu1 %1656 }
 0x522   : > { %4179 = vmatprep.subr.msk.bf16.mxu0 %vm1025_vm0, %v1657_v39  ;;  %v1677_v42 = vsel %vm1025_vm0, %v1657_v39, 0 }
 0x523   : > { %4084 = vmatpush3.bf16.xpose.msra.mxu0 %v1677_v42 }
 0x524   : > { %v1322_v43 = vpop.permute.xlu0 %1321 }
 0x525   : > { %4175 = vmatprep.subr.msk.bf16.mxu1 %vm1025_vm0, %v1322_v43  ;;  %v1342_v54 = vsel %vm1025_vm0, %v1322_v43, 0 }
 0x527   : > { %v4461_v44 = vpop.eup %4460 }
 0x528   : > { %v4463_v45 = vpop.eup %4462  ;;  %v1198_v49 = vmul.f32 %v4461_v44, %v5468_v56  ;;  %v1348_v56 = vsel %vm1025_vm0, %v1326_v30, 0 }
 0x529   : > { %v4465_v46 = vpop.eup %4464  ;;  %v1197_v51 = vmul.f32 %v4463_v45, %v5470_v25 }
 0x52a   : > { %v1199_v52 = vmul.f32 %v4465_v46, %v5464_v17 }
 0x52b   : > { %v4467_v47 = vpop.eup %4466 }
 0x52c   : > { %v1196_v50 = vmul.f32 %v4467_v47, %v5474_v58  ;;  %v1205_v53 = vpack.c.bf16 %v1199_v52, %v1198_v49 }
 0x52e   : > { %v1204_v24 = vpack.c.bf16 %v1197_v51, %v1196_v50 }
 0x530   : > { %4043 = vmatprep.mubr.msk.bf16.mxu1 %vm1115_vm1, %v1204_v24 }
 0x531   : > { %4044 = vmatmul.mubr.msk.bf16.vlgmr.msra.gmra.mrb[8].mxu1 %vm1115_vm1, %v1205_v53 }
 0x532   : > { %4052 = vmatpush3.bf16.xpose.msra.mxu1 %v1342_v54 }
 0x533   : > { %4176 = vmatprep.subr.msk.bf16.mxu1 %vm1025_vm0, %v1324_v29 }
 0x53a   : > { %4054 = vmatpush3.bf16.xpose.msra.mxu1 %v1345_v32 }
 0x53b   : > { %4177 = vmatprep.subr.msk.bf16.mxu1 %vm1025_vm0, %v1326_v30 }
 0x542   : > { %4056 = vmatpush3.bf16.xpose.msra.mxu1 %v1348_v56 }
 0x552   : > { %v1187_v17 = vpop.xlane.xlu1 %1186 }
 0x555   : > { %v1184_v25 = vpop.xlane.xlu0 %1183 }
 0x556   : > { %v1181_v58 = vpop.xlane.xlu1 %1180  ;;  %4468 = vrcp.f32 %v1184_v25 }
 0x557   : > { %4470 = vrcp.f32 %v1181_v58 }
 0x558   : > { %4472 = vrcp.f32 %v1187_v17 }
 0x559   : > { %v1178_v59 = vpop.xlane.xlu0 %1177 }
 0x55a   : > { %4474 = vrcp.f32 %v1178_v59  ;;  %v1659_v60 = vpop.permute.xlu1 %1658 }
 0x55b   : > { %4180 = vmatprep.subr.msk.bf16.mxu0 %vm1025_vm0, %v1659_v60  ;;  %v1680_v61 = vsel %vm1025_vm0, %v1659_v60, 0 }
 0x55c   : > { %4086 = vmatpush3.bf16.xpose.msra.mxu0 %v1680_v61 }
 0x55d   : > { %v1328_v33 = vpop.permute.xlu0 %1327 }
 0x55e   : > { %4178 = vmatprep.subr.msk.bf16.mxu1 %vm1025_vm0, %v1328_v33  ;;  %v1312_v1 = vpop.permute.xlu1 %1311  ;;  %v1351_v40 = vsel %vm1025_vm0, %v1328_v33, 0 }
 0x55f   : > { %4058 = vmatpush3.bf16.xpose.msra.mxu1 %v1351_v40 }
 0x560   : > { %v4469_v3 = vpop.eup %4468 }
 0x561   : > { %v1310_v7 = vpop.permute.xlu0 %1309  ;;  %v4471_v9 = vpop.eup %4470  ;;  %v1202_v15 = vmul.f32 %v4469_v3, %v5486_v18 }
 0x562   : > { %v1314_v10 = vpop.permute.xlu1 %1313  ;;  %v4473_v11 = vpop.eup %4472  ;;  %v1201_v23 = vmul.f32 %v4471_v9, %v5490_v21 }
 0x563   : > { %v1203_v29 = vmul.f32 %v4473_v11, %v5484_v8 }
 0x564   : > { %v4475_v12 = vpop.eup %4474 }
 0x565   : > { %v1661_v5 = vpop.permute.xlu0 %1660  ;;  %v1200_v19 = vmul.f32 %v4475_v12, %v5494_v26  ;;  %v1207_v31 = vpack.c.bf16 %v1203_v29, %v1202_v15 }
 0x566   : > { %4181 = vmatprep.subr.msk.bf16.mxu0 %vm1025_vm0, %v1661_v5  ;;  %v1663_v27 = vpop.permute.xlu1 %1662  ;;  %v1683_v28 = vsel %vm1025_vm0, %v1661_v5, 0 }
 0x567   : > { %4088 = vmatpush3.bf16.xpose.msra.mxu0 %v1683_v28  ;;  %v1206_v30 = vpack.c.bf16 %v1201_v23, %v1200_v19  ;;  %v1686_v21 = vsel %vm1025_vm0, %v1663_v27, 0 }
 0x568   : > { %4182 = vmatprep.subr.msk.bf16.mxu0 %vm1025_vm0, %v1663_v27 }
 0x569   : > { %v1316_v34 = vpop.permute.xlu0 %1315  ;;  %4047 = vmatprep.mubr.msk.bf16.mxu1 %vm1115_vm1, %v1206_v30 }
 0x56a   : > { %4048 = vmatmul.mubr.msk.bf16.gmra.mrb[12].mxu1 %vm1115_vm1, %v1207_v31  ;;  %v1647_v8 = vpop.permute.xlu1 %1646 }
 0x56b   : > { %4059 = vmatprep.mubr.msk.bf16.mxu1 %vm1025_vm0, %v1310_v7 }
 0x56d   : > { %v1645_v18 = vpop.permute.xlu0 %1644 }
 0x56e   : > { %4091 = vmatprep.mubr.msk.bf16.mxu0 %vm1025_vm0, %v1645_v18  ;;  %v1651_v36 = vpop.permute.xlu1 %1650 }
 0x56f   : > { %4090 = vmatpush3.bf16.xpose.msra.mxu0 %v1686_v21 }
 0x571   : > { %v1649_v26 = vpop.permute.xlu0 %1648 }
 0x572   : > { %4060 = vmatmul.mubr.msk.bf16.vlgmr.msra.gmra.mrb[16].mxu1 %vm1025_vm0, %v1312_v1 }
 0x573   : > { %4063 = vmatprep.mubr.msk.bf16.mxu1 %vm1025_vm0, %v1314_v10 }
 0x576   : > { %4092 = vmatmul.mubr.msk.bf16.vlgmr.msra.gmra.mrb[24].mxu0 %vm1025_vm0, %v1647_v8 }
 0x577   : > { %4095 = vmatprep.mubr.msk.bf16.mxu0 %vm1025_vm0, %v1649_v26 }
 0x57a   : > { %4064 = vmatmul.mubr.msk.bf16.gmra.mrb[20].mxu1 %vm1025_vm0, %v1316_v34 }
 0x57e   : > { %4096 = vmatmul.mubr.msk.bf16.gmra.mrb[28].mxu0 %vm1025_vm0, %v1651_v36 }
 0x604   : > { %v4045_v38 = vpop.f32.mrb[8].mxu1 }
 0x605   : > { %v1254_v39 = vpop.f32.mrb[9].mxu1 }
 0x606   : > { %v4046_v42 = vpop.f32.mrb[10].mxu1 }
 0x607   : > { %v1286_v43 = vpack.c.bf16 %v4046_v42, %v4045_v38  ;;  %v1257_v44 = vpop.f32.mrb[11].mxu1 }
 0x608   : > { %v1285_v45 = vpack.c.bf16 %v1257_v44, %v1254_v39 }
 0x609   : > { %1290 = vst.msk [vmem:[#allocation3 + $0x8] sm:$0xff] %vm1025_vm0, %v1286_v43 }
 0x60a   : > { %1289 = vst.msk [vmem:[#allocation3] sm:$0xff] %vm1025_vm0, %v1285_v45 }
 0x63d   : > { %v4049_v46 = vpop.f32.mrb[12].mxu1 }
 0x63e   : > { %v1270_v47 = vpop.f32.mrb[13].mxu1 }
 0x63f   : > { %v4050_v49 = vpop.f32.mrb[14].mxu1 }
 0x640   : > { %v1288_v50 = vpack.c.bf16 %v4050_v49, %v4049_v46  ;;  %v1273_v51 = vpop.f32.mrb[15].mxu1 }
 0x641   : > { %v1287_v52 = vpack.c.bf16 %v1273_v51, %v1270_v47 }
 0x642   : > { %1292 = vst.msk [vmem:[#allocation3 + $0x18] sm:$0xff] %vm1025_vm0, %v1288_v50 }
 0x643   : > { %1291 = vst.msk [vmem:[#allocation3 + $0x10] sm:$0xff] %vm1025_vm0, %v1287_v52 }
 0x645   : > { %v5564_v24 = vpop.f32.mrb[16].mxu1 }
 0x646   : > { %v5566_v53 = vpop.f32.mrb[17].mxu1  ;;  %v1424_v27 = vsel %vm1115_vm1, %v5564_v24, -inf }
 0x647   : > { %v5568_v54 = vpop.f32.mrb[18].mxu1  ;;  %v1418_v29 = vsel %vm1115_vm1, %v5566_v53, -inf }
 0x648   : > { %v5570_v32 = vpop.f32.mrb[19].mxu1  ;;  %v1427_v30 = vsel %vm1115_vm1, %v5568_v54, -inf }
 0x649   : > { %v4093_v56 = vpop.f32.mrb[24].mxu0  ;;  %v1421_v28 = vsel %vm1115_vm1, %v5570_v32, -inf }
 0x64a   : > { %v1722_v17 = vpop.f32.mrb[25].mxu0  ;;  %v1759_v40 = vsel %vm1115_vm1, %v4093_v56, -inf }
 0x64b   : > { %v4094_v25 = vpop.f32.mrb[26].mxu0  ;;  %v1753_v58 = vsel %vm1115_vm1, %v1722_v17, -inf }
 0x64c   : > { %1754 = vmax.xlane.f32.xlu0 %v1753_v58  ;;  %v1725_v59 = vpop.f32.mrb[27].mxu0  ;;  %v1762_v9 = vsel %vm1115_vm1, %v4094_v25, -inf }
 0x64d   : > { %v5573_v60 = vpop.f32.mrb[20].mxu1  ;;  %v1756_v61 = vsel %vm1115_vm1, %v1725_v59, -inf }
 0x64e   : > { %v5576_v33 = vpop.f32.mrb[21].mxu1  ;;  %1757 = vmax.xlane.f32.xlu1 %v1756_v61  ;;  %v1436_v31 = vsel %vm1115_vm1, %v5573_v60, -inf }
 0x64f   : > { %v5578_v1 = vpop.f32.mrb[22].mxu1  ;;  %v1430_v34 = vsel %vm1115_vm1, %v5576_v33, -inf }
 0x650   : > { %v5581_v3 = vpop.f32.mrb[23].mxu1  ;;  %1760 = vmax.xlane.f32.xlu0 %v1759_v40 }
 0x651   : > { %v5583_v7 = vpop.f32.mrb[28].mxu0 }
 0x652   : > { %1763 = vmax.xlane.f32.xlu1 %v1762_v9  ;;  %v5586_v10 = vpop.f32.mrb[29].mxu0  ;;  %v1771_v19 = vsel %vm1115_vm1, %v5583_v7, -inf }
 0x653   : > { %v5588_v11 = vpop.f32.mrb[30].mxu0  ;;  %v1765_v12 = vsel %vm1115_vm1, %v5586_v10, -inf }
 0x654   : > { %1766 = vmax.xlane.f32.xlu0 %v1765_v12  ;;  %v5592_v15 = vpop.f32.mrb[31].mxu0  ;;  %v1774_v23 = vsel %vm1115_vm1, %v5588_v11, -inf }
 0x655   : > { %v1768_v5 = vsel %vm1115_vm1, %v5592_v15, -inf }
 0x656   : > { %1769 = vmax.xlane.f32.xlu1 %v1768_v5 }
 0x658   : > { %1772 = vmax.xlane.f32.xlu0 %v1771_v19 }
 0x65a   : > { %1775 = vmax.xlane.f32.xlu1 %v1774_v23 }
 0x66b   : > { %1516 = vrot.lane.b32.xlu1 %v5394_v35, %s4954_s29 }
 0x66e   : > { %1514 = vrot.lane.b32.xlu0 %v5396_v37, %s4954_s29 }
 0x68d   : > { %1425 = vmax.xlane.f32.xlu0 %v1424_v27 }
 0x68f   : > { %1422 = vmax.xlane.f32.xlu1 %v1421_v28 }
 0x691   : > { %1419 = vmax.xlane.f32.xlu0 %v1418_v29 }
 0x695   : > { %1428 = vmax.xlane.f32.xlu0 %v1427_v30 }
 0x699   : > { %1437 = vmax.xlane.f32.xlu0 %v1436_v31 }
 0x69d   : > { %1431 = vmax.xlane.f32.xlu0 %v1430_v34  ;;  %v1439_v34 = vsel %vm1115_vm1, %v5578_v1, -inf }
 0x6b3   : > { %1518 = vrot.lane.b32.xlu0 %v5416_v57, %s4954_s29 }
 0x6d9   : > { %v1755_v18 = vpop.xlane.xlu0 %1754 }
 0x6da   : > { %v1777_v21 = vsub.f32 %v1722_v17, %v1755_v18 }
 0x6db   : > { %v1758_v8 = vpop.xlane.xlu1 %1757 }
 0x6dc   : > { %v1785_v26 = vmul.f32 1.442695, %v1777_v21  ;;  %v1778_v36 = vsub.f32 %v1725_v59, %v1758_v8 }
 0x6dd   : > { %v1761_v38 = vpop.xlane.xlu0 %1760 }
 0x6de   : > { %4476 = vpow2.f32 %v1785_v26  ;;  %v1787_v39 = vmul.f32 1.442695, %v1778_v36  ;;  %v1779_v42 = vsub.f32 %v4093_v56, %v1761_v38  ;;  %v1433_v26 = vsel %vm1115_vm1, %v5581_v3, -inf }
 0x6df   : > { %v1764_v43 = vpop.xlane.xlu1 %1763 }
 0x6e0   : > { %4478 = vpow2.f32 %v1787_v39  ;;  %v1789_v44 = vmul.f32 1.442695, %v1779_v42  ;;  %v1780_v45 = vsub.f32 %v4094_v25, %v1764_v43 }
 0x6e1   : > { %v5618_v46 = vpop.xlane.xlu0 %1766 }
 0x6e2   : > { %4480 = vpow2.f32 %v1789_v44  ;;  %v1791_v47 = vmul.f32 1.442695, %v1780_v45  ;;  %v1781_v49 = vsub.f32 %v5586_v10, %v5618_v46 }
 0x6e3   : > { %v5622_v50 = vpop.xlane.xlu1 %1769 }
 0x6e4   : > { %v1782_v51 = vsub.f32 %v5592_v15, %v5622_v50  ;;  %4482 = vpow2.f32 %v1791_v47 }
 0x6e5   : > { %v5626_v52 = vpop.xlane.xlu0 %1772 }
 0x6e6   : > { %v1783_v56 = vsub.f32 %v5583_v7, %v5626_v52 }
 0x6e7   : > { %v5630_v17 = vpop.xlane.xlu1 %1775 }
 0x6e8   : > { %v5632_v25 = vpop.eup %4476  ;;  %v1784_v58 = vsub.f32 %v5588_v11, %v5630_v17 }
 0x6e9   : > { %v1515_v59 = vpop.permute.xlu0 %1514  ;;  %v1801_v61 = vsel %vm1115_vm1, %v5632_v25, 0.0 }
 0x6ea   : > { %v5638_v40 = vpop.eup %4478  ;;  %4067 = vmatprep.subr.bf16.mxu1 %v1515_v59  ;;  %1802 = vadd.xlane.f32.xlu1 %v1801_v61  ;;  %v1799_v10 = vmul.f32 1.442695, %v1784_v58 }
 0x6eb   : > { %4068 = vmatpush3.bf16.msra.mxu1 %v1515_v59  ;;  %v1517_v9 = vpop.permute.xlu1 %1516  ;;  %v1804_v12 = vsel %vm1115_vm1, %v5638_v40, 0.0 }
 0x6ec   : > { %v5642_v5 = vpop.eup %4480  ;;  %1805 = vadd.xlane.f32.xlu0 %v1804_v12  ;;  %4069 = vmatprep.subr.bf16.mxu1 %v1517_v9 }
 0x6ed   : > { %v1807_v19 = vsel %vm1115_vm1, %v5642_v5, 0.0 }
 0x6ee   : > { %v5646_v23 = vpop.eup %4482 }
 0x6ef   : > { %4070 = vmatpush3.bf16.msra.mxu1 %v1517_v9  ;;  %v1810_v27 = vsel %vm1115_vm1, %v5646_v23, 0.0 }
 0x6f0   : > { %1808 = vadd.xlane.f32.xlu0 %v1807_v19 }
 0x6f4   : > { %1811 = vadd.xlane.f32.xlu0 %v1810_v27 }
 0x6fb   : > { %1520 = vrot.lane.b32.xlu1 %v5413_v55, %s4954_s29 }
 0x71a   : > { %v1426_v28 = vpop.xlane.xlu0 %1425 }
 0x71b   : > { %v1444_v29 = vsub.f32 %v5564_v24, %v1426_v28  ;;  %v1793_v28 = vmul.f32 1.442695, %v1781_v49 }
 0x71c   : > { %v1423_v45 = vpop.xlane.xlu1 %1422 }
 0x71d   : > { %v1454_v30 = vmul.f32 1.442695, %v1444_v29  ;;  %v1443_v47 = vsub.f32 %v5570_v32, %v1423_v45  ;;  %v1797_v32 = vmul.f32 1.442695, %v1783_v56 }
 0x71e   : > { %v1420_v31 = vpop.xlane.xlu0 %1419 }
 0x71f   : > { %4484 = vpow2.f32 %v1454_v30  ;;  %v1442_v18 = vsub.f32 %v5566_v53, %v1420_v31  ;;  %1440 = vmax.xlane.f32.xlu1 %v1439_v34  ;;  %v1452_v9 = vmul.f32 1.442695, %v1443_v47 }
 0x721   : > { %v1450_v21 = vmul.f32 1.442695, %v1442_v18 }
 0x722   : > { %v1429_v8 = vpop.xlane.xlu0 %1428 }
 0x723   : > { %4486 = vpow2.f32 %v1450_v21  ;;  %1434 = vmax.xlane.f32.xlu1 %v1433_v26  ;;  %v1445_v44 = vsub.f32 %v5568_v54, %v1429_v8 }
 0x725   : > { %v1456_v59 = vmul.f32 1.442695, %v1445_v44 }
 0x726   : > { %v1438_v36 = vpop.xlane.xlu0 %1437 }
 0x727   : > { %v1448_v61 = vsub.f32 %v5573_v60, %v1438_v36  ;;  %4488 = vpow2.f32 %v1456_v59 }
 0x728   : > { %4490 = vpow2.f32 %v1452_v9 }
 0x729   : > { %v5658_v38 = vpop.eup %4484  ;;  %v1462_v19 = vmul.f32 1.442695, %v1448_v61 }
 0x72a   : > { %v1432_v24 = vpop.xlane.xlu0 %1431  ;;  %v1472_v39 = vsel %vm1115_vm1, %v5658_v38, 0.0 }
 0x72b   : > { %1473 = vadd.xlane.f32.xlu0 %v1472_v39  ;;  %v1446_v12 = vsub.f32 %v5576_v33, %v1432_v24  ;;  %4492 = vpow2.f32 %v1462_v19 }
 0x72d   : > { %v5662_v42 = vpop.eup %4486  ;;  %v1458_v27 = vmul.f32 1.442695, %v1446_v12 }
 0x72e   : > { %v1519_v43 = vpop.permute.xlu0 %1518  ;;  %v1466_v53 = vsel %vm1115_vm1, %v5662_v42, 0.0 }
 0x72f   : > { %1467 = vadd.xlane.f32.xlu0 %v1466_v53  ;;  %4071 = vmatprep.subr.bf16.mxu1 %v1519_v43  ;;  %4494 = vpow2.f32 %v1458_v27 }
 0x730   : > { %4072 = vmatpush3.bf16.msra.mxu1 %v1519_v43  ;;  %4496 = vpow2.f32 %v1793_v28 }
 0x731   : > { %v5679_v54 = vpop.eup %4488  ;;  %4498 = vpow2.f32 %v1797_v32  ;;  %v1795_v32 = vmul.f32 1.442695, %v1782_v51 }
 0x732   : > { %v1475_v60 = vsel %vm1115_vm1, %v5679_v54, 0.0  ;;  %v5686_v33 = vpop.eup %4490  ;;  %4500 = vpow2.f32 %v1799_v10 }
 0x733   : > { %v1469_v49 = vsel %vm1115_vm1, %v5686_v33, 0.0 }
 0x734   : > { %1851 = vrot.lane.b32.xlu1 %v5394_v35, %s4955_s21 }
 0x735   : > { %v5691_v46 = vpop.eup %4492 }
 0x736   : > { %v1484_v52 = vsel %vm1115_vm1, %v5691_v46, 0.0 }
 0x738   : > { %1853 = vrot.lane.b32.xlu1 %v5416_v57, %s4955_s21 }
 0x739   : > { %v5695_v29 = vpop.eup %4494 }
 0x73a   : > { %v1478_v7 = vsel %vm1115_vm1, %v5695_v29, 0.0  ;;  %v5701_v56 = vpop.eup %4496 }
 0x73b   : > { %v1813_v11 = vsel %vm1115_vm1, %v5701_v56, 0.0  ;;  %v5705_v17 = vpop.eup %4498 }
 0x73c   : > { %v1819_v58 = vsel %vm1115_vm1, %v5705_v17, 0.0  ;;  %v5709_v30 = vpop.eup %4500 }
 0x73d   : > { %v1822_v31 = vsel %vm1115_vm1, %v5709_v30, 0.0 }
 0x745   : > { %1849 = vrot.lane.b32.xlu0 %v5396_v37, %s4955_s21 }
 0x75c   : > { %1476 = vadd.xlane.f32.xlu1 %v1475_v60 }
 0x760   : > { %1470 = vadd.xlane.f32.xlu1 %v1469_v49 }
 0x764   : > { %1479 = vadd.xlane.f32.xlu0 %v1478_v7  ;;  %1485 = vadd.xlane.f32.xlu1 %v1484_v52 }
 0x768   : > { %1814 = vadd.xlane.f32.xlu0 %v1813_v11 }
 0x76c   : > { %1820 = vadd.xlane.f32.xlu0 %v1819_v58 }
 0x770   : > { %1823 = vadd.xlane.f32.xlu0 %v1822_v31 }
 0x777   : > { %v1803_v34 = vpop.xlane.xlu1 %1802 }
 0x778   : > { %4502 = vrcp.f32 %v1803_v34 }
 0x779   : > { %v1806_v18 = vpop.xlane.xlu0 %1805 }
 0x77a   : > { %4504 = vrcp.f32 %v1806_v18 }
 0x77b   : > { %v1521_v21 = vpop.permute.xlu1 %1520 }
 0x77c   : > { %4073 = vmatprep.subr.bf16.mxu1 %v1521_v21 }
 0x77d   : > { %v1809_v8 = vpop.xlane.xlu0 %1808  ;;  %4074 = vmatpush3.bf16.msra.mxu1 %v1521_v21 }
 0x77e   : > { %4506 = vrcp.f32 %v1809_v8 }
 0x781   : > { %v1812_v26 = vpop.xlane.xlu0 %1811 }
 0x782   : > { %v4503_v36 = vpop.eup %4502  ;;  %4508 = vrcp.f32 %v1812_v26 }
 0x783   : > { %v5714_v39 = vmul.f32 %v4503_v36, %v5632_v25 }
 0x784   : > { %v4505_v24 = vpop.eup %4504 }
 0x785   : > { %v5717_v43 = vmul.f32 %v4505_v24, %v5638_v40 }
 0x786   : > { %1991 = vrot.lane.b32.xlu0 %v5386_v22, %s4956_s22 }
 0x787   : > { %v1841_v53 = vpack.c.bf16 %v5717_v43, %v5714_v39 }
 0x788   : > { %v4507_v44 = vpop.eup %4506 }
 0x789   : > { %v5726_v47 = vmul.f32 %v4507_v44, %v5642_v5 }
 0x78a   : > { %1979 = vrot.lane.b32.xlu0 %v5384_v20, %s4956_s22 }
 0x78c   : > { %v4509_v45 = vpop.eup %4508 }
 0x78d   : > { %v5729_v25 = vmul.f32 %v4509_v45, %v5646_v23 }
 0x78e   : > { %1983 = vrot.lane.b32.xlu0 %v5423_v62, %s4956_s22 }
 0x78f   : > { %v1842_v22 = vpack.c.bf16 %v5729_v25, %v5726_v47 }
 0x7ac   : > { %v1441_v40 = vpop.xlane.xlu1 %1440 }
 0x7ad   : > { %v1449_v59 = vsub.f32 %v5578_v1, %v1441_v40 }
 0x7af   : > { %v1464_v61 = vmul.f32 1.442695, %v1449_v59 }
 0x7b0   : > { %v1435_v9 = vpop.xlane.xlu1 %1434 }
 0x7b1   : > { %4510 = vpow2.f32 %v1464_v61  ;;  %v1447_v20 = vsub.f32 %v5581_v3, %v1435_v9 }
 0x7b3   : > { %v1460_v12 = vmul.f32 1.442695, %v1447_v20 }
 0x7b4   : > { %v1852_v3 = vpop.permute.xlu1 %1851 }
 0x7b5   : > { %4512 = vpow2.f32 %v1460_v12 }
 0x7b6   : > { %4514 = vpow2.f32 %v1795_v32 }
 0x7b8   : > { %v1474_v5 = vpop.xlane.xlu0 %1473  ;;  %v1854_v60 = vpop.permute.xlu1 %1853 }
 0x7bb   : > { %v5737_v19 = vpop.eup %4510 }
 0x7bc   : > { %v1468_v23 = vpop.xlane.xlu0 %1467  ;;  %v1487_v62 = vsel %vm1115_vm1, %v5737_v19, 0.0 }
 0x7bd   : > { %1488 = vadd.xlane.f32.xlu1 %v1487_v62 }
 0x7bf   : > { %v5741_v27 = vpop.eup %4512 }
 0x7c0   : > { %v1850_v28 = vpop.permute.xlu0 %1849  ;;  %v1481_v1 = vsel %vm1115_vm1, %v5741_v27, 0.0  ;;  %v5750_v7 = vpop.eup %4514 }
 0x7c1   : > { %4099 = vmatprep.subr.bf16.mxu1 %v1850_v28  ;;  %1482 = vadd.xlane.f32.xlu1 %v1481_v1  ;;  %v1816_v11 = vsel %vm1115_vm1, %v5750_v7, 0.0 }
 0x7d2   : > { %1855 = vrot.lane.b32.xlu1 %v5413_v55, %s4955_s21 }
 0x7e9   : > { %v1477_v10 = vpop.xlane.xlu1 %1476 }
 0x7ea   : > { %4516 = vrcp.f32 %v1477_v10 }
 0x7eb   : > { %4518 = vrcp.f32 %v1468_v23 }
 0x7ec   : > { %4520 = vrcp.f32 %v1474_v5 }
 0x7ed   : > { %v1471_v49 = vpop.xlane.xlu1 %1470 }
 0x7ee   : > { %4522 = vrcp.f32 %v1471_v49 }
 0x7f4   : > { %v4517_v52 = vpop.eup %4516 }
 0x7f5   : > { %v4519_v58 = vpop.eup %4518  ;;  %v1501_v15 = vmul.f32 %v4517_v52, %v5679_v54  ;;  %v1486_v54 = vpop.xlane.xlu1 %1485 }
 0x7f6   : > { %1817 = vadd.xlane.f32.xlu1 %v1816_v11  ;;  %v4521_v31 = vpop.eup %4520  ;;  %v1498_v50 = vmul.f32 %v4519_v58, %v5662_v42 }
 0x7f7   : > { %v1500_v18 = vmul.f32 %v4521_v31, %v5658_v38  ;;  %v1480_v38 = vpop.xlane.xlu0 %1479 }
 0x7f8   : > { %v4523_v34 = vpop.eup %4522 }
 0x7f9   : > { %v1499_v51 = vmul.f32 %v4523_v34, %v5686_v33  ;;  %v1507_v8 = vpack.c.bf16 %v1501_v15, %v1500_v18 }
 0x7fb   : > { %v1506_v21 = vpack.c.bf16 %v1499_v51, %v1498_v50  ;;  %v1815_v42 = vpop.xlane.xlu0 %1814 }
 0x7fd   : > { %4075 = vmatprep.mubr.msk.bf16.mxu1 %vm1115_vm1, %v1506_v21 }
 0x7fe   : > { %4076 = vmatmul.mubr.msk.bf16.vlgmr.msra.gmra.mrb[24].mxu1 %vm1115_vm1, %v1507_v8 }
 0x7ff   : > { %4100 = vmatpush3.bf16.msra.mxu1 %v1850_v28  ;;  %v1821_v33 = vpop.xlane.xlu0 %1820 }
 0x800   : > { %4101 = vmatprep.subr.bf16.mxu1 %v1852_v3 }
 0x803   : > { %4102 = vmatpush3.bf16.msra.mxu1 %v1852_v3 }
 0x804   : > { %4103 = vmatprep.subr.bf16.mxu1 %v1854_v60 }
 0x807   : > { %4104 = vmatpush3.bf16.msra.mxu1 %v1854_v60  ;;  %1993 = vrot.lane.b32.xlu1 %v5406_v48, %s4956_s22  ;;  %v1824_v48 = vpop.xlane.xlu0 %1823 }
 0x80b   : > { %1995 = vrot.lane.b32.xlu1 %v5426_v0, %s4956_s22 }
 0x80f   : > { %1997 = vrot.lane.b32.xlu1 %v5440_v14, %s4956_s22  ;;  %v1992_v14 = vpop.permute.xlu0 %1991 }
 0x810   : > { %v2012_v12 = vsel %vm1025_vm0, %v1992_v14, 0 }
 0x813   : > { %1981 = vrot.lane.b32.xlu1 %v5403_v16, %s4956_s22  ;;  %v1980_v32 = vpop.permute.xlu0 %1979 }
 0x817   : > { %1985 = vrot.lane.b32.xlu1 %v5438_v13, %s4956_s22  ;;  %v1984_v60 = vpop.permute.xlu0 %1983 }
 0x84a   : > { %v1489_v26 = vpop.xlane.xlu1 %1488 }
 0x84b   : > { %4524 = vrcp.f32 %v1489_v26 }
 0x84c   : > { %4526 = vrcp.f32 %v1480_v38 }
 0x84d   : > { %4528 = vrcp.f32 %v1486_v54 }
 0x84e   : > { %v1483_v36 = vpop.xlane.xlu1 %1482 }
 0x84f   : > { %4530 = vrcp.f32 %v1483_v36 }
 0x850   : > { %4532 = vrcp.f32 %v1824_v48 }
 0x851   : > { %4534 = vrcp.f32 %v1815_v42 }
 0x852   : > { %v1856_v0 = vpop.permute.xlu1 %1855  ;;  %4536 = vrcp.f32 %v1821_v33 }
 0x853   : > { %4105 = vmatprep.subr.bf16.mxu1 %v1856_v0 }
 0x854   : > { %4106 = vmatpush3.bf16.msra.mxu1 %v1856_v0 }
 0x855   : > { %4183 = vmatprep.subr.msk.bf16.mxu1 %vm1025_vm0, %v1992_v14  ;;  %v4525_v16 = vpop.eup %4524 }
 0x856   : > { %v4527_v24 = vpop.eup %4526  ;;  %v1505_v45 = vmul.f32 %v4525_v16, %v5737_v19 }
 0x857   : > { %v4529_v13 = vpop.eup %4528  ;;  %v1502_v40 = vmul.f32 %v4527_v24, %v5695_v29 }
 0x858   : > { %v1504_v61 = vmul.f32 %v4529_v13, %v5691_v46 }
 0x859   : > { %v4531_v44 = vpop.eup %4530 }
 0x85a   : > { %v1503_v59 = vmul.f32 %v4531_v44, %v5741_v27  ;;  %v1509_v20 = vpack.c.bf16 %v1505_v45, %v1504_v61  ;;  %v4533_v39 = vpop.eup %4532 }
 0x85c   : > { %v1508_v9 = vpack.c.bf16 %v1503_v59, %v1502_v40 }
 0x85e   : > { %4079 = vmatprep.mubr.msk.bf16.mxu1 %vm1115_vm1, %v1508_v9 }
 0x85f   : > { %4080 = vmatmul.mubr.msk.bf16.gmra.mrb[28].mxu1 %vm1115_vm1, %v1509_v20 }
 0x860   : > { %4107 = vmatprep.mubr.msk.bf16.mxu1 %vm1115_vm1, %v1841_v53  ;;  %v4535_v53 = vpop.eup %4534 }
 0x861   : > { %v4537_v47 = vpop.eup %4536  ;;  %v1837_v19 = vmul.f32 %v4535_v53, %v5701_v56 }
 0x862   : > { %v1839_v27 = vmul.f32 %v4537_v47, %v5705_v17 }
 0x867   : > { %4108 = vmatmul.mubr.msk.bf16.vlgmr.msra.gmra.mrb[32].mxu1 %vm1115_vm1, %v1842_v22  ;;  %v1840_v22 = vmul.f32 %v4533_v39, %v5709_v30 }
 0x868   : > { %4116 = vmatpush3.bf16.xpose.msra.mxu1 %v2012_v12 }
 0x869   : > { %v1844_v3 = vpack.c.bf16 %v1840_v22, %v1839_v27 }
 0x883   : > { %v1818_v46 = vpop.xlane.xlu1 %1817 }
 0x884   : > { %4538 = vrcp.f32 %v1818_v46 }
 0x887   : > { %v1994_v29 = vpop.permute.xlu1 %1993 }
 0x888   : > { %v2015_v5 = vsel %vm1025_vm0, %v1994_v29, 0  ;;  %4184 = vmatprep.subr.msk.bf16.mxu1 %vm1025_vm0, %v1994_v29 }
 0x889   : > { %4118 = vmatpush3.bf16.xpose.msra.mxu1 %v2015_v5 }
 0x88b   : > { %v1996_v43 = vpop.permute.xlu1 %1995 }
 0x88c   : > { %4185 = vmatprep.subr.msk.bf16.mxu1 %vm1025_vm0, %v1996_v43  ;;  %v2018_v62 = vsel %vm1025_vm0, %v1996_v43, 0 }
 0x88e   : > { %v4539_v25 = vpop.eup %4538 }
 0x88f   : > { %v1838_v23 = vmul.f32 %v4539_v25, %v5750_v7  ;;  %v1998_v28 = vpop.permute.xlu1 %1997 }
 0x890   : > { %v2021_v56 = vsel %vm1025_vm0, %v1998_v28, 0 }
 0x891   : > { %4120 = vmatpush3.bf16.xpose.msra.mxu1 %v2018_v62  ;;  %v1843_v1 = vpack.c.bf16 %v1838_v23, %v1837_v19 }
 0x892   : > { %4186 = vmatprep.subr.msk.bf16.mxu1 %vm1025_vm0, %v1998_v28 }
 0x893   : > { %4111 = vmatprep.mubr.msk.bf16.mxu1 %vm1115_vm1, %v1843_v1  ;;  %v1982_v30 = vpop.permute.xlu1 %1981 }
 0x894   : > { %4112 = vmatmul.mubr.msk.bf16.gmra.mrb[36].mxu1 %vm1115_vm1, %v1844_v3 }
 0x895   : > { %4123 = vmatprep.mubr.msk.bf16.mxu1 %vm1025_vm0, %v1980_v32 }
 0x897   : > { %v1986_v17 = vpop.permute.xlu1 %1985 }
 0x899   : > { %4122 = vmatpush3.bf16.xpose.msra.mxu1 %v2021_v56 }
 0x8a0   : > { %4124 = vmatmul.mubr.msk.bf16.vlgmr.msra.gmra.mrb[40].mxu1 %vm1025_vm0, %v1982_v30 }
 0x8a1   : > { %4127 = vmatprep.mubr.msk.bf16.mxu1 %vm1025_vm0, %v1984_v60 }
 0x8a8   : > { %4128 = vmatmul.mubr.msk.bf16.gmra.mrb[44].mxu1 %vm1025_vm0, %v1986_v17 }
 0x8a9   : > { %2822 = vmatprep.mubr.bf16.mxu1 %v4953_v63 }
 0x8d1   : > { %v5803_v10 = vpop.f32.mrb[24].mxu1 }
 0x8d2   : > { %v5805_v49 = vpop.f32.mrb[25].mxu1 }
 0x8d3   : > { %v5807_v7 = vpop.f32.mrb[26].mxu1 }
 0x8d4   : > { %v1604_v52 = vpack.c.bf16 %v5807_v7, %v5803_v10  ;;  %v5811_v11 = vpop.f32.mrb[27].mxu1 }
 0x8d5   : > { %v1603_v58 = vpack.c.bf16 %v5811_v11, %v5805_v49 }
 0x932   : > { %v5815_v31 = vpop.f32.mrb[28].mxu1 }
 0x933   : > { %v5817_v34 = vpop.f32.mrb[29].mxu1 }
 0x934   : > { %v5819_v15 = vpop.f32.mrb[30].mxu1 }
 0x935   : > { %v1606_v50 = vpack.c.bf16 %v5819_v15, %v5815_v31  ;;  %v5823_v51 = vpop.f32.mrb[31].mxu1 }
 0x936   : > { %v1605_v18 = vpack.c.bf16 %v5823_v51, %v5817_v34 }
 0x93a   : > { %v5827_v21 = vpop.f32.mrb[32].mxu1 }
 0x93b   : > { %v5829_v8 = vpop.f32.mrb[33].mxu1 }
 0x93c   : > { %v5831_v38 = vpop.f32.mrb[34].mxu1 }
 0x93d   : > { %v1939_v42 = vpack.c.bf16 %v5831_v38, %v5827_v21  ;;  %v5835_v54 = vpop.f32.mrb[35].mxu1 }
 0x93e   : > { %v1938_v33 = vpack.c.bf16 %v5835_v54, %v5829_v8 }
 0x967   : > { %v5839_v26 = vpop.f32.mrb[36].mxu1 }
 0x968   : > { %v5841_v48 = vpop.f32.mrb[37].mxu1 }
 0x969   : > { %v5843_v36 = vpop.f32.mrb[38].mxu1 }
 0x96a   : > { %v1941_v0 = vpack.c.bf16 %v5843_v36, %v5839_v26  ;;  %v5847_v14 = vpop.f32.mrb[39].mxu1 }
 0x96b   : > { %v1940_v16 = vpack.c.bf16 %v5847_v14, %v5841_v48 }
 0x973   : > { %v4125_v24 = vpop.f32.mrb[40].mxu1 }
 0x974   : > { %v2057_v13 = vpop.f32.mrb[41].mxu1  ;;  %v2094_v61 = vsel %vm1115_vm1, %v4125_v24, -inf }
 0x975   : > { %v4126_v44 = vpop.f32.mrb[42].mxu1  ;;  %v2088_v45 = vsel %vm1115_vm1, %v2057_v13, -inf }
 0x976   : > { %2089 = vmax.xlane.f32.xlu0 %v2088_v45  ;;  %v2060_v40 = vpop.f32.mrb[43].mxu1  ;;  %v2097_v46 = vsel %vm1115_vm1, %v4126_v44, -inf }
 0x977   : > { %v2091_v59 = vsel %vm1115_vm1, %v2060_v40, -inf }
 0x978   : > { %2092 = vmax.xlane.f32.xlu1 %v2091_v59 }
 0x97a   : > { %2095 = vmax.xlane.f32.xlu0 %v2094_v61 }
 0x97b   : > { %v4129_v9 = vpop.f32.mrb[44].mxu1 }
 0x97c   : > { %v2073_v20 = vpop.f32.mrb[45].mxu1  ;;  %v2106_v53 = vsel %vm1115_vm1, %v4129_v9, -inf }
 0x97d   : > { %v4130_v12 = vpop.f32.mrb[46].mxu1  ;;  %v2100_v39 = vsel %vm1115_vm1, %v2073_v20, -inf }
 0x97e   : > { %2098 = vmax.xlane.f32.xlu0 %v2097_v46  ;;  %v2076_v29 = vpop.f32.mrb[47].mxu1  ;;  %v2109_v43 = vsel %vm1115_vm1, %v4130_v12, -inf }
 0x97f   : > { %v2103_v5 = vsel %vm1115_vm1, %v2076_v29, -inf }
 0x980   : > { %2104 = vmax.xlane.f32.xlu1 %v2103_v5 }
 0x982   : > { %2101 = vmax.xlane.f32.xlu0 %v2100_v39 }
 0x984   : > { %2110 = vmax.xlane.f32.xlu1 %v2109_v43 }
 0x986   : > { %2107 = vmax.xlane.f32.xlu0 %v2106_v53 }
 0x99c   : > { %2184 = vrot.lane.b32.xlu0 %v5396_v37, %s4956_s22 }
 0xa03   : > { %v2090_v47 = vpop.xlane.xlu0 %2089 }
 0xa04   : > { %v2112_v25 = vsub.f32 %v2057_v13, %v2090_v47 }
 0xa05   : > { %v2093_v22 = vpop.xlane.xlu1 %2092 }
 0xa06   : > { %v2120_v62 = vmul.f32 1.442695, %v2112_v25  ;;  %v2113_v27 = vsub.f32 %v2060_v40, %v2093_v22 }
 0xa07   : > { %v2096_v19 = vpop.xlane.xlu0 %2095 }
 0xa08   : > { %v2114_v23 = vsub.f32 %v4125_v24, %v2096_v19  ;;  %v2122_v56 = vmul.f32 1.442695, %v2113_v27 }
 0xa0a   : > { %v2124_v28 = vmul.f32 1.442695, %v2114_v23 }
 0xa0b   : > { %v2099_v1 = vpop.xlane.xlu0 %2098 }
 0xa0c   : > { %4540 = vpow2.f32 %v2124_v28  ;;  %v2115_v3 = vsub.f32 %v4126_v44, %v2099_v1 }
 0xa0d   : > { %v2105_v32 = vpop.xlane.xlu1 %2104  ;;  %4542 = vpow2.f32 %v2120_v62 }
 0xa0e   : > { %v2126_v30 = vmul.f32 1.442695, %v2115_v3 }
 0xa0f   : > { %v2102_v60 = vpop.xlane.xlu0 %2101 }
 0xa10   : > { %4544 = vpow2.f32 %v2126_v30  ;;  %v2116_v17 = vsub.f32 %v2073_v20, %v2102_v60  ;;  %v2117_v20 = vsub.f32 %v2076_v29, %v2105_v32 }
 0xa11   : > { %4546 = vpow2.f32 %v2122_v56  ;;  %v2111_v37 = vpop.xlane.xlu1 %2110 }
 0xa12   : > { %v2128_v24 = vmul.f32 1.442695, %v2116_v17  ;;  %v2119_v61 = vsub.f32 %v4130_v12, %v2111_v37  ;;  %v2130_v47 = vmul.f32 1.442695, %v2117_v20 }
 0xa13   : > { %v2108_v45 = vpop.xlane.xlu0 %2107 }
 0xa14   : > { %v2118_v13 = vsub.f32 %v4129_v9, %v2108_v45  ;;  %v2134_v43 = vmul.f32 1.442695, %v2119_v61 }
 0xa16   : > { %v5861_v59 = vpop.eup %4540  ;;  %v2132_v40 = vmul.f32 1.442695, %v2118_v13 }
 0xa17   : > { %v2185_v46 = vpop.permute.xlu0 %2184  ;;  %v2142_v44 = vsel %vm1115_vm1, %v5861_v59, 0.0  ;;  %v4543_v5 = vpop.eup %4542 }
 0xa18   : > { %4548 = vpow2.f32 %v2132_v40  ;;  %2143 = vadd.xlane.f32.xlu0 %v2142_v44  ;;  %4131 = vmatprep.subr.bf16.mxu0 %v2185_v46  ;;  %v2136_v9 = vsel %vm1115_vm1, %v4543_v5, 0.0 }
 0xa19   : > { %4132 = vmatpush3.bf16.msra.mxu0 %v2185_v46  ;;  %4550 = vpow2.f32 %v2128_v24 }
 0xa1a   : > { %v5865_v39 = vpop.eup %4544  ;;  %4552 = vpow2.f32 %v2134_v43 }
 0xa1b   : > { %v2145_v12 = vsel %vm1115_vm1, %v5865_v39, 0.0  ;;  %v4547_v53 = vpop.eup %4546  ;;  %4554 = vpow2.f32 %v2130_v47  ;;  %v4342_v47 = vld [vmem:[#allocation12 + $0x10] sm:$0xff]  }
 0xa1c   : > { %2137 = vadd.xlane.f32.xlu0 %v2136_v9  ;;  %2146 = vadd.xlane.f32.xlu1 %v2145_v12  ;;  %v2139_v25 = vsel %vm1115_vm1, %v4547_v53, 0.0 }
 0xa20   : > { %2140 = vadd.xlane.f32.xlu1 %v2139_v25  ;;  %v4343_v25 = vld [vmem:[#allocation12 + $0x18] sm:$0xff]  }
 0xa22   : > { %v5871_v22 = vpop.eup %4548 }
 0xa23   : > { %v2154_v29 = vsel %vm1115_vm1, %v5871_v22, 0.0  ;;  %v5875_v19 = vpop.eup %4550 }
 0xa24   : > { %2155 = vadd.xlane.f32.xlu1 %v2154_v29  ;;  %v2148_v23 = vsel %vm1115_vm1, %v5875_v19, 0.0  ;;  %v5879_v62 = vpop.eup %4552  ;;  %v4344_v29 = vld [vmem:[#allocation12 + $0x20] sm:$0xff]  }
 0xa25   : > { %v2157_v27 = vsel %vm1115_vm1, %v5879_v62, 0.0  ;;  %v4555_v28 = vpop.eup %4554 }
 0xa26   : > { %v2151_v1 = vsel %vm1115_vm1, %v4555_v28, 0.0 }
 0xa28   : > { %2149 = vadd.xlane.f32.xlu1 %v2148_v23  ;;  %v4347_v23 = vld [vmem:[#allocation12 + $0x38] sm:$0xff]  }
 0xa2c   : > { %2158 = vadd.xlane.f32.xlu1 %v2157_v27 }
 0xa30   : > { %2152 = vadd.xlane.f32.xlu1 %v2151_v1 }
 0xa32   : > { %2188 = vrot.lane.b32.xlu0 %v5416_v57, %s4956_s22 }
 0xa36   : > { %2190 = vrot.lane.b32.xlu0 %v5413_v55, %s4956_s22 }
 0xa3a   : > { %1611 = vrot.lane.b32.xlu0 %v1603_v58, %s4956_s22 }
 0xa3e   : > { %1946 = vrot.lane.b32.xlu0 %v1938_v33, %s4955_s21 }
 0xa41   : > { %2186 = vrot.lane.b32.xlu1 %v5394_v35, %s4956_s22 }
 0xa45   : > { %1613 = vrot.lane.b32.xlu1 %v1604_v52, %s4956_s22 }
 0xa49   : > { %1948 = vrot.lane.b32.xlu1 %v1939_v42, %s4955_s21 }
 0xaa5   : > { %v2144_v55 = vpop.xlane.xlu0 %2143 }
 0xaa9   : > { %v2138_v57 = vpop.xlane.xlu0 %2137  ;;  %v2147_v49 = vpop.xlane.xlu1 %2146 }
 0xaaa   : > { %4556 = vrcp.f32 %v2138_v57 }
 0xaad   : > { %v2189_v11 = vpop.permute.xlu0 %2188  ;;  %v2141_v58 = vpop.xlane.xlu1 %2140 }
 0xaae   : > { %4558 = vrcp.f32 %v2141_v58 }
 0xaaf   : > { %4560 = vrcp.f32 %v2147_v49 }
 0xab0   : > { %4562 = vrcp.f32 %v2144_v55 }
 0xab1   : > { %v2191_v8 = vpop.permute.xlu0 %2190  ;;  %v2156_v54 = vpop.xlane.xlu1 %2155 }
 0xab4   : > { %v4557_v3 = vpop.eup %4556 }
 0xab5   : > { %v1612_v35 = vpop.permute.xlu0 %1611  ;;  %v2150_v33 = vpop.xlane.xlu1 %2149  ;;  %v2168_v21 = vmul.f32 %v4557_v3, %v4543_v5  ;;  %v3752_v3 = vld [vmem:[%s6319_s6] ss:$0 sm:$0xff] }
 0xab6   : > { %1624 = vst.msk [vmem:[#allocation3] sm:$0xff] %vm1623_vm2, %v1612_v35  ;;  %4564 = vrcp.f32 %v2150_v33 }
 0xab8   : > { %v4559_v10 = vpop.eup %4558 }
 0xab9   : > { %v1947_v7 = vpop.permute.xlu0 %1946  ;;  %v2159_v52 = vpop.xlane.xlu1 %2158  ;;  %v2169_v38 = vmul.f32 %v4559_v10, %v4547_v53  ;;  %v4341_v53 = vld [vmem:[#allocation12 + $0x8] sm:$0xff]  }
 0xaba   : > { %1959 = vst.msk [vmem:[#allocation3] sm:$0xff] %vm1958_vm3, %v1947_v7  ;;  %v4561_v30 = vpop.eup %4560  ;;  %v4652_v7 = vld [vmem:[%s5292_s30] sm:$0xff] }
 0xabb   : > { %v2176_v42 = vpack.c.bf16 %v2169_v38, %v2168_v21  ;;  %v4563_v17 = vpop.eup %4562  ;;  %v2171_v13 = vmul.f32 %v4561_v30, %v5865_v39  ;;  %v4654_v30 = vld [vmem:[%s5292_s30 + $0x8] sm:$0xff] }
 0xabc   : > { %v2170_v40 = vmul.f32 %v4563_v17, %v5861_v59  ;;  %v4340_v59 = vld [vmem:[#allocation12] sm:$0xff]  }
 0xabd   : > { %4139 = vmatprep.mubr.msk.bf16.mxu0 %vm1115_vm1, %v2176_v42  ;;  %v2153_v32 = vpop.xlane.xlu1 %2152  ;;  %v4653_v42 = vld [vmem:[%s5292_s30 + $0x10] sm:$0xff] }
 0xabe   : > { %4566 = vrcp.f32 %v2153_v32  ;;  %v2177_v44 = vpack.c.bf16 %v2171_v13, %v2170_v40 }
 0xabf   : > { %4568 = vrcp.f32 %v2159_v52 }
 0xac0   : > { %4570 = vrcp.f32 %v2156_v54  ;;  %v4565_v37 = vpop.eup %4564 }
 0xac1   : > { %v2187_v56 = vpop.permute.xlu1 %2186  ;;  %v2172_v46 = vmul.f32 %v4565_v37, %v5875_v19  ;;  %v4345_v19 = vld [vmem:[#allocation12 + $0x28] sm:$0xff]  }
 0xac2   : > { %4133 = vmatprep.subr.bf16.mxu0 %v2187_v56 }
 0xac3   : > { %4134 = vmatpush3.bf16.msra.mxu0 %v2187_v56 }
 0xac4   : > { %4135 = vmatprep.subr.bf16.mxu0 %v2189_v11 }
 0xac5   : > { %v1614_v60 = vpop.permute.xlu1 %1613 }
 0xac6   : > { %1625 = vst.msk [vmem:[#allocation3 + $0x8] sm:$0xff] %vm1623_vm2, %v1614_v60 }
 0xac7   : > { %4136 = vmatpush3.bf16.msra.mxu0 %v2189_v11 }
 0xac8   : > { %v4567_v45 = vpop.eup %4566  ;;  %4137 = vmatprep.subr.bf16.mxu0 %v2191_v8 }
 0xac9   : > { %v1949_v24 = vpop.permute.xlu1 %1948  ;;  %v2173_v61 = vmul.f32 %v4567_v45, %v4555_v28  ;;  %v4569_v5 = vpop.eup %4568  ;;  %v4655_v45 = vld [vmem:[%s5292_s30 + $0x18] sm:$0xff] }
 0xaca   : > { %1960 = vst.msk [vmem:[#allocation3 + $0x8] sm:$0xff] %vm1958_vm3, %v1949_v24  ;;  %v4571_v43 = vpop.eup %4570  ;;  %v2175_v39 = vmul.f32 %v4569_v5, %v5879_v62 }
 0xacb   : > { %4138 = vmatpush3.bf16.msra.mxu0 %v2191_v8  ;;  %v2178_v20 = vpack.c.bf16 %v2173_v61, %v2172_v46  ;;  %v2174_v9 = vmul.f32 %v4571_v43, %v5871_v22  ;;  %v4346_v22 = vld [vmem:[#allocation12 + $0x30] sm:$0xff]   ;;  %v4656_v46 = vld [vmem:[%s5292_s30 + $0x20] sm:$0xff] }
 0xacc   : > { %4147 = vmatprep.subr.bf16.mxu0 %v4340_v59  ;;  %v4657_v43 = vld [vmem:[%s5292_s30 + $0x30] sm:$0xff] }
 0xacd   : > { %v2179_v12 = vpack.c.bf16 %v2175_v39, %v2174_v9 }
 0xace   : > { %4140 = vmatmul.mubr.msk.bf16.vlgmr.msra.gmra.mrb[32].mxu0 %vm1115_vm1, %v2177_v44 }
 0xacf   : > { %4143 = vmatprep.mubr.msk.bf16.mxu0 %vm1115_vm1, %v2178_v20  ;;  %4148 = vmatpush3.bf16.msra.mxu0 %v4340_v59 }
 0xad0   : > { %4149 = vmatprep.subr.bf16.mxu0 %v4341_v53 }
 0xad3   : > { %4150 = vmatpush3.bf16.msra.mxu0 %v4341_v53  ;;  %v4659_v53 = vld [vmem:[%s5292_s30 + $0x38] sm:$0xff] }
 0xad4   : > { %4151 = vmatprep.subr.bf16.mxu0 %v4342_v47 }
 0xad6   : > { %4144 = vmatmul.mubr.msk.bf16.gmra.mrb[36].mxu0 %vm1115_vm1, %v2179_v12  ;;  %v4658_v12 = vld [vmem:[%s5292_s30 + $0x28] sm:$0xff]  ;;  %s6357_s30 = sld [smem:[#allocation25_spill]] }
 0xad7   : > { %4152 = vmatpush3.bf16.msra.mxu0 %v4342_v47 }
 0xad8   : > { %4153 = vmatprep.subr.bf16.mxu0 %v4343_v25 }
 0xadb   : > { %4154 = vmatpush3.bf16.msra.mxu0 %v4343_v25 }
 0xadc   : > { %4155 = vmatprep.subr.bf16.mxu0 %v4344_v29 }
 0xadf   : > { %4156 = vmatpush3.bf16.msra.mxu0 %v4344_v29 }
 0xae0   : > { %4157 = vmatprep.subr.bf16.mxu0 %v4345_v19 }
 0xae3   : > { %4158 = vmatpush3.bf16.msra.mxu0 %v4345_v19 }
 0xae4   : > { %4159 = vmatprep.subr.bf16.mxu0 %v4346_v22 }
 0xae7   : > { %4160 = vmatpush3.bf16.msra.mxu0 %v4346_v22  ;;  %v4348_v22 = vld [vmem:[#allocation13] ss:$16 sps:$4 sm:$0xff]  }
 0xae8   : > { %4161 = vmatprep.subr.bf16.mxu0 %v4347_v23 }
 0xaeb   : > { %4162 = vmatpush3.bf16.msra.mxu0 %v4347_v23  ;;  %v4350_v23 = vld [vmem:[#allocation13 + $0x4] ss:$16 sps:$4 sm:$0xff]  }
 0xaec   : > { %2790 = vmatprep.subr.bf16.mxu1 %v4350_v23  ;;  %v4380_v23 = vld [vmem:[#allocation13 + $0xa4] ss:$16 sps:$4 sm:$0xff]  }
 0xaed   : > { %2791 = vmatpush1.bf16.msra.mxu1 %v4348_v22  ;;  %v4375_v22 = vld [vmem:[#allocation13 + $0x88] ss:$16 sps:$4 sm:$0xff]  }
 0xba1   : > { %v4141_v62 = vpop.f32.mrb[32].mxu0 }
 0xba2   : > { %v2242_v27 = vpop.f32.mrb[33].mxu0 }
 0xba3   : > { %v4142_v28 = vpop.f32.mrb[34].mxu0 }
 0xba4   : > { %v2274_v1 = vpack.c.bf16 %v4142_v28, %v4141_v62  ;;  %v2245_v55 = vpop.f32.mrb[35].mxu0  ;;  %v4351_v62 = vld [vmem:[#allocation13 + $0x8] ss:$16 sps:$4 sm:$0xff]   ;;  %v4356_v28 = vld [vmem:[#allocation13 + $0x24] ss:$16 sps:$4 sm:$0xff]  }
 0xba5   : > { %v2273_v57 = vpack.c.bf16 %v2245_v55, %v2242_v27  ;;  %v4353_v27 = vld [vmem:[#allocation13 + $0xc] ss:$16 sps:$4 sm:$0xff]   ;;  %v4354_v55 = vld [vmem:[#allocation13 + $0x20] ss:$16 sps:$4 sm:$0xff]   ;;  %2792 = vmatprep.subr.bf16.mxu1 %v4356_v28  ;;  %v4381_v28 = vld [vmem:[#allocation13 + $0xa8] ss:$16 sps:$4 sm:$0xff]  }
 0xba6   : > { %2283 = vrot.lane.b32.xlu1 %v2274_v1, %s4954_s29  ;;  %v4359_v1 = vld [vmem:[#allocation13 + $0x2c] ss:$16 sps:$4 sm:$0xff]   ;;  %2863 = vmatprep.subr.bf16.mxu0 %v4353_v27  ;;  %v4378_v27 = vld [vmem:[#allocation13 + $0xa0] ss:$16 sps:$4 sm:$0xff]  }
 0xba7   : > { %2281 = vrot.lane.b32.xlu0 %v2273_v57, %s4954_s29  ;;  %v4357_v57 = vld [vmem:[#allocation13 + $0x28] ss:$16 sps:$4 sm:$0xff]   ;;  %2793 = vmatpush1.bf16.msra.mxu1 %v4354_v55  ;;  %v4389_v55 = vld [vmem:[#allocation13 + $0xcc] ss:$16 sps:$4 sm:$0xff]  }
 0xba9   : > { %v4145_v49 = vpop.f32.mrb[36].mxu0 }
 0xbaa   : > { %1617 = vrot.lane.b32.xlu1 %v1606_v50, %s4956_s22  ;;  %v2258_v11 = vpop.f32.mrb[37].mxu0 }
 0xbab   : > { %1615 = vrot.lane.b32.xlu0 %v1605_v18, %s4956_s22  ;;  %v4146_v58 = vpop.f32.mrb[38].mxu0 }
 0xbac   : > { %v2276_v8 = vpack.c.bf16 %v4146_v58, %v4145_v49  ;;  %v2261_v54 = vpop.f32.mrb[39].mxu0 }
 0xbad   : > { %v2275_v35 = vpack.c.bf16 %v2261_v54, %v2258_v11 }
 0xbae   : > { %1952 = vrot.lane.b32.xlu1 %v1941_v0, %s4955_s21 }
 0xbaf   : > { %1950 = vrot.lane.b32.xlu0 %v1940_v16, %s4955_s21 }
 0xbb2   : > { %2287 = vrot.lane.b32.xlu1 %v2276_v8, %s4954_s29 }
 0xbb3   : > { %2285 = vrot.lane.b32.xlu0 %v2275_v35, %s4954_s29  ;;  %s6358_s29 = sld [smem:[#allocation26_spill]] }
 0xc18   : > { %v2284_v31 = vpop.permute.xlu1 %2283 }
 0xc19   : > { %2295 = vst.msk [vmem:[#allocation3 + $0x8] sm:$0xff] %vm2293_vm4, %v2284_v31  ;;  %v2282_v34 = vpop.permute.xlu0 %2281 }
 0xc1a   : > { %2294 = vst.msk [vmem:[#allocation3] sm:$0xff] %vm2293_vm4, %v2282_v34 }
 0xc1c   : > { %v1618_v15 = vpop.permute.xlu1 %1617 }
 0xc1d   : > { %1627 = vst.msk [vmem:[#allocation3 + $0x18] sm:$0xff] %vm1623_vm2, %v1618_v15  ;;  %v1616_v50 = vpop.permute.xlu0 %1615 }
 0xc1e   : > { %1626 = vst.msk [vmem:[#allocation3 + $0x10] sm:$0xff] %vm1623_vm2, %v1616_v50 }
 0xc20   : > { %v1953_v51 = vpop.permute.xlu1 %1952  ;;  %v2299_v48 = vld [vmem:[#allocation3 + $0x8] sm:$0xff] }
 0xc21   : > { %1962 = vst.msk [vmem:[#allocation3 + $0x18] sm:$0xff] %vm1958_vm3, %v1953_v51  ;;  %v1951_v18 = vpop.permute.xlu0 %1950  ;;  %v2298_v26 = vld [vmem:[#allocation3] sm:$0xff] }
 0xc22   : > { %1961 = vst.msk [vmem:[#allocation3 + $0x10] sm:$0xff] %vm1958_vm3, %v1951_v18  ;;  %4163 = vmatprep.mubr.bf16.mxu0 %v2298_v26 }
 0xc23   : > { %4164 = vmatmul.mubr.bf16.vlgmr.msra.gmra.mrb[40].mxu0 %v2299_v48 }
 0xc24   : > { %v2288_v36 = vpop.permute.xlu1 %2287  ;;  %2864 = vmatpush1.bf16.msra.mxu0 %v4351_v62  ;;  %v4383_v62 = vld [vmem:[#allocation13 + $0xac] ss:$16 sps:$4 sm:$0xff]  }
 0xc25   : > { %2297 = vst.msk [vmem:[#allocation3 + $0x18] sm:$0xff] %vm2293_vm4, %v2288_v36  ;;  %v2286_v0 = vpop.permute.xlu0 %2285  ;;  %2865 = vmatprep.subr.bf16.mxu0 %v4359_v1  ;;  %v4386_v1 = vld [vmem:[#allocation13 + $0xc4] ss:$16 sps:$4 sm:$0xff]  }
 0xc26   : > { %2296 = vst.msk [vmem:[#allocation3 + $0x10] sm:$0xff] %vm2293_vm4, %v2286_v0 }
 0xc28   : > { %2866 = vmatpush1.bf16.msra.mxu0 %v4357_v57  ;;  %v4384_v57 = vld [vmem:[#allocation13 + $0xc0] ss:$16 sps:$4 sm:$0xff]  }
 0xc2c   : > { %v2301_v16 = vld [vmem:[#allocation3 + $0x18] sm:$0xff] }
 0xc2d   : > { %v2300_v14 = vld [vmem:[#allocation3 + $0x10] sm:$0xff] }
 0xc2e   : > { %4167 = vmatprep.mubr.bf16.mxu0 %v2300_v14 }
 0xc2f   : > { %4168 = vmatmul.mubr.bf16.gmra.mrb[44].mxu0 %v2301_v16 }
 0xc30   : > { %2895 = vmatprep.mubr.bf16.mxu0 %v4953_v63 }
 0xcf6   : > { %v4165_v33 = vpop.f32.mrb[40].mxu0 }
 0xcf7   : > { %v2400_v10 = vpop.f32.mrb[41].mxu0  ;;  %v2433_v32 = vadd.f32 %v4653_v42, %v4165_v33 }
 0xcf8   : > { %v2431_v52 = vadd.f32 %v4652_v7, %v2400_v10  ;;  %v4166_v21 = vpop.f32.mrb[42].mxu0 }
 0xcf9   : > { %v2403_v38 = vpop.f32.mrb[43].mxu0  ;;  %v5959_v37 = vadd.f32 %v3752_v3, %v2433_v32  ;;  %v2434_v13 = vadd.f32 %v4655_v45, %v4166_v21 }
 0xcfa   : > { %v5953_v56 = vadd.f32 %v3752_v3, %v2431_v52  ;;  %v2432_v60 = vadd.f32 %v4654_v30, %v2403_v38 }
 0xcfb   : > { %v5964_v24 = vadd.f32 %v3752_v3, %v2434_v13 }
 0xcfc   : > { %v5956_v17 = vadd.f32 %v3752_v3, %v2432_v60  ;;  %2456 = vadd.xlane.f32.xlu0 %v5953_v56 }
 0xcfe   : > { %2458 = vadd.xlane.f32.xlu1 %v5956_v17 }
 0xd00   : > { %2460 = vadd.xlane.f32.xlu0 %v5959_v37 }
 0xd02   : > { %v4169_v61 = vpop.f32.mrb[44].mxu0 }
 0xd03   : > { %v2416_v40 = vpop.f32.mrb[45].mxu0  ;;  %v2437_v39 = vadd.f32 %v4657_v43, %v4169_v61  ;;  %v4362_v61 = vld [vmem:[#allocation13 + $0x44] ss:$16 sps:$4 sm:$0xff]   ;;  %v4371_v43 = vld [vmem:[#allocation13 + $0x6c] ss:$16 sps:$4 sm:$0xff]  }
 0xd04   : > { %v2435_v44 = vadd.f32 %v4656_v46, %v2416_v40  ;;  %2462 = vadd.xlane.f32.xlu0 %v5964_v24  ;;  %v4170_v5 = vpop.f32.mrb[46].mxu0  ;;  %v4365_v40 = vld [vmem:[#allocation13 + $0x4c] ss:$16 sps:$4 sm:$0xff]   ;;  %v4360_v46 = vld [vmem:[#allocation13 + $0x40] ss:$16 sps:$4 sm:$0xff]   ;;  %2794 = vmatprep.subr.bf16.mxu1 %v4362_v61 }
 0xd05   : > { %v2419_v20 = vpop.f32.mrb[47].mxu0  ;;  %v2438_v47 = vadd.f32 %v4659_v53, %v4170_v5  ;;  %v5976_v29 = vadd.f32 %v3752_v3, %v2437_v39  ;;  %2867 = vmatprep.subr.bf16.mxu0 %v4365_v40  ;;  %2795 = vmatpush1.bf16.msra.mxu1 %v4360_v46  ;;  %v4366_v39 = vld [vmem:[#allocation13 + $0x60] ss:$16 sps:$4 sm:$0xff]   ;;  %v4377_v53 = vld [vmem:[#allocation13 + $0x8c] ss:$16 sps:$4 sm:$0xff]  }
 0xd06   : > { %v5969_v9 = vadd.f32 %v3752_v3, %v2435_v44  ;;  %v2436_v59 = vadd.f32 %v4658_v12, %v2419_v20  ;;  %v4363_v44 = vld [vmem:[#allocation13 + $0x48] ss:$16 sps:$4 sm:$0xff]   ;;  %v4368_v20 = vld [vmem:[#allocation13 + $0x64] ss:$16 sps:$4 sm:$0xff]   ;;  %v6026_v61 = vld [vmem:[%s6356_s17] ss:$0 sm:$0xff] }
 0xd07   : > { %v5979_v19 = vadd.f32 %v3752_v3, %v2438_v47  ;;  %2868 = vmatpush1.bf16.msra.mxu0 %v4363_v44  ;;  %v4369_v12 = vld [vmem:[#allocation13 + $0x68] ss:$16 sps:$4 sm:$0xff]   ;;  %2796 = vmatprep.subr.bf16.mxu1 %v4368_v20  ;;  %v4372_v47 = vld [vmem:[#allocation13 + $0x80] ss:$16 sps:$4 sm:$0xff]  }
 0xd08   : > { %v5973_v25 = vadd.f32 %v3752_v3, %v2436_v59  ;;  %2464 = vadd.xlane.f32.xlu0 %v5969_v9  ;;  %2869 = vmatprep.subr.bf16.mxu0 %v4371_v43  ;;  %v4374_v59 = vld [vmem:[#allocation13 + $0x84] ss:$16 sps:$4 sm:$0xff]  }
 0xd09   : > { %2797 = vmatpush1.bf16.msra.mxu1 %v4366_v39 }
 0xd0a   : > { %2466 = vadd.xlane.f32.xlu1 %v5973_v25  ;;  %2798 = vmatprep.subr.bf16.mxu1 %v4374_v59 }
 0xd0b   : > { %2870 = vmatpush1.bf16.msra.mxu0 %v4369_v12 }
 0xd0c   : > { %2468 = vadd.xlane.f32.xlu0 %v5976_v29  ;;  %2871 = vmatprep.subr.bf16.mxu0 %v4377_v53 }
 0xd0d   : > { %2799 = vmatpush1.bf16.msra.mxu1 %v4372_v47 }
 0xd0e   : > { %2470 = vadd.xlane.f32.xlu1 %v5979_v19  ;;  %2800 = vmatprep.subr.bf16.mxu1 %v4380_v23  ;;  %v3754_v23 = vld [vmem:[%s6357_s30] ss:$0 sm:$0xff]  ;;  %s3522_s30 = scalar_lea.sflag [#allocation6], %s5286_s1 }
 0xd0f   : > { %2872 = vmatpush1.bf16.msra.mxu0 %v4375_v22 }
 0xd10   : > { %2873 = vmatprep.subr.bf16.mxu0 %v4383_v62 }
 0xd11   : > { %2801 = vmatpush1.bf16.msra.mxu1 %v4378_v27 }
 0xd12   : > { %2802 = vmatprep.subr.bf16.mxu1 %v4386_v1 }
 0xd13   : > { %2874 = vmatpush1.bf16.msra.mxu0 %v4381_v28 }
 0xd14   : > { %2875 = vmatprep.subr.bf16.mxu0 %v4389_v55 }
 0xd15   : > { %2803 = vmatpush1.bf16.msra.mxu1 %v4384_v57 }
 0xd89   : > { %v2457_v49 = vpop.xlane.xlu0 %2456 }
 0xd8a   : > { %v2472_v11 = vmul.f32 0.0078125, %v2457_v49  ;;  %v4387_v49 = vld [vmem:[#allocation13 + $0xc8] ss:$16 sps:$4 sm:$0xff]  }
 0xd8b   : > { %v2459_v58 = vpop.xlane.xlu1 %2458  ;;  %2876 = vmatpush1.bf16.msra.mxu0 %v4387_v49 }
 0xd8c   : > { %v5984_v8 = vsub.f32 %v5953_v56, %v2472_v11  ;;  %v2473_v54 = vmul.f32 0.0078125, %v2459_v58  ;;  %v4392_v11 = vld [vmem:[#allocation13 + $0xe4] ss:$16 sps:$4 sm:$0xff]   ;;  %v4395_v58 = vld [vmem:[#allocation13 + $0xec] ss:$16 sps:$4 sm:$0xff]  }
 0xd8d   : > { %v2461_v35 = vpop.xlane.xlu0 %2460  ;;  %2804 = vmatprep.subr.bf16.mxu1 %v4392_v11  ;;  %2877 = vmatprep.subr.bf16.mxu0 %v4395_v58  ;;  %v4398_v11 = vld [vmem:[#allocation15] sm:$0xff]  }
 0xd8e   : > { %v5987_v31 = vsub.f32 %v5956_v17, %v2473_v54  ;;  %v2474_v34 = vmul.f32 0.0078125, %v2461_v35  ;;  %v2488_v15 = vmul.f32 %v5984_v8, %v5984_v8  ;;  %v4390_v54 = vld [vmem:[#allocation13 + $0xe0] ss:$16 sps:$4 sm:$0xff]   ;;  %v4393_v35 = vld [vmem:[#allocation13 + $0xe8] ss:$16 sps:$4 sm:$0xff]  }
 0xd8f   : > { %2805 = vmatpush1.bf16.msra.mxu1 %v4390_v54  ;;  %2878 = vmatpush1.bf16.msra.mxu0 %v4393_v35  ;;  %v4399_v58 = vld [vmem:[#allocation15 + $0x80] sm:$0xff]   ;;  %v4400_v54 = vld [vmem:[#allocation15 + $0x48] sm:$0xff]  }
 0xd90   : > { %v5992_v50 = vsub.f32 %v5959_v37, %v2474_v34  ;;  %2496 = vadd.xlane.f32.xlu0 %v2488_v15  ;;  %v2489_v51 = vmul.f32 %v5987_v31, %v5987_v31  ;;  %v4396_v34 = vld [vmem:[#allocation15 + $0x40] sm:$0xff]   ;;  %v4401_v35 = vld [vmem:[#allocation15 + $0xc8] sm:$0xff]  }
 0xd91   : > { %v2463_v18 = vpop.xlane.xlu0 %2462  ;;  %v4397_v15 = vld [vmem:[#allocation15 + $0xc0] sm:$0xff]   ;;  %3915 = vmatprep.subr.bf16.mxu1 %v4396_v34 }
 0xd92   : > { %v2475_v26 = vmul.f32 0.0078125, %v2463_v18  ;;  %2498 = vadd.xlane.f32.xlu1 %v2489_v51  ;;  %v2490_v48 = vmul.f32 %v5992_v50, %v5992_v50  ;;  %3955 = vmatprep.subr.bf16.mxu0 %v4397_v15 }
 0xd94   : > { %v5999_v36 = vsub.f32 %v5964_v24, %v2475_v26  ;;  %2500 = vadd.xlane.f32.xlu0 %v2490_v48 }
 0xd95   : > { %v2465_v0 = vpop.xlane.xlu0 %2464 }
 0xd96   : > { %v2476_v14 = vmul.f32 0.0078125, %v2465_v0  ;;  %v2491_v16 = vmul.f32 %v5999_v36, %v5999_v36 }
 0xd97   : > { %v2467_v33 = vpop.xlane.xlu1 %2466 }
 0xd98   : > { %v6004_v3 = vsub.f32 %v5969_v9, %v2476_v14  ;;  %v2477_v10 = vmul.f32 0.0078125, %v2467_v33  ;;  %2502 = vadd.xlane.f32.xlu1 %v2491_v16 }
 0xd99   : > { %v2469_v7 = vpop.xlane.xlu0 %2468 }
 0xd9a   : > { %v6007_v52 = vsub.f32 %v5973_v25, %v2477_v10  ;;  %v2478_v21 = vmul.f32 0.0078125, %v2469_v7  ;;  %v2492_v38 = vmul.f32 %v6004_v3, %v6004_v3 }
 0xd9b   : > { %v2471_v42 = vpop.xlane.xlu1 %2470 }
 0xd9c   : > { %v6012_v32 = vsub.f32 %v5976_v29, %v2478_v21  ;;  %v2479_v30 = vmul.f32 0.0078125, %v2471_v42  ;;  %2504 = vadd.xlane.f32.xlu0 %v2492_v38  ;;  %v2493_v60 = vmul.f32 %v6007_v52, %v6007_v52 }
 0xd9e   : > { %v6017_v45 = vsub.f32 %v5979_v19, %v2479_v30  ;;  %2506 = vadd.xlane.f32.xlu1 %v2493_v60  ;;  %v2494_v13 = vmul.f32 %v6012_v32, %v6012_v32 }
 0xda0   : > { %2508 = vadd.xlane.f32.xlu0 %v2494_v13  ;;  %v2495_v5 = vmul.f32 %v6017_v45, %v6017_v45 }
 0xda2   : > { %2510 = vadd.xlane.f32.xlu1 %v2495_v5 }
 0xe1d   : > { %v2497_v51 = vpop.xlane.xlu0 %2496 }
 0xe1e   : > { %v2512_v18 = vmul.f32 0.0078125, %v2497_v51 }
 0xe1f   : > { %v2499_v26 = vpop.xlane.xlu1 %2498 }
 0xe20   : > { %v2520_v48 = vadd.f32 1e-05, %v2512_v18  ;;  %v2513_v0 = vmul.f32 0.0078125, %v2499_v26  ;;  %v4403_v18 = vld [vmem:[#allocation15 + $0x88] sm:$0xff]  }
 0xe21   : > { %v2501_v14 = vpop.xlane.xlu0 %2500 }
 0xe22   : > { %4572 = vrsqrt.f32 %v2520_v48  ;;  %v2521_v16 = vadd.f32 1e-05, %v2513_v0  ;;  %v2514_v33 = vmul.f32 0.0078125, %v2501_v14 }
 0xe24   : > { %4574 = vrsqrt.f32 %v2521_v16  ;;  %v2522_v10 = vadd.f32 1e-05, %v2514_v33 }
 0xe25   : > { %v2503_v7 = vpop.xlane.xlu1 %2502 }
 0xe26   : > { %4576 = vrsqrt.f32 %v2522_v10  ;;  %v2515_v21 = vmul.f32 0.0078125, %v2503_v7 }
 0xe28   : > { %v2523_v38 = vadd.f32 1e-05, %v2515_v21 }
 0xe29   : > { %v2505_v42 = vpop.xlane.xlu0 %2504 }
 0xe2a   : > { %4578 = vrsqrt.f32 %v2523_v38  ;;  %v2516_v30 = vmul.f32 0.0078125, %v2505_v42 }
 0xe2b   : > { %v2507_v60 = vpop.xlane.xlu1 %2506 }
 0xe2c   : > { %v4573_v13 = vpop.eup %4572  ;;  %v2524_v40 = vadd.f32 1e-05, %v2516_v30  ;;  %v2517_v46 = vmul.f32 0.0078125, %v2507_v60 }
 0xe2d   : > { %v2536_v44 = vmul.f32 %v4573_v13, %v5984_v8  ;;  %v2509_v5 = vpop.xlane.xlu0 %2508 }
 0xe2e   : > { %v4575_v20 = vpop.eup %4574  ;;  %4580 = vrsqrt.f32 %v2524_v40  ;;  %v2525_v43 = vadd.f32 1e-05, %v2517_v46  ;;  %v2518_v39 = vmul.f32 0.0078125, %v2509_v5  ;;  %v4405_v5 = vld [vmem:[#allocation15 + $0xd0] sm:$0xff]  }
 0xe2f   : > { %v2550_v12 = vmul.f32 %v6026_v61, %v2536_v44  ;;  %v2537_v59 = vmul.f32 %v4575_v20, %v5987_v31  ;;  %v2511_v53 = vpop.xlane.xlu1 %2510  ;;  %v4407_v20 = vld [vmem:[#allocation15 + $0x90] sm:$0xff]  }
 0xe30   : > { %v4577_v47 = vpop.eup %4576  ;;  %4582 = vrsqrt.f32 %v2525_v43  ;;  %v2519_v22 = vmul.f32 0.0078125, %v2511_v53  ;;  %v2526_v8 = vadd.f32 1e-05, %v2518_v39  ;;  %v4408_v43 = vld [vmem:[#allocation15 + $0x58] sm:$0xff]   ;;  %v4414_v53 = vld [vmem:[#allocation15 + $0x20] sm:$0xff]  }
 0xe31   : > { %v2551_v62 = vmul.f32 %v6026_v61, %v2537_v59  ;;  %v2564_v28 = vadd.f32 %v3754_v23, %v2550_v12  ;;  %v2538_v55 = vmul.f32 %v4577_v47, %v5992_v50  ;;  %v4409_v39 = vld [vmem:[#allocation15 + $0xd8] sm:$0xff]   ;;  %v4413_v59 = vld [vmem:[#allocation15 + $0xe0] sm:$0xff]  }
 0xe32   : > { %v2527_v27 = vadd.f32 1e-05, %v2519_v22  ;;  %v4411_v12 = vld [vmem:[#allocation15 + $0x98] sm:$0xff]   ;;  %v4415_v47 = vld [vmem:[#allocation15 + $0xa0] sm:$0xff]   ;;  %v4416_v22 = vld [vmem:[#allocation15 + $0x68] sm:$0xff]  }
 0xe33   : > { %v2565_v1 = vadd.f32 %v3754_v23, %v2551_v62  ;;  %v2552_v34 = vmul.f32 %v6026_v61, %v2538_v55  ;;  %v4418_v62 = vld [vmem:[#allocation15 + $0x28] sm:$0xff]   ;;  %v4423_v55 = vld [vmem:[#allocation15 + $0xb0] sm:$0xff]  }
 0xe34   : > { %v4579_v57 = vpop.eup %4578  ;;  %4584 = vrsqrt.f32 %v2527_v27  ;;  %v4420_v27 = vld [vmem:[#allocation15 + $0x70] sm:$0xff]  }
 0xe35   : > { %v2572_v49 = vpack.c.bf16 %v2565_v1, %v2564_v28  ;;  %v2539_v31 = vmul.f32 %v4579_v57, %v5999_v36  ;;  %4586 = vrsqrt.f32 %v2526_v8  ;;  %v4402_v36 = vld [vmem:[#allocation15 + $0x8] sm:$0xff]   ;;  %v2566_v48 = vadd.f32 %v3754_v23, %v2552_v34  ;;  %v4421_v28 = vld [vmem:[#allocation15 + $0xf0] sm:$0xff]   ;;  %v4424_v57 = vld [vmem:[#allocation15 + $0x78] sm:$0xff]  }
 0xe36   : > { %v4419_v8 = vld [vmem:[#allocation15 + $0xa8] sm:$0xff]   ;;  %v4422_v1 = vld [vmem:[#allocation15 + $0x30] sm:$0xff]  }
 0xe37   : > { %2823 = vmatmul.mubr.bf16.vlgmr.msra.gmra.mrb[48].mxu1 %v2572_v49  ;;  %2896 = vmatmul.mubr.bf16.vlgmr.msra.gmra.mrb[48].mxu0 %v2572_v49  ;;  %v2553_v15 = vmul.f32 %v6026_v61, %v2539_v31  ;;  %v4425_v49 = vld [vmem:[#allocation15 + $0xf8] sm:$0xff]  }
 0xe38   : > { %v4581_v51 = vpop.eup %4580  ;;  %2832 = vmatprep.mubr.bf16.mxu1 %v4953_v63  ;;  %2905 = vmatprep.mubr.bf16.mxu0 %v4953_v63  ;;  %v4426_v31 = vld [vmem:[#allocation15 + $0x38] sm:$0xff]  }
 0xe39   : > { %v2567_v50 = vadd.f32 %v3754_v23, %v2553_v15  ;;  %3916 = vmatpush3.bf16.msra.mxu1 %v4398_v11  ;;  %3956 = vmatpush3.bf16.msra.mxu0 %v4399_v58  ;;  %v2540_v0 = vmul.f32 %v4581_v51, %v6004_v3  ;;  %v4427_v11 = vld [vmem:[#allocation15 + $0xb8] sm:$0xff]  }
 0xe3a   : > { %v4583_v26 = vpop.eup %4582  ;;  %3917 = vmatprep.subr.bf16.mxu1 %v4400_v54  ;;  %3957 = vmatprep.subr.bf16.mxu0 %v4401_v35  ;;  %v2608_v58 = vld [vmem:[%s6358_s29] sm:$0xf]  ;;  %v2624_v54 = vsub.s32 3, %v5362_v2  ;;  %s4864_s29 = scalar_lea.vmem %s4863_s24, 2048 }
 0xe3b   : > { %v2541_v14 = vmul.f32 %v4583_v26, %v6007_v52  ;;  %v2573_v16 = vpack.c.bf16 %v2567_v50, %v2566_v48  ;;  %v2554_v7 = vmul.f32 %v6026_v61, %v2540_v0  ;;  %v6059_v35 = vrot.slane %v2608_v58, %v710_v41  ;;  %p4866_p3 = scmp.lt.s32.totalorder %s4864_s29, %s4858_s14 }
 0xe3c   : > { %v6063_v34 = vrot.slane %v2608_v58, %v718_v6  ;;  %v6067_v15 = vrot.slane %v2608_v58, %v714_v4  ;;  %v6069_v51 = vrot.slane %v2608_v58, %v2624_v54 }
 0xe3d   : > { %v2555_v33 = vmul.f32 %v6026_v61, %v2541_v14  ;;  %3918 = vmatpush3.bf16.msra.mxu1 %v4402_v36  ;;  %3958 = vmatpush3.bf16.msra.mxu0 %v4403_v18  ;;  %v2568_v42 = vadd.f32 %v3754_v23, %v2554_v7  ;;  %p4867_p2 = por %p4866_p3, %p4865_p1 }
 0xe3e   : > { %v4585_v10 = vpop.eup %4584  ;;  %3959 = vmatprep.subr.bf16.mxu0 %v4405_v5 }
 0xe3f   : > { %2833 = vmatmul.mubr.bf16.gmra.mrb[52].mxu1 %v2573_v16  ;;  %2906 = vmatmul.mubr.bf16.gmra.mrb[52].mxu0 %v2573_v16  ;;  %v4587_v21 = vpop.eup %4586  ;;  %v2569_v38 = vadd.f32 %v3754_v23, %v2555_v33  ;;  %v2543_v3 = vmul.f32 %v4585_v10, %v6017_v45  ;;  %v4404_v45 = vld [vmem:[#allocation15 + $0x50] sm:$0xff]   ;;  %p4868_p8 = pnand %p4867_p2, %p4861_p13 }
 0xe40   : > { %2842 = vmatprep.mubr.bf16.mxu1 %v4953_v63  ;;  %2915 = vmatprep.mubr.bf16.mxu0 %v4953_v63  ;;  %v2542_v52 = vmul.f32 %v4587_v21, %v6012_v32  ;;  %v4406_v32 = vld [vmem:[#allocation15 + $0x10] sm:$0xff]  }
 0xe41   : > { %v2574_v30 = vpack.c.bf16 %v2569_v38, %v2568_v42  ;;  %v2557_v60 = vmul.f32 %v6026_v61, %v2543_v3  ;;  %3919 = vmatprep.subr.bf16.mxu1 %v4404_v45  ;;  %3960 = vmatpush3.bf16.msra.mxu0 %v4407_v20 }
 0xe42   : > { %v2556_v13 = vmul.f32 %v6026_v61, %v2542_v52  ;;  %3920 = vmatpush3.bf16.msra.mxu1 %v4406_v32  ;;  %v4410_v61 = vld [vmem:[#allocation15 + $0x18] sm:$0xff]   ;;  %3961 = vmatprep.subr.bf16.mxu0 %v4409_v39 }
 0xe43   : > { %v2571_v40 = vadd.f32 %v3754_v23, %v2557_v60  ;;  %3921 = vmatprep.subr.bf16.mxu1 %v4408_v43 }
 0xe44   : > { %v2570_v46 = vadd.f32 %v3754_v23, %v2556_v13  ;;  %v4417_v23 = vld [vmem:[#allocation15 + $0xe8] sm:$0xff]  }
 0xe45   : > { %3962 = vmatpush3.bf16.msra.mxu0 %v4411_v12 }
 0xe46   : > { %v2575_v44 = vpack.c.bf16 %v2571_v40, %v2570_v46  ;;  %3922 = vmatpush3.bf16.msra.mxu1 %v4410_v61  ;;  %3963 = vmatprep.subr.bf16.mxu0 %v4413_v59 }
 0xe47   : > { %2843 = vmatmul.mubr.bf16.gmra.mrb[56].mxu1 %v2574_v30  ;;  %2916 = vmatmul.mubr.bf16.gmra.mrb[56].mxu0 %v2574_v30 }
 0xe48   : > { %2852 = vmatprep.mubr.bf16.mxu1 %v4953_v63  ;;  %2925 = vmatprep.mubr.bf16.mxu0 %v4953_v63  ;;  %v4412_v63 = vld [vmem:[#allocation15 + $0x60] sm:$0xff]  }
 0xe49   : > { %3923 = vmatprep.subr.bf16.mxu1 %v4412_v63  ;;  %3964 = vmatpush3.bf16.msra.mxu0 %v4415_v47 }
 0xe4a   : > { %3924 = vmatpush3.bf16.msra.mxu1 %v4414_v53  ;;  %3965 = vmatprep.subr.bf16.mxu0 %v4417_v23 }
 0xe4b   : > { %3925 = vmatprep.subr.bf16.mxu1 %v4416_v22 }
 0xe4d   : > { %3966 = vmatpush3.bf16.msra.mxu0 %v4419_v8 }
 0xe4e   : > { %3926 = vmatpush3.bf16.msra.mxu1 %v4418_v62  ;;  %3967 = vmatprep.subr.bf16.mxu0 %v4421_v28 }
 0xe4f   : > { %2853 = vmatmul.mubr.bf16.gmra.mrb[60].mxu1 %v2575_v44  ;;  %2926 = vmatmul.mubr.bf16.gmra.mrb[60].mxu0 %v2575_v44 }
 0xe50   : > { %3927 = vmatprep.subr.bf16.mxu1 %v4420_v27 }
 0xe51   : > { %3968 = vmatpush3.bf16.msra.mxu0 %v4423_v55 }
 0xe52   : > { %3928 = vmatpush3.bf16.msra.mxu1 %v4422_v1  ;;  %3969 = vmatprep.subr.bf16.mxu0 %v4425_v49 }
 0xe53   : > { %3929 = vmatprep.subr.bf16.mxu1 %v4424_v57 }
 0xe55   : > { %3970 = vmatpush3.bf16.msra.mxu0 %v4427_v11 }
 0xe56   : > { %3930 = vmatpush3.bf16.msra.mxu1 %v4426_v31 }
 0xf0a   : > { %v2824_v50 = vpop.f32.mrb[48].mxu1  ;;  %v2897_v36 = vpop.f32.mrb[48].mxu0 }
 0xf0b   : > { %v2825_v18 = vadd.f32 %v2824_v50, %v6059_v35  ;;  %v2898_v26 = vadd.f32 %v2897_v36, %v6063_v34  ;;  %v2826_v48 = vpop.f32.mrb[49].mxu1  ;;  %v2899_v0 = vpop.f32.mrb[49].mxu0 }
 0xf0c   : > { %v2827_v41 = vadd.f32 %v2826_v48, %v6067_v15  ;;  %v2900_v14 = vadd.f32 %v2899_v0, %v6069_v51  ;;  %v2828_v6 = vpop.f32.mrb[50].mxu1  ;;  %v2901_v16 = vpop.f32.mrb[50].mxu0 }
 0xf0d   : > { %v2968_v33 = vmul.f32 0.70710677, %v2825_v18  ;;  %v2970_v2 = vmul.f32 0.70710677, %v2898_v26  ;;  %v2829_v7 = vadd.f32 %v2828_v6, %v6059_v35  ;;  %v2902_v21 = vadd.f32 %v2901_v16, %v6063_v34  ;;  %v2830_v38 = vpop.f32.mrb[51].mxu1  ;;  %v2903_v3 = vpop.f32.mrb[51].mxu0 }
 0xf0e   : > { %v2969_v4 = vmul.f32 0.70710677, %v2827_v41  ;;  %v2971_v10 = vmul.f32 0.70710677, %v2900_v14  ;;  %v2831_v42 = vadd.f32 %v2830_v38, %v6067_v15  ;;  %v2904_v52 = vadd.f32 %v2903_v3, %v6069_v51 }
 0xf0f   : > { %4588 = verf.f32 %v2968_v33  ;;  %v2972_v30 = vmul.f32 0.70710677, %v2829_v7  ;;  %v2974_v60 = vmul.f32 0.70710677, %v2902_v21  ;;  %v2936_v22 = vmul.f32 0.5, %v2825_v18 }
 0xf10   : > { %4590 = verf.f32 %v2970_v2  ;;  %v2973_v13 = vmul.f32 0.70710677, %v2831_v42  ;;  %v2975_v46 = vmul.f32 0.70710677, %v2904_v52  ;;  %v2938_v55 = vmul.f32 0.5, %v2898_v26 }
 0xf11   : > { %4592 = verf.f32 %v2969_v4  ;;  %v6086_v57 = vmul.f32 0.5, %v2827_v41  ;;  %v6088_v49 = vmul.f32 0.5, %v2900_v14  ;;  %v2940_v58 = vmul.f32 0.5, %v2829_v7 }
 0xf12   : > { %4594 = verf.f32 %v2971_v10  ;;  %v2834_v40 = vpop.f32.mrb[52].mxu1  ;;  %v2907_v45 = vpop.f32.mrb[52].mxu0  ;;  %v2942_v48 = vmul.f32 0.5, %v2902_v21  ;;  %v6090_v0 = vmul.f32 0.5, %v2831_v42  ;;  %v6093_v33 = vmul.f32 0.5, %v2904_v52 }
 0xf13   : > { %4596 = verf.f32 %v2972_v30  ;;  %v2835_v44 = vadd.f32 %v2834_v40, %v6059_v35  ;;  %v2836_v5 = vpop.f32.mrb[53].mxu1  ;;  %v2908_v32 = vadd.f32 %v2907_v45, %v6063_v34  ;;  %v2909_v43 = vpop.f32.mrb[53].mxu0 }
 0xf14   : > { %4598 = verf.f32 %v2974_v60  ;;  %v2837_v20 = vadd.f32 %v2836_v5, %v6067_v15  ;;  %v2838_v39 = vpop.f32.mrb[54].mxu1  ;;  %v2910_v12 = vadd.f32 %v2909_v43, %v6069_v51  ;;  %v2911_v63 = vpop.f32.mrb[54].mxu0 }
 0xf15   : > { %4600 = verf.f32 %v2973_v13  ;;  %v2976_v61 = vmul.f32 0.70710677, %v2835_v44  ;;  %v2840_v59 = vpop.f32.mrb[55].mxu1  ;;  %v2978_v53 = vmul.f32 0.70710677, %v2908_v32  ;;  %v2913_v47 = vpop.f32.mrb[55].mxu0  ;;  %v2839_v8 = vadd.f32 %v2838_v39, %v6059_v35 }
 0xf16   : > { %4602 = verf.f32 %v2975_v46  ;;  %v2977_v23 = vmul.f32 0.70710677, %v2837_v20  ;;  %v2979_v62 = vmul.f32 0.70710677, %v2910_v12  ;;  %v2912_v27 = vadd.f32 %v2911_v63, %v6063_v34 }
 0xf17   : > { %4604 = verf.f32 %v2976_v61  ;;  %v2841_v28 = vadd.f32 %v2840_v59, %v6067_v15  ;;  %v2980_v54 = vmul.f32 0.70710677, %v2839_v8  ;;  %v2914_v16 = vadd.f32 %v2913_v47, %v6069_v51 }
 0xf18   : > { %4606 = verf.f32 %v2978_v53  ;;  %v2982_v6 = vmul.f32 0.70710677, %v2912_v27  ;;  %v6095_v14 = vmul.f32 0.5, %v2835_v44  ;;  %v6097_v3 = vmul.f32 0.5, %v2908_v32 }
 0xf19   : > { %v4589_v1 = vpop.eup %4588  ;;  %4608 = verf.f32 %v2977_v23  ;;  %v2981_v2 = vmul.f32 0.70710677, %v2841_v28  ;;  %v6099_v30 = vmul.f32 0.5, %v2837_v20  ;;  %v6101_v21 = vmul.f32 0.5, %v2910_v12 }
 0xf1a   : > { %v4591_v31 = vpop.eup %4590  ;;  %v3032_v11 = vadd.f32 1.0, %v4589_v1  ;;  %4610 = verf.f32 %v2979_v62  ;;  %v2844_v50 = vpop.f32.mrb[56].mxu1  ;;  %v2983_v32 = vmul.f32 0.70710677, %v2914_v16  ;;  %v6120_v1 = vmul.f32 0.5, %v2839_v8 }
 0xf1b   : > { %v2917_v36 = vpop.f32.mrb[56].mxu0  ;;  %v4593_v18 = vpop.eup %4592  ;;  %v3034_v38 = vadd.f32 1.0, %v4591_v31  ;;  %4612 = verf.f32 %v2980_v54  ;;  %v2845_v20 = vadd.f32 %v2844_v50, %v6059_v35  ;;  %v6122_v31 = vmul.f32 0.5, %v2912_v27 }
 0xf1c   : > { %v2846_v26 = vpop.f32.mrb[57].mxu1  ;;  %v4595_v41 = vpop.eup %4594  ;;  %v6105_v40 = vmul.f32 %v3032_v11, %v2936_v22  ;;  %v3033_v52 = vadd.f32 1.0, %v4593_v18  ;;  %4614 = verf.f32 %v2982_v6  ;;  %v2918_v12 = vadd.f32 %v2917_v36, %v6063_v34 }
 0xf1d   : > { %v2919_v4 = vpop.f32.mrb[57].mxu0  ;;  %v2848_v10 = vpop.f32.mrb[58].mxu1  ;;  %v3035_v39 = vadd.f32 1.0, %v4595_v41  ;;  %4616 = verf.f32 %v2981_v2  ;;  %v6113_v59 = vmul.f32 %v3034_v38, %v2938_v55  ;;  %v2984_v47 = vmul.f32 0.70710677, %v2845_v20 }
 0xf1e   : > { %v4597_v7 = vpop.eup %4596  ;;  %v2921_v42 = vpop.f32.mrb[58].mxu0  ;;  %v2847_v22 = vadd.f32 %v2846_v26, %v6067_v15  ;;  %v6124_v11 = vmul.f32 0.5, %v2841_v28  ;;  %v6128_v18 = vmul.f32 0.5, %v2914_v16  ;;  %4618 = verf.f32 %v2983_v32 }
 0xf1f   : > { %v6103_v60 = vpop.f32.mrb[59].mxu1  ;;  %v4599_v13 = vpop.eup %4598  ;;  %v3036_v46 = vadd.f32 1.0, %v4597_v7  ;;  %v6131_v8 = vmul.f32 %v3033_v52, %v6086_v57  ;;  %v6134_v27 = vmul.f32 %v3035_v39, %v6088_v49  ;;  %4620 = verf.f32 %v2984_v47 }
 0xf20   : > { %v6107_v44 = vpop.f32.mrb[59].mxu0  ;;  %v4601_v45 = vpop.eup %4600  ;;  %v3038_v5 = vadd.f32 1.0, %v4599_v13  ;;  %v2986_v28 = vmul.f32 0.70710677, %v2918_v12  ;;  %v2985_v16 = vmul.f32 0.70710677, %v2847_v22  ;;  %v2920_v13 = vadd.f32 %v2919_v4, %v6069_v51 }
 0xf21   : > { %v4603_v43 = vpop.eup %4602  ;;  %v6110_v61 = vmul.f32 %v3036_v46, %v2940_v58  ;;  %v3037_v36 = vadd.f32 1.0, %v4601_v45  ;;  %v2849_v49 = vadd.f32 %v2848_v10, %v6059_v35  ;;  %v2922_v52 = vadd.f32 %v2921_v42, %v6063_v34 }
 0xf22   : > { %v4605_v63 = vpop.eup %4604  ;;  %v6115_v53 = vmul.f32 %v3038_v5, %v2942_v48  ;;  %v2854_v58 = vpop.f32.mrb[60].mxu1  ;;  %v3039_v7 = vadd.f32 1.0, %v4603_v43  ;;  %4622 = verf.f32 %v2986_v28  ;;  %v6148_v47 = vmul.f32 0.5, %v2845_v20 }
 0xf23   : > { %v4607_v23 = vpop.eup %4606  ;;  %v2927_v54 = vpop.f32.mrb[60].mxu0  ;;  %v3040_v38 = vadd.f32 1.0, %v4605_v63  ;;  %v3069_v5 = vmul.f32 %v3037_v36, %v6090_v0  ;;  %v6150_v63 = vmul.f32 0.5, %v2918_v12  ;;  %4624 = verf.f32 %v2985_v16 }
 0xf24   : > { %v4609_v50 = vpop.eup %4608  ;;  %v2856_v48 = vpop.f32.mrb[61].mxu1  ;;  %v3042_v57 = vadd.f32 1.0, %v4607_v23  ;;  %v2987_v4 = vmul.f32 0.70710677, %v2920_v13  ;;  %v2988_v55 = vmul.f32 0.70710677, %v2849_v49  ;;  %v3071_v23 = vmul.f32 %v3039_v7, %v6093_v33 }
 0xf25   : > { %v2929_v6 = vpop.f32.mrb[61].mxu0  ;;  %v4611_v26 = vpop.eup %4610  ;;  %v3041_v32 = vadd.f32 1.0, %v4609_v50  ;;  %v6154_v28 = vmul.f32 %v3040_v38, %v6095_v14  ;;  %v6156_v10 = vmul.f32 0.5, %v2847_v22  ;;  %v2990_v42 = vmul.f32 0.70710677, %v2922_v52 }
 0xf26   : > { %v6136_v41 = vpop.f32.mrb[62].mxu1  ;;  %v6138_v2 = vpop.f32.mrb[62].mxu0  ;;  %v3043_v39 = vadd.f32 1.0, %v4611_v26  ;;  %v6159_v50 = vmul.f32 %v3042_v57, %v6097_v3  ;;  %4626 = verf.f32 %v2987_v4  ;;  %v2851_v20 = vadd.f32 %v6103_v60, %v6067_v15 }
 0xf27   : > { %v6141_v46 = vpop.f32.mrb[63].mxu1  ;;  %v6143_v45 = vpop.f32.mrb[63].mxu0  ;;  %v2924_v12 = vadd.f32 %v6107_v44, %v6069_v51  ;;  %v6166_v36 = vmul.f32 %v3041_v32, %v6099_v30  ;;  %4628 = verf.f32 %v2988_v55  ;;  %v6172_v14 = vadd.f32 %v2854_v58, %v6059_v35 }
 0xf28   : > { %v4613_v43 = vpop.eup %4612  ;;  %v6169_v33 = vmul.f32 %v3043_v39, %v6101_v21  ;;  %v6174_v3 = vmul.f32 0.5, %v2920_v13  ;;  %4630 = verf.f32 %v2990_v42  ;;  %v2989_v26 = vmul.f32 0.70710677, %v2851_v20 }
 0xf29   : > { %v4615_v62 = vpop.eup %4614  ;;  %v3044_v22 = vadd.f32 1.0, %v4613_v43  ;;  %v2956_v16 = vmul.f32 0.5, %v2849_v49  ;;  %v2991_v44 = vmul.f32 0.70710677, %v2924_v12  ;;  %v2992_v30 = vmul.f32 0.70710677, %v6172_v14 }
 0xf2a   : > { %v4617_v0 = vpop.eup %4616  ;;  %v3046_v60 = vadd.f32 1.0, %v4615_v62  ;;  %4632 = verf.f32 %v2989_v26  ;;  %v6178_v21 = vadd.f32 %v2927_v54, %v6063_v34  ;;  %v6181_v58 = vadd.f32 %v2856_v48, %v6067_v15 }
 0xf2b   : > { %v4619_v7 = vpop.eup %4618  ;;  %v3045_v38 = vadd.f32 1.0, %v4617_v0  ;;  %4634 = verf.f32 %v2991_v44  ;;  %v6184_v55 = vadd.f32 %v2929_v6, %v6069_v51  ;;  %v3097_v13 = vpack.c.bf16 %v3069_v5, %v6131_v8 }
 0xf2c   : > { %v4621_v57 = vpop.eup %4620  ;;  %v3099_v62 = vpack.c.bf16 %v3071_v23, %v6134_v27  ;;  %v3076_v32 = vmul.f32 %v3044_v22, %v6120_v1  ;;  %v3047_v39 = vadd.f32 1.0, %v4619_v7  ;;  %v2958_v43 = vmul.f32 0.5, %v2922_v52 }
 0xf2d   : > { %v4623_v49 = vpop.eup %4622  ;;  %v2994_v4 = vmul.f32 0.70710677, %v6178_v21  ;;  %v3078_v54 = vmul.f32 %v3046_v60, %v6122_v31  ;;  %v3077_v48 = vmul.f32 %v3045_v38, %v6124_v11  ;;  %v3048_v42 = vadd.f32 1.0, %v4621_v57  ;;  %3407 = vmatprep.mubr.bf16.mxu1 %v3097_v13 }
 0xf2e   : > { %v2993_v0 = vmul.f32 0.70710677, %v6181_v58  ;;  %3472 = vmatprep.mubr.bf16.mxu0 %v3099_v62  ;;  %v4625_v6 = vpop.eup %4624  ;;  %v2957_v8 = vmul.f32 0.5, %v2851_v20  ;;  %4636 = verf.f32 %v2992_v30  ;;  %v2995_v27 = vmul.f32 0.70710677, %v6184_v55 }
 0xf2f   : > { %v6196_v1 = vadd.f32 %v6136_v41, %v6059_v35  ;;  %v6359_v52 = vpack.c.bf16 %v6110_v61, %v6105_v40  ;;  %v6360_v31 = vpack.c.bf16 %v6115_v53, %v6113_v59  ;;  %v3050_v11 = vadd.f32 1.0, %v4623_v49 }
 0xf30   : > { %4638 = verf.f32 %v2994_v4  ;;  %v2932_v5 = vadd.f32 %v6138_v2, %v6063_v34  ;;  %v6208_v23 = vadd.f32 %v6141_v46, %v6067_v15  ;;  %v4627_v20 = vpop.eup %4626  ;;  %v3079_v35 = vmul.f32 %v3047_v39, %v6128_v18 }
 0xf31   : > { %3408 = vmatmul.mubr.bf16.vlgmr.msra.gmra.mrb[64].mxu1 %v6359_v52  ;;  %3473 = vmatmul.mubr.bf16.vlgmr.msra.gmra.mrb[64].mxu0 %v6360_v31  ;;  %v2959_v41 = vmul.f32 0.5, %v2924_v12  ;;  %4640 = verf.f32 %v2993_v0  ;;  %v2996_v40 = vmul.f32 0.70710677, %v6196_v1  ;;  %v4629_v61 = vpop.eup %4628  ;;  %v3080_v59 = vmul.f32 %v3048_v42, %v6148_v47 }
 0xf32   : > { %v3049_v53 = vadd.f32 1.0, %v4625_v6  ;;  %4642 = verf.f32 %v2995_v27  ;;  %v2998_v22 = vmul.f32 0.70710677, %v2932_v5  ;;  %v4631_v26 = vpop.eup %4630  ;;  %v3052_v7 = vadd.f32 1.0, %v4629_v61 }
 0xf33   : > { %4644 = verf.f32 %v2996_v40  ;;  %v2997_v34 = vmul.f32 0.70710677, %v6208_v23  ;;  %v2934_v15 = vadd.f32 %v6143_v45, %v6069_v51  ;;  %v3082_v18 = vmul.f32 %v3050_v11, %v6150_v63 }
 0xf34   : > { %v3054_v2 = vadd.f32 1.0, %v4631_v26  ;;  %4646 = verf.f32 %v2998_v22  ;;  %v3101_v46 = vpack.c.bf16 %v3077_v48, %v6166_v36  ;;  %v4633_v12 = vpop.eup %4632  ;;  %v3051_v60 = vadd.f32 1.0, %v4627_v20 }
 0xf35   : > { %v3084_v47 = vmul.f32 %v3052_v7, %v2956_v16  ;;  %4648 = verf.f32 %v2997_v34  ;;  %v2999_v38 = vmul.f32 0.70710677, %v2934_v15  ;;  %v4635_v44 = vpop.eup %4634  ;;  %v3053_v30 = vadd.f32 1.0, %v4633_v12 }
 0xf36   : > { %v3086_v57 = vmul.f32 %v3054_v2, %v2958_v43  ;;  %3415 = vmatprep.mubr.bf16.mxu1 %v3101_v46  ;;  %v3103_v13 = vpack.c.bf16 %v3079_v35, %v6169_v33  ;;  %v3100_v62 = vpack.c.bf16 %v3076_v32, %v6154_v28  ;;  %v3055_v51 = vadd.f32 1.0, %v4635_v44 }
 0xf37   : > { %4650 = verf.f32 %v2999_v38  ;;  %v3102_v45 = vpack.c.bf16 %v3078_v54, %v6159_v50  ;;  %v3104_v63 = vpack.c.bf16 %v3084_v47, %v3080_v59  ;;  %v3081_v36 = vmul.f32 %v3049_v53, %v6156_v10 }
 0xf38   : > { %v3085_v49 = vmul.f32 %v3053_v30, %v2957_v8  ;;  %3480 = vmatprep.mubr.bf16.mxu0 %v3103_v13  ;;  %v3106_v16 = vpack.c.bf16 %v3086_v57, %v3082_v18  ;;  %v4637_v39 = vpop.eup %4636  ;;  %v3083_v43 = vmul.f32 %v3051_v60, %v6174_v3  ;;  %v3087_v4 = vmul.f32 %v3055_v51, %v2959_v41 }
 0xf39   : > { %3416 = vmatmul.mubr.bf16.gmra.mrb[68].mxu1 %v3100_v62  ;;  %3481 = vmatmul.mubr.bf16.gmra.mrb[68].mxu0 %v3102_v45  ;;  %v3056_v0 = vadd.f32 1.0, %v4637_v39  ;;  %v2960_v54 = vmul.f32 0.5, %v6172_v14  ;;  %v2962_v8 = vmul.f32 0.5, %v6178_v21  ;;  %v2964_v3 = vmul.f32 0.5, %v6196_v1 }
 0xf3a   : > { %v4639_v48 = vpop.eup %4638  ;;  %v3105_v33 = vpack.c.bf16 %v3085_v49, %v3081_v36  ;;  %v3107_v28 = vpack.c.bf16 %v3087_v4, %v3083_v43  ;;  %v2961_v11 = vmul.f32 0.5, %v6181_v58  ;;  %v2966_v20 = vmul.f32 0.5, %v2932_v5 }
 0xf3b   : > { %v4641_v42 = vpop.eup %4640  ;;  %v3058_v10 = vadd.f32 1.0, %v4639_v48  ;;  %v2965_v41 = vmul.f32 0.5, %v6208_v23  ;;  %v3088_v40 = vmul.f32 %v3056_v0, %v2960_v54  ;;  %v2963_v21 = vmul.f32 0.5, %v6184_v55  ;;  %v6232_v55 = vld [vmem:[%s6361_s16] ss:$0 sm:$0xff] }
 0xf3c   : > { %v4643_v32 = vpop.eup %4642  ;;  %3423 = vmatprep.mubr.bf16.mxu1 %v3105_v33  ;;  %3488 = vmatprep.mubr.bf16.mxu0 %v3107_v28  ;;  %v3057_v27 = vadd.f32 1.0, %v4641_v42  ;;  %v2967_v7 = vmul.f32 0.5, %v2934_v15 }
 0xf3d   : > { %v4645_v50 = vpop.eup %4644  ;;  %v3059_v61 = vadd.f32 1.0, %v4643_v32  ;;  %v3090_v22 = vmul.f32 %v3058_v10, %v2962_v8 }
 0xf3e   : > { %v4647_v6 = vpop.eup %4646  ;;  %v3060_v52 = vadd.f32 1.0, %v4645_v50  ;;  %v3089_v1 = vmul.f32 %v3057_v27, %v2961_v11 }
 0xf3f   : > { %v4649_v31 = vpop.eup %4648  ;;  %v3062_v35 = vadd.f32 1.0, %v4647_v6  ;;  %v3091_v2 = vmul.f32 %v3059_v61, %v2963_v21 }
 0xf40   : > { %v3092_v59 = vmul.f32 %v3060_v52, %v2964_v3  ;;  %v3061_v14 = vadd.f32 1.0, %v4649_v31 }
 0xf41   : > { %3424 = vmatmul.mubr.bf16.gmra.mrb[72].mxu1 %v3104_v63  ;;  %v4651_v53 = vpop.eup %4650  ;;  %v3094_v26 = vmul.f32 %v3062_v35, %v2966_v20  ;;  %3489 = vmatmul.mubr.bf16.gmra.mrb[72].mxu0 %v3106_v16 }
 0xf42   : > { %v3093_v34 = vmul.f32 %v3061_v14, %v2965_v41  ;;  %v3063_v18 = vadd.f32 1.0, %v4651_v53  ;;  %v3108_v58 = vpack.c.bf16 %v3092_v59, %v3088_v40 }
 0xf43   : > { %v3110_v5 = vpack.c.bf16 %v3094_v26, %v3090_v22 }
 0xf44   : > { %v3095_v46 = vmul.f32 %v3063_v18, %v2967_v7  ;;  %v3109_v23 = vpack.c.bf16 %v3093_v34, %v3089_v1 }
 0xf46   : > { %3431 = vmatprep.mubr.bf16.mxu1 %v3109_v23  ;;  %v3111_v12 = vpack.c.bf16 %v3095_v46, %v3091_v2 }
 0xf48   : > { %3496 = vmatprep.mubr.bf16.mxu0 %v3111_v12 }
 0xf49   : > { %3432 = vmatmul.mubr.bf16.gmra.mrb[76].mxu1 %v3108_v58  ;;  %3497 = vmatmul.mubr.bf16.gmra.mrb[76].mxu0 %v3110_v5 }
0x1004   : > { %v3931_v60 = vpop.f32.mrb[64].mxu1  ;;  %v3971_v47 = vpop.f32.mrb[64].mxu0 }
0x1005   : > { %v3932_v15 = vpop.f32.mrb[65].mxu1  ;;  %v3972_v38 = vpop.f32.mrb[65].mxu0 }
0x1006   : > { %v3933_v44 = vadd.f32 %v3932_v15, %v3931_v60  ;;  %v3973_v57 = vadd.f32 %v3972_v38, %v3971_v47  ;;  %v3934_v30 = vpop.f32.mrb[66].mxu1  ;;  %v3974_v13 = vpop.f32.mrb[66].mxu0 }
0x1007   : > { %v3935_v62 = vpop.f32.mrb[67].mxu1  ;;  %v3975_v51 = vpop.f32.mrb[67].mxu0 }
0x1008   : > { %v3410_v45 = vadd.f32 %v3933_v44, %v6232_v55  ;;  %v3936_v63 = vadd.f32 %v3935_v62, %v3934_v30  ;;  %v3976_v36 = vadd.f32 %v3975_v51, %v3974_v13 }
0x100a   : > { %v3475_v49 = vadd.f32 %v3973_v57, %v3410_v45  ;;  %v3413_v16 = vadd.f32 %v3936_v63, %v6232_v55 }
0x100c   : > { %v3505_v39 = vadd.f32 %v3475_v49, %v5953_v56  ;;  %v3478_v43 = vadd.f32 %v3976_v36, %v3413_v16  ;;  %v3937_v4 = vpop.f32.mrb[68].mxu1  ;;  %v3977_v33 = vpop.f32.mrb[68].mxu0 }
0x100d   : > { %v3938_v42 = vpop.f32.mrb[69].mxu1  ;;  %v3978_v32 = vpop.f32.mrb[69].mxu0 }
0x100e   : > { %3513 = vst [vmem:[%s6239_s23] sm:$0xff] %v3505_v39  ;;  %v3506_v48 = vadd.f32 %v3478_v43, %v5956_v17  ;;  %v3939_v28 = vadd.f32 %v3938_v42, %v3937_v4  ;;  %v3940_v0 = vpop.f32.mrb[70].mxu1  ;;  %v3979_v50 = vadd.f32 %v3978_v32, %v3977_v33  ;;  %v3980_v54 = vpop.f32.mrb[70].mxu0 }
0x100f   : > { %v3941_v56 = vpop.f32.mrb[71].mxu1  ;;  %v3981_v8 = vpop.f32.mrb[71].mxu0 }
0x1010   : > { %3514 = vst [vmem:[%s6239_s23 + $0x8] sm:$0xff] %v3506_v48  ;;  %v3418_v10 = vadd.f32 %v3939_v28, %v6232_v55  ;;  %v3942_v6 = vadd.f32 %v3941_v56, %v3940_v0  ;;  %v3982_v27 = vadd.f32 %v3981_v8, %v3980_v54 }
0x1012   : > { %v3483_v3 = vadd.f32 %v3979_v50, %v3418_v10  ;;  %v3421_v52 = vadd.f32 %v3942_v6, %v6232_v55 }
0x1014   : > { %v3507_v17 = vadd.f32 %v3483_v3, %v5959_v37  ;;  %v3486_v31 = vadd.f32 %v3982_v27, %v3421_v52  ;;  %v3943_v11 = vpop.f32.mrb[72].mxu1  ;;  %v3983_v20 = vpop.f32.mrb[72].mxu0 }
0x1015   : > { %v3944_v35 = vpop.f32.mrb[73].mxu1  ;;  %v3984_v61 = vpop.f32.mrb[73].mxu0 }
0x1016   : > { %3515 = vst [vmem:[%s6239_s23 + $0x10] sm:$0xff] %v3507_v17  ;;  %v3508_v41 = vadd.f32 %v3486_v31, %v5964_v24  ;;  %v3945_v40 = vadd.f32 %v3944_v35, %v3943_v11  ;;  %v3946_v59 = vpop.f32.mrb[74].mxu1  ;;  %v3985_v14 = vadd.f32 %v3984_v61, %v3983_v20  ;;  %v3986_v53 = vpop.f32.mrb[74].mxu0 }
0x1017   : > { %v3947_v22 = vpop.f32.mrb[75].mxu1  ;;  %v3987_v7 = vpop.f32.mrb[75].mxu0 }
0x1018   : > { %3516 = vst [vmem:[%s6239_s23 + $0x18] sm:$0xff] %v3508_v41  ;;  %v3426_v21 = vadd.f32 %v3945_v40, %v6232_v55  ;;  %v3948_v26 = vadd.f32 %v3947_v22, %v3946_v59  ;;  %v3988_v37 = vadd.f32 %v3987_v7, %v3986_v53 }
0x101a   : > { %v3491_v1 = vadd.f32 %v3985_v14, %v3426_v21  ;;  %v3429_v34 = vadd.f32 %v3948_v26, %v6232_v55 }
0x101c   : > { %v3509_v18 = vadd.f32 %v3491_v1, %v5969_v9  ;;  %v3494_v24 = vadd.f32 %v3988_v37, %v3429_v34  ;;  %v3949_v58 = vpop.f32.mrb[76].mxu1  ;;  %v3989_v5 = vpop.f32.mrb[76].mxu0 }
0x101d   : > { %v3950_v2 = vpop.f32.mrb[77].mxu1  ;;  %v3990_v12 = vpop.f32.mrb[77].mxu0 }
0x101e   : > { %3517 = vst [vmem:[%s6239_s23 + $0x20] sm:$0xff] %v3509_v18  ;;  %v3510_v46 = vadd.f32 %v3494_v24, %v5973_v25  ;;  %v3951_v23 = vadd.f32 %v3950_v2, %v3949_v58  ;;  %v3952_v60 = vpop.f32.mrb[78].mxu1  ;;  %v3991_v47 = vadd.f32 %v3990_v12, %v3989_v5  ;;  %v3992_v15 = vpop.f32.mrb[78].mxu0 }
0x101f   : > { %v3953_v38 = vpop.f32.mrb[79].mxu1  ;;  %v3993_v57 = vpop.f32.mrb[79].mxu0 }
0x1020   : > { %3518 = vst [vmem:[%s6239_s23 + $0x28] sm:$0xff] %v3510_v46  ;;  %v3434_v9 = vadd.f32 %v3951_v23, %v6232_v55  ;;  %v3954_v44 = vadd.f32 %v3953_v38, %v3952_v60  ;;  %v3994_v30 = vadd.f32 %v3993_v57, %v3992_v15 }
0x1022   : > { %v3499_v13 = vadd.f32 %v3991_v47, %v3434_v9  ;;  %v3437_v62 = vadd.f32 %v3954_v44, %v6232_v55 }
0x1024   : > { %v3511_v25 = vadd.f32 %v3499_v13, %v5976_v29  ;;  %v3502_v51 = vadd.f32 %v3994_v30, %v3437_v62 }
0x1026   : > { %3519 = vst [vmem:[%s6239_s23 + $0x30] sm:$0xff] %v3511_v25  ;;  %v3512_v45 = vadd.f32 %v3502_v51, %v5979_v19 }
0x1028   : > { %3520 = vst [vmem:[%s6239_s23 + $0x38] sm:$0xff] %v3512_v45 }
0x1029   : > { %4871 = shalt.err (!%p4868_p8)
}
0x102a   : > { %s4872_s21 = scalar_lea.hbm %s6264_s13, 1024  ;;  %s4876_s23 = scalar_lea.hbm %s6362_s8, 2048 }
0x102b   : > { %p4873_p10 = scmp.ne.s32.totalorder %s6264_s13, %s4872_s21  ;;  %p4877_p0 = scmp.lt.u32.totalorder %s6264_s13, %s6362_s8 }
0x102c   : > { %p4878_p5 = scmp.lt.u32.totalorder %s4876_s23, %s4872_s21  ;;  %p4880_p6 = scmp.lt.u32.totalorder %s4872_s21, %s6264_s13 }
0x102d   : > { %p4874_p11 = pnand %p4873_p10, %p6363_p9 }
0x102e   : > { %p4879_p7 = por %p4878_p5, %p4877_p0 }
0x102f   : > { %p4875_p12 = pneg %p4874_p11 }
0x1030   : > { %p4881_p4 = por %p4880_p6, %p4879_p7 }
0x1032   : > { %p4882_p13 = pnand %p4881_p4, %p4875_p12 }
0x1034   : > { %4885 = shalt.err (!%p4882_p13)
}
0x1035   : > { %s4958_s17 = smov 128   ;;  %s4959_s14 = smov 8  }
0x1036   : > { %4213 = dma.vmem_to_hbm [thread:$0]  (%p6363_p9), %s6266_s19, 1024, %s6264_s13, %s3522_s30, %s4958_s17, %s4958_s17, %s4959_s14  }
0x1037 PF: > { %s3550_s15 = sand.u32 1, %s4924_s25   ;;  %p6364_p1 = scmp.ne.s32.totalorder %s6347_s7, 0 }
0x1038   : > { %p6365_p3 = scmp.ge.s32.totalorder %s4936_s28, 2  ;;  %s3551_s24 = scalar_lea.sflag [#allocation6], %s3550_s15 }
0x103a   : > { %p4239_p2 = pnand %p6365_p3, %p6364_p1 }
0x103c   : > { %4919 = dma.done.wait (!%p4239_p2), %s3551_s24, 1024  }
0x103d   : > { %4921 = vsyncadd (!%p4239_p2), %s3551_s24, 4294966272  ;;  %p29_p8 = scmp.ge.s32.totalorder %s5207_s18, 4   ;;  %s6366_s25 = smov %s4928_s26 }
0x103e   : > { %s6367_s26 = smov %s4932_s27  ;;  %s6368_s27 = smov %s5218_s10 }
0x103f   : > { %s6369_s28 = smov %s5207_s18  ;;  %31 = sbr.rel (!%p29_p8) target bundleno = 16 (0x10), region = 141 }
0x1046   :  { %3556 = vsyncpa [#allocation5], 1 }
0x1047   :  { %3558 = vsyncpa [#allocation5 + $0x1], 1 }
0x1048   :  { %3559 = vsyncpa [#allocation8], 1 }
0x1049   :  { %3560 = vsyncpa [#allocation11], 1 }
0x104a   :  { %3561 = vsyncpa [#allocation14], 1 }
0x104b   :  { %3562 = vsyncpa [#allocation6], 1 }
0x104c   :  { %3564 = vsyncpa [#allocation6 + $0x1], 1 }

// kernel: tpu_custom_call.1
= control target key start
LH: loop header
LB: loop body
LE: loop exit
PB: predicated region body
PF: predicated region fallthrough
CT: control target
= control target key end

     0   :  { %s6313_s0 = inlined_call_operand.hbm [shape: f32[2,64,128], index: 0, kind: input, shape index: {}]   ;;  %s6314_s1 = inlined_call_operand.hbm [shape: f32[1,128], index: 1, kind: input, shape index: {}]   ;;  %s6315_s2 = inlined_call_operand.hbm [shape: f32[1,128], index: 2, kind: input, shape index: {}]   ;;  %s6316_s3 = inlined_call_operand.hbm [shape: bf16[128,384], index: 3, kind: input, shape index: {}]   ;;  %s6317_s4 = inlined_call_operand.vmem [shape: f32[1,384], index: 4, kind: input, shape index: {}]   ;;  %s6318_s5 = inlined_call_operand.hbm [shape: bf16[128,128], index: 5, kind: input, shape index: {}]   ;;  %s6319_s6 = inlined_call_operand.vmem [shape: f32[1,128], index: 6, kind: input, shape index: {}]   ;;  %s6320_s7 = inlined_call_operand.vmem [shape: f32[1,128], index: 7, kind: input, shape index: {}]   ;;  %s6321_s8 = inlined_call_operand.vmem [shape: f32[1,128], index: 8, kind: input, shape index: {}]   ;;  %s6322_s9 = inlined_call_operand.hbm [shape: bf16[128,512], index: 9, kind: input, shape index: {}]   ;;  %s6323_s10 = inlined_call_operand.vmem [shape: f32[1,512], index: 10, kind: input, shape index: {}]   ;;  %s6324_s11 = inlined_call_operand.hbm [shape: bf16[512,128], index: 11, kind: input, shape index: {}]   ;;  %s6325_s12 = inlined_call_operand.vmem [shape: f32[1,128], index: 12, kind: input, shape index: {}]   ;;  %s6326_s13 = inlined_call_operand.hbm [shape: f32[2,64,128], index: 13, kind: output, shape index: {}]  }
   0x1   :  { %6331 = sst [smem:[#allocation22_spill]] %s6314_s1 }
   0x2   :  { %6332 = sst [smem:[#allocation23_spill]] %s6316_s3 }
   0x3   :  { %6333 = sst [smem:[#allocation24_spill]] %s6320_s7 }
   0x4   :  { %6334 = sst [smem:[#allocation25_spill]] %s6321_s8 }
   0x5   :  { %6335 = sst [smem:[#allocation26_spill]] %s6323_s10 }
   0x6   :  { %6336 = sst [smem:[#allocation27_spill]] %s6325_s12 }
   0x7   :  { %6337 = sst [smem:[#allocation28_spill]] %s6326_s13 }
   0x8   :  { %18 = vsyncpa [#allocation5], 0 }
   0x9   :  { %20 = vsyncpa [#allocation5 + $0x1], 0 }
   0xa   :  { %21 = vsyncpa [#allocation8], 0 }
   0xb   :  { %22 = vsyncpa [#allocation11], 0 }
   0xc   :  { %23 = vsyncpa [#allocation14], 0 }
   0xd   :  { %24 = vsyncpa [#allocation6], 0 }
   0xe   :  { %26 = vsyncpa [#allocation6 + $0x1], 0  ;;  %s5030_s25 = smov 0   ;;  %s5032_s26 = smov 0  }
   0xf   :  { %s5034_s27 = smov 0   ;;  %s5036_s28 = smov 0  }
  0x10 LB: > { %s4938_s29 = smov [#allocation7]   ;;  %s5051_s14 = sadd.s32 4294967295, %s4936_s28   ;;  %s4936_s28 = sphi %s5036_s28, %s6369_s28   ;;  %s4932_s27 = sphi %s5034_s27, %s6368_s27   ;;  %s4928_s26 = sphi %s5032_s26, %s6367_s26   ;;  %s4924_s25 = sphi %s5030_s25, %s6366_s25  }
  0x11   : > { %s354_s30 = sshll.u32 %s4938_s29, 4  ;;  %p3666_p0 = scmp.ge.s32.totalorder %s4936_s28, 1  ;;  %s5056_s30 = int_to_ptr.vmem [resolvable:$true] %s354_s30 }
  0x12   : > { %p6328_p1 = scmp.eq.s32.totalorder %s5051_s14, 0  ;;  %p341_p2 = scmp.lt.s32.totalorder %s4936_s28, 3 }
  0x13   : > { %s4939_s16 = smov [#allocation10]   ;;  %s4940_s19 = smov [#allocation13]  }
  0x14   : > { %p5058_p3 = pnand %p3666_p0, %p341_p2  ;;  %s375_s17 = sshll.u32 %s4939_s16, 4  ;;  %s5065_s17 = int_to_ptr.vmem [resolvable:$true] %s375_s17 }
  0x15   : > { %s413_s20 = sshll.u32 %s4940_s19, 4  ;;  %s6340_s1 = sld [smem:[#allocation22_spill]]  ;;  %s5073_s20 = int_to_ptr.vmem [resolvable:$true] %s413_s20 }
  0x16   : > { %s6338_s15 = scalar_select %p5058_p3, 1, 0 }
  0x17   : > { %p4215_p5 = pneg %p5058_p3 }
  0x19   : > { %p5069_p6 = pnand %p4215_p5, %p6328_p1 }
  0x1b   : > { %s4660_s23 = scalar_lea.hbm %s6340_s1, 16  ;;  %p5083_p8 = pneg %p5069_p6 }
  0x1c   : > { %p4661_p7 = scmp.ne.s32.totalorder %s6340_s1, %s4660_s23  ;;  %p4667_p11 = scmp.lt.u32.totalorder %s4660_s23, %s6340_s1 }
  0x1e   : > { %p4663_p9 = pnand %p5083_p8, %p4661_p7 }
  0x20   : > { %p4664_p10 = pneg %p4663_p9 }
  0x22   : > { %p4669_p12 = pnand %p4667_p11, %p4664_p10 }
  0x24   : > { %4672 = shalt.err (!%p4669_p12)
}
  0x25   : > { %s4673_s21 = scalar_lea.vmem %s5056_s30, 16  ;;  %s4680_s22 = scalar_lea.vmem %s5056_s30, 32 }
  0x26   : > { %p4674_p13 = scmp.ne.s32.totalorder %s5056_s30, %s4673_s21  ;;  %p4681_p5 = scmp.lt.s32.totalorder %s5056_s30, %s5056_s30 }
  0x27   : > { %p4682_p7 = scmp.lt.s32.totalorder %s4680_s22, %s4673_s21 }
  0x28   : > { %p4676_p0 = pnand %p4674_p13, %p5083_p8 }
  0x29   : > { %p4683_p9 = por %p4682_p7, %p4681_p5 }
  0x2a   : > { %p4677_p2 = pneg %p4676_p0 }
  0x2c   : > { %p4684_p4 = pnand %p4683_p9, %p4677_p2 }
  0x2e   : > { %4687 = shalt.err (!%p4684_p4)
}
  0x2f   : > { %4218 = dma.hbm_to_vmem [thread:$0]  (!%p5069_p6), %s6340_s1, 16, %s5056_s30, [#allocation8]  }
  0x30   : > { %s6342_s3 = sld [smem:[#allocation23_spill]] }
  0x36   : > { %s4688_s19 = scalar_lea.hbm %s6342_s3, 3072 }
  0x37   : > { %p4689_p10 = scmp.ne.s32.totalorder %s6342_s3, %s4688_s19  ;;  %p4695_p4 = scmp.lt.u32.totalorder %s4688_s19, %s6342_s3 }
  0x39   : > { %p4691_p11 = pnand %p4689_p10, %p5083_p8 }
  0x3b   : > { %p4692_p12 = pneg %p4691_p11 }
  0x3d   : > { %p4697_p13 = pnand %p4695_p4, %p4692_p12 }
  0x3f   : > { %4700 = shalt.err (!%p4697_p13)
}
  0x40   : > { %s4701_s30 = scalar_lea.vmem %s5065_s17, 3072  ;;  %p4709_p7 = scmp.lt.s32.totalorder %s5065_s17, %s5065_s17 }
  0x41   : > { %p4702_p0 = scmp.ne.s32.totalorder %s5065_s17, %s4701_s30  ;;  %p4710_p9 = scmp.lt.s32.totalorder %s4701_s30, %s4701_s30 }
  0x43   : > { %p4704_p2 = pnand %p4702_p0, %p5083_p8  ;;  %p4711_p10 = por %p4710_p9, %p4709_p7 }
  0x45   : > { %p4705_p5 = pneg %p4704_p2 }
  0x47   : > { %p4712_p11 = pnand %p4711_p10, %p4705_p5 }
  0x49   : > { %4715 = shalt.err (!%p4712_p11)
}
  0x4a   : > { %s4941_s10 = smov 192   ;;  %s4942_s12 = smov 12  }
  0x4b   : > { %4224 = dma.hbm_to_vmem [thread:$0]  (!%p5069_p6), %s6342_s3, 3072, %s5065_s17, [#allocation11], %s4941_s10, %s4941_s10, %s4942_s12  }
  0x4c   : > { %s4716_s19 = scalar_lea.hbm %s6322_s9, 4096 }
  0x4d   : > { %p4717_p12 = scmp.ne.s32.totalorder %s6322_s9, %s4716_s19  ;;  %p4723_p0 = scmp.lt.u32.totalorder %s4716_s19, %s6322_s9 }
  0x4f   : > { %p4719_p4 = pnand %p4717_p12, %p5083_p8 }
  0x51   : > { %p4720_p13 = pneg %p4719_p4 }
  0x53   : > { %p4725_p2 = pnand %p4723_p0, %p4720_p13 }
  0x55   : > { %4728 = shalt.err (!%p4725_p2)
}
  0x56   : > { %s4729_s17 = scalar_lea.vmem %s5073_s20, 4096  ;;  %p4737_p10 = scmp.lt.s32.totalorder %s5073_s20, %s5073_s20 }
  0x57   : > { %p4730_p5 = scmp.ne.s32.totalorder %s5073_s20, %s4729_s17  ;;  %p4738_p11 = scmp.lt.s32.totalorder %s4729_s17, %s4729_s17 }
  0x59   : > { %p4732_p7 = pnand %p4730_p5, %p5083_p8  ;;  %p4739_p12 = por %p4738_p11, %p4737_p10 }
  0x5b   : > { %p4733_p9 = pneg %p4732_p7 }
  0x5d   : > { %p4740_p4 = pnand %p4739_p12, %p4733_p9 }
  0x5f   : > { %4743 = shalt.err (!%p4740_p4)
}
  0x60   : > { %s4943_s10 = smov 256   ;;  %s4944_s1 = smov 16  }
  0x61   : > { %4230 = dma.hbm_to_vmem [thread:$0]  (!%p5069_p6), %s6322_s9, 4096, %s5073_s20, [#allocation14], %s4943_s10, %s4943_s10, %s4944_s1  }
  0x62   : > { %s4945_s23 = smov [#allocation9]   ;;  %s4946_s29 = smov [#allocation12]  }
  0x63   : > { %s365_s24 = sshll.u32 %s4945_s23, 4  ;;  %s391_s19 = sshll.u32 %s4946_s29, 4  ;;  %s366_s24 = int_to_ptr.vmem [resolvable:$true] %s365_s24  ;;  %s392_s19 = int_to_ptr.vmem [resolvable:$true] %s391_s19 }
  0x64   : > { %s4744_s30 = scalar_lea.hbm %s6315_s2, 16 }
  0x65   : > { %p4745_p13 = scmp.ne.s32.totalorder %s6315_s2, %s4744_s30  ;;  %p4751_p5 = scmp.lt.u32.totalorder %s4744_s30, %s6315_s2 }
  0x67   : > { %p4747_p0 = pnand %p4745_p13, %p5083_p8 }
  0x69   : > { %p4748_p2 = pneg %p4747_p0 }
  0x6b   : > { %p4753_p7 = pnand %p4751_p5, %p4748_p2 }
  0x6d   : > { %4756 = shalt.err (!%p4753_p7)
}
  0x6e   : > { %s4757_s20 = scalar_lea.vmem %s366_s24, 16  ;;  %s4764_s10 = scalar_lea.vmem %s366_s24, 32 }
  0x6f   : > { %p4758_p9 = scmp.ne.s32.totalorder %s366_s24, %s4757_s20  ;;  %p4765_p12 = scmp.lt.s32.totalorder %s366_s24, %s366_s24 }
  0x70   : > { %p4766_p4 = scmp.lt.s32.totalorder %s4764_s10, %s4757_s20 }
  0x71   : > { %p4760_p10 = pnand %p4758_p9, %p5083_p8 }
  0x72   : > { %p4767_p1 = por %p4766_p4, %p4765_p12 }
  0x73   : > { %p4761_p11 = pneg %p4760_p10 }
  0x75   : > { %p4768_p3 = pnand %p4767_p1, %p4761_p11 }
  0x77   : > { %4771 = shalt.err (!%p4768_p3)
}
  0x78   : > { %4221 = dma.hbm_to_vmem [thread:$0]  (!%p5069_p6), %s6315_s2, 16, %s366_s24, [#allocation8]  }
  0x79   : > { %s4772_s12 = scalar_lea.hbm %s6318_s5, 1024 }
  0x7a   : > { %p4773_p13 = scmp.ne.s32.totalorder %s6318_s5, %s4772_s12  ;;  %p4779_p3 = scmp.lt.u32.totalorder %s4772_s12, %s6318_s5 }
  0x7c   : > { %p4775_p0 = pnand %p4773_p13, %p5083_p8 }
  0x7e   : > { %p4776_p1 = pneg %p4775_p0 }
  0x80   : > { %p4781_p2 = pnand %p4779_p3, %p4776_p1 }
  0x82   : > { %4784 = shalt.err (!%p4781_p2)
}
  0x83   : > { %s4785_s22 = scalar_lea.vmem %s392_s19, 1024  ;;  %p4793_p10 = scmp.lt.s32.totalorder %s392_s19, %s392_s19 }
  0x84   : > { %p4786_p5 = scmp.ne.s32.totalorder %s392_s19, %s4785_s22  ;;  %p4794_p11 = scmp.lt.s32.totalorder %s4785_s22, %s4785_s22 }
  0x86   : > { %p4788_p7 = pnand %p4786_p5, %p5083_p8  ;;  %p4795_p12 = por %p4794_p11, %p4793_p10 }
  0x88   : > { %p4789_p9 = pneg %p4788_p7 }
  0x8a   : > { %p4796_p4 = pnand %p4795_p12, %p4789_p9 }
  0x8c   : > { %4799 = shalt.err (!%p4796_p4)
}
  0x8d   : > { %s4947_s24 = smov 64   ;;  %s4948_s30 = smov 4  }
  0x8e   : > { %4227 = dma.hbm_to_vmem [thread:$0]  (!%p5069_p6), %s6318_s5, 1024, %s392_s19, [#allocation11], %s4947_s24, %s4947_s24, %s4948_s30  }
  0x8f   : > { %s4949_s10 = smov [#allocation15]   ;;  %s4800_s8 = scalar_lea.hbm %s6324_s11, 4096 }
  0x90   : > { %s429_s3 = sshll.u32 %s4949_s10, 4  ;;  %p4801_p13 = scmp.ne.s32.totalorder %s6324_s11, %s4800_s8  ;;  %s430_s3 = int_to_ptr.vmem [resolvable:$true] %s429_s3 }
  0x91   : > { %p4807_p3 = scmp.lt.u32.totalorder %s4800_s8, %s6324_s11 }
  0x92   : > { %p4803_p0 = pnand %p4801_p13, %p5083_p8 }
  0x94   : > { %p4804_p1 = pneg %p4803_p0 }
  0x96   : > { %p4809_p2 = pnand %p4807_p3, %p4804_p1 }
  0x98   : > { %4812 = shalt.err (!%p4809_p2)
}
  0x99   : > { %s4813_s19 = scalar_lea.vmem %s430_s3, 4096  ;;  %p4821_p10 = scmp.lt.s32.totalorder %s430_s3, %s430_s3 }
  0x9a   : > { %p4814_p5 = scmp.ne.s32.totalorder %s430_s3, %s4813_s19  ;;  %p4822_p11 = scmp.lt.s32.totalorder %s4813_s19, %s4813_s19 }
  0x9c   : > { %p4816_p7 = pnand %p4814_p5, %p5083_p8  ;;  %p4823_p12 = por %p4822_p11, %p4821_p10 }
  0x9e   : > { %p4817_p9 = pneg %p4816_p7 }
  0xa0   : > { %p4824_p4 = pnand %p4823_p12, %p4817_p9 }
  0xa2   : > { %4827 = shalt.err (!%p4824_p4)
}
  0xa3   : > { %4233 = dma.hbm_to_vmem [thread:$0]  (!%p5069_p6), %s6324_s11, 4096, %s430_s3, [#allocation14], %s4947_s24, %s4947_s24, %s4948_s30  }
  0xa4   : > { %s3665_s16 = sadd.s32 4294967294, %s4936_s28   ;;  %s5207_s18 = sadd.s32 1, %s4936_s28  }
  0xa5   : > { %s36_s17 = ssub.s32 %s4936_s28, %s5207_s18  ;;  %s39_s20 = sadd.s32 1, %s4932_s27 }
  0xa6   : > { %p37_p8 = scmp.eq.s32.totalorder %s36_s17, 0  ;;  %p46_p13 = scmp.ne.s32.totalorder %s4932_s27, %s4928_s26 }
  0xa7   : > { %p47_p0 = scmp.eq.s32.totalorder %s4936_s28, 0  ;;  %p52_p1 = scmp.ne.s32.totalorder %s4928_s26, %s4924_s25 }
  0xa8   : > { %s5218_s10 = scalar_select %p37_p8, %s4932_s27, %s39_s20  }
  0xa9   : > { %p5220_p3 = por %p47_p0, %p46_p13  ;;  %p6344_p2 = scmp.eq.s32.totalorder %s5051_s14, 0 }
  0xaa   : > { %p328_p5 = scmp.eq.s32.totalorder %s5051_s14, 1  ;;  %p334_p7 = scmp.eq.s32.totalorder %s3665_s16, 1 }
  0xab   : > { %p5226_p6 = por %p6344_p2, %p52_p1  ;;  %p4248_p9 = scmp.lt.s32.totalorder %s4936_s28, 2 }
  0xac   : > { %s446_s30 = sand.u32 1, %s4932_s27   ;;  %p5233_p10 = por %p328_p5, %p46_p13 }
  0xad   : > { %p5237_p11 = por %p334_p7, %p52_p1  ;;  %s3674_s8 = sshll.u32 %s446_s30, 6 }
  0xae   : > { %s6346_s3 = scalar_select %p5233_p10, 1, 0 }
  0xaf   : > { %s6347_s7 = scalar_select %p5237_p11, 1, 0 }
  0xb0   : > { %s3825_s12 = sshll.u32 %s4936_s28, 10  ;;  %s450_s19 = scalar_lea.vmem [#allocation4], %s3674_s8 }
  0xb1   : > { %s5245_s29 = scalar_lea.hbm %s6313_s0, %s3825_s12  ;;  %s457_s21 = sshll.u32 %s450_s19, 4  ;;  %s5247_s21 = int_to_ptr.vmem [resolvable:$true] %s457_s21 }
  0xb2   : > { %p5251_p12 = pnand %p4248_p9, %p5220_p3  ;;  %s5255_s16 = scalar_lea.sflag [#allocation5], %s446_s30 }
  0xb3   : > { %s4828_s17 = scalar_lea.hbm %s5245_s29, 1024  ;;  %s4833_s1 = scalar_lea.hbm %s6313_s0, 2048 }
  0xb4   : > { %p4829_p4 = scmp.ne.s32.totalorder %s5245_s29, %s4828_s17  ;;  %p4830_p8 = pneg %p5251_p12 }
  0xb5   : > { %p4834_p1 = scmp.lt.u32.totalorder %s5245_s29, %s6313_s0  ;;  %p4835_p3 = scmp.lt.u32.totalorder %s4833_s1, %s4828_s17 }
  0xb6   : > { %p4831_p13 = pnand %p4830_p8, %p4829_p4  ;;  %p4837_p5 = scmp.lt.u32.totalorder %s4828_s17, %s5245_s29 }
  0xb7   : > { %p4836_p2 = por %p4835_p3, %p4834_p1 }
  0xb8   : > { %p4832_p0 = pneg %p4831_p13 }
  0xb9   : > { %p4838_p7 = por %p4837_p5, %p4836_p2 }
  0xbb   : > { %p4839_p9 = pnand %p4838_p7, %p4832_p0 }
  0xbd   : > { %4842 = shalt.err (!%p4839_p9)
}
  0xbe   : > { %s4843_s30 = scalar_lea.vmem %s5247_s21, 1024  ;;  %s4950_s23 = smov [#allocation4]  }
  0xbf   : > { %p4844_p4 = scmp.ne.s32.totalorder %s5247_s21, %s4843_s30  ;;  %s4848_s19 = sshll.u32 %s4950_s23, 4  ;;  %s4849_s19 = int_to_ptr.vmem [resolvable:$false] %s4848_s19 }
  0xc0   : > { %s4850_s20 = scalar_lea.vmem %s4849_s19, 2048  ;;  %p4851_p10 = scmp.lt.s32.totalorder %s5247_s21, %s4849_s19 }
  0xc1   : > { %p4846_p13 = pnand %p4844_p4, %p4830_p8  ;;  %p4852_p1 = scmp.lt.s32.totalorder %s4850_s20, %s4843_s30 }
  0xc3   : > { %p4847_p11 = pneg %p4846_p13  ;;  %p4853_p3 = por %p4852_p1, %p4851_p10 }
  0xc5   : > { %p4854_p2 = pnand %p4853_p3, %p4847_p11 }
  0xc7   : > { %4857 = shalt.err (!%p4854_p2)
}
  0xc8   : > { %s4951_s17 = smov 128   ;;  %s4952_s8 = smov 8  }
  0xc9   : > { %4237 = dma.hbm_to_vmem [thread:$0]  (!%p5251_p12), %s5245_s29, 1024, %s5247_s21, %s5255_s16, %s4951_s17, %s4951_s17, %s4952_s8  }
  0xca   : > { %p6349_p8 = scmp.ne.s32.totalorder %s6338_s15, 0 }
  0xcb   : > { %s5286_s1 = sand.u32 (!%p6349_p8), 1, %s4928_s26  }
  0xcc   : > { %469 = sbr.rel (%p6349_p8) target bundleno = 4151 (0x1037), region = 72  ;;  %s3678_s12 = sshll.u32 (!%p6349_p8), %s5286_s1, 6 }
  0xcd   : > { %s472_s13 = scalar_lea.sflag (!%p6349_p8), [#allocation5], %s5286_s1  ;;  %s5292_s30 = scalar_lea.vmem (!%p6349_p8), [#allocation4], %s3678_s12 }
  0xd3   : > { %4903 = dma.done.wait (%p5226_p6), %s472_s13, 1024  }
  0xd4   : > { %4905 = vsyncadd (%p5226_p6), %s472_s13, 4294966272  ;;  %p6350_p10 = scmp.eq.s32.totalorder %s5051_s14, 0 }
  0xd6   : > { %4907 = dma.done.wait (%p6350_p10), [#allocation8], 32   ;;  %p6351_p11 = pmov %p6350_p10 }
  0xd7   : > { %p6352_p12 = pmov %p6350_p10 }
  0xd8   : > { %4909 = vsyncadd (%p6351_p11), [#allocation8], 4294967264 }
  0xd9   : > { %4911 = dma.done.wait (%p6352_p12), [#allocation11], 4096   ;;  %p6353_p0 = pmov %p6350_p10 }
  0xdb   : > { %4913 = vsyncadd (%p6353_p0), [#allocation11], 4294963200  ;;  %p6354_p5 = pmov %p6353_p0 }
  0xdc   : > { %p6355_p7 = pmov %p6353_p0 }
  0xdd   : > { %4915 = dma.done.wait (%p6354_p5), [#allocation14], 8192  }
  0xde   : > { %4917 = vsyncadd (%p6355_p7), [#allocation14], 4294959104  ;;  %v543_v0 = vld [vmem:[%s5292_s30] sm:$0xff]  ;;  %v545_v1 = vld [vmem:[%s5292_s30 + $0x10] sm:$0xff]  ;;  %v4953_v63 = vmov 0   ;;  %vm1025_vm0 = vcmask 261120  }
  0xdf   : > { %553 = vadd.xlane.f32.xlu0 %v543_v0  ;;  %557 = vadd.xlane.f32.xlu1 %v545_v1  ;;  %v544_v2 = vld [vmem:[%s5292_s30 + $0x8] sm:$0xff]  ;;  %v546_v3 = vld [vmem:[%s5292_s30 + $0x18] sm:$0xff]  ;;  %v547_v4 = vld [vmem:[%s5292_s30 + $0x20] sm:$0xff]  ;;  %vm1115_vm1 = vcmask 523264   ;;  %s4954_s29 = smov 96   ;;  %s4955_s21 = smov 64  }
  0xe0   : > { %v548_v5 = vld [vmem:[%s5292_s30 + $0x28] sm:$0xff]  ;;  %v549_v6 = vld [vmem:[%s5292_s30 + $0x30] sm:$0xff]  ;;  %v550_v7 = vld [vmem:[%s5292_s30 + $0x38] sm:$0xff]  ;;  %883 = vmatprep.mubr.bf16.mxu0 %v4953_v63  ;;  %s4956_s22 = smov 32   ;;  %vm1623_vm2 = vcmask 523520   ;;  %vm1958_vm3 = vcmask 785920  }
  0xe1   : > { %v4308_v8 = vld [vmem:[#allocation10 + $0x4] ss:$12 sps:$4 sm:$0xff]   ;;  %v4310_v9 = vld [vmem:[#allocation10] ss:$12 sps:$4 sm:$0xff]   ;;  %v4311_v10 = vld [vmem:[#allocation10 + $0x1c] ss:$12 sps:$4 sm:$0xff]  }
  0xe2   : > { %v4313_v11 = vld [vmem:[#allocation10 + $0x8] ss:$12 sps:$4 sm:$0xff]   ;;  %851 = vmatprep.subr.bf16.mxu0 %v4308_v8  ;;  %v4314_v44 = vld [vmem:[#allocation10 + $0x18] ss:$12 sps:$4 sm:$0xff]   ;;  %v4317_v46 = vld [vmem:[#allocation10 + $0x20] ss:$12 sps:$4 sm:$0xff]  }
  0xe3   : > { %555 = vadd.xlane.f32.xlu0 %v544_v2  ;;  %559 = vadd.xlane.f32.xlu1 %v546_v3  ;;  %v4315_v45 = vld [vmem:[#allocation10 + $0x34] ss:$12 sps:$4 sm:$0xff]   ;;  %v4318_v47 = vld [vmem:[#allocation10 + $0x30] ss:$12 sps:$4 sm:$0xff]   ;;  %v4319_v48 = vld [vmem:[#allocation10 + $0x4c] ss:$12 sps:$4 sm:$0xff]  }
  0xe4   : > { %852 = vmatpush1.bf16.msra.mxu0 %v4310_v9  ;;  %3995 = vmatprep.subr.bf16.mxu1 %v4313_v11  ;;  %v4321_v49 = vld [vmem:[#allocation10 + $0x38] ss:$12 sps:$4 sm:$0xff]   ;;  %v4322_v50 = vld [vmem:[#allocation10 + $0x48] ss:$12 sps:$4 sm:$0xff]   ;;  %v4325_v52 = vld [vmem:[#allocation10 + $0x50] ss:$12 sps:$4 sm:$0xff]  }
  0xe5   : > { %853 = vmatprep.subr.bf16.mxu0 %v4311_v10  ;;  %3996 = vmatpush3.bf16.msra.mxu1 %v4313_v11  ;;  %v4323_v51 = vld [vmem:[#allocation10 + $0x64] ss:$12 sps:$4 sm:$0xff]   ;;  %v4326_v53 = vld [vmem:[#allocation10 + $0x60] ss:$12 sps:$4 sm:$0xff]   ;;  %v4327_v54 = vld [vmem:[#allocation10 + $0x7c] ss:$12 sps:$4 sm:$0xff]  }
  0xe6   : > { %3997 = vmatprep.subr.bf16.mxu1 %v4317_v46  ;;  %v4329_v55 = vld [vmem:[#allocation10 + $0x68] ss:$12 sps:$4 sm:$0xff]   ;;  %v4330_v56 = vld [vmem:[#allocation10 + $0x78] ss:$12 sps:$4 sm:$0xff]   ;;  %v4333_v58 = vld [vmem:[#allocation10 + $0x80] ss:$12 sps:$4 sm:$0xff]  }
  0xe7   : > { %561 = vadd.xlane.f32.xlu0 %v547_v4  ;;  %563 = vadd.xlane.f32.xlu1 %v548_v5  ;;  %v4331_v57 = vld [vmem:[#allocation10 + $0x94] ss:$12 sps:$4 sm:$0xff]   ;;  %v4334_v59 = vld [vmem:[#allocation10 + $0x90] ss:$12 sps:$4 sm:$0xff]   ;;  %v4335_v60 = vld [vmem:[#allocation10 + $0xac] ss:$12 sps:$4 sm:$0xff]  }
  0xe8   : > { %854 = vmatpush1.bf16.msra.mxu0 %v4314_v44  ;;  %v4337_v61 = vld [vmem:[#allocation10 + $0x98] ss:$12 sps:$4 sm:$0xff]   ;;  %v4338_v62 = vld [vmem:[#allocation10 + $0xa8] ss:$12 sps:$4 sm:$0xff]   ;;  %vm2293_vm4 = vcmask 1048320   ;;  %s6356_s17 = sld [smem:[#allocation24_spill]] }
  0xe9   : > { %855 = vmatprep.subr.bf16.mxu0 %v4315_v45  ;;  %3998 = vmatpush3.bf16.msra.mxu1 %v4317_v46  ;;  %s6361_s16 = sld [smem:[#allocation27_spill]]  ;;  %s6239_s23 = scalar_lea.vmem [#allocation16], %s3678_s12 }
  0xea   : > { %3999 = vmatprep.subr.bf16.mxu1 %v4321_v49  ;;  %s3826_s12 = sshll.u32 %s5051_s14, 10  ;;  %s3535_s19 = sshll.u32 %s6239_s23, 4  ;;  %s6266_s19 = int_to_ptr.vmem [resolvable:$true] %s3535_s19 }
  0xeb   : > { %565 = vadd.xlane.f32.xlu0 %v549_v6  ;;  %567 = vadd.xlane.f32.xlu1 %v550_v7  ;;  %s6362_s8 = sld [smem:[#allocation28_spill]]  ;;  %s4858_s14 = scalar_lea.vmem %s6266_s19, 1024 }
  0xec   : > { %856 = vmatpush1.bf16.msra.mxu0 %v4318_v47  ;;  %p4859_p6 = scmp.ne.s32.totalorder %s6266_s19, %s4858_s14  ;;  %p6363_p9 = scmp.ne.s32.totalorder %s6346_s3, 0 }
  0xed   : > { %857 = vmatprep.subr.bf16.mxu0 %v4319_v48  ;;  %4000 = vmatpush3.bf16.msra.mxu1 %v4321_v49  ;;  %s4957_s15 = smov [#allocation16]  }
  0xee   : > { %4001 = vmatprep.subr.bf16.mxu1 %v4325_v52  ;;  %p4860_p4 = pnand %p4859_p6, %p6363_p9  ;;  %s4862_s24 = sshll.u32 %s4957_s15, 4  ;;  %s4863_s24 = int_to_ptr.vmem [resolvable:$false] %s4862_s24 }
  0xef   : > { %p4865_p1 = scmp.lt.s32.totalorder %s6266_s19, %s4863_s24 }
  0xf0   : > { %858 = vmatpush1.bf16.msra.mxu0 %v4322_v50  ;;  %p4861_p13 = pneg %p4860_p4 }
  0xf1   : > { %859 = vmatprep.subr.bf16.mxu0 %v4323_v51  ;;  %4002 = vmatpush3.bf16.msra.mxu1 %v4325_v52  ;;  %s6264_s13 = scalar_lea.hbm %s6362_s8, %s3826_s12 }
  0xf2   : > { %4003 = vmatprep.subr.bf16.mxu1 %v4329_v55 }
  0xf4   : > { %860 = vmatpush1.bf16.msra.mxu0 %v4326_v53 }
  0xf5   : > { %861 = vmatprep.subr.bf16.mxu0 %v4327_v54  ;;  %4004 = vmatpush3.bf16.msra.mxu1 %v4329_v55 }
  0xf6   : > { %4005 = vmatprep.subr.bf16.mxu1 %v4333_v58 }
  0xf8   : > { %862 = vmatpush1.bf16.msra.mxu0 %v4330_v56 }
  0xf9   : > { %863 = vmatprep.subr.bf16.mxu0 %v4331_v57  ;;  %4006 = vmatpush3.bf16.msra.mxu1 %v4333_v58 }
  0xfa   : > { %4007 = vmatprep.subr.bf16.mxu1 %v4337_v61 }
  0xfc   : > { %864 = vmatpush1.bf16.msra.mxu0 %v4334_v59 }
  0xfd   : > { %865 = vmatprep.subr.bf16.mxu0 %v4335_v60  ;;  %4008 = vmatpush3.bf16.msra.mxu1 %v4337_v61 }
 0x100   : > { %866 = vmatpush1.bf16.msra.mxu0 %v4338_v62 }
 0x16c   : > { %v554_v12 = vpop.xlane.xlu0 %553  ;;  %v558_v13 = vpop.xlane.xlu1 %557 }
 0x16d   : > { %v570_v14 = vmul.f32 0.0078125, %v554_v12  ;;  %v572_v15 = vmul.f32 0.0078125, %v558_v13 }
 0x16f   : > { %v5318_v16 = vsub.f32 %v543_v0, %v570_v14  ;;  %v5320_v17 = vsub.f32 %v545_v1, %v572_v15  ;;  %v4339_v0 = vld [vmem:[#allocation10 + $0xb0] ss:$12 sps:$4 sm:$0xff]  }
 0x170   : > { %v556_v18 = vpop.xlane.xlu0 %555  ;;  %v560_v19 = vpop.xlane.xlu1 %559  ;;  %4009 = vmatprep.subr.bf16.mxu1 %v4339_v0 }
 0x171   : > { %v571_v20 = vmul.f32 0.0078125, %v556_v18  ;;  %v586_v21 = vmul.f32 %v5318_v16, %v5318_v16  ;;  %v573_v22 = vmul.f32 0.0078125, %v560_v19  ;;  %v588_v23 = vmul.f32 %v5320_v17, %v5320_v17  ;;  %4010 = vmatpush3.bf16.msra.mxu1 %v4339_v0 }
 0x173   : > { %594 = vadd.xlane.f32.xlu0 %v586_v21  ;;  %v5326_v24 = vsub.f32 %v544_v2, %v571_v20  ;;  %v5328_v25 = vsub.f32 %v546_v3, %v573_v22 }
 0x174   : > { %v562_v26 = vpop.xlane.xlu0 %561  ;;  %v564_v27 = vpop.xlane.xlu1 %563 }
 0x175   : > { %v574_v28 = vmul.f32 0.0078125, %v562_v26  ;;  %v587_v29 = vmul.f32 %v5326_v24, %v5326_v24  ;;  %v575_v30 = vmul.f32 0.0078125, %v564_v27  ;;  %v589_v31 = vmul.f32 %v5328_v25, %v5328_v25 }
 0x177   : > { %598 = vadd.xlane.f32.xlu0 %v588_v23  ;;  %596 = vadd.xlane.f32.xlu1 %v587_v29  ;;  %v5334_v32 = vsub.f32 %v547_v4, %v574_v28  ;;  %v5336_v33 = vsub.f32 %v548_v5, %v575_v30  ;;  %v3686_v30 = vld [vmem:[#allocation7] ss:$0 sm:$0xff] }
 0x178   : > { %v566_v34 = vpop.xlane.xlu0 %565  ;;  %v568_v35 = vpop.xlane.xlu1 %567 }
 0x179   : > { %v576_v36 = vmul.f32 0.0078125, %v566_v34  ;;  %v590_v37 = vmul.f32 %v5334_v32, %v5334_v32  ;;  %v577_v38 = vmul.f32 0.0078125, %v568_v35  ;;  %v591_v39 = vmul.f32 %v5336_v33, %v5336_v33 }
 0x17b   : > { %600 = vadd.xlane.f32.xlu1 %v589_v31  ;;  %602 = vadd.xlane.f32.xlu0 %v590_v37  ;;  %v5342_v40 = vsub.f32 %v549_v6, %v576_v36  ;;  %v5344_v41 = vsub.f32 %v550_v7, %v577_v38  ;;  %v3687_v38 = vld [vmem:[#allocation9] ss:$0 sm:$0xff] }
 0x17d   : > { %v592_v42 = vmul.f32 %v5342_v40, %v5342_v40  ;;  %v593_v43 = vmul.f32 %v5344_v41, %v5344_v41 }
 0x17f   : > { %604 = vadd.xlane.f32.xlu1 %v591_v39  ;;  %606 = vadd.xlane.f32.xlu0 %v592_v42 }
 0x183   : > { %608 = vadd.xlane.f32.xlu1 %v593_v43 }
 0x200   : > { %v595_v1 = vpop.xlane.xlu0 %594 }
 0x201   : > { %v610_v2 = vmul.f32 0.0078125, %v595_v1 }
 0x203   : > { %v618_v3 = vadd.f32 1e-05, %v610_v2 }
 0x204   : > { %v597_v4 = vpop.xlane.xlu1 %596  ;;  %v599_v5 = vpop.xlane.xlu0 %598 }
 0x205   : > { %4428 = vrsqrt.f32 %v618_v3  ;;  %v611_v6 = vmul.f32 0.0078125, %v597_v4  ;;  %v612_v7 = vmul.f32 0.0078125, %v599_v5  ;;  %v706_v3 = vld [vmem:[%s6317_s4] sm:$0x7] }
 0x207   : > { %v619_v8 = vadd.f32 1e-05, %v611_v6  ;;  %v620_v9 = vadd.f32 1e-05, %v612_v7 }
 0x208   : > { %v601_v10 = vpop.xlane.xlu1 %600  ;;  %v603_v11 = vpop.xlane.xlu0 %602 }
 0x209   : > { %4430 = vrsqrt.f32 %v619_v8  ;;  %v613_v12 = vmul.f32 0.0078125, %v601_v10  ;;  %v614_v13 = vmul.f32 0.0078125, %v603_v11 }
 0x20a   : > { %4432 = vrsqrt.f32 %v620_v9 }
 0x20b   : > { %v621_v14 = vadd.f32 1e-05, %v613_v12  ;;  %v622_v15 = vadd.f32 1e-05, %v614_v13 }
 0x20c   : > { %v605_v18 = vpop.xlane.xlu1 %604  ;;  %v607_v19 = vpop.xlane.xlu0 %606 }
 0x20d   : > { %4434 = vrsqrt.f32 %v621_v14  ;;  %v615_v20 = vmul.f32 0.0078125, %v605_v18  ;;  %v616_v21 = vmul.f32 0.0078125, %v607_v19 }
 0x20e   : > { %4436 = vrsqrt.f32 %v622_v15 }
 0x20f   : > { %v4429_v22 = vpop.eup %4428  ;;  %v623_v23 = vadd.f32 1e-05, %v615_v20  ;;  %v624_v26 = vadd.f32 1e-05, %v616_v21 }
 0x210   : > { %v609_v27 = vpop.xlane.xlu1 %608  ;;  %v634_v28 = vmul.f32 %v4429_v22, %v5318_v16 }
 0x211   : > { %4438 = vrsqrt.f32 %v623_v23  ;;  %v617_v29 = vmul.f32 0.0078125, %v609_v27 }
 0x212   : > { %4440 = vrsqrt.f32 %v624_v26  ;;  %v648_v37 = vmul.f32 %v3686_v30, %v634_v28 }
 0x213   : > { %v4431_v31 = vpop.eup %4430  ;;  %v625_v34 = vadd.f32 1e-05, %v617_v29 }
 0x214   : > { %v4433_v35 = vpop.eup %4432  ;;  %v635_v36 = vmul.f32 %v4431_v31, %v5326_v24  ;;  %v662_v46 = vadd.f32 %v3687_v38, %v648_v37 }
 0x215   : > { %4442 = vrsqrt.f32 %v625_v34  ;;  %v636_v39 = vmul.f32 %v4433_v35, %v5320_v17 }
 0x216   : > { %v649_v42 = vmul.f32 %v3686_v30, %v635_v36 }
 0x217   : > { %v4435_v43 = vpop.eup %4434  ;;  %v650_v44 = vmul.f32 %v3686_v30, %v636_v39 }
 0x218   : > { %v4437_v45 = vpop.eup %4436  ;;  %v663_v16 = vadd.f32 %v3687_v38, %v649_v42  ;;  %v637_v47 = vmul.f32 %v4435_v43, %v5328_v25 }
 0x219   : > { %v638_v48 = vmul.f32 %v4437_v45, %v5334_v32  ;;  %v664_v52 = vadd.f32 %v3687_v38, %v650_v44 }
 0x21a   : > { %v670_v49 = vpack.c.bf16 %v663_v16, %v662_v46  ;;  %v651_v50 = vmul.f32 %v3686_v30, %v637_v47 }
 0x21b   : > { %v4439_v51 = vpop.eup %4438  ;;  %v652_v54 = vmul.f32 %v3686_v30, %v638_v48 }
 0x21c   : > { %v4441_v24 = vpop.eup %4440  ;;  %884 = vmatmul.mubr.bf16.vlgmr.msra.gmra.mrb[0].mxu0 %v670_v49  ;;  %4011 = vmatprep.mubr.bf16.mxu1 %v670_v49  ;;  %v665_v53 = vadd.f32 %v3687_v38, %v651_v50  ;;  %v639_v17 = vmul.f32 %v4439_v51, %v5336_v33 }
 0x21d   : > { %893 = vmatprep.mubr.bf16.mxu0 %v4953_v63  ;;  %v640_v55 = vmul.f32 %v4441_v24, %v5342_v40  ;;  %v666_v32 = vadd.f32 %v3687_v38, %v652_v54  ;;  %v708_v40 = vlaneseq }
 0x21e   : > { %v671_v56 = vpack.c.bf16 %v665_v53, %v664_v52  ;;  %v653_v57 = vmul.f32 %v3686_v30, %v639_v17 }
 0x21f   : > { %v4443_v25 = vpop.eup %4442  ;;  %v654_v60 = vmul.f32 %v3686_v30, %v640_v55  ;;  %v5362_v2 = vshrl.u32 %v708_v40, 7 }
 0x220   : > { %4012 = vmatmul.mubr.bf16.vlgmr.msra.gmra.mrb[0].mxu1 %v671_v56  ;;  %v667_v58 = vadd.f32 %v3687_v38, %v653_v57  ;;  %v641_v59 = vmul.f32 %v4443_v25, %v5344_v41 }
 0x221   : > { %v668_v0 = vadd.f32 %v3687_v38, %v654_v60  ;;  %v710_v41 = vsub.s32 0, %v5362_v2  ;;  %v714_v4 = vsub.s32 1, %v5362_v2  ;;  %v718_v6 = vsub.s32 2, %v5362_v2 }
 0x222   : > { %v672_v61 = vpack.c.bf16 %v667_v58, %v666_v32  ;;  %v655_v62 = vmul.f32 %v3686_v30, %v641_v59 }
 0x223   : > { %v5371_v5 = vrot.slane %v706_v3, %v710_v41  ;;  %v5376_v8 = vrot.slane %v706_v3, %v714_v4  ;;  %v719_v14 = vrot.slane %v706_v3, %v718_v6 }
 0x224   : > { %894 = vmatmul.mubr.bf16.gmra.mrb[4].mxu0 %v671_v56  ;;  %4015 = vmatprep.mubr.bf16.mxu1 %v672_v61  ;;  %v669_v33 = vadd.f32 %v3687_v38, %v655_v62 }
 0x225   : > { %903 = vmatprep.mubr.bf16.mxu0 %v4953_v63 }
 0x226   : > { %v673_v1 = vpack.c.bf16 %v669_v33, %v668_v0 }
 0x228   : > { %4016 = vmatmul.mubr.bf16.gmra.mrb[4].mxu1 %v673_v1 }
 0x22c   : > { %904 = vmatmul.mubr.bf16.gmra.mrb[8].mxu0 %v672_v61 }
 0x22d   : > { %913 = vmatprep.mubr.bf16.mxu0 %v4953_v63 }
 0x234   : > { %914 = vmatmul.mubr.bf16.gmra.mrb[12].mxu0 %v673_v1 }
 0x2ef   : > { %v885_v7 = vpop.f32.mrb[0].mxu0 }
 0x2f0   : > { %v887_v9 = vpop.f32.mrb[1].mxu0  ;;  %v886_v11 = vadd.f32 %v885_v7, %v5371_v5 }
 0x2f1   : > { %v889_v10 = vpop.f32.mrb[2].mxu0  ;;  %v888_v15 = vadd.f32 %v887_v9, %v5376_v8 }
 0x2f2   : > { %v890_v12 = vadd.f32 %v889_v10, %v5371_v5  ;;  %v891_v13 = vpop.f32.mrb[3].mxu0 }
 0x2f3   : > { %v892_v18 = vadd.f32 %v891_v13, %v5376_v8  ;;  %v4013_v19 = vpop.f32.mrb[0].mxu1 }
 0x2f4   : > { %v5384_v20 = vpack.c.bf16 %v890_v12, %v886_v11  ;;  %v958_v21 = vpop.f32.mrb[1].mxu1  ;;  %v967_v26 = vadd.f32 %v4013_v19, %v719_v14 }
 0x2f5   : > { %v5386_v22 = vpack.c.bf16 %v892_v18, %v888_v15  ;;  %v4014_v23 = vpop.f32.mrb[2].mxu1  ;;  %v959_v29 = vadd.f32 %v958_v21, %v719_v14 }
 0x2f6   : > { %v970_v27 = vadd.f32 %v4014_v23, %v719_v14  ;;  %v961_v28 = vpop.f32.mrb[3].mxu1  ;;  %4027 = vmatprep.mubr.msk.bf16.mxu0 %vm1025_vm0, %v5384_v20 }
 0x2f7   : > { %v962_v30 = vadd.f32 %v961_v28, %v719_v14  ;;  %v895_v31 = vpop.f32.mrb[4].mxu0  ;;  %4171 = vmatprep.subr.msk.bf16.mxu0 %vm1025_vm0, %v5386_v22  ;;  %v1039_v34 = vsel %vm1025_vm0, %v5386_v22, 0 }
 0x2f8   : > { %v5394_v35 = vpack.c.bf16 %v970_v27, %v967_v26  ;;  %v897_v36 = vpop.f32.mrb[5].mxu0  ;;  %4020 = vmatpush3.bf16.xpose.msra.mxu0 %v1039_v34  ;;  %v896_v39 = vadd.f32 %v895_v31, %v5371_v5 }
 0x2f9   : > { %v5396_v37 = vpack.c.bf16 %v962_v30, %v959_v29  ;;  %v899_v38 = vpop.f32.mrb[6].mxu0  ;;  %v898_v44 = vadd.f32 %v897_v36, %v5376_v8 }
 0x2fa   : > { %v900_v42 = vadd.f32 %v899_v38, %v5371_v5  ;;  %v901_v43 = vpop.f32.mrb[7].mxu0 }
 0x2fb   : > { %v902_v45 = vadd.f32 %v901_v43, %v5376_v8  ;;  %v4017_v46 = vpop.f32.mrb[4].mxu1  ;;  %4035 = vmatprep.subr.bf16.mxu1 %v5396_v37 }
 0x2fc   : > { %v5403_v16 = vpack.c.bf16 %v900_v42, %v896_v39  ;;  %v974_v47 = vpop.f32.mrb[5].mxu1  ;;  %4036 = vmatpush3.bf16.msra.mxu1 %v5396_v37  ;;  %v983_v50 = vadd.f32 %v4017_v46, %v719_v14 }
 0x2fd   : > { %v5406_v48 = vpack.c.bf16 %v902_v45, %v898_v44  ;;  %v4018_v49 = vpop.f32.mrb[6].mxu1  ;;  %4037 = vmatprep.subr.bf16.mxu1 %v5394_v35  ;;  %v975_v24 = vadd.f32 %v974_v47, %v719_v14 }
 0x2fe   : > { %v986_v51 = vadd.f32 %v4018_v49, %v719_v14  ;;  %v977_v52 = vpop.f32.mrb[7].mxu1 }
 0x2ff   : > { %v978_v53 = vadd.f32 %v977_v52, %v719_v14  ;;  %v905_v17 = vpop.f32.mrb[8].mxu0  ;;  %4172 = vmatprep.subr.msk.bf16.mxu0 %vm1025_vm0, %v5406_v48  ;;  %v1042_v54 = vsel %vm1025_vm0, %v5406_v48, 0 }
 0x300   : > { %v5413_v55 = vpack.c.bf16 %v986_v51, %v983_v50  ;;  %v907_v56 = vpop.f32.mrb[9].mxu0  ;;  %4022 = vmatpush3.bf16.xpose.msra.mxu0 %v1042_v54  ;;  %4038 = vmatpush3.bf16.msra.mxu1 %v5394_v35  ;;  %v906_v32 = vadd.f32 %v905_v17, %v5371_v5 }
 0x301   : > { %v5416_v57 = vpack.c.bf16 %v978_v53, %v975_v24  ;;  %v909_v25 = vpop.f32.mrb[10].mxu0  ;;  %v908_v60 = vadd.f32 %v907_v56, %v5376_v8 }
 0x302   : > { %v910_v58 = vadd.f32 %v909_v25, %v5371_v5  ;;  %v911_v59 = vpop.f32.mrb[11].mxu0 }
 0x303   : > { %v912_v61 = vadd.f32 %v911_v59, %v5376_v8  ;;  %4039 = vmatprep.subr.bf16.mxu1 %v5416_v57 }
 0x304   : > { %v5423_v62 = vpack.c.bf16 %v910_v58, %v906_v32  ;;  %4040 = vmatpush3.bf16.msra.mxu1 %v5416_v57 }
 0x305   : > { %v5426_v0 = vpack.c.bf16 %v912_v61, %v908_v60  ;;  %4041 = vmatprep.subr.bf16.mxu1 %v5413_v55 }
 0x307   : > { %v915_v33 = vpop.f32.mrb[12].mxu0  ;;  %4173 = vmatprep.subr.msk.bf16.mxu0 %vm1025_vm0, %v5426_v0  ;;  %v1045_v1 = vsel %vm1025_vm0, %v5426_v0, 0 }
 0x308   : > { %v917_v40 = vpop.f32.mrb[13].mxu0  ;;  %4024 = vmatpush3.bf16.xpose.msra.mxu0 %v1045_v1  ;;  %4042 = vmatpush3.bf16.msra.mxu1 %v5413_v55  ;;  %v916_v7 = vadd.f32 %v915_v33, %v5371_v5 }
 0x309   : > { %v919_v3 = vpop.f32.mrb[14].mxu0  ;;  %v918_v11 = vadd.f32 %v917_v40, %v5376_v8 }
 0x30a   : > { %v920_v9 = vadd.f32 %v919_v3, %v5371_v5  ;;  %v921_v10 = vpop.f32.mrb[15].mxu0 }
 0x30b   : > { %v922_v12 = vadd.f32 %v921_v10, %v5376_v8 }
 0x30c   : > { %v5438_v13 = vpack.c.bf16 %v920_v9, %v916_v7 }
 0x30d   : > { %v5440_v14 = vpack.c.bf16 %v922_v12, %v918_v11 }
 0x30f   : > { %4174 = vmatprep.subr.msk.bf16.mxu0 %vm1025_vm0, %v5440_v14  ;;  %v1048_v15 = vsel %vm1025_vm0, %v5440_v14, 0 }
 0x310   : > { %4026 = vmatpush3.bf16.xpose.msra.mxu0 %v1048_v15 }
 0x317   : > { %4028 = vmatmul.mubr.msk.bf16.vlgmr.msra.gmra.mrb[16].mxu0 %vm1025_vm0, %v5403_v16 }
 0x318   : > { %4031 = vmatprep.mubr.msk.bf16.mxu0 %vm1025_vm0, %v5423_v62 }
 0x31f   : > { %4032 = vmatmul.mubr.msk.bf16.gmra.mrb[20].mxu0 %vm1025_vm0, %v5438_v13 }
 0x3ea   : > { %v4029_v5 = vpop.f32.mrb[16].mxu0 }
 0x3eb   : > { %v1084_v8 = vpop.f32.mrb[17].mxu0  ;;  %v1122_v26 = vsel %vm1115_vm1, %v4029_v5, -inf }
 0x3ec   : > { %v4030_v18 = vpop.f32.mrb[18].mxu0  ;;  %v1116_v19 = vsel %vm1115_vm1, %v1084_v8, -inf }
 0x3ed   : > { %1117 = vmax.xlane.f32.xlu0 %v1116_v19  ;;  %v1087_v21 = vpop.f32.mrb[19].mxu0  ;;  %v1125_v23 = vsel %vm1115_vm1, %v4030_v18, -inf }
 0x3ee   : > { %1126 = vmax.xlane.f32.xlu1 %v1125_v23  ;;  %v1119_v27 = vsel %vm1115_vm1, %v1087_v21, -inf }
 0x3f1   : > { %1123 = vmax.xlane.f32.xlu0 %v1122_v26 }
 0x3f2   : > { %1120 = vmax.xlane.f32.xlu1 %v1119_v27  ;;  %v4033_v28 = vpop.f32.mrb[20].mxu0 }
 0x3f3   : > { %v1100_v29 = vpop.f32.mrb[21].mxu0  ;;  %v1134_v38 = vsel %vm1115_vm1, %v4033_v28, -inf }
 0x3f4   : > { %v4034_v30 = vpop.f32.mrb[22].mxu0  ;;  %v1128_v31 = vsel %vm1115_vm1, %v1100_v29, -inf }
 0x3f5   : > { %1129 = vmax.xlane.f32.xlu0 %v1128_v31  ;;  %v1103_v34 = vpop.f32.mrb[23].mxu0  ;;  %v1137_v36 = vsel %vm1115_vm1, %v4034_v30, -inf }
 0x3f6   : > { %1138 = vmax.xlane.f32.xlu1 %v1137_v36  ;;  %v1131_v39 = vsel %vm1115_vm1, %v1103_v34, -inf }
 0x3f9   : > { %1135 = vmax.xlane.f32.xlu0 %v1134_v38 }
 0x3fa   : > { %1132 = vmax.xlane.f32.xlu1 %v1131_v39 }
 0x40b   : > { %1323 = vrot.lane.b32.xlu1 %v5406_v48, %s4954_s29 }
 0x40f   : > { %1325 = vrot.lane.b32.xlu1 %v5426_v0, %s4954_s29 }
 0x47a   : > { %v1118_v42 = vpop.xlane.xlu0 %1117 }
 0x47b   : > { %v1127_v43 = vpop.xlane.xlu1 %1126  ;;  %v1140_v45 = vsub.f32 %v1084_v8, %v1118_v42 }
 0x47c   : > { %v1143_v44 = vsub.f32 %v4030_v18, %v1127_v43 }
 0x47d   : > { %v1148_v52 = vmul.f32 1.442695, %v1140_v45 }
 0x47e   : > { %v1154_v46 = vmul.f32 1.442695, %v1143_v44  ;;  %v1124_v47 = vpop.xlane.xlu0 %1123 }
 0x47f   : > { %v1142_v49 = vsub.f32 %v4029_v5, %v1124_v47  ;;  %v1121_v50 = vpop.xlane.xlu1 %1120 }
 0x480   : > { %4444 = vpow2.f32 %v1154_v46  ;;  %v1141_v51 = vsub.f32 %v1087_v21, %v1121_v50 }
 0x481   : > { %v1152_v24 = vmul.f32 1.442695, %v1142_v49 }
 0x482   : > { %v1150_v53 = vmul.f32 1.442695, %v1141_v51  ;;  %v1130_v61 = vpop.xlane.xlu0 %1129 }
 0x483   : > { %4446 = vpow2.f32 %v1152_v24  ;;  %v1139_v33 = vpop.xlane.xlu1 %1138  ;;  %v1144_v11 = vsub.f32 %v1100_v29, %v1130_v61 }
 0x484   : > { %4448 = vpow2.f32 %v1150_v53  ;;  %v1147_v1 = vsub.f32 %v4034_v30, %v1139_v33 }
 0x485   : > { %4450 = vpow2.f32 %v1148_v52  ;;  %v1156_v5 = vmul.f32 1.442695, %v1144_v11 }
 0x486   : > { %v1136_v40 = vpop.xlane.xlu0 %1135  ;;  %v1162_v9 = vmul.f32 1.442695, %v1147_v1 }
 0x487   : > { %v1133_v3 = vpop.xlane.xlu1 %1132  ;;  %v1146_v7 = vsub.f32 %v4033_v28, %v1136_v40 }
 0x488   : > { %v1145_v10 = vsub.f32 %v1103_v34, %v1133_v3  ;;  %4452 = vpow2.f32 %v1162_v9 }
 0x489   : > { %v1160_v12 = vmul.f32 1.442695, %v1146_v7 }
 0x48a   : > { %v5464_v17 = vpop.eup %4444  ;;  %v1158_v15 = vmul.f32 1.442695, %v1145_v10 }
 0x48b   : > { %v1173_v54 = vsel %vm1115_vm1, %v5464_v17, 0.0  ;;  %4454 = vpow2.f32 %v1160_v12  ;;  %v1324_v29 = vpop.permute.xlu1 %1323 }
 0x48c   : > { %1174 = vadd.xlane.f32.xlu1 %v1173_v54  ;;  %4456 = vpow2.f32 %v1158_v15 }
 0x48d   : > { %v5468_v56 = vpop.eup %4446  ;;  %4458 = vpow2.f32 %v1156_v5 }
 0x48e   : > { %v5470_v25 = vpop.eup %4448  ;;  %v1170_v32 = vsel %vm1115_vm1, %v5468_v56, 0.0 }
 0x48f   : > { %v5474_v58 = vpop.eup %4450  ;;  %1171 = vadd.xlane.f32.xlu0 %v1170_v32  ;;  %v1167_v59 = vsel %vm1115_vm1, %v5470_v25, 0.0  ;;  %v1326_v30 = vpop.permute.xlu1 %1325  ;;  %v1345_v32 = vsel %vm1025_vm0, %v1324_v29, 0 }
 0x490   : > { %1168 = vadd.xlane.f32.xlu1 %v1167_v59  ;;  %v1164_v60 = vsel %vm1115_vm1, %v5474_v58, 0.0 }
 0x492   : > { %v5484_v8 = vpop.eup %4452 }
 0x493   : > { %1165 = vadd.xlane.f32.xlu0 %v1164_v60  ;;  %v1185_v19 = vsel %vm1115_vm1, %v5484_v8, 0.0 }
 0x495   : > { %v5486_v18 = vpop.eup %4454 }
 0x496   : > { %v5490_v21 = vpop.eup %4456  ;;  %v1182_v23 = vsel %vm1115_vm1, %v5486_v18, 0.0 }
 0x497   : > { %v5494_v26 = vpop.eup %4458  ;;  %v1179_v27 = vsel %vm1115_vm1, %v5490_v21, 0.0 }
 0x498   : > { %v1176_v28 = vsel %vm1115_vm1, %v5494_v26, 0.0 }
 0x4a1   : > { %1656 = vrot.lane.b32.xlu1 %v5386_v22, %s4955_s21 }
 0x4a9   : > { %1321 = vrot.lane.b32.xlu0 %v5386_v22, %s4954_s29 }
 0x4c5   : > { %1186 = vadd.xlane.f32.xlu1 %v1185_v19 }
 0x4c8   : > { %1183 = vadd.xlane.f32.xlu0 %v1182_v23 }
 0x4c9   : > { %1180 = vadd.xlane.f32.xlu1 %v1179_v27 }
 0x4cc   : > { %1177 = vadd.xlane.f32.xlu0 %v1176_v28 }
 0x4da   : > { %1658 = vrot.lane.b32.xlu1 %v5406_v48, %s4955_s21 }
 0x4de   : > { %1311 = vrot.lane.b32.xlu1 %v5403_v16, %s4954_s29 }
 0x4e2   : > { %1327 = vrot.lane.b32.xlu0 %v5440_v14, %s4954_s29  ;;  %1313 = vrot.lane.b32.xlu1 %v5423_v62, %s4954_s29 }
 0x4e6   : > { %1309 = vrot.lane.b32.xlu0 %v5384_v20, %s4954_s29  ;;  %1662 = vrot.lane.b32.xlu1 %v5440_v14, %s4955_s21 }
 0x4ea   : > { %1660 = vrot.lane.b32.xlu0 %v5426_v0, %s4955_s21  ;;  %1646 = vrot.lane.b32.xlu1 %v5403_v16, %s4955_s21 }
 0x4ee   : > { %1315 = vrot.lane.b32.xlu0 %v5438_v13, %s4954_s29  ;;  %1650 = vrot.lane.b32.xlu1 %v5438_v13, %s4955_s21 }
 0x4f2   : > { %1644 = vrot.lane.b32.xlu0 %v5384_v20, %s4955_s21 }
 0x4f6   : > { %1648 = vrot.lane.b32.xlu0 %v5423_v62, %s4955_s21 }
 0x519   : > { %v1175_v31 = vpop.xlane.xlu1 %1174 }
 0x51c   : > { %v1172_v34 = vpop.xlane.xlu0 %1171 }
 0x51d   : > { %v1169_v36 = vpop.xlane.xlu1 %1168  ;;  %4460 = vrcp.f32 %v1172_v34 }
 0x51e   : > { %4462 = vrcp.f32 %v1169_v36 }
 0x51f   : > { %4464 = vrcp.f32 %v1175_v31 }
 0x520   : > { %v1166_v38 = vpop.xlane.xlu0 %1165 }
 0x521   : > { %4466 = vrcp.f32 %v1166_v38  ;;  %v1657_v39 = vpop.permute.xlu1 %1656 }
 0x522   : > { %4179 = vmatprep.subr.msk.bf16.mxu0 %vm1025_vm0, %v1657_v39  ;;  %v1677_v42 = vsel %vm1025_vm0, %v1657_v39, 0 }
 0x523   : > { %4084 = vmatpush3.bf16.xpose.msra.mxu0 %v1677_v42 }
 0x524   : > { %v1322_v43 = vpop.permute.xlu0 %1321 }
 0x525   : > { %4175 = vmatprep.subr.msk.bf16.mxu1 %vm1025_vm0, %v1322_v43  ;;  %v1342_v54 = vsel %vm1025_vm0, %v1322_v43, 0 }
 0x527   : > { %v4461_v44 = vpop.eup %4460 }
 0x528   : > { %v4463_v45 = vpop.eup %4462  ;;  %v1198_v49 = vmul.f32 %v4461_v44, %v5468_v56  ;;  %v1348_v56 = vsel %vm1025_vm0, %v1326_v30, 0 }
 0x529   : > { %v4465_v46 = vpop.eup %4464  ;;  %v1197_v51 = vmul.f32 %v4463_v45, %v5470_v25 }
 0x52a   : > { %v1199_v52 = vmul.f32 %v4465_v46, %v5464_v17 }
 0x52b   : > { %v4467_v47 = vpop.eup %4466 }
 0x52c   : > { %v1196_v50 = vmul.f32 %v4467_v47, %v5474_v58  ;;  %v1205_v53 = vpack.c.bf16 %v1199_v52, %v1198_v49 }
 0x52e   : > { %v1204_v24 = vpack.c.bf16 %v1197_v51, %v1196_v50 }
 0x530   : > { %4043 = vmatprep.mubr.msk.bf16.mxu1 %vm1115_vm1, %v1204_v24 }
 0x531   : > { %4044 = vmatmul.mubr.msk.bf16.vlgmr.msra.gmra.mrb[8].mxu1 %vm1115_vm1, %v1205_v53 }
 0x532   : > { %4052 = vmatpush3.bf16.xpose.msra.mxu1 %v1342_v54 }
 0x533   : > { %4176 = vmatprep.subr.msk.bf16.mxu1 %vm1025_vm0, %v1324_v29 }
 0x53a   : > { %4054 = vmatpush3.bf16.xpose.msra.mxu1 %v1345_v32 }
 0x53b   : > { %4177 = vmatprep.subr.msk.bf16.mxu1 %vm1025_vm0, %v1326_v30 }
 0x542   : > { %4056 = vmatpush3.bf16.xpose.msra.mxu1 %v1348_v56 }
 0x552   : > { %v1187_v17 = vpop.xlane.xlu1 %1186 }
 0x555   : > { %v1184_v25 = vpop.xlane.xlu0 %1183 }
 0x556   : > { %v1181_v58 = vpop.xlane.xlu1 %1180  ;;  %4468 = vrcp.f32 %v1184_v25 }
 0x557   : > { %4470 = vrcp.f32 %v1181_v58 }
 0x558   : > { %4472 = vrcp.f32 %v1187_v17 }
 0x559   : > { %v1178_v59 = vpop.xlane.xlu0 %1177 }
 0x55a   : > { %4474 = vrcp.f32 %v1178_v59  ;;  %v1659_v60 = vpop.permute.xlu1 %1658 }
 0x55b   : > { %4180 = vmatprep.subr.msk.bf16.mxu0 %vm1025_vm0, %v1659_v60  ;;  %v1680_v61 = vsel %vm1025_vm0, %v1659_v60, 0 }
 0x55c   : > { %4086 = vmatpush3.bf16.xpose.msra.mxu0 %v1680_v61 }
 0x55d   : > { %v1328_v33 = vpop.permute.xlu0 %1327 }
 0x55e   : > { %4178 = vmatprep.subr.msk.bf16.mxu1 %vm1025_vm0, %v1328_v33  ;;  %v1312_v1 = vpop.permute.xlu1 %1311  ;;  %v1351_v40 = vsel %vm1025_vm0, %v1328_v33, 0 }
 0x55f   : > { %4058 = vmatpush3.bf16.xpose.msra.mxu1 %v1351_v40 }
 0x560   : > { %v4469_v3 = vpop.eup %4468 }
 0x561   : > { %v1310_v7 = vpop.permute.xlu0 %1309  ;;  %v4471_v9 = vpop.eup %4470  ;;  %v1202_v15 = vmul.f32 %v4469_v3, %v5486_v18 }
 0x562   : > { %v1314_v10 = vpop.permute.xlu1 %1313  ;;  %v4473_v11 = vpop.eup %4472  ;;  %v1201_v23 = vmul.f32 %v4471_v9, %v5490_v21 }
 0x563   : > { %v1203_v29 = vmul.f32 %v4473_v11, %v5484_v8 }
 0x564   : > { %v4475_v12 = vpop.eup %4474 }
 0x565   : > { %v1661_v5 = vpop.permute.xlu0 %1660  ;;  %v1200_v19 = vmul.f32 %v4475_v12, %v5494_v26  ;;  %v1207_v31 = vpack.c.bf16 %v1203_v29, %v1202_v15 }
 0x566   : > { %4181 = vmatprep.subr.msk.bf16.mxu0 %vm1025_vm0, %v1661_v5  ;;  %v1663_v27 = vpop.permute.xlu1 %1662  ;;  %v1683_v28 = vsel %vm1025_vm0, %v1661_v5, 0 }
 0x567   : > { %4088 = vmatpush3.bf16.xpose.msra.mxu0 %v1683_v28  ;;  %v1206_v30 = vpack.c.bf16 %v1201_v23, %v1200_v19  ;;  %v1686_v21 = vsel %vm1025_vm0, %v1663_v27, 0 }
 0x568   : > { %4182 = vmatprep.subr.msk.bf16.mxu0 %vm1025_vm0, %v1663_v27 }
 0x569   : > { %v1316_v34 = vpop.permute.xlu0 %1315  ;;  %4047 = vmatprep.mubr.msk.bf16.mxu1 %vm1115_vm1, %v1206_v30 }
 0x56a   : > { %4048 = vmatmul.mubr.msk.bf16.gmra.mrb[12].mxu1 %vm1115_vm1, %v1207_v31  ;;  %v1647_v8 = vpop.permute.xlu1 %1646 }
 0x56b   : > { %4059 = vmatprep.mubr.msk.bf16.mxu1 %vm1025_vm0, %v1310_v7 }
 0x56d   : > { %v1645_v18 = vpop.permute.xlu0 %1644 }
 0x56e   : > { %4091 = vmatprep.mubr.msk.bf16.mxu0 %vm1025_vm0, %v1645_v18  ;;  %v1651_v36 = vpop.permute.xlu1 %1650 }
 0x56f   : > { %4090 = vmatpush3.bf16.xpose.msra.mxu0 %v1686_v21 }
 0x571   : > { %v1649_v26 = vpop.permute.xlu0 %1648 }
 0x572   : > { %4060 = vmatmul.mubr.msk.bf16.vlgmr.msra.gmra.mrb[16].mxu1 %vm1025_vm0, %v1312_v1 }
 0x573   : > { %4063 = vmatprep.mubr.msk.bf16.mxu1 %vm1025_vm0, %v1314_v10 }
 0x576   : > { %4092 = vmatmul.mubr.msk.bf16.vlgmr.msra.gmra.mrb[24].mxu0 %vm1025_vm0, %v1647_v8 }
 0x577   : > { %4095 = vmatprep.mubr.msk.bf16.mxu0 %vm1025_vm0, %v1649_v26 }
 0x57a   : > { %4064 = vmatmul.mubr.msk.bf16.gmra.mrb[20].mxu1 %vm1025_vm0, %v1316_v34 }
 0x57e   : > { %4096 = vmatmul.mubr.msk.bf16.gmra.mrb[28].mxu0 %vm1025_vm0, %v1651_v36 }
 0x604   : > { %v4045_v38 = vpop.f32.mrb[8].mxu1 }
 0x605   : > { %v1254_v39 = vpop.f32.mrb[9].mxu1 }
 0x606   : > { %v4046_v42 = vpop.f32.mrb[10].mxu1 }
 0x607   : > { %v1286_v43 = vpack.c.bf16 %v4046_v42, %v4045_v38  ;;  %v1257_v44 = vpop.f32.mrb[11].mxu1 }
 0x608   : > { %v1285_v45 = vpack.c.bf16 %v1257_v44, %v1254_v39 }
 0x609   : > { %1290 = vst.msk [vmem:[#allocation3 + $0x8] sm:$0xff] %vm1025_vm0, %v1286_v43 }
 0x60a   : > { %1289 = vst.msk [vmem:[#allocation3] sm:$0xff] %vm1025_vm0, %v1285_v45 }
 0x63d   : > { %v4049_v46 = vpop.f32.mrb[12].mxu1 }
 0x63e   : > { %v1270_v47 = vpop.f32.mrb[13].mxu1 }
 0x63f   : > { %v4050_v49 = vpop.f32.mrb[14].mxu1 }
 0x640   : > { %v1288_v50 = vpack.c.bf16 %v4050_v49, %v4049_v46  ;;  %v1273_v51 = vpop.f32.mrb[15].mxu1 }
 0x641   : > { %v1287_v52 = vpack.c.bf16 %v1273_v51, %v1270_v47 }
 0x642   : > { %1292 = vst.msk [vmem:[#allocation3 + $0x18] sm:$0xff] %vm1025_vm0, %v1288_v50 }
 0x643   : > { %1291 = vst.msk [vmem:[#allocation3 + $0x10] sm:$0xff] %vm1025_vm0, %v1287_v52 }
 0x645   : > { %v5564_v24 = vpop.f32.mrb[16].mxu1 }
 0x646   : > { %v5566_v53 = vpop.f32.mrb[17].mxu1  ;;  %v1424_v27 = vsel %vm1115_vm1, %v5564_v24, -inf }
 0x647   : > { %v5568_v54 = vpop.f32.mrb[18].mxu1  ;;  %v1418_v29 = vsel %vm1115_vm1, %v5566_v53, -inf }
 0x648   : > { %v5570_v32 = vpop.f32.mrb[19].mxu1  ;;  %v1427_v30 = vsel %vm1115_vm1, %v5568_v54, -inf }
 0x649   : > { %v4093_v56 = vpop.f32.mrb[24].mxu0  ;;  %v1421_v28 = vsel %vm1115_vm1, %v5570_v32, -inf }
 0x64a   : > { %v1722_v17 = vpop.f32.mrb[25].mxu0  ;;  %v1759_v40 = vsel %vm1115_vm1, %v4093_v56, -inf }
 0x64b   : > { %v4094_v25 = vpop.f32.mrb[26].mxu0  ;;  %v1753_v58 = vsel %vm1115_vm1, %v1722_v17, -inf }
 0x64c   : > { %1754 = vmax.xlane.f32.xlu0 %v1753_v58  ;;  %v1725_v59 = vpop.f32.mrb[27].mxu0  ;;  %v1762_v9 = vsel %vm1115_vm1, %v4094_v25, -inf }
 0x64d   : > { %v5573_v60 = vpop.f32.mrb[20].mxu1  ;;  %v1756_v61 = vsel %vm1115_vm1, %v1725_v59, -inf }
 0x64e   : > { %v5576_v33 = vpop.f32.mrb[21].mxu1  ;;  %1757 = vmax.xlane.f32.xlu1 %v1756_v61  ;;  %v1436_v31 = vsel %vm1115_vm1, %v5573_v60, -inf }
 0x64f   : > { %v5578_v1 = vpop.f32.mrb[22].mxu1  ;;  %v1430_v34 = vsel %vm1115_vm1, %v5576_v33, -inf }
 0x650   : > { %v5581_v3 = vpop.f32.mrb[23].mxu1  ;;  %1760 = vmax.xlane.f32.xlu0 %v1759_v40 }
 0x651   : > { %v5583_v7 = vpop.f32.mrb[28].mxu0 }
 0x652   : > { %1763 = vmax.xlane.f32.xlu1 %v1762_v9  ;;  %v5586_v10 = vpop.f32.mrb[29].mxu0  ;;  %v1771_v19 = vsel %vm1115_vm1, %v5583_v7, -inf }
 0x653   : > { %v5588_v11 = vpop.f32.mrb[30].mxu0  ;;  %v1765_v12 = vsel %vm1115_vm1, %v5586_v10, -inf }
 0x654   : > { %1766 = vmax.xlane.f32.xlu0 %v1765_v12  ;;  %v5592_v15 = vpop.f32.mrb[31].mxu0  ;;  %v1774_v23 = vsel %vm1115_vm1, %v5588_v11, -inf }
 0x655   : > { %v1768_v5 = vsel %vm1115_vm1, %v5592_v15, -inf }
 0x656   : > { %1769 = vmax.xlane.f32.xlu1 %v1768_v5 }
 0x658   : > { %1772 = vmax.xlane.f32.xlu0 %v1771_v19 }
 0x65a   : > { %1775 = vmax.xlane.f32.xlu1 %v1774_v23 }
 0x66b   : > { %1516 = vrot.lane.b32.xlu1 %v5394_v35, %s4954_s29 }
 0x66e   : > { %1514 = vrot.lane.b32.xlu0 %v5396_v37, %s4954_s29 }
 0x68d   : > { %1425 = vmax.xlane.f32.xlu0 %v1424_v27 }
 0x68f   : > { %1422 = vmax.xlane.f32.xlu1 %v1421_v28 }
 0x691   : > { %1419 = vmax.xlane.f32.xlu0 %v1418_v29 }
 0x695   : > { %1428 = vmax.xlane.f32.xlu0 %v1427_v30 }
 0x699   : > { %1437 = vmax.xlane.f32.xlu0 %v1436_v31 }
 0x69d   : > { %1431 = vmax.xlane.f32.xlu0 %v1430_v34  ;;  %v1439_v34 = vsel %vm1115_vm1, %v5578_v1, -inf }
 0x6b3   : > { %1518 = vrot.lane.b32.xlu0 %v5416_v57, %s4954_s29 }
 0x6d9   : > { %v1755_v18 = vpop.xlane.xlu0 %1754 }
 0x6da   : > { %v1777_v21 = vsub.f32 %v1722_v17, %v1755_v18 }
 0x6db   : > { %v1758_v8 = vpop.xlane.xlu1 %1757 }
 0x6dc   : > { %v1785_v26 = vmul.f32 1.442695, %v1777_v21  ;;  %v1778_v36 = vsub.f32 %v1725_v59, %v1758_v8 }
 0x6dd   : > { %v1761_v38 = vpop.xlane.xlu0 %1760 }
 0x6de   : > { %4476 = vpow2.f32 %v1785_v26  ;;  %v1787_v39 = vmul.f32 1.442695, %v1778_v36  ;;  %v1779_v42 = vsub.f32 %v4093_v56, %v1761_v38  ;;  %v1433_v26 = vsel %vm1115_vm1, %v5581_v3, -inf }
 0x6df   : > { %v1764_v43 = vpop.xlane.xlu1 %1763 }
 0x6e0   : > { %4478 = vpow2.f32 %v1787_v39  ;;  %v1789_v44 = vmul.f32 1.442695, %v1779_v42  ;;  %v1780_v45 = vsub.f32 %v4094_v25, %v1764_v43 }
 0x6e1   : > { %v5618_v46 = vpop.xlane.xlu0 %1766 }
 0x6e2   : > { %4480 = vpow2.f32 %v1789_v44  ;;  %v1791_v47 = vmul.f32 1.442695, %v1780_v45  ;;  %v1781_v49 = vsub.f32 %v5586_v10, %v5618_v46 }
 0x6e3   : > { %v5622_v50 = vpop.xlane.xlu1 %1769 }
 0x6e4   : > { %v1782_v51 = vsub.f32 %v5592_v15, %v5622_v50  ;;  %4482 = vpow2.f32 %v1791_v47 }
 0x6e5   : > { %v5626_v52 = vpop.xlane.xlu0 %1772 }
 0x6e6   : > { %v1783_v56 = vsub.f32 %v5583_v7, %v5626_v52 }
 0x6e7   : > { %v5630_v17 = vpop.xlane.xlu1 %1775 }
 0x6e8   : > { %v5632_v25 = vpop.eup %4476  ;;  %v1784_v58 = vsub.f32 %v5588_v11, %v5630_v17 }
 0x6e9   : > { %v1515_v59 = vpop.permute.xlu0 %1514  ;;  %v1801_v61 = vsel %vm1115_vm1, %v5632_v25, 0.0 }
 0x6ea   : > { %v5638_v40 = vpop.eup %4478  ;;  %4067 = vmatprep.subr.bf16.mxu1 %v1515_v59  ;;  %1802 = vadd.xlane.f32.xlu1 %v1801_v61  ;;  %v1799_v10 = vmul.f32 1.442695, %v1784_v58 }
 0x6eb   : > { %4068 = vmatpush3.bf16.msra.mxu1 %v1515_v59  ;;  %v1517_v9 = vpop.permute.xlu1 %1516  ;;  %v1804_v12 = vsel %vm1115_vm1, %v5638_v40, 0.0 }
 0x6ec   : > { %v5642_v5 = vpop.eup %4480  ;;  %1805 = vadd.xlane.f32.xlu0 %v1804_v12  ;;  %4069 = vmatprep.subr.bf16.mxu1 %v1517_v9 }
 0x6ed   : > { %v1807_v19 = vsel %vm1115_vm1, %v5642_v5, 0.0 }
 0x6ee   : > { %v5646_v23 = vpop.eup %4482 }
 0x6ef   : > { %4070 = vmatpush3.bf16.msra.mxu1 %v1517_v9  ;;  %v1810_v27 = vsel %vm1115_vm1, %v5646_v23, 0.0 }
 0x6f0   : > { %1808 = vadd.xlane.f32.xlu0 %v1807_v19 }
 0x6f4   : > { %1811 = vadd.xlane.f32.xlu0 %v1810_v27 }
 0x6fb   : > { %1520 = vrot.lane.b32.xlu1 %v5413_v55, %s4954_s29 }
 0x71a   : > { %v1426_v28 = vpop.xlane.xlu0 %1425 }
 0x71b   : > { %v1444_v29 = vsub.f32 %v5564_v24, %v1426_v28  ;;  %v1793_v28 = vmul.f32 1.442695, %v1781_v49 }
 0x71c   : > { %v1423_v45 = vpop.xlane.xlu1 %1422 }
 0x71d   : > { %v1454_v30 = vmul.f32 1.442695, %v1444_v29  ;;  %v1443_v47 = vsub.f32 %v5570_v32, %v1423_v45  ;;  %v1797_v32 = vmul.f32 1.442695, %v1783_v56 }
 0x71e   : > { %v1420_v31 = vpop.xlane.xlu0 %1419 }
 0x71f   : > { %4484 = vpow2.f32 %v1454_v30  ;;  %v1442_v18 = vsub.f32 %v5566_v53, %v1420_v31  ;;  %1440 = vmax.xlane.f32.xlu1 %v1439_v34  ;;  %v1452_v9 = vmul.f32 1.442695, %v1443_v47 }
 0x721   : > { %v1450_v21 = vmul.f32 1.442695, %v1442_v18 }
 0x722   : > { %v1429_v8 = vpop.xlane.xlu0 %1428 }
 0x723   : > { %4486 = vpow2.f32 %v1450_v21  ;;  %1434 = vmax.xlane.f32.xlu1 %v1433_v26  ;;  %v1445_v44 = vsub.f32 %v5568_v54, %v1429_v8 }
 0x725   : > { %v1456_v59 = vmul.f32 1.442695, %v1445_v44 }
 0x726   : > { %v1438_v36 = vpop.xlane.xlu0 %1437 }
 0x727   : > { %v1448_v61 = vsub.f32 %v5573_v60, %v1438_v36  ;;  %4488 = vpow2.f32 %v1456_v59 }
 0x728   : > { %4490 = vpow2.f32 %v1452_v9 }
 0x729   : > { %v5658_v38 = vpop.eup %4484  ;;  %v1462_v19 = vmul.f32 1.442695, %v1448_v61 }
 0x72a   : > { %v1432_v24 = vpop.xlane.xlu0 %1431  ;;  %v1472_v39 = vsel %vm1115_vm1, %v5658_v38, 0.0 }
 0x72b   : > { %1473 = vadd.xlane.f32.xlu0 %v1472_v39  ;;  %v1446_v12 = vsub.f32 %v5576_v33, %v1432_v24  ;;  %4492 = vpow2.f32 %v1462_v19 }
 0x72d   : > { %v5662_v42 = vpop.eup %4486  ;;  %v1458_v27 = vmul.f32 1.442695, %v1446_v12 }
 0x72e   : > { %v1519_v43 = vpop.permute.xlu0 %1518  ;;  %v1466_v53 = vsel %vm1115_vm1, %v5662_v42, 0.0 }
 0x72f   : > { %1467 = vadd.xlane.f32.xlu0 %v1466_v53  ;;  %4071 = vmatprep.subr.bf16.mxu1 %v1519_v43  ;;  %4494 = vpow2.f32 %v1458_v27 }
 0x730   : > { %4072 = vmatpush3.bf16.msra.mxu1 %v1519_v43  ;;  %4496 = vpow2.f32 %v1793_v28 }
 0x731   : > { %v5679_v54 = vpop.eup %4488  ;;  %4498 = vpow2.f32 %v1797_v32  ;;  %v1795_v32 = vmul.f32 1.442695, %v1782_v51 }
 0x732   : > { %v1475_v60 = vsel %vm1115_vm1, %v5679_v54, 0.0  ;;  %v5686_v33 = vpop.eup %4490  ;;  %4500 = vpow2.f32 %v1799_v10 }
 0x733   : > { %v1469_v49 = vsel %vm1115_vm1, %v5686_v33, 0.0 }
 0x734   : > { %1851 = vrot.lane.b32.xlu1 %v5394_v35, %s4955_s21 }
 0x735   : > { %v5691_v46 = vpop.eup %4492 }
 0x736   : > { %v1484_v52 = vsel %vm1115_vm1, %v5691_v46, 0.0 }
 0x738   : > { %1853 = vrot.lane.b32.xlu1 %v5416_v57, %s4955_s21 }
 0x739   : > { %v5695_v29 = vpop.eup %4494 }
 0x73a   : > { %v1478_v7 = vsel %vm1115_vm1, %v5695_v29, 0.0  ;;  %v5701_v56 = vpop.eup %4496 }
 0x73b   : > { %v1813_v11 = vsel %vm1115_vm1, %v5701_v56, 0.0  ;;  %v5705_v17 = vpop.eup %4498 }
 0x73c   : > { %v1819_v58 = vsel %vm1115_vm1, %v5705_v17, 0.0  ;;  %v5709_v30 = vpop.eup %4500 }
 0x73d   : > { %v1822_v31 = vsel %vm1115_vm1, %v5709_v30, 0.0 }
 0x745   : > { %1849 = vrot.lane.b32.xlu0 %v5396_v37, %s4955_s21 }
 0x75c   : > { %1476 = vadd.xlane.f32.xlu1 %v1475_v60 }
 0x760   : > { %1470 = vadd.xlane.f32.xlu1 %v1469_v49 }
 0x764   : > { %1479 = vadd.xlane.f32.xlu0 %v1478_v7  ;;  %1485 = vadd.xlane.f32.xlu1 %v1484_v52 }
 0x768   : > { %1814 = vadd.xlane.f32.xlu0 %v1813_v11 }
 0x76c   : > { %1820 = vadd.xlane.f32.xlu0 %v1819_v58 }
 0x770   : > { %1823 = vadd.xlane.f32.xlu0 %v1822_v31 }
 0x777   : > { %v1803_v34 = vpop.xlane.xlu1 %1802 }
 0x778   : > { %4502 = vrcp.f32 %v1803_v34 }
 0x779   : > { %v1806_v18 = vpop.xlane.xlu0 %1805 }
 0x77a   : > { %4504 = vrcp.f32 %v1806_v18 }
 0x77b   : > { %v1521_v21 = vpop.permute.xlu1 %1520 }
 0x77c   : > { %4073 = vmatprep.subr.bf16.mxu1 %v1521_v21 }
 0x77d   : > { %v1809_v8 = vpop.xlane.xlu0 %1808  ;;  %4074 = vmatpush3.bf16.msra.mxu1 %v1521_v21 }
 0x77e   : > { %4506 = vrcp.f32 %v1809_v8 }
 0x781   : > { %v1812_v26 = vpop.xlane.xlu0 %1811 }
 0x782   : > { %v4503_v36 = vpop.eup %4502  ;;  %4508 = vrcp.f32 %v1812_v26 }
 0x783   : > { %v5714_v39 = vmul.f32 %v4503_v36, %v5632_v25 }
 0x784   : > { %v4505_v24 = vpop.eup %4504 }
 0x785   : > { %v5717_v43 = vmul.f32 %v4505_v24, %v5638_v40 }
 0x786   : > { %1991 = vrot.lane.b32.xlu0 %v5386_v22, %s4956_s22 }
 0x787   : > { %v1841_v53 = vpack.c.bf16 %v5717_v43, %v5714_v39 }
 0x788   : > { %v4507_v44 = vpop.eup %4506 }
 0x789   : > { %v5726_v47 = vmul.f32 %v4507_v44, %v5642_v5 }
 0x78a   : > { %1979 = vrot.lane.b32.xlu0 %v5384_v20, %s4956_s22 }
 0x78c   : > { %v4509_v45 = vpop.eup %4508 }
 0x78d   : > { %v5729_v25 = vmul.f32 %v4509_v45, %v5646_v23 }
 0x78e   : > { %1983 = vrot.lane.b32.xlu0 %v5423_v62, %s4956_s22 }
 0x78f   : > { %v1842_v22 = vpack.c.bf16 %v5729_v25, %v5726_v47 }
 0x7ac   : > { %v1441_v40 = vpop.xlane.xlu1 %1440 }
 0x7ad   : > { %v1449_v59 = vsub.f32 %v5578_v1, %v1441_v40 }
 0x7af   : > { %v1464_v61 = vmul.f32 1.442695, %v1449_v59 }
 0x7b0   : > { %v1435_v9 = vpop.xlane.xlu1 %1434 }
 0x7b1   : > { %4510 = vpow2.f32 %v1464_v61  ;;  %v1447_v20 = vsub.f32 %v5581_v3, %v1435_v9 }
 0x7b3   : > { %v1460_v12 = vmul.f32 1.442695, %v1447_v20 }
 0x7b4   : > { %v1852_v3 = vpop.permute.xlu1 %1851 }
 0x7b5   : > { %4512 = vpow2.f32 %v1460_v12 }
 0x7b6   : > { %4514 = vpow2.f32 %v1795_v32 }
 0x7b8   : > { %v1474_v5 = vpop.xlane.xlu0 %1473  ;;  %v1854_v60 = vpop.permute.xlu1 %1853 }
 0x7bb   : > { %v5737_v19 = vpop.eup %4510 }
 0x7bc   : > { %v1468_v23 = vpop.xlane.xlu0 %1467  ;;  %v1487_v62 = vsel %vm1115_vm1, %v5737_v19, 0.0 }
 0x7bd   : > { %1488 = vadd.xlane.f32.xlu1 %v1487_v62 }
 0x7bf   : > { %v5741_v27 = vpop.eup %4512 }
 0x7c0   : > { %v1850_v28 = vpop.permute.xlu0 %1849  ;;  %v1481_v1 = vsel %vm1115_vm1, %v5741_v27, 0.0  ;;  %v5750_v7 = vpop.eup %4514 }
 0x7c1   : > { %4099 = vmatprep.subr.bf16.mxu1 %v1850_v28  ;;  %1482 = vadd.xlane.f32.xlu1 %v1481_v1  ;;  %v1816_v11 = vsel %vm1115_vm1, %v5750_v7, 0.0 }
 0x7d2   : > { %1855 = vrot.lane.b32.xlu1 %v5413_v55, %s4955_s21 }
 0x7e9   : > { %v1477_v10 = vpop.xlane.xlu1 %1476 }
 0x7ea   : > { %4516 = vrcp.f32 %v1477_v10 }
 0x7eb   : > { %4518 = vrcp.f32 %v1468_v23 }
 0x7ec   : > { %4520 = vrcp.f32 %v1474_v5 }
 0x7ed   : > { %v1471_v49 = vpop.xlane.xlu1 %1470 }
 0x7ee   : > { %4522 = vrcp.f32 %v1471_v49 }
 0x7f4   : > { %v4517_v52 = vpop.eup %4516 }
 0x7f5   : > { %v4519_v58 = vpop.eup %4518  ;;  %v1501_v15 = vmul.f32 %v4517_v52, %v5679_v54  ;;  %v1486_v54 = vpop.xlane.xlu1 %1485 }
 0x7f6   : > { %1817 = vadd.xlane.f32.xlu1 %v1816_v11  ;;  %v4521_v31 = vpop.eup %4520  ;;  %v1498_v50 = vmul.f32 %v4519_v58, %v5662_v42 }
 0x7f7   : > { %v1500_v18 = vmul.f32 %v4521_v31, %v5658_v38  ;;  %v1480_v38 = vpop.xlane.xlu0 %1479 }
 0x7f8   : > { %v4523_v34 = vpop.eup %4522 }
 0x7f9   : > { %v1499_v51 = vmul.f32 %v4523_v34, %v5686_v33  ;;  %v1507_v8 = vpack.c.bf16 %v1501_v15, %v1500_v18 }
 0x7fb   : > { %v1506_v21 = vpack.c.bf16 %v1499_v51, %v1498_v50  ;;  %v1815_v42 = vpop.xlane.xlu0 %1814 }
 0x7fd   : > { %4075 = vmatprep.mubr.msk.bf16.mxu1 %vm1115_vm1, %v1506_v21 }
 0x7fe   : > { %4076 = vmatmul.mubr.msk.bf16.vlgmr.msra.gmra.mrb[24].mxu1 %vm1115_vm1, %v1507_v8 }
 0x7ff   : > { %4100 = vmatpush3.bf16.msra.mxu1 %v1850_v28  ;;  %v1821_v33 = vpop.xlane.xlu0 %1820 }
 0x800   : > { %4101 = vmatprep.subr.bf16.mxu1 %v1852_v3 }
 0x803   : > { %4102 = vmatpush3.bf16.msra.mxu1 %v1852_v3 }
 0x804   : > { %4103 = vmatprep.subr.bf16.mxu1 %v1854_v60 }
 0x807   : > { %4104 = vmatpush3.bf16.msra.mxu1 %v1854_v60  ;;  %1993 = vrot.lane.b32.xlu1 %v5406_v48, %s4956_s22  ;;  %v1824_v48 = vpop.xlane.xlu0 %1823 }
 0x80b   : > { %1995 = vrot.lane.b32.xlu1 %v5426_v0, %s4956_s22 }
 0x80f   : > { %1997 = vrot.lane.b32.xlu1 %v5440_v14, %s4956_s22  ;;  %v1992_v14 = vpop.permute.xlu0 %1991 }
 0x810   : > { %v2012_v12 = vsel %vm1025_vm0, %v1992_v14, 0 }
 0x813   : > { %1981 = vrot.lane.b32.xlu1 %v5403_v16, %s4956_s22  ;;  %v1980_v32 = vpop.permute.xlu0 %1979 }
 0x817   : > { %1985 = vrot.lane.b32.xlu1 %v5438_v13, %s4956_s22  ;;  %v1984_v60 = vpop.permute.xlu0 %1983 }
 0x84a   : > { %v1489_v26 = vpop.xlane.xlu1 %1488 }
 0x84b   : > { %4524 = vrcp.f32 %v1489_v26 }
 0x84c   : > { %4526 = vrcp.f32 %v1480_v38 }
 0x84d   : > { %4528 = vrcp.f32 %v1486_v54 }
 0x84e   : > { %v1483_v36 = vpop.xlane.xlu1 %1482 }
 0x84f   : > { %4530 = vrcp.f32 %v1483_v36 }
 0x850   : > { %4532 = vrcp.f32 %v1824_v48 }
 0x851   : > { %4534 = vrcp.f32 %v1815_v42 }
 0x852   : > { %v1856_v0 = vpop.permute.xlu1 %1855  ;;  %4536 = vrcp.f32 %v1821_v33 }
 0x853   : > { %4105 = vmatprep.subr.bf16.mxu1 %v1856_v0 }
 0x854   : > { %4106 = vmatpush3.bf16.msra.mxu1 %v1856_v0 }
 0x855   : > { %4183 = vmatprep.subr.msk.bf16.mxu1 %vm1025_vm0, %v1992_v14  ;;  %v4525_v16 = vpop.eup %4524 }
 0x856   : > { %v4527_v24 = vpop.eup %4526  ;;  %v1505_v45 = vmul.f32 %v4525_v16, %v5737_v19 }
 0x857   : > { %v4529_v13 = vpop.eup %4528  ;;  %v1502_v40 = vmul.f32 %v4527_v24, %v5695_v29 }
 0x858   : > { %v1504_v61 = vmul.f32 %v4529_v13, %v5691_v46 }
 0x859   : > { %v4531_v44 = vpop.eup %4530 }
 0x85a   : > { %v1503_v59 = vmul.f32 %v4531_v44, %v5741_v27  ;;  %v1509_v20 = vpack.c.bf16 %v1505_v45, %v1504_v61  ;;  %v4533_v39 = vpop.eup %4532 }
 0x85c   : > { %v1508_v9 = vpack.c.bf16 %v1503_v59, %v1502_v40 }
 0x85e   : > { %4079 = vmatprep.mubr.msk.bf16.mxu1 %vm1115_vm1, %v1508_v9 }
 0x85f   : > { %4080 = vmatmul.mubr.msk.bf16.gmra.mrb[28].mxu1 %vm1115_vm1, %v1509_v20 }
 0x860   : > { %4107 = vmatprep.mubr.msk.bf16.mxu1 %vm1115_vm1, %v1841_v53  ;;  %v4535_v53 = vpop.eup %4534 }
 0x861   : > { %v4537_v47 = vpop.eup %4536  ;;  %v1837_v19 = vmul.f32 %v4535_v53, %v5701_v56 }
 0x862   : > { %v1839_v27 = vmul.f32 %v4537_v47, %v5705_v17 }
 0x867   : > { %4108 = vmatmul.mubr.msk.bf16.vlgmr.msra.gmra.mrb[32].mxu1 %vm1115_vm1, %v1842_v22  ;;  %v1840_v22 = vmul.f32 %v4533_v39, %v5709_v30 }
 0x868   : > { %4116 = vmatpush3.bf16.xpose.msra.mxu1 %v2012_v12 }
 0x869   : > { %v1844_v3 = vpack.c.bf16 %v1840_v22, %v1839_v27 }
 0x883   : > { %v1818_v46 = vpop.xlane.xlu1 %1817 }
 0x884   : > { %4538 = vrcp.f32 %v1818_v46 }
 0x887   : > { %v1994_v29 = vpop.permute.xlu1 %1993 }
 0x888   : > { %v2015_v5 = vsel %vm1025_vm0, %v1994_v29, 0  ;;  %4184 = vmatprep.subr.msk.bf16.mxu1 %vm1025_vm0, %v1994_v29 }
 0x889   : > { %4118 = vmatpush3.bf16.xpose.msra.mxu1 %v2015_v5 }
 0x88b   : > { %v1996_v43 = vpop.permute.xlu1 %1995 }
 0x88c   : > { %4185 = vmatprep.subr.msk.bf16.mxu1 %vm1025_vm0, %v1996_v43  ;;  %v2018_v62 = vsel %vm1025_vm0, %v1996_v43, 0 }
 0x88e   : > { %v4539_v25 = vpop.eup %4538 }
 0x88f   : > { %v1838_v23 = vmul.f32 %v4539_v25, %v5750_v7  ;;  %v1998_v28 = vpop.permute.xlu1 %1997 }
 0x890   : > { %v2021_v56 = vsel %vm1025_vm0, %v1998_v28, 0 }
 0x891   : > { %4120 = vmatpush3.bf16.xpose.msra.mxu1 %v2018_v62  ;;  %v1843_v1 = vpack.c.bf16 %v1838_v23, %v1837_v19 }
 0x892   : > { %4186 = vmatprep.subr.msk.bf16.mxu1 %vm1025_vm0, %v1998_v28 }
 0x893   : > { %4111 = vmatprep.mubr.msk.bf16.mxu1 %vm1115_vm1, %v1843_v1  ;;  %v1982_v30 = vpop.permute.xlu1 %1981 }
 0x894   : > { %4112 = vmatmul.mubr.msk.bf16.gmra.mrb[36].mxu1 %vm1115_vm1, %v1844_v3 }
 0x895   : > { %4123 = vmatprep.mubr.msk.bf16.mxu1 %vm1025_vm0, %v1980_v32 }
 0x897   : > { %v1986_v17 = vpop.permute.xlu1 %1985 }
 0x899   : > { %4122 = vmatpush3.bf16.xpose.msra.mxu1 %v2021_v56 }
 0x8a0   : > { %4124 = vmatmul.mubr.msk.bf16.vlgmr.msra.gmra.mrb[40].mxu1 %vm1025_vm0, %v1982_v30 }
 0x8a1   : > { %4127 = vmatprep.mubr.msk.bf16.mxu1 %vm1025_vm0, %v1984_v60 }
 0x8a8   : > { %4128 = vmatmul.mubr.msk.bf16.gmra.mrb[44].mxu1 %vm1025_vm0, %v1986_v17 }
 0x8a9   : > { %2822 = vmatprep.mubr.bf16.mxu1 %v4953_v63 }
 0x8d1   : > { %v5803_v10 = vpop.f32.mrb[24].mxu1 }
 0x8d2   : > { %v5805_v49 = vpop.f32.mrb[25].mxu1 }
 0x8d3   : > { %v5807_v7 = vpop.f32.mrb[26].mxu1 }
 0x8d4   : > { %v1604_v52 = vpack.c.bf16 %v5807_v7, %v5803_v10  ;;  %v5811_v11 = vpop.f32.mrb[27].mxu1 }
 0x8d5   : > { %v1603_v58 = vpack.c.bf16 %v5811_v11, %v5805_v49 }
 0x932   : > { %v5815_v31 = vpop.f32.mrb[28].mxu1 }
 0x933   : > { %v5817_v34 = vpop.f32.mrb[29].mxu1 }
 0x934   : > { %v5819_v15 = vpop.f32.mrb[30].mxu1 }
 0x935   : > { %v1606_v50 = vpack.c.bf16 %v5819_v15, %v5815_v31  ;;  %v5823_v51 = vpop.f32.mrb[31].mxu1 }
 0x936   : > { %v1605_v18 = vpack.c.bf16 %v5823_v51, %v5817_v34 }
 0x93a   : > { %v5827_v21 = vpop.f32.mrb[32].mxu1 }
 0x93b   : > { %v5829_v8 = vpop.f32.mrb[33].mxu1 }
 0x93c   : > { %v5831_v38 = vpop.f32.mrb[34].mxu1 }
 0x93d   : > { %v1939_v42 = vpack.c.bf16 %v5831_v38, %v5827_v21  ;;  %v5835_v54 = vpop.f32.mrb[35].mxu1 }
 0x93e   : > { %v1938_v33 = vpack.c.bf16 %v5835_v54, %v5829_v8 }
 0x967   : > { %v5839_v26 = vpop.f32.mrb[36].mxu1 }
 0x968   : > { %v5841_v48 = vpop.f32.mrb[37].mxu1 }
 0x969   : > { %v5843_v36 = vpop.f32.mrb[38].mxu1 }
 0x96a   : > { %v1941_v0 = vpack.c.bf16 %v5843_v36, %v5839_v26  ;;  %v5847_v14 = vpop.f32.mrb[39].mxu1 }
 0x96b   : > { %v1940_v16 = vpack.c.bf16 %v5847_v14, %v5841_v48 }
 0x973   : > { %v4125_v24 = vpop.f32.mrb[40].mxu1 }
 0x974   : > { %v2057_v13 = vpop.f32.mrb[41].mxu1  ;;  %v2094_v61 = vsel %vm1115_vm1, %v4125_v24, -inf }
 0x975   : > { %v4126_v44 = vpop.f32.mrb[42].mxu1  ;;  %v2088_v45 = vsel %vm1115_vm1, %v2057_v13, -inf }
 0x976   : > { %2089 = vmax.xlane.f32.xlu0 %v2088_v45  ;;  %v2060_v40 = vpop.f32.mrb[43].mxu1  ;;  %v2097_v46 = vsel %vm1115_vm1, %v4126_v44, -inf }
 0x977   : > { %v2091_v59 = vsel %vm1115_vm1, %v2060_v40, -inf }
 0x978   : > { %2092 = vmax.xlane.f32.xlu1 %v2091_v59 }
 0x97a   : > { %2095 = vmax.xlane.f32.xlu0 %v2094_v61 }
 0x97b   : > { %v4129_v9 = vpop.f32.mrb[44].mxu1 }
 0x97c   : > { %v2073_v20 = vpop.f32.mrb[45].mxu1  ;;  %v2106_v53 = vsel %vm1115_vm1, %v4129_v9, -inf }
 0x97d   : > { %v4130_v12 = vpop.f32.mrb[46].mxu1  ;;  %v2100_v39 = vsel %vm1115_vm1, %v2073_v20, -inf }
 0x97e   : > { %2098 = vmax.xlane.f32.xlu0 %v2097_v46  ;;  %v2076_v29 = vpop.f32.mrb[47].mxu1  ;;  %v2109_v43 = vsel %vm1115_vm1, %v4130_v12, -inf }
 0x97f   : > { %v2103_v5 = vsel %vm1115_vm1, %v2076_v29, -inf }
 0x980   : > { %2104 = vmax.xlane.f32.xlu1 %v2103_v5 }
 0x982   : > { %2101 = vmax.xlane.f32.xlu0 %v2100_v39 }
 0x984   : > { %2110 = vmax.xlane.f32.xlu1 %v2109_v43 }
 0x986   : > { %2107 = vmax.xlane.f32.xlu0 %v2106_v53 }
 0x99c   : > { %2184 = vrot.lane.b32.xlu0 %v5396_v37, %s4956_s22 }
 0xa03   : > { %v2090_v47 = vpop.xlane.xlu0 %2089 }
 0xa04   : > { %v2112_v25 = vsub.f32 %v2057_v13, %v2090_v47 }
 0xa05   : > { %v2093_v22 = vpop.xlane.xlu1 %2092 }
 0xa06   : > { %v2120_v62 = vmul.f32 1.442695, %v2112_v25  ;;  %v2113_v27 = vsub.f32 %v2060_v40, %v2093_v22 }
 0xa07   : > { %v2096_v19 = vpop.xlane.xlu0 %2095 }
 0xa08   : > { %v2114_v23 = vsub.f32 %v4125_v24, %v2096_v19  ;;  %v2122_v56 = vmul.f32 1.442695, %v2113_v27 }
 0xa0a   : > { %v2124_v28 = vmul.f32 1.442695, %v2114_v23 }
 0xa0b   : > { %v2099_v1 = vpop.xlane.xlu0 %2098 }
 0xa0c   : > { %4540 = vpow2.f32 %v2124_v28  ;;  %v2115_v3 = vsub.f32 %v4126_v44, %v2099_v1 }
 0xa0d   : > { %v2105_v32 = vpop.xlane.xlu1 %2104  ;;  %4542 = vpow2.f32 %v2120_v62 }
 0xa0e   : > { %v2126_v30 = vmul.f32 1.442695, %v2115_v3 }
 0xa0f   : > { %v2102_v60 = vpop.xlane.xlu0 %2101 }
 0xa10   : > { %4544 = vpow2.f32 %v2126_v30  ;;  %v2116_v17 = vsub.f32 %v2073_v20, %v2102_v60  ;;  %v2117_v20 = vsub.f32 %v2076_v29, %v2105_v32 }
 0xa11   : > { %4546 = vpow2.f32 %v2122_v56  ;;  %v2111_v37 = vpop.xlane.xlu1 %2110 }
 0xa12   : > { %v2128_v24 = vmul.f32 1.442695, %v2116_v17  ;;  %v2119_v61 = vsub.f32 %v4130_v12, %v2111_v37  ;;  %v2130_v47 = vmul.f32 1.442695, %v2117_v20 }
 0xa13   : > { %v2108_v45 = vpop.xlane.xlu0 %2107 }
 0xa14   : > { %v2118_v13 = vsub.f32 %v4129_v9, %v2108_v45  ;;  %v2134_v43 = vmul.f32 1.442695, %v2119_v61 }
 0xa16   : > { %v5861_v59 = vpop.eup %4540  ;;  %v2132_v40 = vmul.f32 1.442695, %v2118_v13 }
 0xa17   : > { %v2185_v46 = vpop.permute.xlu0 %2184  ;;  %v2142_v44 = vsel %vm1115_vm1, %v5861_v59, 0.0  ;;  %v4543_v5 = vpop.eup %4542 }
 0xa18   : > { %4548 = vpow2.f32 %v2132_v40  ;;  %2143 = vadd.xlane.f32.xlu0 %v2142_v44  ;;  %4131 = vmatprep.subr.bf16.mxu0 %v2185_v46  ;;  %v2136_v9 = vsel %vm1115_vm1, %v4543_v5, 0.0 }
 0xa19   : > { %4132 = vmatpush3.bf16.msra.mxu0 %v2185_v46  ;;  %4550 = vpow2.f32 %v2128_v24 }
 0xa1a   : > { %v5865_v39 = vpop.eup %4544  ;;  %4552 = vpow2.f32 %v2134_v43 }
 0xa1b   : > { %v2145_v12 = vsel %vm1115_vm1, %v5865_v39, 0.0  ;;  %v4547_v53 = vpop.eup %4546  ;;  %4554 = vpow2.f32 %v2130_v47  ;;  %v4342_v47 = vld [vmem:[#allocation12 + $0x10] sm:$0xff]  }
 0xa1c   : > { %2137 = vadd.xlane.f32.xlu0 %v2136_v9  ;;  %2146 = vadd.xlane.f32.xlu1 %v2145_v12  ;;  %v2139_v25 = vsel %vm1115_vm1, %v4547_v53, 0.0 }
 0xa20   : > { %2140 = vadd.xlane.f32.xlu1 %v2139_v25  ;;  %v4343_v25 = vld [vmem:[#allocation12 + $0x18] sm:$0xff]  }
 0xa22   : > { %v5871_v22 = vpop.eup %4548 }
 0xa23   : > { %v2154_v29 = vsel %vm1115_vm1, %v5871_v22, 0.0  ;;  %v5875_v19 = vpop.eup %4550 }
 0xa24   : > { %2155 = vadd.xlane.f32.xlu1 %v2154_v29  ;;  %v2148_v23 = vsel %vm1115_vm1, %v5875_v19, 0.0  ;;  %v5879_v62 = vpop.eup %4552  ;;  %v4344_v29 = vld [vmem:[#allocation12 + $0x20] sm:$0xff]  }
 0xa25   : > { %v2157_v27 = vsel %vm1115_vm1, %v5879_v62, 0.0  ;;  %v4555_v28 = vpop.eup %4554 }
 0xa26   : > { %v2151_v1 = vsel %vm1115_vm1, %v4555_v28, 0.0 }
 0xa28   : > { %2149 = vadd.xlane.f32.xlu1 %v2148_v23  ;;  %v4347_v23 = vld [vmem:[#allocation12 + $0x38] sm:$0xff]  }
 0xa2c   : > { %2158 = vadd.xlane.f32.xlu1 %v2157_v27 }
 0xa30   : > { %2152 = vadd.xlane.f32.xlu1 %v2151_v1 }
 0xa32   : > { %2188 = vrot.lane.b32.xlu0 %v5416_v57, %s4956_s22 }
 0xa36   : > { %2190 = vrot.lane.b32.xlu0 %v5413_v55, %s4956_s22 }
 0xa3a   : > { %1611 = vrot.lane.b32.xlu0 %v1603_v58, %s4956_s22 }
 0xa3e   : > { %1946 = vrot.lane.b32.xlu0 %v1938_v33, %s4955_s21 }
 0xa41   : > { %2186 = vrot.lane.b32.xlu1 %v5394_v35, %s4956_s22 }
 0xa45   : > { %1613 = vrot.lane.b32.xlu1 %v1604_v52, %s4956_s22 }
 0xa49   : > { %1948 = vrot.lane.b32.xlu1 %v1939_v42, %s4955_s21 }
 0xaa5   : > { %v2144_v55 = vpop.xlane.xlu0 %2143 }
 0xaa9   : > { %v2138_v57 = vpop.xlane.xlu0 %2137  ;;  %v2147_v49 = vpop.xlane.xlu1 %2146 }
 0xaaa   : > { %4556 = vrcp.f32 %v2138_v57 }
 0xaad   : > { %v2189_v11 = vpop.permute.xlu0 %2188  ;;  %v2141_v58 = vpop.xlane.xlu1 %2140 }
 0xaae   : > { %4558 = vrcp.f32 %v2141_v58 }
 0xaaf   : > { %4560 = vrcp.f32 %v2147_v49 }
 0xab0   : > { %4562 = vrcp.f32 %v2144_v55 }
 0xab1   : > { %v2191_v8 = vpop.permute.xlu0 %2190  ;;  %v2156_v54 = vpop.xlane.xlu1 %2155 }
 0xab4   : > { %v4557_v3 = vpop.eup %4556 }
 0xab5   : > { %v1612_v35 = vpop.permute.xlu0 %1611  ;;  %v2150_v33 = vpop.xlane.xlu1 %2149  ;;  %v2168_v21 = vmul.f32 %v4557_v3, %v4543_v5  ;;  %v3752_v3 = vld [vmem:[%s6319_s6] ss:$0 sm:$0xff] }
 0xab6   : > { %1624 = vst.msk [vmem:[#allocation3] sm:$0xff] %vm1623_vm2, %v1612_v35  ;;  %4564 = vrcp.f32 %v2150_v33 }
 0xab8   : > { %v4559_v10 = vpop.eup %4558 }
 0xab9   : > { %v1947_v7 = vpop.permute.xlu0 %1946  ;;  %v2159_v52 = vpop.xlane.xlu1 %2158  ;;  %v2169_v38 = vmul.f32 %v4559_v10, %v4547_v53  ;;  %v4341_v53 = vld [vmem:[#allocation12 + $0x8] sm:$0xff]  }
 0xaba   : > { %1959 = vst.msk [vmem:[#allocation3] sm:$0xff] %vm1958_vm3, %v1947_v7  ;;  %v4561_v30 = vpop.eup %4560  ;;  %v4652_v7 = vld [vmem:[%s5292_s30] sm:$0xff] }
 0xabb   : > { %v2176_v42 = vpack.c.bf16 %v2169_v38, %v2168_v21  ;;  %v4563_v17 = vpop.eup %4562  ;;  %v2171_v13 = vmul.f32 %v4561_v30, %v5865_v39  ;;  %v4654_v30 = vld [vmem:[%s5292_s30 + $0x8] sm:$0xff] }
 0xabc   : > { %v2170_v40 = vmul.f32 %v4563_v17, %v5861_v59  ;;  %v4340_v59 = vld [vmem:[#allocation12] sm:$0xff]  }
 0xabd   : > { %4139 = vmatprep.mubr.msk.bf16.mxu0 %vm1115_vm1, %v2176_v42  ;;  %v2153_v32 = vpop.xlane.xlu1 %2152  ;;  %v4653_v42 = vld [vmem:[%s5292_s30 + $0x10] sm:$0xff] }
 0xabe   : > { %4566 = vrcp.f32 %v2153_v32  ;;  %v2177_v44 = vpack.c.bf16 %v2171_v13, %v2170_v40 }
 0xabf   : > { %4568 = vrcp.f32 %v2159_v52 }
 0xac0   : > { %4570 = vrcp.f32 %v2156_v54  ;;  %v4565_v37 = vpop.eup %4564 }
 0xac1   : > { %v2187_v56 = vpop.permute.xlu1 %2186  ;;  %v2172_v46 = vmul.f32 %v4565_v37, %v5875_v19  ;;  %v4345_v19 = vld [vmem:[#allocation12 + $0x28] sm:$0xff]  }
 0xac2   : > { %4133 = vmatprep.subr.bf16.mxu0 %v2187_v56 }
 0xac3   : > { %4134 = vmatpush3.bf16.msra.mxu0 %v2187_v56 }
 0xac4   : > { %4135 = vmatprep.subr.bf16.mxu0 %v2189_v11 }
 0xac5   : > { %v1614_v60 = vpop.permute.xlu1 %1613 }
 0xac6   : > { %1625 = vst.msk [vmem:[#allocation3 + $0x8] sm:$0xff] %vm1623_vm2, %v1614_v60 }
 0xac7   : > { %4136 = vmatpush3.bf16.msra.mxu0 %v2189_v11 }
 0xac8   : > { %v4567_v45 = vpop.eup %4566  ;;  %4137 = vmatprep.subr.bf16.mxu0 %v2191_v8 }
 0xac9   : > { %v1949_v24 = vpop.permute.xlu1 %1948  ;;  %v2173_v61 = vmul.f32 %v4567_v45, %v4555_v28  ;;  %v4569_v5 = vpop.eup %4568  ;;  %v4655_v45 = vld [vmem:[%s5292_s30 + $0x18] sm:$0xff] }
 0xaca   : > { %1960 = vst.msk [vmem:[#allocation3 + $0x8] sm:$0xff] %vm1958_vm3, %v1949_v24  ;;  %v4571_v43 = vpop.eup %4570  ;;  %v2175_v39 = vmul.f32 %v4569_v5, %v5879_v62 }
 0xacb   : > { %4138 = vmatpush3.bf16.msra.mxu0 %v2191_v8  ;;  %v2178_v20 = vpack.c.bf16 %v2173_v61, %v2172_v46  ;;  %v2174_v9 = vmul.f32 %v4571_v43, %v5871_v22  ;;  %v4346_v22 = vld [vmem:[#allocation12 + $0x30] sm:$0xff]   ;;  %v4656_v46 = vld [vmem:[%s5292_s30 + $0x20] sm:$0xff] }
 0xacc   : > { %4147 = vmatprep.subr.bf16.mxu0 %v4340_v59  ;;  %v4657_v43 = vld [vmem:[%s5292_s30 + $0x30] sm:$0xff] }
 0xacd   : > { %v2179_v12 = vpack.c.bf16 %v2175_v39, %v2174_v9 }
 0xace   : > { %4140 = vmatmul.mubr.msk.bf16.vlgmr.msra.gmra.mrb[32].mxu0 %vm1115_vm1, %v2177_v44 }
 0xacf   : > { %4143 = vmatprep.mubr.msk.bf16.mxu0 %vm1115_vm1, %v2178_v20  ;;  %4148 = vmatpush3.bf16.msra.mxu0 %v4340_v59 }
 0xad0   : > { %4149 = vmatprep.subr.bf16.mxu0 %v4341_v53 }
 0xad3   : > { %4150 = vmatpush3.bf16.msra.mxu0 %v4341_v53  ;;  %v4659_v53 = vld [vmem:[%s5292_s30 + $0x38] sm:$0xff] }
 0xad4   : > { %4151 = vmatprep.subr.bf16.mxu0 %v4342_v47 }
 0xad6   : > { %4144 = vmatmul.mubr.msk.bf16.gmra.mrb[36].mxu0 %vm1115_vm1, %v2179_v12  ;;  %v4658_v12 = vld [vmem:[%s5292_s30 + $0x28] sm:$0xff]  ;;  %s6357_s30 = sld [smem:[#allocation25_spill]] }
 0xad7   : > { %4152 = vmatpush3.bf16.msra.mxu0 %v4342_v47 }
 0xad8   : > { %4153 = vmatprep.subr.bf16.mxu0 %v4343_v25 }
 0xadb   : > { %4154 = vmatpush3.bf16.msra.mxu0 %v4343_v25 }
 0xadc   : > { %4155 = vmatprep.subr.bf16.mxu0 %v4344_v29 }
 0xadf   : > { %4156 = vmatpush3.bf16.msra.mxu0 %v4344_v29 }
 0xae0   : > { %4157 = vmatprep.subr.bf16.mxu0 %v4345_v19 }
 0xae3   : > { %4158 = vmatpush3.bf16.msra.mxu0 %v4345_v19 }
 0xae4   : > { %4159 = vmatprep.subr.bf16.mxu0 %v4346_v22 }
 0xae7   : > { %4160 = vmatpush3.bf16.msra.mxu0 %v4346_v22  ;;  %v4348_v22 = vld [vmem:[#allocation13] ss:$16 sps:$4 sm:$0xff]  }
 0xae8   : > { %4161 = vmatprep.subr.bf16.mxu0 %v4347_v23 }
 0xaeb   : > { %4162 = vmatpush3.bf16.msra.mxu0 %v4347_v23  ;;  %v4350_v23 = vld [vmem:[#allocation13 + $0x4] ss:$16 sps:$4 sm:$0xff]  }
 0xaec   : > { %2790 = vmatprep.subr.bf16.mxu1 %v4350_v23  ;;  %v4380_v23 = vld [vmem:[#allocation13 + $0xa4] ss:$16 sps:$4 sm:$0xff]  }
 0xaed   : > { %2791 = vmatpush1.bf16.msra.mxu1 %v4348_v22  ;;  %v4375_v22 = vld [vmem:[#allocation13 + $0x88] ss:$16 sps:$4 sm:$0xff]  }
 0xba1   : > { %v4141_v62 = vpop.f32.mrb[32].mxu0 }
 0xba2   : > { %v2242_v27 = vpop.f32.mrb[33].mxu0 }
 0xba3   : > { %v4142_v28 = vpop.f32.mrb[34].mxu0 }
 0xba4   : > { %v2274_v1 = vpack.c.bf16 %v4142_v28, %v4141_v62  ;;  %v2245_v55 = vpop.f32.mrb[35].mxu0  ;;  %v4351_v62 = vld [vmem:[#allocation13 + $0x8] ss:$16 sps:$4 sm:$0xff]   ;;  %v4356_v28 = vld [vmem:[#allocation13 + $0x24] ss:$16 sps:$4 sm:$0xff]  }
 0xba5   : > { %v2273_v57 = vpack.c.bf16 %v2245_v55, %v2242_v27  ;;  %v4353_v27 = vld [vmem:[#allocation13 + $0xc] ss:$16 sps:$4 sm:$0xff]   ;;  %v4354_v55 = vld [vmem:[#allocation13 + $0x20] ss:$16 sps:$4 sm:$0xff]   ;;  %2792 = vmatprep.subr.bf16.mxu1 %v4356_v28  ;;  %v4381_v28 = vld [vmem:[#allocation13 + $0xa8] ss:$16 sps:$4 sm:$0xff]  }
 0xba6   : > { %2283 = vrot.lane.b32.xlu1 %v2274_v1, %s4954_s29  ;;  %v4359_v1 = vld [vmem:[#allocation13 + $0x2c] ss:$16 sps:$4 sm:$0xff]   ;;  %2863 = vmatprep.subr.bf16.mxu0 %v4353_v27  ;;  %v4378_v27 = vld [vmem:[#allocation13 + $0xa0] ss:$16 sps:$4 sm:$0xff]  }
 0xba7   : > { %2281 = vrot.lane.b32.xlu0 %v2273_v57, %s4954_s29  ;;  %v4357_v57 = vld [vmem:[#allocation13 + $0x28] ss:$16 sps:$4 sm:$0xff]   ;;  %2793 = vmatpush1.bf16.msra.mxu1 %v4354_v55  ;;  %v4389_v55 = vld [vmem:[#allocation13 + $0xcc] ss:$16 sps:$4 sm:$0xff]  }
 0xba9   : > { %v4145_v49 = vpop.f32.mrb[36].mxu0 }
 0xbaa   : > { %1617 = vrot.lane.b32.xlu1 %v1606_v50, %s4956_s22  ;;  %v2258_v11 = vpop.f32.mrb[37].mxu0 }
 0xbab   : > { %1615 = vrot.lane.b32.xlu0 %v1605_v18, %s4956_s22  ;;  %v4146_v58 = vpop.f32.mrb[38].mxu0 }
 0xbac   : > { %v2276_v8 = vpack.c.bf16 %v4146_v58, %v4145_v49  ;;  %v2261_v54 = vpop.f32.mrb[39].mxu0 }
 0xbad   : > { %v2275_v35 = vpack.c.bf16 %v2261_v54, %v2258_v11 }
 0xbae   : > { %1952 = vrot.lane.b32.xlu1 %v1941_v0, %s4955_s21 }
 0xbaf   : > { %1950 = vrot.lane.b32.xlu0 %v1940_v16, %s4955_s21 }
 0xbb2   : > { %2287 = vrot.lane.b32.xlu1 %v2276_v8, %s4954_s29 }
 0xbb3   : > { %2285 = vrot.lane.b32.xlu0 %v2275_v35, %s4954_s29  ;;  %s6358_s29 = sld [smem:[#allocation26_spill]] }
 0xc18   : > { %v2284_v31 = vpop.permute.xlu1 %2283 }
 0xc19   : > { %2295 = vst.msk [vmem:[#allocation3 + $0x8] sm:$0xff] %vm2293_vm4, %v2284_v31  ;;  %v2282_v34 = vpop.permute.xlu0 %2281 }
 0xc1a   : > { %2294 = vst.msk [vmem:[#allocation3] sm:$0xff] %vm2293_vm4, %v2282_v34 }
 0xc1c   : > { %v1618_v15 = vpop.permute.xlu1 %1617 }
 0xc1d   : > { %1627 = vst.msk [vmem:[#allocation3 + $0x18] sm:$0xff] %vm1623_vm2, %v1618_v15  ;;  %v1616_v50 = vpop.permute.xlu0 %1615 }
 0xc1e   : > { %1626 = vst.msk [vmem:[#allocation3 + $0x10] sm:$0xff] %vm1623_vm2, %v1616_v50 }
 0xc20   : > { %v1953_v51 = vpop.permute.xlu1 %1952  ;;  %v2299_v48 = vld [vmem:[#allocation3 + $0x8] sm:$0xff] }
 0xc21   : > { %1962 = vst.msk [vmem:[#allocation3 + $0x18] sm:$0xff] %vm1958_vm3, %v1953_v51  ;;  %v1951_v18 = vpop.permute.xlu0 %1950  ;;  %v2298_v26 = vld [vmem:[#allocation3] sm:$0xff] }
 0xc22   : > { %1961 = vst.msk [vmem:[#allocation3 + $0x10] sm:$0xff] %vm1958_vm3, %v1951_v18  ;;  %4163 = vmatprep.mubr.bf16.mxu0 %v2298_v26 }
 0xc23   : > { %4164 = vmatmul.mubr.bf16.vlgmr.msra.gmra.mrb[40].mxu0 %v2299_v48 }
 0xc24   : > { %v2288_v36 = vpop.permute.xlu1 %2287  ;;  %2864 = vmatpush1.bf16.msra.mxu0 %v4351_v62  ;;  %v4383_v62 = vld [vmem:[#allocation13 + $0xac] ss:$16 sps:$4 sm:$0xff]  }
 0xc25   : > { %2297 = vst.msk [vmem:[#allocation3 + $0x18] sm:$0xff] %vm2293_vm4, %v2288_v36  ;;  %v2286_v0 = vpop.permute.xlu0 %2285  ;;  %2865 = vmatprep.subr.bf16.mxu0 %v4359_v1  ;;  %v4386_v1 = vld [vmem:[#allocation13 + $0xc4] ss:$16 sps:$4 sm:$0xff]  }
 0xc26   : > { %2296 = vst.msk [vmem:[#allocation3 + $0x10] sm:$0xff] %vm2293_vm4, %v2286_v0 }
 0xc28   : > { %2866 = vmatpush1.bf16.msra.mxu0 %v4357_v57  ;;  %v4384_v57 = vld [vmem:[#allocation13 + $0xc0] ss:$16 sps:$4 sm:$0xff]  }
 0xc2c   : > { %v2301_v16 = vld [vmem:[#allocation3 + $0x18] sm:$0xff] }
 0xc2d   : > { %v2300_v14 = vld [vmem:[#allocation3 + $0x10] sm:$0xff] }
 0xc2e   : > { %4167 = vmatprep.mubr.bf16.mxu0 %v2300_v14 }
 0xc2f   : > { %4168 = vmatmul.mubr.bf16.gmra.mrb[44].mxu0 %v2301_v16 }
 0xc30   : > { %2895 = vmatprep.mubr.bf16.mxu0 %v4953_v63 }
 0xcf6   : > { %v4165_v33 = vpop.f32.mrb[40].mxu0 }
 0xcf7   : > { %v2400_v10 = vpop.f32.mrb[41].mxu0  ;;  %v2433_v32 = vadd.f32 %v4653_v42, %v4165_v33 }
 0xcf8   : > { %v2431_v52 = vadd.f32 %v4652_v7, %v2400_v10  ;;  %v4166_v21 = vpop.f32.mrb[42].mxu0 }
 0xcf9   : > { %v2403_v38 = vpop.f32.mrb[43].mxu0  ;;  %v5959_v37 = vadd.f32 %v3752_v3, %v2433_v32  ;;  %v2434_v13 = vadd.f32 %v4655_v45, %v4166_v21 }
 0xcfa   : > { %v5953_v56 = vadd.f32 %v3752_v3, %v2431_v52  ;;  %v2432_v60 = vadd.f32 %v4654_v30, %v2403_v38 }
 0xcfb   : > { %v5964_v24 = vadd.f32 %v3752_v3, %v2434_v13 }
 0xcfc   : > { %v5956_v17 = vadd.f32 %v3752_v3, %v2432_v60  ;;  %2456 = vadd.xlane.f32.xlu0 %v5953_v56 }
 0xcfe   : > { %2458 = vadd.xlane.f32.xlu1 %v5956_v17 }
 0xd00   : > { %2460 = vadd.xlane.f32.xlu0 %v5959_v37 }
 0xd02   : > { %v4169_v61 = vpop.f32.mrb[44].mxu0 }
 0xd03   : > { %v2416_v40 = vpop.f32.mrb[45].mxu0  ;;  %v2437_v39 = vadd.f32 %v4657_v43, %v4169_v61  ;;  %v4362_v61 = vld [vmem:[#allocation13 + $0x44] ss:$16 sps:$4 sm:$0xff]   ;;  %v4371_v43 = vld [vmem:[#allocation13 + $0x6c] ss:$16 sps:$4 sm:$0xff]  }
 0xd04   : > { %v2435_v44 = vadd.f32 %v4656_v46, %v2416_v40  ;;  %2462 = vadd.xlane.f32.xlu0 %v5964_v24  ;;  %v4170_v5 = vpop.f32.mrb[46].mxu0  ;;  %v4365_v40 = vld [vmem:[#allocation13 + $0x4c] ss:$16 sps:$4 sm:$0xff]   ;;  %v4360_v46 = vld [vmem:[#allocation13 + $0x40] ss:$16 sps:$4 sm:$0xff]   ;;  %2794 = vmatprep.subr.bf16.mxu1 %v4362_v61 }
 0xd05   : > { %v2419_v20 = vpop.f32.mrb[47].mxu0  ;;  %v2438_v47 = vadd.f32 %v4659_v53, %v4170_v5  ;;  %v5976_v29 = vadd.f32 %v3752_v3, %v2437_v39  ;;  %2867 = vmatprep.subr.bf16.mxu0 %v4365_v40  ;;  %2795 = vmatpush1.bf16.msra.mxu1 %v4360_v46  ;;  %v4366_v39 = vld [vmem:[#allocation13 + $0x60] ss:$16 sps:$4 sm:$0xff]   ;;  %v4377_v53 = vld [vmem:[#allocation13 + $0x8c] ss:$16 sps:$4 sm:$0xff]  }
 0xd06   : > { %v5969_v9 = vadd.f32 %v3752_v3, %v2435_v44  ;;  %v2436_v59 = vadd.f32 %v4658_v12, %v2419_v20  ;;  %v4363_v44 = vld [vmem:[#allocation13 + $0x48] ss:$16 sps:$4 sm:$0xff]   ;;  %v4368_v20 = vld [vmem:[#allocation13 + $0x64] ss:$16 sps:$4 sm:$0xff]   ;;  %v6026_v61 = vld [vmem:[%s6356_s17] ss:$0 sm:$0xff] }
 0xd07   : > { %v5979_v19 = vadd.f32 %v3752_v3, %v2438_v47  ;;  %2868 = vmatpush1.bf16.msra.mxu0 %v4363_v44  ;;  %v4369_v12 = vld [vmem:[#allocation13 + $0x68] ss:$16 sps:$4 sm:$0xff]   ;;  %2796 = vmatprep.subr.bf16.mxu1 %v4368_v20  ;;  %v4372_v47 = vld [vmem:[#allocation13 + $0x80] ss:$16 sps:$4 sm:$0xff]  }
 0xd08   : > { %v5973_v25 = vadd.f32 %v3752_v3, %v2436_v59  ;;  %2464 = vadd.xlane.f32.xlu0 %v5969_v9  ;;  %2869 = vmatprep.subr.bf16.mxu0 %v4371_v43  ;;  %v4374_v59 = vld [vmem:[#allocation13 + $0x84] ss:$16 sps:$4 sm:$0xff]  }
 0xd09   : > { %2797 = vmatpush1.bf16.msra.mxu1 %v4366_v39 }
 0xd0a   : > { %2466 = vadd.xlane.f32.xlu1 %v5973_v25  ;;  %2798 = vmatprep.subr.bf16.mxu1 %v4374_v59 }
 0xd0b   : > { %2870 = vmatpush1.bf16.msra.mxu0 %v4369_v12 }
 0xd0c   : > { %2468 = vadd.xlane.f32.xlu0 %v5976_v29  ;;  %2871 = vmatprep.subr.bf16.mxu0 %v4377_v53 }
 0xd0d   : > { %2799 = vmatpush1.bf16.msra.mxu1 %v4372_v47 }
 0xd0e   : > { %2470 = vadd.xlane.f32.xlu1 %v5979_v19  ;;  %2800 = vmatprep.subr.bf16.mxu1 %v4380_v23  ;;  %v3754_v23 = vld [vmem:[%s6357_s30] ss:$0 sm:$0xff]  ;;  %s3522_s30 = scalar_lea.sflag [#allocation6], %s5286_s1 }
 0xd0f   : > { %2872 = vmatpush1.bf16.msra.mxu0 %v4375_v22 }
 0xd10   : > { %2873 = vmatprep.subr.bf16.mxu0 %v4383_v62 }
 0xd11   : > { %2801 = vmatpush1.bf16.msra.mxu1 %v4378_v27 }
 0xd12   : > { %2802 = vmatprep.subr.bf16.mxu1 %v4386_v1 }
 0xd13   : > { %2874 = vmatpush1.bf16.msra.mxu0 %v4381_v28 }
 0xd14   : > { %2875 = vmatprep.subr.bf16.mxu0 %v4389_v55 }
 0xd15   : > { %2803 = vmatpush1.bf16.msra.mxu1 %v4384_v57 }
 0xd89   : > { %v2457_v49 = vpop.xlane.xlu0 %2456 }
 0xd8a   : > { %v2472_v11 = vmul.f32 0.0078125, %v2457_v49  ;;  %v4387_v49 = vld [vmem:[#allocation13 + $0xc8] ss:$16 sps:$4 sm:$0xff]  }
 0xd8b   : > { %v2459_v58 = vpop.xlane.xlu1 %2458  ;;  %2876 = vmatpush1.bf16.msra.mxu0 %v4387_v49 }
 0xd8c   : > { %v5984_v8 = vsub.f32 %v5953_v56, %v2472_v11  ;;  %v2473_v54 = vmul.f32 0.0078125, %v2459_v58  ;;  %v4392_v11 = vld [vmem:[#allocation13 + $0xe4] ss:$16 sps:$4 sm:$0xff]   ;;  %v4395_v58 = vld [vmem:[#allocation13 + $0xec] ss:$16 sps:$4 sm:$0xff]  }
 0xd8d   : > { %v2461_v35 = vpop.xlane.xlu0 %2460  ;;  %2804 = vmatprep.subr.bf16.mxu1 %v4392_v11  ;;  %2877 = vmatprep.subr.bf16.mxu0 %v4395_v58  ;;  %v4398_v11 = vld [vmem:[#allocation15] sm:$0xff]  }
 0xd8e   : > { %v5987_v31 = vsub.f32 %v5956_v17, %v2473_v54  ;;  %v2474_v34 = vmul.f32 0.0078125, %v2461_v35  ;;  %v2488_v15 = vmul.f32 %v5984_v8, %v5984_v8  ;;  %v4390_v54 = vld [vmem:[#allocation13 + $0xe0] ss:$16 sps:$4 sm:$0xff]   ;;  %v4393_v35 = vld [vmem:[#allocation13 + $0xe8] ss:$16 sps:$4 sm:$0xff]  }
 0xd8f   : > { %2805 = vmatpush1.bf16.msra.mxu1 %v4390_v54  ;;  %2878 = vmatpush1.bf16.msra.mxu0 %v4393_v35  ;;  %v4399_v58 = vld [vmem:[#allocation15 + $0x80] sm:$0xff]   ;;  %v4400_v54 = vld [vmem:[#allocation15 + $0x48] sm:$0xff]  }
 0xd90   : > { %v5992_v50 = vsub.f32 %v5959_v37, %v2474_v34  ;;  %2496 = vadd.xlane.f32.xlu0 %v2488_v15  ;;  %v2489_v51 = vmul.f32 %v5987_v31, %v5987_v31  ;;  %v4396_v34 = vld [vmem:[#allocation15 + $0x40] sm:$0xff]   ;;  %v4401_v35 = vld [vmem:[#allocation15 + $0xc8] sm:$0xff]  }
 0xd91   : > { %v2463_v18 = vpop.xlane.xlu0 %2462  ;;  %v4397_v15 = vld [vmem:[#allocation15 + $0xc0] sm:$0xff]   ;;  %3915 = vmatprep.subr.bf16.mxu1 %v4396_v34 }
 0xd92   : > { %v2475_v26 = vmul.f32 0.0078125, %v2463_v18  ;;  %2498 = vadd.xlane.f32.xlu1 %v2489_v51  ;;  %v2490_v48 = vmul.f32 %v5992_v50, %v5992_v50  ;;  %3955 = vmatprep.subr.bf16.mxu0 %v4397_v15 }
 0xd94   : > { %v5999_v36 = vsub.f32 %v5964_v24, %v2475_v26  ;;  %2500 = vadd.xlane.f32.xlu0 %v2490_v48 }
 0xd95   : > { %v2465_v0 = vpop.xlane.xlu0 %2464 }
 0xd96   : > { %v2476_v14 = vmul.f32 0.0078125, %v2465_v0  ;;  %v2491_v16 = vmul.f32 %v5999_v36, %v5999_v36 }
 0xd97   : > { %v2467_v33 = vpop.xlane.xlu1 %2466 }
 0xd98   : > { %v6004_v3 = vsub.f32 %v5969_v9, %v2476_v14  ;;  %v2477_v10 = vmul.f32 0.0078125, %v2467_v33  ;;  %2502 = vadd.xlane.f32.xlu1 %v2491_v16 }
 0xd99   : > { %v2469_v7 = vpop.xlane.xlu0 %2468 }
 0xd9a   : > { %v6007_v52 = vsub.f32 %v5973_v25, %v2477_v10  ;;  %v2478_v21 = vmul.f32 0.0078125, %v2469_v7  ;;  %v2492_v38 = vmul.f32 %v6004_v3, %v6004_v3 }
 0xd9b   : > { %v2471_v42 = vpop.xlane.xlu1 %2470 }
 0xd9c   : > { %v6012_v32 = vsub.f32 %v5976_v29, %v2478_v21  ;;  %v2479_v30 = vmul.f32 0.0078125, %v2471_v42  ;;  %2504 = vadd.xlane.f32.xlu0 %v2492_v38  ;;  %v2493_v60 = vmul.f32 %v6007_v52, %v6007_v52 }
 0xd9e   : > { %v6017_v45 = vsub.f32 %v5979_v19, %v2479_v30  ;;  %2506 = vadd.xlane.f32.xlu1 %v2493_v60  ;;  %v2494_v13 = vmul.f32 %v6012_v32, %v6012_v32 }
 0xda0   : > { %2508 = vadd.xlane.f32.xlu0 %v2494_v13  ;;  %v2495_v5 = vmul.f32 %v6017_v45, %v6017_v45 }
 0xda2   : > { %2510 = vadd.xlane.f32.xlu1 %v2495_v5 }
 0xe1d   : > { %v2497_v51 = vpop.xlane.xlu0 %2496 }
 0xe1e   : > { %v2512_v18 = vmul.f32 0.0078125, %v2497_v51 }
 0xe1f   : > { %v2499_v26 = vpop.xlane.xlu1 %2498 }
 0xe20   : > { %v2520_v48 = vadd.f32 1e-05, %v2512_v18  ;;  %v2513_v0 = vmul.f32 0.0078125, %v2499_v26  ;;  %v4403_v18 = vld [vmem:[#allocation15 + $0x88] sm:$0xff]  }
 0xe21   : > { %v2501_v14 = vpop.xlane.xlu0 %2500 }
 0xe22   : > { %4572 = vrsqrt.f32 %v2520_v48  ;;  %v2521_v16 = vadd.f32 1e-05, %v2513_v0  ;;  %v2514_v33 = vmul.f32 0.0078125, %v2501_v14 }
 0xe24   : > { %4574 = vrsqrt.f32 %v2521_v16  ;;  %v2522_v10 = vadd.f32 1e-05, %v2514_v33 }
 0xe25   : > { %v2503_v7 = vpop.xlane.xlu1 %2502 }
 0xe26   : > { %4576 = vrsqrt.f32 %v2522_v10  ;;  %v2515_v21 = vmul.f32 0.0078125, %v2503_v7 }
 0xe28   : > { %v2523_v38 = vadd.f32 1e-05, %v2515_v21 }
 0xe29   : > { %v2505_v42 = vpop.xlane.xlu0 %2504 }
 0xe2a   : > { %4578 = vrsqrt.f32 %v2523_v38  ;;  %v2516_v30 = vmul.f32 0.0078125, %v2505_v42 }
 0xe2b   : > { %v2507_v60 = vpop.xlane.xlu1 %2506 }
 0xe2c   : > { %v4573_v13 = vpop.eup %4572  ;;  %v2524_v40 = vadd.f32 1e-05, %v2516_v30  ;;  %v2517_v46 = vmul.f32 0.0078125, %v2507_v60 }
 0xe2d   : > { %v2536_v44 = vmul.f32 %v4573_v13, %v5984_v8  ;;  %v2509_v5 = vpop.xlane.xlu0 %2508 }
 0xe2e   : > { %v4575_v20 = vpop.eup %4574  ;;  %4580 = vrsqrt.f32 %v2524_v40  ;;  %v2525_v43 = vadd.f32 1e-05, %v2517_v46  ;;  %v2518_v39 = vmul.f32 0.0078125, %v2509_v5  ;;  %v4405_v5 = vld [vmem:[#allocation15 + $0xd0] sm:$0xff]  }
 0xe2f   : > { %v2550_v12 = vmul.f32 %v6026_v61, %v2536_v44  ;;  %v2537_v59 = vmul.f32 %v4575_v20, %v5987_v31  ;;  %v2511_v53 = vpop.xlane.xlu1 %2510  ;;  %v4407_v20 = vld [vmem:[#allocation15 + $0x90] sm:$0xff]  }
 0xe30   : > { %v4577_v47 = vpop.eup %4576  ;;  %4582 = vrsqrt.f32 %v2525_v43  ;;  %v2519_v22 = vmul.f32 0.0078125, %v2511_v53  ;;  %v2526_v8 = vadd.f32 1e-05, %v2518_v39  ;;  %v4408_v43 = vld [vmem:[#allocation15 + $0x58] sm:$0xff]   ;;  %v4414_v53 = vld [vmem:[#allocation15 + $0x20] sm:$0xff]  }
 0xe31   : > { %v2551_v62 = vmul.f32 %v6026_v61, %v2537_v59  ;;  %v2564_v28 = vadd.f32 %v3754_v23, %v2550_v12  ;;  %v2538_v55 = vmul.f32 %v4577_v47, %v5992_v50  ;;  %v4409_v39 = vld [vmem:[#allocation15 + $0xd8] sm:$0xff]   ;;  %v4413_v59 = vld [vmem:[#allocation15 + $0xe0] sm:$0xff]  }
 0xe32   : > { %v2527_v27 = vadd.f32 1e-05, %v2519_v22  ;;  %v4411_v12 = vld [vmem:[#allocation15 + $0x98] sm:$0xff]   ;;  %v4415_v47 = vld [vmem:[#allocation15 + $0xa0] sm:$0xff]   ;;  %v4416_v22 = vld [vmem:[#allocation15 + $0x68] sm:$0xff]  }
 0xe33   : > { %v2565_v1 = vadd.f32 %v3754_v23, %v2551_v62  ;;  %v2552_v34 = vmul.f32 %v6026_v61, %v2538_v55  ;;  %v4418_v62 = vld [vmem:[#allocation15 + $0x28] sm:$0xff]   ;;  %v4423_v55 = vld [vmem:[#allocation15 + $0xb0] sm:$0xff]  }
 0xe34   : > { %v4579_v57 = vpop.eup %4578  ;;  %4584 = vrsqrt.f32 %v2527_v27  ;;  %v4420_v27 = vld [vmem:[#allocation15 + $0x70] sm:$0xff]  }
 0xe35   : > { %v2572_v49 = vpack.c.bf16 %v2565_v1, %v2564_v28  ;;  %v2539_v31 = vmul.f32 %v4579_v57, %v5999_v36  ;;  %4586 = vrsqrt.f32 %v2526_v8  ;;  %v4402_v36 = vld [vmem:[#allocation15 + $0x8] sm:$0xff]   ;;  %v2566_v48 = vadd.f32 %v3754_v23, %v2552_v34  ;;  %v4421_v28 = vld [vmem:[#allocation15 + $0xf0] sm:$0xff]   ;;  %v4424_v57 = vld [vmem:[#allocation15 + $0x78] sm:$0xff]  }
 0xe36   : > { %v4419_v8 = vld [vmem:[#allocation15 + $0xa8] sm:$0xff]   ;;  %v4422_v1 = vld [vmem:[#allocation15 + $0x30] sm:$0xff]  }
 0xe37   : > { %2823 = vmatmul.mubr.bf16.vlgmr.msra.gmra.mrb[48].mxu1 %v2572_v49  ;;  %2896 = vmatmul.mubr.bf16.vlgmr.msra.gmra.mrb[48].mxu0 %v2572_v49  ;;  %v2553_v15 = vmul.f32 %v6026_v61, %v2539_v31  ;;  %v4425_v49 = vld [vmem:[#allocation15 + $0xf8] sm:$0xff]  }
 0xe38   : > { %v4581_v51 = vpop.eup %4580  ;;  %2832 = vmatprep.mubr.bf16.mxu1 %v4953_v63  ;;  %2905 = vmatprep.mubr.bf16.mxu0 %v4953_v63  ;;  %v4426_v31 = vld [vmem:[#allocation15 + $0x38] sm:$0xff]  }
 0xe39   : > { %v2567_v50 = vadd.f32 %v3754_v23, %v2553_v15  ;;  %3916 = vmatpush3.bf16.msra.mxu1 %v4398_v11  ;;  %3956 = vmatpush3.bf16.msra.mxu0 %v4399_v58  ;;  %v2540_v0 = vmul.f32 %v4581_v51, %v6004_v3  ;;  %v4427_v11 = vld [vmem:[#allocation15 + $0xb8] sm:$0xff]  }
 0xe3a   : > { %v4583_v26 = vpop.eup %4582  ;;  %3917 = vmatprep.subr.bf16.mxu1 %v4400_v54  ;;  %3957 = vmatprep.subr.bf16.mxu0 %v4401_v35  ;;  %v2608_v58 = vld [vmem:[%s6358_s29] sm:$0xf]  ;;  %v2624_v54 = vsub.s32 3, %v5362_v2  ;;  %s4864_s29 = scalar_lea.vmem %s4863_s24, 2048 }
 0xe3b   : > { %v2541_v14 = vmul.f32 %v4583_v26, %v6007_v52  ;;  %v2573_v16 = vpack.c.bf16 %v2567_v50, %v2566_v48  ;;  %v2554_v7 = vmul.f32 %v6026_v61, %v2540_v0  ;;  %v6059_v35 = vrot.slane %v2608_v58, %v710_v41  ;;  %p4866_p3 = scmp.lt.s32.totalorder %s4864_s29, %s4858_s14 }
 0xe3c   : > { %v6063_v34 = vrot.slane %v2608_v58, %v718_v6  ;;  %v6067_v15 = vrot.slane %v2608_v58, %v714_v4  ;;  %v6069_v51 = vrot.slane %v2608_v58, %v2624_v54 }
 0xe3d   : > { %v2555_v33 = vmul.f32 %v6026_v61, %v2541_v14  ;;  %3918 = vmatpush3.bf16.msra.mxu1 %v4402_v36  ;;  %3958 = vmatpush3.bf16.msra.mxu0 %v4403_v18  ;;  %v2568_v42 = vadd.f32 %v3754_v23, %v2554_v7  ;;  %p4867_p2 = por %p4866_p3, %p4865_p1 }
 0xe3e   : > { %v4585_v10 = vpop.eup %4584  ;;  %3959 = vmatprep.subr.bf16.mxu0 %v4405_v5 }
 0xe3f   : > { %2833 = vmatmul.mubr.bf16.gmra.mrb[52].mxu1 %v2573_v16  ;;  %2906 = vmatmul.mubr.bf16.gmra.mrb[52].mxu0 %v2573_v16  ;;  %v4587_v21 = vpop.eup %4586  ;;  %v2569_v38 = vadd.f32 %v3754_v23, %v2555_v33  ;;  %v2543_v3 = vmul.f32 %v4585_v10, %v6017_v45  ;;  %v4404_v45 = vld [vmem:[#allocation15 + $0x50] sm:$0xff]   ;;  %p4868_p8 = pnand %p4867_p2, %p4861_p13 }
 0xe40   : > { %2842 = vmatprep.mubr.bf16.mxu1 %v4953_v63  ;;  %2915 = vmatprep.mubr.bf16.mxu0 %v4953_v63  ;;  %v2542_v52 = vmul.f32 %v4587_v21, %v6012_v32  ;;  %v4406_v32 = vld [vmem:[#allocation15 + $0x10] sm:$0xff]  }
 0xe41   : > { %v2574_v30 = vpack.c.bf16 %v2569_v38, %v2568_v42  ;;  %v2557_v60 = vmul.f32 %v6026_v61, %v2543_v3  ;;  %3919 = vmatprep.subr.bf16.mxu1 %v4404_v45  ;;  %3960 = vmatpush3.bf16.msra.mxu0 %v4407_v20 }
 0xe42   : > { %v2556_v13 = vmul.f32 %v6026_v61, %v2542_v52  ;;  %3920 = vmatpush3.bf16.msra.mxu1 %v4406_v32  ;;  %v4410_v61 = vld [vmem:[#allocation15 + $0x18] sm:$0xff]   ;;  %3961 = vmatprep.subr.bf16.mxu0 %v4409_v39 }
 0xe43   : > { %v2571_v40 = vadd.f32 %v3754_v23, %v2557_v60  ;;  %3921 = vmatprep.subr.bf16.mxu1 %v4408_v43 }
 0xe44   : > { %v2570_v46 = vadd.f32 %v3754_v23, %v2556_v13  ;;  %v4417_v23 = vld [vmem:[#allocation15 + $0xe8] sm:$0xff]  }
 0xe45   : > { %3962 = vmatpush3.bf16.msra.mxu0 %v4411_v12 }
 0xe46   : > { %v2575_v44 = vpack.c.bf16 %v2571_v40, %v2570_v46  ;;  %3922 = vmatpush3.bf16.msra.mxu1 %v4410_v61  ;;  %3963 = vmatprep.subr.bf16.mxu0 %v4413_v59 }
 0xe47   : > { %2843 = vmatmul.mubr.bf16.gmra.mrb[56].mxu1 %v2574_v30  ;;  %2916 = vmatmul.mubr.bf16.gmra.mrb[56].mxu0 %v2574_v30 }
 0xe48   : > { %2852 = vmatprep.mubr.bf16.mxu1 %v4953_v63  ;;  %2925 = vmatprep.mubr.bf16.mxu0 %v4953_v63  ;;  %v4412_v63 = vld [vmem:[#allocation15 + $0x60] sm:$0xff]  }
 0xe49   : > { %3923 = vmatprep.subr.bf16.mxu1 %v4412_v63  ;;  %3964 = vmatpush3.bf16.msra.mxu0 %v4415_v47 }
 0xe4a   : > { %3924 = vmatpush3.bf16.msra.mxu1 %v4414_v53  ;;  %3965 = vmatprep.subr.bf16.mxu0 %v4417_v23 }
 0xe4b   : > { %3925 = vmatprep.subr.bf16.mxu1 %v4416_v22 }
 0xe4d   : > { %3966 = vmatpush3.bf16.msra.mxu0 %v4419_v8 }
 0xe4e   : > { %3926 = vmatpush3.bf16.msra.mxu1 %v4418_v62  ;;  %3967 = vmatprep.subr.bf16.mxu0 %v4421_v28 }
 0xe4f   : > { %2853 = vmatmul.mubr.bf16.gmra.mrb[60].mxu1 %v2575_v44  ;;  %2926 = vmatmul.mubr.bf16.gmra.mrb[60].mxu0 %v2575_v44 }
 0xe50   : > { %3927 = vmatprep.subr.bf16.mxu1 %v4420_v27 }
 0xe51   : > { %3968 = vmatpush3.bf16.msra.mxu0 %v4423_v55 }
 0xe52   : > { %3928 = vmatpush3.bf16.msra.mxu1 %v4422_v1  ;;  %3969 = vmatprep.subr.bf16.mxu0 %v4425_v49 }
 0xe53   : > { %3929 = vmatprep.subr.bf16.mxu1 %v4424_v57 }
 0xe55   : > { %3970 = vmatpush3.bf16.msra.mxu0 %v4427_v11 }
 0xe56   : > { %3930 = vmatpush3.bf16.msra.mxu1 %v4426_v31 }
 0xf0a   : > { %v2824_v50 = vpop.f32.mrb[48].mxu1  ;;  %v2897_v36 = vpop.f32.mrb[48].mxu0 }
 0xf0b   : > { %v2825_v18 = vadd.f32 %v2824_v50, %v6059_v35  ;;  %v2898_v26 = vadd.f32 %v2897_v36, %v6063_v34  ;;  %v2826_v48 = vpop.f32.mrb[49].mxu1  ;;  %v2899_v0 = vpop.f32.mrb[49].mxu0 }
 0xf0c   : > { %v2827_v41 = vadd.f32 %v2826_v48, %v6067_v15  ;;  %v2900_v14 = vadd.f32 %v2899_v0, %v6069_v51  ;;  %v2828_v6 = vpop.f32.mrb[50].mxu1  ;;  %v2901_v16 = vpop.f32.mrb[50].mxu0 }
 0xf0d   : > { %v2968_v33 = vmul.f32 0.70710677, %v2825_v18  ;;  %v2970_v2 = vmul.f32 0.70710677, %v2898_v26  ;;  %v2829_v7 = vadd.f32 %v2828_v6, %v6059_v35  ;;  %v2902_v21 = vadd.f32 %v2901_v16, %v6063_v34  ;;  %v2830_v38 = vpop.f32.mrb[51].mxu1  ;;  %v2903_v3 = vpop.f32.mrb[51].mxu0 }
 0xf0e   : > { %v2969_v4 = vmul.f32 0.70710677, %v2827_v41  ;;  %v2971_v10 = vmul.f32 0.70710677, %v2900_v14  ;;  %v2831_v42 = vadd.f32 %v2830_v38, %v6067_v15  ;;  %v2904_v52 = vadd.f32 %v2903_v3, %v6069_v51 }
 0xf0f   : > { %4588 = verf.f32 %v2968_v33  ;;  %v2972_v30 = vmul.f32 0.70710677, %v2829_v7  ;;  %v2974_v60 = vmul.f32 0.70710677, %v2902_v21  ;;  %v2936_v22 = vmul.f32 0.5, %v2825_v18 }
 0xf10   : > { %4590 = verf.f32 %v2970_v2  ;;  %v2973_v13 = vmul.f32 0.70710677, %v2831_v42  ;;  %v2975_v46 = vmul.f32 0.70710677, %v2904_v52  ;;  %v2938_v55 = vmul.f32 0.5, %v2898_v26 }
 0xf11   : > { %4592 = verf.f32 %v2969_v4  ;;  %v6086_v57 = vmul.f32 0.5, %v2827_v41  ;;  %v6088_v49 = vmul.f32 0.5, %v2900_v14  ;;  %v2940_v58 = vmul.f32 0.5, %v2829_v7 }
 0xf12   : > { %4594 = verf.f32 %v2971_v10  ;;  %v2834_v40 = vpop.f32.mrb[52].mxu1  ;;  %v2907_v45 = vpop.f32.mrb[52].mxu0  ;;  %v2942_v48 = vmul.f32 0.5, %v2902_v21  ;;  %v6090_v0 = vmul.f32 0.5, %v2831_v42  ;;  %v6093_v33 = vmul.f32 0.5, %v2904_v52 }
 0xf13   : > { %4596 = verf.f32 %v2972_v30  ;;  %v2835_v44 = vadd.f32 %v2834_v40, %v6059_v35  ;;  %v2836_v5 = vpop.f32.mrb[53].mxu1  ;;  %v2908_v32 = vadd.f32 %v2907_v45, %v6063_v34  ;;  %v2909_v43 = vpop.f32.mrb[53].mxu0 }
 0xf14   : > { %4598 = verf.f32 %v2974_v60  ;;  %v2837_v20 = vadd.f32 %v2836_v5, %v6067_v15  ;;  %v2838_v39 = vpop.f32.mrb[54].mxu1  ;;  %v2910_v12 = vadd.f32 %v2909_v43, %v6069_v51  ;;  %v2911_v63 = vpop.f32.mrb[54].mxu0 }
 0xf15   : > { %4600 = verf.f32 %v2973_v13  ;;  %v2976_v61 = vmul.f32 0.70710677, %v2835_v44  ;;  %v2840_v59 = vpop.f32.mrb[55].mxu1  ;;  %v2978_v53 = vmul.f32 0.70710677, %v2908_v32  ;;  %v2913_v47 = vpop.f32.mrb[55].mxu0  ;;  %v2839_v8 = vadd.f32 %v2838_v39, %v6059_v35 }
 0xf16   : > { %4602 = verf.f32 %v2975_v46  ;;  %v2977_v23 = vmul.f32 0.70710677, %v2837_v20  ;;  %v2979_v62 = vmul.f32 0.70710677, %v2910_v12  ;;  %v2912_v27 = vadd.f32 %v2911_v63, %v6063_v34 }
 0xf17   : > { %4604 = verf.f32 %v2976_v61  ;;  %v2841_v28 = vadd.f32 %v2840_v59, %v6067_v15  ;;  %v2980_v54 = vmul.f32 0.70710677, %v2839_v8  ;;  %v2914_v16 = vadd.f32 %v2913_v47, %v6069_v51 }
 0xf18   : > { %4606 = verf.f32 %v2978_v53  ;;  %v2982_v6 = vmul.f32 0.70710677, %v2912_v27  ;;  %v6095_v14 = vmul.f32 0.5, %v2835_v44  ;;  %v6097_v3 = vmul.f32 0.5, %v2908_v32 }
 0xf19   : > { %v4589_v1 = vpop.eup %4588  ;;  %4608 = verf.f32 %v2977_v23  ;;  %v2981_v2 = vmul.f32 0.70710677, %v2841_v28  ;;  %v6099_v30 = vmul.f32 0.5, %v2837_v20  ;;  %v6101_v21 = vmul.f32 0.5, %v2910_v12 }
 0xf1a   : > { %v4591_v31 = vpop.eup %4590  ;;  %v3032_v11 = vadd.f32 1.0, %v4589_v1  ;;  %4610 = verf.f32 %v2979_v62  ;;  %v2844_v50 = vpop.f32.mrb[56].mxu1  ;;  %v2983_v32 = vmul.f32 0.70710677, %v2914_v16  ;;  %v6120_v1 = vmul.f32 0.5, %v2839_v8 }
 0xf1b   : > { %v2917_v36 = vpop.f32.mrb[56].mxu0  ;;  %v4593_v18 = vpop.eup %4592  ;;  %v3034_v38 = vadd.f32 1.0, %v4591_v31  ;;  %4612 = verf.f32 %v2980_v54  ;;  %v2845_v20 = vadd.f32 %v2844_v50, %v6059_v35  ;;  %v6122_v31 = vmul.f32 0.5, %v2912_v27 }
 0xf1c   : > { %v2846_v26 = vpop.f32.mrb[57].mxu1  ;;  %v4595_v41 = vpop.eup %4594  ;;  %v6105_v40 = vmul.f32 %v3032_v11, %v2936_v22  ;;  %v3033_v52 = vadd.f32 1.0, %v4593_v18  ;;  %4614 = verf.f32 %v2982_v6  ;;  %v2918_v12 = vadd.f32 %v2917_v36, %v6063_v34 }
 0xf1d   : > { %v2919_v4 = vpop.f32.mrb[57].mxu0  ;;  %v2848_v10 = vpop.f32.mrb[58].mxu1  ;;  %v3035_v39 = vadd.f32 1.0, %v4595_v41  ;;  %4616 = verf.f32 %v2981_v2  ;;  %v6113_v59 = vmul.f32 %v3034_v38, %v2938_v55  ;;  %v2984_v47 = vmul.f32 0.70710677, %v2845_v20 }
 0xf1e   : > { %v4597_v7 = vpop.eup %4596  ;;  %v2921_v42 = vpop.f32.mrb[58].mxu0  ;;  %v2847_v22 = vadd.f32 %v2846_v26, %v6067_v15  ;;  %v6124_v11 = vmul.f32 0.5, %v2841_v28  ;;  %v6128_v18 = vmul.f32 0.5, %v2914_v16  ;;  %4618 = verf.f32 %v2983_v32 }
 0xf1f   : > { %v6103_v60 = vpop.f32.mrb[59].mxu1  ;;  %v4599_v13 = vpop.eup %4598  ;;  %v3036_v46 = vadd.f32 1.0, %v4597_v7  ;;  %v6131_v8 = vmul.f32 %v3033_v52, %v6086_v57  ;;  %v6134_v27 = vmul.f32 %v3035_v39, %v6088_v49  ;;  %4620 = verf.f32 %v2984_v47 }
 0xf20   : > { %v6107_v44 = vpop.f32.mrb[59].mxu0  ;;  %v4601_v45 = vpop.eup %4600  ;;  %v3038_v5 = vadd.f32 1.0, %v4599_v13  ;;  %v2986_v28 = vmul.f32 0.70710677, %v2918_v12  ;;  %v2985_v16 = vmul.f32 0.70710677, %v2847_v22  ;;  %v2920_v13 = vadd.f32 %v2919_v4, %v6069_v51 }
 0xf21   : > { %v4603_v43 = vpop.eup %4602  ;;  %v6110_v61 = vmul.f32 %v3036_v46, %v2940_v58  ;;  %v3037_v36 = vadd.f32 1.0, %v4601_v45  ;;  %v2849_v49 = vadd.f32 %v2848_v10, %v6059_v35  ;;  %v2922_v52 = vadd.f32 %v2921_v42, %v6063_v34 }
 0xf22   : > { %v4605_v63 = vpop.eup %4604  ;;  %v6115_v53 = vmul.f32 %v3038_v5, %v2942_v48  ;;  %v2854_v58 = vpop.f32.mrb[60].mxu1  ;;  %v3039_v7 = vadd.f32 1.0, %v4603_v43  ;;  %4622 = verf.f32 %v2986_v28  ;;  %v6148_v47 = vmul.f32 0.5, %v2845_v20 }
 0xf23   : > { %v4607_v23 = vpop.eup %4606  ;;  %v2927_v54 = vpop.f32.mrb[60].mxu0  ;;  %v3040_v38 = vadd.f32 1.0, %v4605_v63  ;;  %v3069_v5 = vmul.f32 %v3037_v36, %v6090_v0  ;;  %v6150_v63 = vmul.f32 0.5, %v2918_v12  ;;  %4624 = verf.f32 %v2985_v16 }
 0xf24   : > { %v4609_v50 = vpop.eup %4608  ;;  %v2856_v48 = vpop.f32.mrb[61].mxu1  ;;  %v3042_v57 = vadd.f32 1.0, %v4607_v23  ;;  %v2987_v4 = vmul.f32 0.70710677, %v2920_v13  ;;  %v2988_v55 = vmul.f32 0.70710677, %v2849_v49  ;;  %v3071_v23 = vmul.f32 %v3039_v7, %v6093_v33 }
 0xf25   : > { %v2929_v6 = vpop.f32.mrb[61].mxu0  ;;  %v4611_v26 = vpop.eup %4610  ;;  %v3041_v32 = vadd.f32 1.0, %v4609_v50  ;;  %v6154_v28 = vmul.f32 %v3040_v38, %v6095_v14  ;;  %v6156_v10 = vmul.f32 0.5, %v2847_v22  ;;  %v2990_v42 = vmul.f32 0.70710677, %v2922_v52 }
 0xf26   : > { %v6136_v41 = vpop.f32.mrb[62].mxu1  ;;  %v6138_v2 = vpop.f32.mrb[62].mxu0  ;;  %v3043_v39 = vadd.f32 1.0, %v4611_v26  ;;  %v6159_v50 = vmul.f32 %v3042_v57, %v6097_v3  ;;  %4626 = verf.f32 %v2987_v4  ;;  %v2851_v20 = vadd.f32 %v6103_v60, %v6067_v15 }
 0xf27   : > { %v6141_v46 = vpop.f32.mrb[63].mxu1  ;;  %v6143_v45 = vpop.f32.mrb[63].mxu0  ;;  %v2924_v12 = vadd.f32 %v6107_v44, %v6069_v51  ;;  %v6166_v36 = vmul.f32 %v3041_v32, %v6099_v30  ;;  %4628 = verf.f32 %v2988_v55  ;;  %v6172_v14 = vadd.f32 %v2854_v58, %v6059_v35 }
 0xf28   : > { %v4613_v43 = vpop.eup %4612  ;;  %v6169_v33 = vmul.f32 %v3043_v39, %v6101_v21  ;;  %v6174_v3 = vmul.f32 0.5, %v2920_v13  ;;  %4630 = verf.f32 %v2990_v42  ;;  %v2989_v26 = vmul.f32 0.70710677, %v2851_v20 }
 0xf29   : > { %v4615_v62 = vpop.eup %4614  ;;  %v3044_v22 = vadd.f32 1.0, %v4613_v43  ;;  %v2956_v16 = vmul.f32 0.5, %v2849_v49  ;;  %v2991_v44 = vmul.f32 0.70710677, %v2924_v12  ;;  %v2992_v30 = vmul.f32 0.70710677, %v6172_v14 }
 0xf2a   : > { %v4617_v0 = vpop.eup %4616  ;;  %v3046_v60 = vadd.f32 1.0, %v4615_v62  ;;  %4632 = verf.f32 %v2989_v26  ;;  %v6178_v21 = vadd.f32 %v2927_v54, %v6063_v34  ;;  %v6181_v58 = vadd.f32 %v2856_v48, %v6067_v15 }
 0xf2b   : > { %v4619_v7 = vpop.eup %4618  ;;  %v3045_v38 = vadd.f32 1.0, %v4617_v0  ;;  %4634 = verf.f32 %v2991_v44  ;;  %v6184_v55 = vadd.f32 %v2929_v6, %v6069_v51  ;;  %v3097_v13 = vpack.c.bf16 %v3069_v5, %v6131_v8 }
 0xf2c   : > { %v4621_v57 = vpop.eup %4620  ;;  %v3099_v62 = vpack.c.bf16 %v3071_v23, %v6134_v27  ;;  %v3076_v32 = vmul.f32 %v3044_v22, %v6120_v1  ;;  %v3047_v39 = vadd.f32 1.0, %v4619_v7  ;;  %v2958_v43 = vmul.f32 0.5, %v2922_v52 }
 0xf2d   : > { %v4623_v49 = vpop.eup %4622  ;;  %v2994_v4 = vmul.f32 0.70710677, %v6178_v21  ;;  %v3078_v54 = vmul.f32 %v3046_v60, %v6122_v31  ;;  %v3077_v48 = vmul.f32 %v3045_v38, %v6124_v11  ;;  %v3048_v42 = vadd.f32 1.0, %v4621_v57  ;;  %3407 = vmatprep.mubr.bf16.mxu1 %v3097_v13 }
 0xf2e   : > { %v2993_v0 = vmul.f32 0.70710677, %v6181_v58  ;;  %3472 = vmatprep.mubr.bf16.mxu0 %v3099_v62  ;;  %v4625_v6 = vpop.eup %4624  ;;  %v2957_v8 = vmul.f32 0.5, %v2851_v20  ;;  %4636 = verf.f32 %v2992_v30  ;;  %v2995_v27 = vmul.f32 0.70710677, %v6184_v55 }
 0xf2f   : > { %v6196_v1 = vadd.f32 %v6136_v41, %v6059_v35  ;;  %v6359_v52 = vpack.c.bf16 %v6110_v61, %v6105_v40  ;;  %v6360_v31 = vpack.c.bf16 %v6115_v53, %v6113_v59  ;;  %v3050_v11 = vadd.f32 1.0, %v4623_v49 }
 0xf30   : > { %4638 = verf.f32 %v2994_v4  ;;  %v2932_v5 = vadd.f32 %v6138_v2, %v6063_v34  ;;  %v6208_v23 = vadd.f32 %v6141_v46, %v6067_v15  ;;  %v4627_v20 = vpop.eup %4626  ;;  %v3079_v35 = vmul.f32 %v3047_v39, %v6128_v18 }
 0xf31   : > { %3408 = vmatmul.mubr.bf16.vlgmr.msra.gmra.mrb[64].mxu1 %v6359_v52  ;;  %3473 = vmatmul.mubr.bf16.vlgmr.msra.gmra.mrb[64].mxu0 %v6360_v31  ;;  %v2959_v41 = vmul.f32 0.5, %v2924_v12  ;;  %4640 = verf.f32 %v2993_v0  ;;  %v2996_v40 = vmul.f32 0.70710677, %v6196_v1  ;;  %v4629_v61 = vpop.eup %4628  ;;  %v3080_v59 = vmul.f32 %v3048_v42, %v6148_v47 }
 0xf32   : > { %v3049_v53 = vadd.f32 1.0, %v4625_v6  ;;  %4642 = verf.f32 %v2995_v27  ;;  %v2998_v22 = vmul.f32 0.70710677, %v2932_v5  ;;  %v4631_v26 = vpop.eup %4630  ;;  %v3052_v7 = vadd.f32 1.0, %v4629_v61 }
 0xf33   : > { %4644 = verf.f32 %v2996_v40  ;;  %v2997_v34 = vmul.f32 0.70710677, %v6208_v23  ;;  %v2934_v15 = vadd.f32 %v6143_v45, %v6069_v51  ;;  %v3082_v18 = vmul.f32 %v3050_v11, %v6150_v63 }
 0xf34   : > { %v3054_v2 = vadd.f32 1.0, %v4631_v26  ;;  %4646 = verf.f32 %v2998_v22  ;;  %v3101_v46 = vpack.c.bf16 %v3077_v48, %v6166_v36  ;;  %v4633_v12 = vpop.eup %4632  ;;  %v3051_v60 = vadd.f32 1.0, %v4627_v20 }
 0xf35   : > { %v3084_v47 = vmul.f32 %v3052_v7, %v2956_v16  ;;  %4648 = verf.f32 %v2997_v34  ;;  %v2999_v38 = vmul.f32 0.70710677, %v2934_v15  ;;  %v4635_v44 = vpop.eup %4634  ;;  %v3053_v30 = vadd.f32 1.0, %v4633_v12 }
 0xf36   : > { %v3086_v57 = vmul.f32 %v3054_v2, %v2958_v43  ;;  %3415 = vmatprep.mubr.bf16.mxu1 %v3101_v46  ;;  %v3103_v13 = vpack.c.bf16 %v3079_v35, %v6169_v33  ;;  %v3100_v62 = vpack.c.bf16 %v3076_v32, %v6154_v28  ;;  %v3055_v51 = vadd.f32 1.0, %v4635_v44 }
 0xf37   : > { %4650 = verf.f32 %v2999_v38  ;;  %v3102_v45 = vpack.c.bf16 %v3078_v54, %v6159_v50  ;;  %v3104_v63 = vpack.c.bf16 %v3084_v47, %v3080_v59  ;;  %v3081_v36 = vmul.f32 %v3049_v53, %v6156_v10 }
 0xf38   : > { %v3085_v49 = vmul.f32 %v3053_v30, %v2957_v8  ;;  %3480 = vmatprep.mubr.bf16.mxu0 %v3103_v13  ;;  %v3106_v16 = vpack.c.bf16 %v3086_v57, %v3082_v18  ;;  %v4637_v39 = vpop.eup %4636  ;;  %v3083_v43 = vmul.f32 %v3051_v60, %v6174_v3  ;;  %v3087_v4 = vmul.f32 %v3055_v51, %v2959_v41 }
 0xf39   : > { %3416 = vmatmul.mubr.bf16.gmra.mrb[68].mxu1 %v3100_v62  ;;  %3481 = vmatmul.mubr.bf16.gmra.mrb[68].mxu0 %v3102_v45  ;;  %v3056_v0 = vadd.f32 1.0, %v4637_v39  ;;  %v2960_v54 = vmul.f32 0.5, %v6172_v14  ;;  %v2962_v8 = vmul.f32 0.5, %v6178_v21  ;;  %v2964_v3 = vmul.f32 0.5, %v6196_v1 }
 0xf3a   : > { %v4639_v48 = vpop.eup %4638  ;;  %v3105_v33 = vpack.c.bf16 %v3085_v49, %v3081_v36  ;;  %v3107_v28 = vpack.c.bf16 %v3087_v4, %v3083_v43  ;;  %v2961_v11 = vmul.f32 0.5, %v6181_v58  ;;  %v2966_v20 = vmul.f32 0.5, %v2932_v5 }
 0xf3b   : > { %v4641_v42 = vpop.eup %4640  ;;  %v3058_v10 = vadd.f32 1.0, %v4639_v48  ;;  %v2965_v41 = vmul.f32 0.5, %v6208_v23  ;;  %v3088_v40 = vmul.f32 %v3056_v0, %v2960_v54  ;;  %v2963_v21 = vmul.f32 0.5, %v6184_v55  ;;  %v6232_v55 = vld [vmem:[%s6361_s16] ss:$0 sm:$0xff] }
 0xf3c   : > { %v4643_v32 = vpop.eup %4642  ;;  %3423 = vmatprep.mubr.bf16.mxu1 %v3105_v33  ;;  %3488 = vmatprep.mubr.bf16.mxu0 %v3107_v28  ;;  %v3057_v27 = vadd.f32 1.0, %v4641_v42  ;;  %v2967_v7 = vmul.f32 0.5, %v2934_v15 }
 0xf3d   : > { %v4645_v50 = vpop.eup %4644  ;;  %v3059_v61 = vadd.f32 1.0, %v4643_v32  ;;  %v3090_v22 = vmul.f32 %v3058_v10, %v2962_v8 }
 0xf3e   : > { %v4647_v6 = vpop.eup %4646  ;;  %v3060_v52 = vadd.f32 1.0, %v4645_v50  ;;  %v3089_v1 = vmul.f32 %v3057_v27, %v2961_v11 }
 0xf3f   : > { %v4649_v31 = vpop.eup %4648  ;;  %v3062_v35 = vadd.f32 1.0, %v4647_v6  ;;  %v3091_v2 = vmul.f32 %v3059_v61, %v2963_v21 }
 0xf40   : > { %v3092_v59 = vmul.f32 %v3060_v52, %v2964_v3  ;;  %v3061_v14 = vadd.f32 1.0, %v4649_v31 }
 0xf41   : > { %3424 = vmatmul.mubr.bf16.gmra.mrb[72].mxu1 %v3104_v63  ;;  %v4651_v53 = vpop.eup %4650  ;;  %v3094_v26 = vmul.f32 %v3062_v35, %v2966_v20  ;;  %3489 = vmatmul.mubr.bf16.gmra.mrb[72].mxu0 %v3106_v16 }
 0xf42   : > { %v3093_v34 = vmul.f32 %v3061_v14, %v2965_v41  ;;  %v3063_v18 = vadd.f32 1.0, %v4651_v53  ;;  %v3108_v58 = vpack.c.bf16 %v3092_v59, %v3088_v40 }
 0xf43   : > { %v3110_v5 = vpack.c.bf16 %v3094_v26, %v3090_v22 }
 0xf44   : > { %v3095_v46 = vmul.f32 %v3063_v18, %v2967_v7  ;;  %v3109_v23 = vpack.c.bf16 %v3093_v34, %v3089_v1 }
 0xf46   : > { %3431 = vmatprep.mubr.bf16.mxu1 %v3109_v23  ;;  %v3111_v12 = vpack.c.bf16 %v3095_v46, %v3091_v2 }
 0xf48   : > { %3496 = vmatprep.mubr.bf16.mxu0 %v3111_v12 }
 0xf49   : > { %3432 = vmatmul.mubr.bf16.gmra.mrb[76].mxu1 %v3108_v58  ;;  %3497 = vmatmul.mubr.bf16.gmra.mrb[76].mxu0 %v3110_v5 }
0x1004   : > { %v3931_v60 = vpop.f32.mrb[64].mxu1  ;;  %v3971_v47 = vpop.f32.mrb[64].mxu0 }
0x1005   : > { %v3932_v15 = vpop.f32.mrb[65].mxu1  ;;  %v3972_v38 = vpop.f32.mrb[65].mxu0 }
0x1006   : > { %v3933_v44 = vadd.f32 %v3932_v15, %v3931_v60  ;;  %v3973_v57 = vadd.f32 %v3972_v38, %v3971_v47  ;;  %v3934_v30 = vpop.f32.mrb[66].mxu1  ;;  %v3974_v13 = vpop.f32.mrb[66].mxu0 }
0x1007   : > { %v3935_v62 = vpop.f32.mrb[67].mxu1  ;;  %v3975_v51 = vpop.f32.mrb[67].mxu0 }
0x1008   : > { %v3410_v45 = vadd.f32 %v3933_v44, %v6232_v55  ;;  %v3936_v63 = vadd.f32 %v3935_v62, %v3934_v30  ;;  %v3976_v36 = vadd.f32 %v3975_v51, %v3974_v13 }
0x100a   : > { %v3475_v49 = vadd.f32 %v3973_v57, %v3410_v45  ;;  %v3413_v16 = vadd.f32 %v3936_v63, %v6232_v55 }
0x100c   : > { %v3505_v39 = vadd.f32 %v3475_v49, %v5953_v56  ;;  %v3478_v43 = vadd.f32 %v3976_v36, %v3413_v16  ;;  %v3937_v4 = vpop.f32.mrb[68].mxu1  ;;  %v3977_v33 = vpop.f32.mrb[68].mxu0 }
0x100d   : > { %v3938_v42 = vpop.f32.mrb[69].mxu1  ;;  %v3978_v32 = vpop.f32.mrb[69].mxu0 }
0x100e   : > { %3513 = vst [vmem:[%s6239_s23] sm:$0xff] %v3505_v39  ;;  %v3506_v48 = vadd.f32 %v3478_v43, %v5956_v17  ;;  %v3939_v28 = vadd.f32 %v3938_v42, %v3937_v4  ;;  %v3940_v0 = vpop.f32.mrb[70].mxu1  ;;  %v3979_v50 = vadd.f32 %v3978_v32, %v3977_v33  ;;  %v3980_v54 = vpop.f32.mrb[70].mxu0 }
0x100f   : > { %v3941_v56 = vpop.f32.mrb[71].mxu1  ;;  %v3981_v8 = vpop.f32.mrb[71].mxu0 }
0x1010   : > { %3514 = vst [vmem:[%s6239_s23 + $0x8] sm:$0xff] %v3506_v48  ;;  %v3418_v10 = vadd.f32 %v3939_v28, %v6232_v55  ;;  %v3942_v6 = vadd.f32 %v3941_v56, %v3940_v0  ;;  %v3982_v27 = vadd.f32 %v3981_v8, %v3980_v54 }
0x1012   : > { %v3483_v3 = vadd.f32 %v3979_v50, %v3418_v10  ;;  %v3421_v52 = vadd.f32 %v3942_v6, %v6232_v55 }
0x1014   : > { %v3507_v17 = vadd.f32 %v3483_v3, %v5959_v37  ;;  %v3486_v31 = vadd.f32 %v3982_v27, %v3421_v52  ;;  %v3943_v11 = vpop.f32.mrb[72].mxu1  ;;  %v3983_v20 = vpop.f32.mrb[72].mxu0 }
0x1015   : > { %v3944_v35 = vpop.f32.mrb[73].mxu1  ;;  %v3984_v61 = vpop.f32.mrb[73].mxu0 }
0x1016   : > { %3515 = vst [vmem:[%s6239_s23 + $0x10] sm:$0xff] %v3507_v17  ;;  %v3508_v41 = vadd.f32 %v3486_v31, %v5964_v24  ;;  %v3945_v40 = vadd.f32 %v3944_v35, %v3943_v11  ;;  %v3946_v59 = vpop.f32.mrb[74].mxu1  ;;  %v3985_v14 = vadd.f32 %v3984_v61, %v3983_v20  ;;  %v3986_v53 = vpop.f32.mrb[74].mxu0 }
0x1017   : > { %v3947_v22 = vpop.f32.mrb[75].mxu1  ;;  %v3987_v7 = vpop.f32.mrb[75].mxu0 }
0x1018   : > { %3516 = vst [vmem:[%s6239_s23 + $0x18] sm:$0xff] %v3508_v41  ;;  %v3426_v21 = vadd.f32 %v3945_v40, %v6232_v55  ;;  %v3948_v26 = vadd.f32 %v3947_v22, %v3946_v59  ;;  %v3988_v37 = vadd.f32 %v3987_v7, %v3986_v53 }
0x101a   : > { %v3491_v1 = vadd.f32 %v3985_v14, %v3426_v21  ;;  %v3429_v34 = vadd.f32 %v3948_v26, %v6232_v55 }
0x101c   : > { %v3509_v18 = vadd.f32 %v3491_v1, %v5969_v9  ;;  %v3494_v24 = vadd.f32 %v3988_v37, %v3429_v34  ;;  %v3949_v58 = vpop.f32.mrb[76].mxu1  ;;  %v3989_v5 = vpop.f32.mrb[76].mxu0 }
0x101d   : > { %v3950_v2 = vpop.f32.mrb[77].mxu1  ;;  %v3990_v12 = vpop.f32.mrb[77].mxu0 }
0x101e   : > { %3517 = vst [vmem:[%s6239_s23 + $0x20] sm:$0xff] %v3509_v18  ;;  %v3510_v46 = vadd.f32 %v3494_v24, %v5973_v25  ;;  %v3951_v23 = vadd.f32 %v3950_v2, %v3949_v58  ;;  %v3952_v60 = vpop.f32.mrb[78].mxu1  ;;  %v3991_v47 = vadd.f32 %v3990_v12, %v3989_v5  ;;  %v3992_v15 = vpop.f32.mrb[78].mxu0 }
0x101f   : > { %v3953_v38 = vpop.f32.mrb[79].mxu1  ;;  %v3993_v57 = vpop.f32.mrb[79].mxu0 }
0x1020   : > { %3518 = vst [vmem:[%s6239_s23 + $0x28] sm:$0xff] %v3510_v46  ;;  %v3434_v9 = vadd.f32 %v3951_v23, %v6232_v55  ;;  %v3954_v44 = vadd.f32 %v3953_v38, %v3952_v60  ;;  %v3994_v30 = vadd.f32 %v3993_v57, %v3992_v15 }
0x1022   : > { %v3499_v13 = vadd.f32 %v3991_v47, %v3434_v9  ;;  %v3437_v62 = vadd.f32 %v3954_v44, %v6232_v55 }
0x1024   : > { %v3511_v25 = vadd.f32 %v3499_v13, %v5976_v29  ;;  %v3502_v51 = vadd.f32 %v3994_v30, %v3437_v62 }
0x1026   : > { %3519 = vst [vmem:[%s6239_s23 + $0x30] sm:$0xff] %v3511_v25  ;;  %v3512_v45 = vadd.f32 %v3502_v51, %v5979_v19 }
0x1028   : > { %3520 = vst [vmem:[%s6239_s23 + $0x38] sm:$0xff] %v3512_v45 }
0x1029   : > { %4871 = shalt.err (!%p4868_p8)
}
0x102a   : > { %s4872_s21 = scalar_lea.hbm %s6264_s13, 1024  ;;  %s4876_s23 = scalar_lea.hbm %s6362_s8, 2048 }
0x102b   : > { %p4873_p10 = scmp.ne.s32.totalorder %s6264_s13, %s4872_s21  ;;  %p4877_p0 = scmp.lt.u32.totalorder %s6264_s13, %s6362_s8 }
0x102c   : > { %p4878_p5 = scmp.lt.u32.totalorder %s4876_s23, %s4872_s21  ;;  %p4880_p6 = scmp.lt.u32.totalorder %s4872_s21, %s6264_s13 }
0x102d   : > { %p4874_p11 = pnand %p4873_p10, %p6363_p9 }
0x102e   : > { %p4879_p7 = por %p4878_p5, %p4877_p0 }
0x102f   : > { %p4875_p12 = pneg %p4874_p11 }
0x1030   : > { %p4881_p4 = por %p4880_p6, %p4879_p7 }
0x1032   : > { %p4882_p13 = pnand %p4881_p4, %p4875_p12 }
0x1034   : > { %4885 = shalt.err (!%p4882_p13)
}
0x1035   : > { %s4958_s17 = smov 128   ;;  %s4959_s14 = smov 8  }
0x1036   : > { %4213 = dma.vmem_to_hbm [thread:$0]  (%p6363_p9), %s6266_s19, 1024, %s6264_s13, %s3522_s30, %s4958_s17, %s4958_s17, %s4959_s14  }
0x1037 PF: > { %s3550_s15 = sand.u32 1, %s4924_s25   ;;  %p6364_p1 = scmp.ne.s32.totalorder %s6347_s7, 0 }
0x1038   : > { %p6365_p3 = scmp.ge.s32.totalorder %s4936_s28, 2  ;;  %s3551_s24 = scalar_lea.sflag [#allocation6], %s3550_s15 }
0x103a   : > { %p4239_p2 = pnand %p6365_p3, %p6364_p1 }
0x103c   : > { %4919 = dma.done.wait (!%p4239_p2), %s3551_s24, 1024  }
0x103d   : > { %4921 = vsyncadd (!%p4239_p2), %s3551_s24, 4294966272  ;;  %p29_p8 = scmp.ge.s32.totalorder %s5207_s18, 4   ;;  %s6366_s25 = smov %s4928_s26 }
0x103e   : > { %s6367_s26 = smov %s4932_s27  ;;  %s6368_s27 = smov %s5218_s10 }
0x103f   : > { %s6369_s28 = smov %s5207_s18  ;;  %31 = sbr.rel (!%p29_p8) target bundleno = 16 (0x10), region = 141 }
0x1046   :  { %3556 = vsyncpa [#allocation5], 1 }
0x1047   :  { %3558 = vsyncpa [#allocation5 + $0x1], 1 }
0x1048   :  { %3559 = vsyncpa [#allocation8], 1 }
0x1049   :  { %3560 = vsyncpa [#allocation11], 1 }
0x104a   :  { %3561 = vsyncpa [#allocation14], 1 }
0x104b   :  { %3562 = vsyncpa [#allocation6], 1 }
0x104c   :  { %3564 = vsyncpa [#allocation6 + $0x1], 1 }

</bundles_post_ra>
